<compile_context>
chip_gen: v7x
topology: tpu7x:2x2x1
jax: 0.10.0
libtpu: 0.0.40
codegen_flags: <defaults>
</compile_context>

<pallas_src>
import functools

import jax
import jax.numpy as jnp
from jax.experimental import pallas as pl
from jax.experimental.pallas import tpu as pltpu

EPS = 1e-5  # nn.LayerNorm default


def _layernorm_unit(z):
    """Two-pass LayerNorm without affine (gamma/beta folded into the next
    matmul's weights host-side)."""
    mu = jnp.mean(z, axis=-1, keepdims=True)
    zc = z - mu
    var = jnp.mean(zc * zc, axis=-1, keepdims=True)
    return zc * jax.lax.rsqrt(var + EPS)


def _prompt_layer_kernel(num_heads,
                         x_ref, vis_ref,
                         wq_ref, bq_ref, wk_ref, wv_ref, wo_ref, bo_ref,
                         w1_ref, bm1_ref, w2_ref, bm2_ref,
                         out_ref):
    Bt, N, C = x_ref.shape
    M = vis_ref.shape[1]
    H = num_heads
    hd = C // H
    cdt = wq_ref.dtype  # bf16 matmul operands; accumulation stays f32

    # Flatten the Bt batch block into the row dim for all dense matmuls.
    x = x_ref[...].reshape(Bt * N, C)                 # f32 residual path
    vis = vis_ref[...].reshape(Bt * M, C).astype(cdt)

    # ---- q = k = v = norm1(x); cross attention against (visual, visual) ----
    # norm1 affine + qk scale are folded into wq/bq host-side.
    xn = _layernorm_unit(x)
    q = (jnp.dot(xn.astype(cdt), wq_ref[...],
                 preferred_element_type=jnp.float32) + bq_ref[...]).astype(cdt)
    k = jnp.dot(vis, wk_ref[...], preferred_element_type=jnp.float32).astype(cdt)
    v = jnp.dot(vis, wv_ref[...], preferred_element_type=jnp.float32).astype(cdt)

    # One head relayout per tensor: (rows, C) -> (Bt*H, rows, hd). No per-head
    # narrow column slicing inside the attention math.
    qh = q.reshape(Bt, N, H, hd).transpose(0, 2, 1, 3).reshape(Bt * H, N, hd)
    kh = k.reshape(Bt, M, H, hd).transpose(0, 2, 1, 3).reshape(Bt * H, M, hd)
    vh = v.reshape(Bt, M, H, hd).transpose(0, 2, 1, 3).reshape(Bt * H, M, hd)

    s = jnp.einsum("bnd,bmd->bnm", qh, kh,
                   preferred_element_type=jnp.float32)          # (Bt*H, N, M)
    s = s - jnp.max(s, axis=-1, keepdims=True)
    p = jnp.exp(s)
    p = p * pl.reciprocal(jnp.sum(p, axis=-1, keepdims=True), approx=True)

    o = jnp.einsum("bnm,bmd->bnd", p.astype(cdt), vh,
                   preferred_element_type=jnp.float32)          # (Bt*H, N, hd)
    # Head "concat" back to (Bt*N, C), then ONE full-width output projection
    # (K = C) instead of H small matmuls with K = hd.
    o = o.reshape(Bt, H, N, hd).transpose(0, 2, 1, 3).reshape(Bt * N, C)
    attn_out = jnp.dot(o.astype(cdt), wo_ref[...],
                       preferred_element_type=jnp.float32) + bo_ref[...]

    x1 = x + attn_out

    # ---- MLP branch: norm3 -> Linear(C,4C) -> QuickGELU -> Linear(4C,C) ----
    # norm3 affine folded into w1/bm1 host-side.
    x1n = _layernorm_unit(x1)
    h = jnp.dot(x1n.astype(cdt), w1_ref[...],
                preferred_element_type=jnp.float32) + bm1_ref[...]
    h = h * jax.nn.sigmoid(1.702 * h)                 # QuickGELU (f32)
    m = jnp.dot(h.astype(cdt), w2_ref[...],
                preferred_element_type=jnp.float32) + bm2_ref[...]

    out_ref[...] = (x1 + m).reshape(Bt, N, C).astype(out_ref.dtype)


def _pick_bt(B, N, M, C, H, vmem_limit_bytes, target_rows):
    """Choose the per-step batch block from the VMEM budget (weights are
    single-buffered residents), targeting >= target_rows MXU rows, while
    keeping at least two grid steps so v7x's two TensorCores split the work."""
    weight_bytes = 12 * C * C * 2                     # qkv+out (4C^2) + mlp (8C^2), bf16
    budget = max(int(vmem_limit_bytes * 0.85) - weight_bytes, 1 << 20)
    # Rough per-batch-element VMEM bytes (pipeline blocks + kernel temporaries).
    per_b = 4 * (
        2 * N * C            # x / out pipeline blocks (double-buffered, f32)
        + 2 * M * C          # visual pipeline block (double-buffered, f32)
        + 8 * N * C          # xn, q, o, attn_out, x1, x1n, m, head relayouts
        + 4 * N * C          # MLP hidden (4C wide, f32)
        + 3 * M * C          # k, v (+ head relayouts, partly bf16)
        + 2 * H * N * M      # scores + probs (f32)
    )
    bt_vmem = max(budget // per_b, 1)
    bt_rows = max(-(-target_rows // N), 1)            # cdiv(target_rows, N)
    bt = int(min(bt_vmem, bt_rows, B))
    if B >= 2:                                        # keep >= 2 grid steps
        bt = min(bt, -(-B // 2))
    return max(bt, 1)


def prompt_generator_layer(x, visual, params, num_heads, *,
                           target_rows=256,
                           vmem_limit_bytes=48 * 1024 * 1024,
                           compute_dtype=jnp.bfloat16):
    B, N0, C = x.shape
    M = visual.shape[1]
    assert C % num_heads == 0, "d_model must be divisible by nhead"
    hd = C // num_heads
    scale = hd ** -0.5
    cdt = compute_dtype
    f32 = jnp.float32
    row = lambda a: a.reshape(1, -1).astype(f32)

    # --- host-side folds (one-time): norm1/norm3 affine + qk scale into weights
    wq = (params["g1"][:, None] * params["wq"] * scale).astype(cdt)
    bq = row((params["b1"] @ params["wq"]) * scale)
    wk = params["wk"].astype(cdt)
    wv = params["wv"].astype(cdt)
    wo = params["wo"].astype(cdt)
    bo = row(params["bo"])
    w1 = (params["g3"][:, None] * params["w1"]).astype(cdt)
    bm1 = row(params["bm1"] + params["b3"] @ params["w1"])
    w2 = params["w2"].astype(cdt)
    bm2 = row(params["bm2"])

    # --- pad N to a multiple of 8 (sublane) so (Bt, N) collapses for free.
    N = N0 if N0 % 8 == 0 else ((N0 + 7) // 8) * 8
    if N != N0:
        x = jnp.pad(x, ((0, 0), (0, N - N0), (0, 0)))
    # TODO(synk): if M % 8 != 0 the block is still valid (full-extent dims),
    # but key-side padding would need an attention mask; not needed here.

    # --- batch block from VMEM budget, cdiv grid with zero-padded batch.
    bt = _pick_bt(B, N, M, C, num_heads, vmem_limit_bytes, target_rows)
    Bp = -(-B // bt) * bt
    x_p = x if Bp == B else jnp.pad(x, ((0, Bp - B), (0, 0), (0, 0)))
    vis_p = visual if Bp == B else jnp.pad(visual, ((0, Bp - B), (0, 0), (0, 0)))

    inputs = [x_p, vis_p, wq, bq, wk, wv, wo, bo, w1, bm1, w2, bm2]

    in_specs = [
        pl.BlockSpec((bt, N, C), lambda b: (b, 0, 0)),
        pl.BlockSpec((bt, M, C), lambda b: (b, 0, 0)),
    ] + [
        # Whole-array, constant-index blocks: resident across grid steps and
        # single-buffered (no point double-buffering a block that never moves).
        pl.BlockSpec(a.shape, lambda b, nd=a.ndim: (0,) * nd,
                     pipeline_mode=pl.Buffered(1))
        for a in inputs[2:]
    ]

    kernel = functools.partial(_prompt_layer_kernel, num_heads)

    out = pl.pallas_call(
        kernel,
        out_shape=jax.ShapeDtypeStruct((Bp, N, C), x.dtype),
        grid_spec=pltpu.PrefetchScalarGridSpec(
            num_scalar_prefetch=0,
            grid=(Bp // bt,),
            in_specs=in_specs,
            out_specs=pl.BlockSpec((bt, N, C), lambda b: (b, 0, 0)),
        ),
        compiler_params=pltpu.CompilerParams(
            dimension_semantics=("parallel",),
            # Safe for v7x's 64 MiB physical VMEM; raise toward ~96-100 MiB on
            # v5e / v6e (128 MiB) together with target_rows for larger Bt.
            vmem_limit_bytes=vmem_limit_bytes),
    )(*inputs)

    return out[:B, :N0]


def prompt_generator_layer_ref(x, visual, params, num_heads):
    """Pure-JAX f32 reference mirroring the PyTorch forward."""
    B, N, C = x.shape
    M = visual.shape[1]
    H = num_heads
    hd = C // H
    scale = hd ** -0.5

    def ln(z, g, b):
        mu = jnp.mean(z, axis=-1, keepdims=True)
        var = jnp.mean((z - mu) ** 2, axis=-1, keepdims=True)
        return (z - mu) / jnp.sqrt(var + EPS) * g + b

    xn = ln(x, params["g1"], params["b1"])
    q = xn @ params["wq"]
    k = visual @ params["wk"]
    v = visual @ params["wv"]
    q = q.reshape(B, N, H, hd).transpose(0, 2, 1, 3)
    k = k.reshape(B, M, H, hd).transpose(0, 2, 1, 3)
    v = v.reshape(B, M, H, hd).transpose(0, 2, 1, 3)
    attn = jnp.einsum("bhnd,bhmd->bhnm", q, k) * scale
    attn = jax.nn.softmax(attn, axis=-1)
    o = jnp.einsum("bhnm,bhmd->bhnd", attn, v).transpose(0, 2, 1, 3).reshape(B, N, C)
    o = o @ params["wo"] + params["bo"]
    x1 = x + o

    x1n = ln(x1, params["g3"], params["b3"])
    h = x1n @ params["w1"] + params["bm1"]
    h = h * jax.nn.sigmoid(1.702 * h)
    m = h @ params["w2"] + params["bm2"]
    return x1 + m


def init_params(key, d_model):
    ks = jax.random.split(key, 12)
    n = lambda k, shape, s=0.02: (s * jax.random.normal(k, shape)).astype(jnp.float32)
    C = d_model
    return dict(
        g1=jnp.ones((C,), jnp.float32) + n(ks[0], (C,)),
        b1=n(ks[1], (C,)),
        g3=jnp.ones((C,), jnp.float32) + n(ks[2], (C,)),
        b3=n(ks[3], (C,)),
        wq=n(ks[4], (C, C)),    # (in, out); qkv_bias=False
        wk=n(ks[5], (C, C)),
        wv=n(ks[6], (C, C)),
        wo=n(ks[7], (C, C)),
        bo=n(ks[8], (C,)),
        w1=n(ks[9], (C, 4 * C)),
        bm1=n(ks[10], (4 * C,)),
        w2=n(ks[11], (4 * C, C)),
        bm2=jnp.zeros((C,), jnp.float32),
    )


if __name__ == "__main__":
    # d_model=128 (lane-dense), nhead=4. With B=16, N=8 the VMEM-driven block
    # picker chooses bt=8 -> 64 matmul rows per step and a 2-step grid (one
    # step per v7x TensorCore); larger real batches scale Bt*N toward 256.
    B, N, M, C, H = 16, 8, 16, 128, 4

    key = jax.random.PRNGKey(0)
    kx, kv, kp = jax.random.split(key, 3)
    x = jax.random.normal(kx, (B, N, C), jnp.float32)
    visual = jax.random.normal(kv, (B, M, C), jnp.float32)
    params = init_params(kp, C)

    out = prompt_generator_layer(x, visual, params, H)
    out = jax.block_until_ready(out)

    ref = prompt_generator_layer_ref(x, visual, params, H)
    assert out.shape == (B, N, C)
    err = float(jnp.max(jnp.abs(out - ref)))
    # bf16 matmul operands + approx softmax reciprocal => relaxed tolerance,
    # accumulation / normalization / residuals are all f32.
    assert err < 2e-2, f"max abs err {err}"
    print("KERNEL_OK")
</pallas_src>

<mosaic_0001>
module attributes {stable_mosaic.version = 11 : i64} {
  func.func @_prompt_layer_kernel(%arg0: i32, %arg1: memref<8x8x128xf32, #tpu.memory_space<vmem>>, %arg2: memref<8x16x128xf32, #tpu.memory_space<vmem>>, %arg3: memref<128x128xbf16, #tpu.memory_space<vmem>>, %arg4: memref<1x128xf32, #tpu.memory_space<vmem>>, %arg5: memref<128x128xbf16, #tpu.memory_space<vmem>>, %arg6: memref<128x128xbf16, #tpu.memory_space<vmem>>, %arg7: memref<128x128xbf16, #tpu.memory_space<vmem>>, %arg8: memref<1x128xf32, #tpu.memory_space<vmem>>, %arg9: memref<128x512xbf16, #tpu.memory_space<vmem>>, %arg10: memref<1x512xf32, #tpu.memory_space<vmem>>, %arg11: memref<512x128xbf16, #tpu.memory_space<vmem>>, %arg12: memref<1x128xf32, #tpu.memory_space<vmem>>, %arg13: memref<8x8x128xf32, #tpu.memory_space<vmem>>) attributes {dimension_semantics = [#tpu.dimension_semantics<parallel>], iteration_bounds = array<i64: 2>, scalar_prefetch = 0 : i64, scratch_operands = 0 : i64, tpu.core_type = #tpu.core_type<tc>, window_params = [{transform_indices = @transform_0, window_bounds = array<i64: 8, 8, 128>}, {transform_indices = @transform_1, window_bounds = array<i64: 8, 16, 128>}, {pipeline_mode = #tpu.pipeline_mode<synchronous>, transform_indices = @transform_2, window_bounds = array<i64: 128, 128>}, {pipeline_mode = #tpu.pipeline_mode<synchronous>, transform_indices = @transform_3, window_bounds = array<i64: 1, 128>}, {pipeline_mode = #tpu.pipeline_mode<synchronous>, transform_indices = @transform_4, window_bounds = array<i64: 128, 128>}, {pipeline_mode = #tpu.pipeline_mode<synchronous>, transform_indices = @transform_5, window_bounds = array<i64: 128, 128>}, {pipeline_mode = #tpu.pipeline_mode<synchronous>, transform_indices = @transform_6, window_bounds = array<i64: 128, 128>}, {pipeline_mode = #tpu.pipeline_mode<synchronous>, transform_indices = @transform_7, window_bounds = array<i64: 1, 128>}, {pipeline_mode = #tpu.pipeline_mode<synchronous>, transform_indices = @transform_8, window_bounds = array<i64: 128, 512>}, {pipeline_mode = #tpu.pipeline_mode<synchronous>, transform_indices = @transform_9, window_bounds = array<i64: 1, 512>}, {pipeline_mode = #tpu.pipeline_mode<synchronous>, transform_indices = @transform_10, window_bounds = array<i64: 512, 128>}, {pipeline_mode = #tpu.pipeline_mode<synchronous>, transform_indices = @transform_11, window_bounds = array<i64: 1, 128>}, {transform_indices = @transform_12, window_bounds = array<i64: 8, 8, 128>}]} {
    %c0 = arith.constant 0 : index
    %c0_0 = arith.constant 0 : index
    %c0_1 = arith.constant 0 : index
    %0 = vector.load %arg1[%c0, %c0_0, %c0_1] : memref<8x8x128xf32, #tpu.memory_space<vmem>>, vector<8x8x128xf32>
    %1 = vector.shape_cast %0 : vector<8x8x128xf32> to vector<64x128xf32>
    %c0_2 = arith.constant 0 : index
    %c0_3 = arith.constant 0 : index
    %c0_4 = arith.constant 0 : index
    %2 = vector.load %arg2[%c0_2, %c0_3, %c0_4] : memref<8x16x128xf32, #tpu.memory_space<vmem>>, vector<8x16x128xf32>
    %3 = vector.shape_cast %2 : vector<8x16x128xf32> to vector<128x128xf32>
    %4 = arith.truncf %3 : vector<128x128xf32> to vector<128x128xbf16>
    %cst = arith.constant dense<0.000000e+00> : vector<64xf32>
    %5 = vector.multi_reduction <add>, %1, %cst [1] : vector<64x128xf32> to vector<64xf32>
    %6 = vector.shape_cast %5 : vector<64xf32> to vector<64x1xf32>
    %cst_5 = arith.constant 1.280000e+02 : f32
    %7 = vector.broadcast %cst_5 : f32 to vector<64x1xf32>
    %8 = arith.divf %6, %7 : vector<64x1xf32>
    %9 = vector.broadcast %8 : vector<64x1xf32> to vector<64x128xf32>
    %10 = arith.subf %1, %9 : vector<64x128xf32>
    %11 = arith.mulf %10, %10 : vector<64x128xf32>
    %cst_6 = arith.constant dense<0.000000e+00> : vector<64xf32>
    %12 = vector.multi_reduction <add>, %11, %cst_6 [1] : vector<64x128xf32> to vector<64xf32>
    %13 = vector.shape_cast %12 : vector<64xf32> to vector<64x1xf32>
    %cst_7 = arith.constant 1.280000e+02 : f32
    %14 = vector.broadcast %cst_7 : f32 to vector<64x1xf32>
    %15 = arith.divf %13, %14 : vector<64x1xf32>
    %cst_8 = arith.constant 9.99999974E-6 : f32
    %16 = vector.broadcast %cst_8 : f32 to vector<64x1xf32>
    %17 = arith.addf %15, %16 : vector<64x1xf32>
    %18 = math.rsqrt %17 : vector<64x1xf32>
    %19 = vector.broadcast %18 : vector<64x1xf32> to vector<64x128xf32>
    %20 = arith.mulf %10, %19 : vector<64x128xf32>
    %21 = arith.truncf %20 : vector<64x128xf32> to vector<64x128xbf16>
    %c0_9 = arith.constant 0 : index
    %c0_10 = arith.constant 0 : index
    %22 = vector.load %arg3[%c0_9, %c0_10] : memref<128x128xbf16, #tpu.memory_space<vmem>>, vector<128x128xbf16>
    %cst_11 = arith.constant dense<0.000000e+00> : vector<64x128xf32>
    %23 = tpu.matmul %21, %22, %cst_11 {dimension_numbers = #tpu.dot_dimension_numbers<[1], [0], [0], [1], [0, 0, 1, 1], [], []>} : vector<64x128xbf16>, vector<128x128xbf16>, vector<64x128xf32> -> vector<64x128xf32>
    %c0_12 = arith.constant 0 : index
    %c0_13 = arith.constant 0 : index
    %24 = vector.load %arg4[%c0_12, %c0_13] : memref<1x128xf32, #tpu.memory_space<vmem>>, vector<1x128xf32>
    %25 = vector.broadcast %24 : vector<1x128xf32> to vector<64x128xf32>
    %26 = arith.addf %23, %25 : vector<64x128xf32>
    %27 = arith.truncf %26 : vector<64x128xf32> to vector<64x128xbf16>
    %c0_14 = arith.constant 0 : index
    %c0_15 = arith.constant 0 : index
    %28 = vector.load %arg5[%c0_14, %c0_15] : memref<128x128xbf16, #tpu.memory_space<vmem>>, vector<128x128xbf16>
    %cst_16 = arith.constant dense<0.000000e+00> : vector<128x128xf32>
    %29 = tpu.matmul %4, %28, %cst_16 {dimension_numbers = #tpu.dot_dimension_numbers<[1], [0], [0], [1], [0, 0, 1, 1], [], []>} : vector<128x128xbf16>, vector<128x128xbf16>, vector<128x128xf32> -> vector<128x128xf32>
    %30 = arith.truncf %29 : vector<128x128xf32> to vector<128x128xbf16>
    %c0_17 = arith.constant 0 : index
    %c0_18 = arith.constant 0 : index
    %31 = vector.load %arg6[%c0_17, %c0_18] : memref<128x128xbf16, #tpu.memory_space<vmem>>, vector<128x128xbf16>
    %cst_19 = arith.constant dense<0.000000e+00> : vector<128x128xf32>
    %32 = tpu.matmul %4, %31, %cst_19 {dimension_numbers = #tpu.dot_dimension_numbers<[1], [0], [0], [1], [0, 0, 1, 1], [], []>} : vector<128x128xbf16>, vector<128x128xbf16>, vector<128x128xf32> -> vector<128x128xf32>
    %33 = arith.truncf %32 : vector<128x128xf32> to vector<128x128xbf16>
    %34 = vector.shape_cast %27 : vector<64x128xbf16> to vector<8x8x4x32xbf16>
    %35 = tpu.transpose %34, [0, 2, 1, 3] : vector<8x8x4x32xbf16> -> vector<8x4x8x32xbf16>
    %36 = vector.shape_cast %35 : vector<8x4x8x32xbf16> to vector<32x8x32xbf16>
    %37 = vector.shape_cast %30 : vector<128x128xbf16> to vector<8x16x4x32xbf16>
    %38 = tpu.transpose %37, [0, 2, 1, 3] : vector<8x16x4x32xbf16> -> vector<8x4x16x32xbf16>
    %39 = vector.shape_cast %38 : vector<8x4x16x32xbf16> to vector<32x16x32xbf16>
    %40 = vector.shape_cast %33 : vector<128x128xbf16> to vector<8x16x4x32xbf16>
    %41 = tpu.transpose %40, [0, 2, 1, 3] : vector<8x16x4x32xbf16> -> vector<8x4x16x32xbf16>
    %42 = vector.shape_cast %41 : vector<8x4x16x32xbf16> to vector<32x16x32xbf16>
    "tpu.trace_start"() <{level = 10 : i32, message = "bnd,bmd->bnm"}> : () -> ()
    %cst_20 = arith.constant dense<0.000000e+00> : vector<32x8x16xf32>
    %43 = tpu.matmul %36, %39, %cst_20 {dimension_numbers = #tpu.dot_dimension_numbers<[2], [2], [1], [1], [0, 0, 0, 1, 1, 1], [0], [0]>} : vector<32x8x32xbf16>, vector<32x16x32xbf16>, vector<32x8x16xf32> -> vector<32x8x16xf32>
    "tpu.trace_stop"() : () -> ()
    %cst_21 = arith.constant dense<0xFF800000> : vector<32x8xf32>
    %44 = vector.multi_reduction <maximumf>, %43, %cst_21 [2] : vector<32x8x16xf32> to vector<32x8xf32>
    %45 = vector.shape_cast %44 : vector<32x8xf32> to vector<32x8x1xf32>
    %46 = vector.broadcast %45 : vector<32x8x1xf32> to vector<32x8x16xf32>
    %47 = arith.subf %43, %46 : vector<32x8x16xf32>
    %48 = math.exp %47 : vector<32x8x16xf32>
    %cst_22 = arith.constant dense<0.000000e+00> : vector<32x8xf32>
    %49 = vector.multi_reduction <add>, %48, %cst_22 [2] : vector<32x8x16xf32> to vector<32x8xf32>
    %50 = vector.shape_cast %49 : vector<32x8xf32> to vector<32x8x1xf32>
    %51 = tpu.reciprocal %50 {approx = true} : vector<32x8x1xf32> -> vector<32x8x1xf32>
    %52 = vector.broadcast %51 : vector<32x8x1xf32> to vector<32x8x16xf32>
    %53 = arith.mulf %48, %52 : vector<32x8x16xf32>
    %54 = arith.truncf %53 : vector<32x8x16xf32> to vector<32x8x16xbf16>
    "tpu.trace_start"() <{level = 10 : i32, message = "bnm,bmd->bnd"}> : () -> ()
    %cst_23 = arith.constant dense<0.000000e+00> : vector<32x8x32xf32>
    %55 = tpu.matmul %54, %42, %cst_23 {dimension_numbers = #tpu.dot_dimension_numbers<[2], [1], [1], [2], [0, 0, 0, 1, 1, 2], [0], [0]>} : vector<32x8x16xbf16>, vector<32x16x32xbf16>, vector<32x8x32xf32> -> vector<32x8x32xf32>
    "tpu.trace_stop"() : () -> ()
    %56 = vector.shape_cast %55 : vector<32x8x32xf32> to vector<8x4x8x32xf32>
    %57 = tpu.transpose %56, [0, 2, 1, 3] : vector<8x4x8x32xf32> -> vector<8x8x4x32xf32>
    %58 = vector.shape_cast %57 : vector<8x8x4x32xf32> to vector<64x128xf32>
    %59 = arith.truncf %58 : vector<64x128xf32> to vector<64x128xbf16>
    %c0_24 = arith.constant 0 : index
    %c0_25 = arith.constant 0 : index
    %60 = vector.load %arg7[%c0_24, %c0_25] : memref<128x128xbf16, #tpu.memory_space<vmem>>, vector<128x128xbf16>
    %cst_26 = arith.constant dense<0.000000e+00> : vector<64x128xf32>
    %61 = tpu.matmul %59, %60, %cst_26 {dimension_numbers = #tpu.dot_dimension_numbers<[1], [0], [0], [1], [0, 0, 1, 1], [], []>} : vector<64x128xbf16>, vector<128x128xbf16>, vector<64x128xf32> -> vector<64x128xf32>
    %c0_27 = arith.constant 0 : index
    %c0_28 = arith.constant 0 : index
    %62 = vector.load %arg8[%c0_27, %c0_28] : memref<1x128xf32, #tpu.memory_space<vmem>>, vector<1x128xf32>
    %63 = vector.broadcast %62 : vector<1x128xf32> to vector<64x128xf32>
    %64 = arith.addf %61, %63 : vector<64x128xf32>
    %65 = arith.addf %1, %64 : vector<64x128xf32>
    %cst_29 = arith.constant dense<0.000000e+00> : vector<64xf32>
    %66 = vector.multi_reduction <add>, %65, %cst_29 [1] : vector<64x128xf32> to vector<64xf32>
    %67 = vector.shape_cast %66 : vector<64xf32> to vector<64x1xf32>
    %cst_30 = arith.constant 1.280000e+02 : f32
    %68 = vector.broadcast %cst_30 : f32 to vector<64x1xf32>
    %69 = arith.divf %67, %68 : vector<64x1xf32>
    %70 = vector.broadcast %69 : vector<64x1xf32> to vector<64x128xf32>
    %71 = arith.subf %65, %70 : vector<64x128xf32>
    %72 = arith.mulf %71, %71 : vector<64x128xf32>
    %cst_31 = arith.constant dense<0.000000e+00> : vector<64xf32>
    %73 = vector.multi_reduction <add>, %72, %cst_31 [1] : vector<64x128xf32> to vector<64xf32>
    %74 = vector.shape_cast %73 : vector<64xf32> to vector<64x1xf32>
    %cst_32 = arith.constant 1.280000e+02 : f32
    %75 = vector.broadcast %cst_32 : f32 to vector<64x1xf32>
    %76 = arith.divf %74, %75 : vector<64x1xf32>
    %cst_33 = arith.constant 9.99999974E-6 : f32
    %77 = vector.broadcast %cst_33 : f32 to vector<64x1xf32>
    %78 = arith.addf %76, %77 : vector<64x1xf32>
    %79 = math.rsqrt %78 : vector<64x1xf32>
    %80 = vector.broadcast %79 : vector<64x1xf32> to vector<64x128xf32>
    %81 = arith.mulf %71, %80 : vector<64x128xf32>
    %82 = arith.truncf %81 : vector<64x128xf32> to vector<64x128xbf16>
    %c0_34 = arith.constant 0 : index
    %c0_35 = arith.constant 0 : index
    %83 = vector.load %arg9[%c0_34, %c0_35] : memref<128x512xbf16, #tpu.memory_space<vmem>>, vector<128x512xbf16>
    %cst_36 = arith.constant dense<0.000000e+00> : vector<64x512xf32>
    %84 = tpu.matmul %82, %83, %cst_36 {dimension_numbers = #tpu.dot_dimension_numbers<[1], [0], [0], [1], [0, 0, 1, 1], [], []>} : vector<64x128xbf16>, vector<128x512xbf16>, vector<64x512xf32> -> vector<64x512xf32>
    %c0_37 = arith.constant 0 : index
    %c0_38 = arith.constant 0 : index
    %85 = vector.load %arg10[%c0_37, %c0_38] : memref<1x512xf32, #tpu.memory_space<vmem>>, vector<1x512xf32>
    %86 = vector.broadcast %85 : vector<1x512xf32> to vector<64x512xf32>
    %87 = arith.addf %84, %86 : vector<64x512xf32>
    %cst_39 = arith.constant 1.702000e+00 : f32
    %88 = vector.broadcast %cst_39 : f32 to vector<64x512xf32>
    %89 = arith.mulf %88, %87 : vector<64x512xf32>
    %90 = arith.negf %89 : vector<64x512xf32>
    %91 = math.exp %90 : vector<64x512xf32>
    %cst_40 = arith.constant 1.000000e+00 : f32
    %92 = vector.broadcast %cst_40 : f32 to vector<64x512xf32>
    %93 = arith.addf %92, %91 : vector<64x512xf32>
    %94 = arith.divf %92, %93 : vector<64x512xf32>
    %95 = arith.mulf %87, %94 : vector<64x512xf32>
    %96 = arith.truncf %95 : vector<64x512xf32> to vector<64x512xbf16>
    %c0_41 = arith.constant 0 : index
    %c0_42 = arith.constant 0 : index
    %97 = vector.load %arg11[%c0_41, %c0_42] : memref<512x128xbf16, #tpu.memory_space<vmem>>, vector<512x128xbf16>
    %cst_43 = arith.constant dense<0.000000e+00> : vector<64x128xf32>
    %98 = tpu.matmul %96, %97, %cst_43 {dimension_numbers = #tpu.dot_dimension_numbers<[1], [0], [0], [1], [0, 0, 1, 1], [], []>} : vector<64x512xbf16>, vector<512x128xbf16>, vector<64x128xf32> -> vector<64x128xf32>
    %c0_44 = arith.constant 0 : index
    %c0_45 = arith.constant 0 : index
    %99 = vector.load %arg12[%c0_44, %c0_45] : memref<1x128xf32, #tpu.memory_space<vmem>>, vector<1x128xf32>
    %100 = vector.broadcast %99 : vector<1x128xf32> to vector<64x128xf32>
    %101 = arith.addf %98, %100 : vector<64x128xf32>
    %102 = arith.addf %65, %101 : vector<64x128xf32>
    %103 = vector.shape_cast %102 : vector<64x128xf32> to vector<8x8x128xf32>
    %c0_46 = arith.constant 0 : index
    %c0_47 = arith.constant 0 : index
    %c0_48 = arith.constant 0 : index
    %104 = vector.load %arg13[%c0_46, %c0_47, %c0_48] : memref<8x8x128xf32, #tpu.memory_space<vmem>>, vector<8x8x128xf32>
    tpu.vector_store %arg13[%c0_46, %c0_47, %c0_48], %103 {strides = array<i32>} : memref<8x8x128xf32, #tpu.memory_space<vmem>>, vector<8x8x128xf32>,
    return
  }
  func.func @transform_0(%arg0: i32) -> (i32, i32, i32) {
    %c0_i32 = arith.constant 0 : i32
    %c0_i32_0 = arith.constant 0 : i32
    %c0_i32_1 = arith.constant 0 : i32
    return %arg0, %c0_i32, %c0_i32_0 : i32, i32, i32
  }
  func.func @transform_1(%arg0: i32) -> (i32, i32, i32) {
    %c0_i32 = arith.constant 0 : i32
    %c0_i32_0 = arith.constant 0 : i32
    %c0_i32_1 = arith.constant 0 : i32
    return %arg0, %c0_i32, %c0_i32_0 : i32, i32, i32
  }
  func.func @transform_2(%arg0: i32) -> (i32, i32) {
    %c0_i32 = arith.constant 0 : i32
    %c0_i32_0 = arith.constant 0 : i32
    %c0_i32_1 = arith.constant 0 : i32
    return %c0_i32, %c0_i32_0 : i32, i32
  }
  func.func @transform_3(%arg0: i32) -> (i32, i32) {
    %c0_i32 = arith.constant 0 : i32
    %c0_i32_0 = arith.constant 0 : i32
    %c0_i32_1 = arith.constant 0 : i32
    return %c0_i32, %c0_i32_0 : i32, i32
  }
  func.func @transform_4(%arg0: i32) -> (i32, i32) {
    %c0_i32 = arith.constant 0 : i32
    %c0_i32_0 = arith.constant 0 : i32
    %c0_i32_1 = arith.constant 0 : i32
    return %c0_i32, %c0_i32_0 : i32, i32
  }
  func.func @transform_5(%arg0: i32) -> (i32, i32) {
    %c0_i32 = arith.constant 0 : i32
    %c0_i32_0 = arith.constant 0 : i32
    %c0_i32_1 = arith.constant 0 : i32
    return %c0_i32, %c0_i32_0 : i32, i32
  }
  func.func @transform_6(%arg0: i32) -> (i32, i32) {
    %c0_i32 = arith.constant 0 : i32
    %c0_i32_0 = arith.constant 0 : i32
    %c0_i32_1 = arith.constant 0 : i32
    return %c0_i32, %c0_i32_0 : i32, i32
  }
  func.func @transform_7(%arg0: i32) -> (i32, i32) {
    %c0_i32 = arith.constant 0 : i32
    %c0_i32_0 = arith.constant 0 : i32
    %c0_i32_1 = arith.constant 0 : i32
    return %c0_i32, %c0_i32_0 : i32, i32
  }
  func.func @transform_8(%arg0: i32) -> (i32, i32) {
    %c0_i32 = arith.constant 0 : i32
    %c0_i32_0 = arith.constant 0 : i32
    %c0_i32_1 = arith.constant 0 : i32
    return %c0_i32, %c0_i32_0 : i32, i32
  }
  func.func @transform_9(%arg0: i32) -> (i32, i32) {
    %c0_i32 = arith.constant 0 : i32
    %c0_i32_0 = arith.constant 0 : i32
    %c0_i32_1 = arith.constant 0 : i32
    return %c0_i32, %c0_i32_0 : i32, i32
  }
  func.func @transform_10(%arg0: i32) -> (i32, i32) {
    %c0_i32 = arith.constant 0 : i32
    %c0_i32_0 = arith.constant 0 : i32
    %c0_i32_1 = arith.constant 0 : i32
    return %c0_i32, %c0_i32_0 : i32, i32
  }
  func.func @transform_11(%arg0: i32) -> (i32, i32) {
    %c0_i32 = arith.constant 0 : i32
    %c0_i32_0 = arith.constant 0 : i32
    %c0_i32_1 = arith.constant 0 : i32
    return %c0_i32, %c0_i32_0 : i32, i32
  }
  func.func @transform_12(%arg0: i32) -> (i32, i32, i32) {
    %c0_i32 = arith.constant 0 : i32
    %c0_i32_0 = arith.constant 0 : i32
    %c0_i32_1 = arith.constant 0 : i32
    return %arg0, %c0_i32, %c0_i32_0 : i32, i32, i32
  }
}

</mosaic_0001>

<bundles_post_ra>
// kernel: tpu_custom_call.1
= control target key start
LH: loop header
LB: loop body
LE: loop exit
PB: predicated region body
PF: predicated region fallthrough
CT: control target
= control target key end

     0   :  { %s18362_s0 = inlined_call_operand.hbm [shape: f32[16,8,128], index: 0, kind: input, shape index: {}]   ;;  %s18363_s1 = inlined_call_operand.hbm [shape: f32[16,16,128], index: 1, kind: input, shape index: {}]   ;;  %s18364_s2 = inlined_call_operand.hbm [shape: bf16[128,128], index: 2, kind: input, shape index: {}]   ;;  %s18365_s3 = inlined_call_operand.vmem [shape: f32[1,128], index: 3, kind: input, shape index: {}]   ;;  %s18366_s4 = inlined_call_operand.hbm [shape: bf16[128,128], index: 4, kind: input, shape index: {}]   ;;  %s18367_s5 = inlined_call_operand.hbm [shape: bf16[128,128], index: 5, kind: input, shape index: {}]   ;;  %s18368_s6 = inlined_call_operand.hbm [shape: bf16[128,128], index: 6, kind: input, shape index: {}]   ;;  %s18369_s7 = inlined_call_operand.vmem [shape: f32[1,128], index: 7, kind: input, shape index: {}]   ;;  %s18370_s8 = inlined_call_operand.hbm [shape: bf16[128,512], index: 8, kind: input, shape index: {}]   ;;  %s18371_s9 = inlined_call_operand.vmem [shape: f32[1,512], index: 9, kind: input, shape index: {}]   ;;  %s18372_s10 = inlined_call_operand.hbm [shape: bf16[512,128], index: 10, kind: input, shape index: {}]   ;;  %s18373_s11 = inlined_call_operand.vmem [shape: f32[1,128], index: 11, kind: input, shape index: {}]   ;;  %s18374_s12 = inlined_call_operand.hbm [shape: f32[16,8,128], index: 12, kind: output, shape index: {}]  }
   0x1   :  { %18442 = sst [smem:[#allocation57_spill]] %s18362_s0 }
   0x2   :  { %18443 = sst [smem:[#allocation58_spill]] %s18364_s2 }
   0x3   :  { %18444 = sst [smem:[#allocation59_spill]] %s18366_s4 }
   0x4   :  { %18445 = sst [smem:[#allocation60_spill]] %s18367_s5 }
   0x5   :  { %18446 = sst [smem:[#allocation61_spill]] %s18368_s6 }
   0x6   :  { %18447 = sst [smem:[#allocation62_spill]] %s18369_s7 }
   0x7   :  { %18448 = sst [smem:[#allocation63_spill]] %s18370_s8 }
   0x8   :  { %18449 = sst [smem:[#allocation64_spill]] %s18371_s9 }
   0x9   :  { %18450 = sst [smem:[#allocation65_spill]] %s18373_s11 }
   0xa   :  { %18451 = sst [smem:[#allocation66_spill]] %s18374_s12 }
   0xb   :  { %17 = vsyncpa [#allocation3], 0 }
   0xc   :  { %19 = vsyncpa [#allocation3 + $0x1], 0 }
   0xd   :  { %20 = vsyncpa [#allocation6], 0 }
   0xe   :  { %22 = vsyncpa [#allocation6 + $0x1], 0 }
   0xf   :  { %23 = vsyncpa [#allocation9], 0 }
  0x10   :  { %24 = vsyncpa [#allocation12], 0 }
  0x11   :  { %25 = vsyncpa [#allocation15], 0 }
  0x12   :  { %26 = vsyncpa [#allocation4], 0 }
  0x13   :  { %28 = vsyncpa [#allocation4 + $0x1], 0  ;;  %s14589_s21 = smov 0   ;;  %s14591_s22 = smov 0  }
  0x14   :  { %s14593_s23 = smov 0   ;;  %s14595_s24 = smov 0  }
  0x15 LB: > { %s14499_s25 = smov [#allocation7]   ;;  %s14610_s27 = sadd.s32 4294967295, %s14497_s24   ;;  %s14497_s24 = sphi %s14595_s24, %s18667_s24   ;;  %s14493_s23 = sphi %s14593_s23, %s18666_s23   ;;  %s14489_s22 = sphi %s14591_s22, %s18665_s22   ;;  %s14485_s21 = sphi %s14589_s21, %s18664_s21  }
  0x16   : > { %s339_s26 = sshll.u32 %s14499_s25, 4  ;;  %p12486_p0 = scmp.ge.s32.totalorder %s14497_s24, 1  ;;  %s14615_s26 = int_to_ptr.vmem [resolvable:$true] %s339_s26 }
  0x17   : > { %p18376_p1 = scmp.eq.s32.totalorder %s14610_s27, 0  ;;  %p327_p2 = scmp.lt.s32.totalorder %s14497_s24, 3 }
  0x18   : > { %s14500_s29 = smov [#allocation8]   ;;  %s14501_s14 = smov [#allocation11]  }
  0x19   : > { %p14617_p3 = pnand %p12486_p0, %p327_p2  ;;  %s355_s30 = sshll.u32 %s14500_s29, 4  ;;  %s14630_s30 = int_to_ptr.vmem [resolvable:$true] %s355_s30 }
  0x1a   : > { %s381_s15 = sshll.u32 %s14501_s14, 4  ;;  %s18454_s2 = sld [smem:[#allocation58_spill]]  ;;  %s14632_s15 = int_to_ptr.vmem [resolvable:$true] %s381_s15 }
  0x1b   : > { %s18452_s28 = scalar_select %p14617_p3, 1, 0 }
  0x1c   : > { %p13617_p5 = pneg %p14617_p3 }
  0x1e   : > { %p14626_p6 = pnand %p13617_p5, %p18376_p1 }
  0x20   : > { %s14183_s18 = scalar_lea.hbm %s18454_s2, 1024  ;;  %p14642_p8 = pneg %p14626_p6 }
  0x21   : > { %p14184_p7 = scmp.ne.s32.totalorder %s18454_s2, %s14183_s18  ;;  %p14190_p11 = scmp.lt.u32.totalorder %s14183_s18, %s18454_s2 }
  0x23   : > { %p14186_p9 = pnand %p14642_p8, %p14184_p7 }
  0x25   : > { %p14187_p10 = pneg %p14186_p9 }
  0x27   : > { %p14192_p12 = pnand %p14190_p11, %p14187_p10 }
  0x29   : > { %14195 = shalt.err (!%p14192_p12)
}
  0x2a   : > { %s14196_s16 = scalar_lea.vmem %s14615_s26, 1024  ;;  %p14204_p5 = scmp.lt.s32.totalorder %s14615_s26, %s14615_s26 }
  0x2b   : > { %p14197_p13 = scmp.ne.s32.totalorder %s14615_s26, %s14196_s16  ;;  %p14205_p4 = scmp.lt.s32.totalorder %s14196_s16, %s14196_s16 }
  0x2d   : > { %p14199_p0 = pnand %p14197_p13, %p14642_p8  ;;  %p14206_p7 = por %p14205_p4, %p14204_p5 }
  0x2f   : > { %p14200_p2 = pneg %p14199_p0 }
  0x31   : > { %p14207_p9 = pnand %p14206_p7, %p14200_p2 }
  0x33   : > { %14210 = shalt.err (!%p14207_p9)
}
  0x34   : > { %s18378_s17 = smov 64   ;;  %s14503_s18 = smov 4  }
  0x35   : > { %13620 = dma.hbm_to_vmem [thread:$0]  (!%p14626_p6), %s18454_s2, 1024, %s14615_s26, [#allocation6], %s18378_s17, %s18378_s17, %s14503_s18  }
  0x36   : > { %s18456_s4 = sld [smem:[#allocation59_spill]] }
  0x3c   : > { %s14211_s16 = scalar_lea.hbm %s18456_s4, 1024 }
  0x3d   : > { %p14212_p4 = scmp.ne.s32.totalorder %s18456_s4, %s14211_s16  ;;  %p14218_p12 = scmp.lt.u32.totalorder %s14211_s16, %s18456_s4 }
  0x3f   : > { %p14214_p10 = pnand %p14212_p4, %p14642_p8 }
  0x41   : > { %p14215_p11 = pneg %p14214_p10 }
  0x43   : > { %p14220_p13 = pnand %p14218_p12, %p14215_p11 }
  0x45   : > { %14223 = shalt.err (!%p14220_p13)
}
  0x46   : > { %s14224_s26 = scalar_lea.vmem %s14630_s30, 1024  ;;  %p14232_p7 = scmp.lt.s32.totalorder %s14630_s30, %s14630_s30 }
  0x47   : > { %p14225_p0 = scmp.ne.s32.totalorder %s14630_s30, %s14224_s26  ;;  %p14233_p9 = scmp.lt.s32.totalorder %s14224_s26, %s14224_s26 }
  0x49   : > { %p14227_p2 = pnand %p14225_p0, %p14642_p8  ;;  %p14234_p4 = por %p14233_p9, %p14232_p7 }
  0x4b   : > { %p14228_p5 = pneg %p14227_p2 }
  0x4d   : > { %p14235_p10 = pnand %p14234_p4, %p14228_p5 }
  0x4f   : > { %14238 = shalt.err (!%p14235_p10)
}
  0x50   : > { %13623 = dma.hbm_to_vmem [thread:$0]  (!%p14626_p6), %s18456_s4, 1024, %s14630_s30, [#allocation9], %s18378_s17, %s18378_s17, %s14503_s18  }
  0x51   : > { %s18457_s6 = sld [smem:[#allocation61_spill]] }
  0x57   : > { %s14239_s19 = scalar_lea.hbm %s18457_s6, 1024 }
  0x58   : > { %p14240_p11 = scmp.ne.s32.totalorder %s18457_s6, %s14239_s19  ;;  %p14246_p0 = scmp.lt.u32.totalorder %s14239_s19, %s18457_s6 }
  0x5a   : > { %p14242_p12 = pnand %p14240_p11, %p14642_p8 }
  0x5c   : > { %p14243_p13 = pneg %p14242_p12 }
  0x5e   : > { %p14248_p2 = pnand %p14246_p0, %p14243_p13 }
  0x60   : > { %14251 = shalt.err (!%p14248_p2)
}
  0x61   : > { %s14252_s30 = scalar_lea.vmem %s14632_s15, 1024  ;;  %p14260_p4 = scmp.lt.s32.totalorder %s14632_s15, %s14632_s15 }
  0x62   : > { %p14253_p5 = scmp.ne.s32.totalorder %s14632_s15, %s14252_s30  ;;  %p14261_p10 = scmp.lt.s32.totalorder %s14252_s30, %s14252_s30 }
  0x64   : > { %p14255_p7 = pnand %p14253_p5, %p14642_p8  ;;  %p14262_p11 = por %p14261_p10, %p14260_p4 }
  0x66   : > { %p14256_p9 = pneg %p14255_p7 }
  0x68   : > { %p14263_p12 = pnand %p14262_p11, %p14256_p9 }
  0x6a   : > { %14266 = shalt.err (!%p14263_p12)
}
  0x6b   : > { %13629 = dma.hbm_to_vmem [thread:$0]  (!%p14626_p6), %s18457_s6, 1024, %s14632_s15, [#allocation12], %s18378_s17, %s18378_s17, %s14503_s18  }
  0x6c   : > { %s14504_s9 = smov [#allocation10]   ;;  %s14505_s12 = smov [#allocation13]  }
  0x6d   : > { %s368_s11 = sshll.u32 %s14504_s9, 4  ;;  %s397_s19 = sshll.u32 %s14505_s12, 4  ;;  %s369_s11 = int_to_ptr.vmem [resolvable:$true] %s368_s11  ;;  %s398_s19 = int_to_ptr.vmem [resolvable:$true] %s397_s19 }
  0x6e   : > { %s18458_s5 = sld [smem:[#allocation60_spill]] }
  0x74   : > { %s14267_s14 = scalar_lea.hbm %s18458_s5, 1024 }
  0x75   : > { %p14268_p13 = scmp.ne.s32.totalorder %s18458_s5, %s14267_s14  ;;  %p14274_p5 = scmp.lt.u32.totalorder %s14267_s14, %s18458_s5 }
  0x77   : > { %p14270_p0 = pnand %p14268_p13, %p14642_p8 }
  0x79   : > { %p14271_p2 = pneg %p14270_p0 }
  0x7b   : > { %p14276_p7 = pnand %p14274_p5, %p14271_p2 }
  0x7d   : > { %14279 = shalt.err (!%p14276_p7)
}
  0x7e   : > { %s14280_s15 = scalar_lea.vmem %s369_s11, 1024  ;;  %p14288_p11 = scmp.lt.s32.totalorder %s369_s11, %s369_s11 }
  0x7f   : > { %p14281_p9 = scmp.ne.s32.totalorder %s369_s11, %s14280_s15  ;;  %p14289_p12 = scmp.lt.s32.totalorder %s14280_s15, %s14280_s15 }
  0x81   : > { %p14283_p4 = pnand %p14281_p9, %p14642_p8  ;;  %p14290_p1 = por %p14289_p12, %p14288_p11 }
  0x83   : > { %p14284_p10 = pneg %p14283_p4 }
  0x85   : > { %p14291_p3 = pnand %p14290_p1, %p14284_p10 }
  0x87   : > { %14294 = shalt.err (!%p14291_p3)
}
  0x88   : > { %13626 = dma.hbm_to_vmem [thread:$0]  (!%p14626_p6), %s18458_s5, 1024, %s369_s11, [#allocation9], %s18378_s17, %s18378_s17, %s14503_s18  }
  0x89   : > { %s18459_s8 = sld [smem:[#allocation63_spill]] }
  0x8f   : > { %s14295_s20 = scalar_lea.hbm %s18459_s8, 4096 }
  0x90   : > { %p14296_p1 = scmp.ne.s32.totalorder %s18459_s8, %s14295_s20  ;;  %p14302_p0 = scmp.lt.u32.totalorder %s14295_s20, %s18459_s8 }
  0x92   : > { %p14298_p3 = pnand %p14296_p1, %p14642_p8 }
  0x94   : > { %p14299_p13 = pneg %p14298_p3 }
  0x96   : > { %p14304_p2 = pnand %p14302_p0, %p14299_p13 }
  0x98   : > { %14307 = shalt.err (!%p14304_p2)
}
  0x99   : > { %s14308_s26 = scalar_lea.vmem %s398_s19, 4096  ;;  %p14316_p4 = scmp.lt.s32.totalorder %s398_s19, %s398_s19 }
  0x9a   : > { %p14309_p5 = scmp.ne.s32.totalorder %s398_s19, %s14308_s26  ;;  %p14317_p10 = scmp.lt.s32.totalorder %s14308_s26, %s14308_s26 }
  0x9c   : > { %p14311_p7 = pnand %p14309_p5, %p14642_p8  ;;  %p14318_p11 = por %p14317_p10, %p14316_p4 }
  0x9e   : > { %p14312_p9 = pneg %p14311_p7 }
  0xa0   : > { %p14319_p12 = pnand %p14318_p11, %p14312_p9 }
  0xa2   : > { %14322 = shalt.err (!%p14319_p12)
}
  0xa3   : > { %s14506_s11 = smov 256   ;;  %s14507_s15 = smov 16  }
  0xa4   : > { %13632 = dma.hbm_to_vmem [thread:$0]  (!%p14626_p6), %s18459_s8, 4096, %s398_s19, [#allocation12], %s14506_s11, %s14506_s11, %s14507_s15  }
  0xa5   : > { %s14508_s9 = smov [#allocation14]   ;;  %s14323_s14 = scalar_lea.hbm %s18372_s10, 4096 }
  0xa6   : > { %s413_s12 = sshll.u32 %s14508_s9, 4  ;;  %p14324_p1 = scmp.ne.s32.totalorder %s18372_s10, %s14323_s14  ;;  %s414_s12 = int_to_ptr.vmem [resolvable:$true] %s413_s12 }
  0xa7   : > { %p14330_p0 = scmp.lt.u32.totalorder %s14323_s14, %s18372_s10 }
  0xa8   : > { %p14326_p3 = pnand %p14324_p1, %p14642_p8 }
  0xaa   : > { %p14327_p13 = pneg %p14326_p3 }
  0xac   : > { %p14332_p2 = pnand %p14330_p0, %p14327_p13 }
  0xae   : > { %14335 = shalt.err (!%p14332_p2)
}
  0xaf   : > { %s14336_s19 = scalar_lea.vmem %s414_s12, 4096  ;;  %p14344_p4 = scmp.lt.s32.totalorder %s414_s12, %s414_s12 }
  0xb0   : > { %p14337_p5 = scmp.ne.s32.totalorder %s414_s12, %s14336_s19  ;;  %p14345_p10 = scmp.lt.s32.totalorder %s14336_s19, %s14336_s19 }
  0xb2   : > { %p14339_p7 = pnand %p14337_p5, %p14642_p8  ;;  %p14346_p11 = por %p14345_p10, %p14344_p4 }
  0xb4   : > { %p14340_p9 = pneg %p14339_p7 }
  0xb6   : > { %p14347_p12 = pnand %p14346_p11, %p14340_p9 }
  0xb8   : > { %14350 = shalt.err (!%p14347_p12)
}
  0xb9   : > { %s18460_s11 = smov 64   ;;  %s12485_s13 = sadd.s32 4294967294, %s14497_s24  }
  0xba   : > { %13635 = dma.hbm_to_vmem [thread:$0]  (!%p14626_p6), %s18372_s10, 4096, %s414_s12, [#allocation15], %s18460_s11, %s18460_s11, %s14503_s18  }
  0xbb   : > { %s14780_s25 = sadd.s32 1, %s14497_s24   ;;  %s41_s7 = sadd.s32 1, %s14493_s23 }
  0xbc   : > { %s38_s2 = ssub.s32 %s14497_s24, %s14780_s25  ;;  %p48_p1 = scmp.ne.s32.totalorder %s14493_s23, %s14489_s22 }
  0xbd   : > { %p39_p8 = scmp.eq.s32.totalorder %s38_s2, 0  ;;  %p49_p3 = scmp.eq.s32.totalorder %s14497_s24, 0 }
  0xbe   : > { %p54_p13 = scmp.ne.s32.totalorder %s14489_s22, %s14485_s21  ;;  %p18462_p2 = scmp.eq.s32.totalorder %s14610_s27, 0 }
  0xbf   : > { %s14791_s9 = scalar_select %p39_p8, %s14493_s23, %s41_s7  }
  0xc0   : > { %p14793_p0 = por %p49_p3, %p48_p1  ;;  %p14799_p6 = por %p18462_p2, %p54_p13 }
  0xc1   : > { %p314_p5 = scmp.eq.s32.totalorder %s14610_s27, 1  ;;  %p320_p7 = scmp.eq.s32.totalorder %s12485_s13, 1 }
  0xc2   : > { %p13653_p9 = scmp.lt.s32.totalorder %s14497_s24, 2  ;;  %s14806_s12 = sand.u32 1, %s14493_s23  }
  0xc3   : > { %p14808_p4 = por %p314_p5, %p48_p1  ;;  %p14812_p10 = por %p320_p7, %p54_p13 }
  0xc4   : > { %s12494_s16 = sshll.u32 %s14806_s12, 6  ;;  %s12807_s30 = sshll.u32 %s14497_s24, 10 }
  0xc5   : > { %s18464_s29 = scalar_select %p14808_p4, 1, 0 }
  0xc6   : > { %s18465_s14 = scalar_select %p14812_p10, 1, 0 }
  0xc7   : > { %s18466_s0 = sld [smem:[#allocation57_spill]]  ;;  %s434_s17 = scalar_lea.vmem [#allocation2], %s12494_s16 }
  0xc8   : > { %s441_s15 = sshll.u32 %s434_s17, 4  ;;  %p14827_p11 = pnand %p13653_p9, %p14793_p0  ;;  %s14823_s15 = int_to_ptr.vmem [resolvable:$true] %s441_s15 }
  0xc9   : > { %s431_s7 = scalar_lea.sflag [#allocation3], %s14806_s12 }
  0xca   : > { %p14353_p8 = pneg %p14827_p11 }
  0xcd   : > { %s14821_s11 = scalar_lea.hbm %s18466_s0, %s12807_s30  ;;  %s14356_s20 = scalar_lea.hbm %s18466_s0, 2048 }
  0xce   : > { %s14351_s26 = scalar_lea.hbm %s14821_s11, 1024  ;;  %p14357_p13 = scmp.lt.u32.totalorder %s14821_s11, %s18466_s0 }
  0xcf   : > { %p14352_p12 = scmp.ne.s32.totalorder %s14821_s11, %s14351_s26  ;;  %p14358_p0 = scmp.lt.u32.totalorder %s14356_s20, %s14351_s26 }
  0xd0   : > { %p14360_p5 = scmp.lt.u32.totalorder %s14351_s26, %s14821_s11 }
  0xd1   : > { %p14354_p1 = pnand %p14353_p8, %p14352_p12  ;;  %p14359_p2 = por %p14358_p0, %p14357_p13 }
  0xd3   : > { %p14355_p3 = pneg %p14354_p1  ;;  %p14361_p7 = por %p14360_p5, %p14359_p2 }
  0xd5   : > { %p14362_p9 = pnand %p14361_p7, %p14355_p3 }
  0xd7   : > { %14365 = shalt.err (!%p14362_p9)
}
  0xd8   : > { %s14366_s2 = scalar_lea.vmem %s14823_s15, 1024  ;;  %s14509_s16 = smov [#allocation2]  }
  0xd9   : > { %p14367_p12 = scmp.ne.s32.totalorder %s14823_s15, %s14366_s2  ;;  %s14371_s30 = sshll.u32 %s14509_s16, 4  ;;  %s14372_s30 = int_to_ptr.vmem [resolvable:$false] %s14371_s30 }
  0xda   : > { %s14373_s19 = scalar_lea.vmem %s14372_s30, 2048  ;;  %p14374_p4 = scmp.lt.s32.totalorder %s14823_s15, %s14372_s30 }
  0xdb   : > { %p14369_p1 = pnand %p14367_p12, %p14353_p8  ;;  %p14375_p13 = scmp.lt.s32.totalorder %s14373_s19, %s14366_s2 }
  0xdd   : > { %p14370_p10 = pneg %p14369_p1  ;;  %p14376_p0 = por %p14375_p13, %p14374_p4 }
  0xdf   : > { %p14377_p2 = pnand %p14376_p0, %p14370_p10 }
  0xe1   : > { %14380 = shalt.err (!%p14377_p2)
}
  0xe2   : > { %s14510_s26 = smov 128   ;;  %s14511_s20 = smov 8  }
  0xe3   : > { %13639 = dma.hbm_to_vmem [thread:$0]  (!%p14827_p11), %s14821_s11, 1024, %s14823_s15, %s431_s7, %s14510_s26, %s14510_s26, %s14511_s20  }
  0xe4   : > { %s12497_s2 = sshll.u32 %s14806_s12, 7  ;;  %s12809_s17 = sshll.u32 %s14497_s24, 11 }
  0xe5   : > { %s14868_s19 = scalar_lea.hbm %s18363_s1, %s12809_s17  ;;  %s455_s0 = scalar_lea.vmem [#allocation5], %s12497_s2 }
  0xe6   : > { %s463_s4 = sshll.u32 %s455_s0, 4  ;;  %s18468_s5 = sand.u32 1, %s14497_s24   ;;  %s14870_s4 = int_to_ptr.vmem [resolvable:$true] %s463_s4 }
  0xe7   : > { %s14874_s6 = scalar_lea.sflag [#allocation6], %s18468_s5  ;;  %s14381_s8 = scalar_lea.hbm %s14868_s19, 2048 }
  0xe8   : > { %p14382_p4 = scmp.ne.s32.totalorder %s14868_s19, %s14381_s8  ;;  %s14386_s15 = scalar_lea.hbm %s18363_s1, 4096 }
  0xe9   : > { %p14387_p5 = scmp.lt.u32.totalorder %s14868_s19, %s18363_s1  ;;  %p14388_p7 = scmp.lt.u32.totalorder %s14386_s15, %s14381_s8 }
  0xea   : > { %p14384_p10 = pnand %p14382_p4, %p14353_p8  ;;  %p14390_p12 = scmp.lt.u32.totalorder %s14381_s8, %s14868_s19 }
  0xeb   : > { %p14389_p9 = por %p14388_p7, %p14387_p5 }
  0xec   : > { %p14385_p3 = pneg %p14384_p10 }
  0xed   : > { %p14391_p1 = por %p14390_p12, %p14389_p9 }
  0xef   : > { %p14392_p13 = pnand %p14391_p1, %p14385_p3 }
  0xf1   : > { %14395 = shalt.err (!%p14392_p13)
}
  0xf2   : > { %s14396_s0 = scalar_lea.vmem %s14870_s4, 2048  ;;  %s14512_s5 = smov [#allocation5]  }
  0xf3   : > { %p14397_p0 = scmp.ne.s32.totalorder %s14870_s4, %s14396_s0  ;;  %s14401_s2 = sshll.u32 %s14512_s5, 4  ;;  %s14402_s2 = int_to_ptr.vmem [resolvable:$false] %s14401_s2 }
  0xf4   : > { %s14403_s16 = scalar_lea.vmem %s14402_s2, 4096  ;;  %p14404_p10 = scmp.lt.s32.totalorder %s14870_s4, %s14402_s2 }
  0xf5   : > { %p14399_p2 = pnand %p14397_p0, %p14353_p8  ;;  %p14405_p5 = scmp.lt.s32.totalorder %s14403_s16, %s14396_s0 }
  0xf7   : > { %p14400_p4 = pneg %p14399_p2  ;;  %p14406_p7 = por %p14405_p5, %p14404_p10 }
  0xf9   : > { %p14407_p9 = pnand %p14406_p7, %p14400_p4 }
  0xfb   : > { %14410 = shalt.err (!%p14407_p9)
}
  0xfc   : > { %13642 = dma.hbm_to_vmem [thread:$0]  (!%p14827_p11), %s14868_s19, 2048, %s14870_s4, %s14874_s6, %s14510_s26, %s14510_s26, %s14511_s20  }
  0xfd   : > { %p18469_p8 = scmp.ne.s32.totalorder %s18452_s28, 0 }
  0xff   : > { %475 = sbr.rel (%p18469_p8) target bundleno = 3171 (0xc63), region = 68 }
 0x106   : > { %s14906_s8 = sand.u32 1, %s14489_s22  }
 0x107   : > { %s12502_s30 = sshll.u32 %s14906_s8, 6  ;;  %s478_s12 = scalar_lea.sflag [#allocation3], %s14906_s8 }
 0x108   : > { %s14912_s13 = scalar_lea.vmem [#allocation2], %s12502_s30 }
 0x109   : > { %14456 = dma.done.wait (%p14799_p6), %s478_s12, 1024  }
 0x10a   : > { %14458 = vsyncadd (%p14799_p6), %s478_s12, 4294966272  ;;  %s486_s4 = sand.u32 1, %s14610_s27   ;;  %s12503_s6 = sshll.u32 %s14906_s8, 7 }
 0x10b   : > { %s487_s28 = scalar_lea.sflag [#allocation6], %s486_s4  ;;  %s14920_s26 = scalar_lea.vmem [#allocation5], %s12503_s6 }
 0x10c   : > { %14460 = dma.done.wait (%p14799_p6), %s487_s28, 2048  }
 0x10d   : > { %14462 = vsyncadd (%p14799_p6), %s487_s28, 4294965248  ;;  %p18470_p11 = scmp.eq.s32.totalorder %s14610_s27, 0 }
 0x10f   : > { %14464 = dma.done.wait (%p18470_p11), [#allocation6], 1024   ;;  %p18471_p3 = pmov %p18470_p11 }
 0x111   : > { %14466 = vsyncadd (%p18471_p3), [#allocation6], 4294966272  ;;  %p18472_p12 = pmov %p18471_p3 }
 0x112   : > { %p18473_p1 = pmov %p18471_p3 }
 0x113   : > { %14468 = dma.done.wait (%p18472_p12), [#allocation9], 2048  }
 0x114   : > { %14470 = vsyncadd (%p18473_p1), [#allocation9], 4294965248  ;;  %p18474_p13 = pmov %p18473_p1 }
 0x115   : > { %p18475_p0 = pmov %p18473_p1 }
 0x116   : > { %14472 = dma.done.wait (%p18474_p13), [#allocation12], 5120  }
 0x117   : > { %14474 = vsyncadd (%p18475_p0), [#allocation12], 4294962176  ;;  %p18476_p6 = pmov %p18475_p0 }
 0x118   : > { %p18477_p2 = pmov %p18475_p0 }
 0x119   : > { %14476 = dma.done.wait (%p18476_p6), [#allocation15], 4096  }
 0x11a   : > { %14478 = vsyncadd (%p18477_p2), [#allocation15], 4294963200  ;;  %v564_v0 = vld [vmem:[%s14912_s13] sm:$0xff]  ;;  %v566_v1 = vld [vmem:[%s14912_s13 + $0x10] sm:$0xff]  ;;  %s14513_s18 = smov 64   ;;  %s14514_s20 = smov 96  }
 0x11b   : > { %596 = vadd.xlane.f32.xlu0 %v564_v0  ;;  %600 = vadd.xlane.f32.xlu1 %v566_v1  ;;  %v14945_v2 = vld [vmem:[%s14912_s13 + $0x8] sm:$0xff]  ;;  %v14948_v3 = vld [vmem:[%s14912_s13 + $0x18] sm:$0xff]  ;;  %v14951_v4 = vld [vmem:[%s14912_s13 + $0x20] sm:$0xff]  ;;  %s14515_s19 = smov 32   ;;  %vm6593_vm0 = vcmask 261120   ;;  %vm14520_vm1 = vmmov 0  }
 0x11c   : > { %v14954_v5 = vld [vmem:[%s14912_s13 + $0x28] sm:$0xff]  ;;  %v14959_v6 = vld [vmem:[%s14912_s13 + $0x30] sm:$0xff]  ;;  %v14962_v7 = vld [vmem:[%s14912_s13 + $0x38] sm:$0xff]  ;;  %vm8066_vm2 = vcmask 130048   ;;  %vm11019_vm3 = vcmask 523264   ;;  %vm11028_vm4 = vcmask 785408  }
 0x11d   : > { %v13775_v8 = vld [vmem:[#allocation8] sm:$0xff]   ;;  %v13776_v9 = vld [vmem:[#allocation8 + $0x8] sm:$0xff]   ;;  %v13777_v10 = vld [vmem:[#allocation8 + $0x10] sm:$0xff]   ;;  %s18656_s0 = sld [smem:[#allocation62_spill]]  ;;  %s18658_s16 = sld [smem:[#allocation64_spill]] }
 0x11e   : > { %13099 = vmatprep.subr.bf16.mxu1 %v13775_v8  ;;  %v13778_v11 = vld [vmem:[#allocation8 + $0x18] sm:$0xff]   ;;  %v13779_v12 = vld [vmem:[#allocation8 + $0x20] sm:$0xff]   ;;  %v573_v14 = vld [vmem:[%s14920_s26 + $0x8] sm:$0xff]  ;;  %s18659_s4 = sld [smem:[#allocation65_spill]]  ;;  %s18288_s6 = scalar_lea.vmem [#allocation16], %s12502_s30 }
 0x11f   : > { %598 = vadd.xlane.f32.xlu0 %v14945_v2  ;;  %602 = vadd.xlane.f32.xlu1 %v14948_v3  ;;  %v572_v13 = vld [vmem:[%s14920_s26] sm:$0xff]  ;;  %v13780_v15 = vld [vmem:[#allocation8 + $0x28] sm:$0xff]   ;;  %v13781_v19 = vld [vmem:[#allocation8 + $0x30] sm:$0xff]   ;;  %s12810_s30 = sshll.u32 %s14610_s27, 10  ;;  %s12332_s28 = sshll.u32 %s18288_s6, 4  ;;  %s18315_s28 = int_to_ptr.vmem [resolvable:$true] %s12332_s28 }
 0x120   : > { %13100 = vmatpush3.bf16.msra.mxu1 %v13775_v8  ;;  %v14970_v16 = vpack.c.bf16 %v573_v14, %v572_v13  ;;  %v13783_v17 = vld [vmem:[#allocation7] sm:$0xff]   ;;  %v13784_v18 = vld [vmem:[#allocation7 + $0x8] sm:$0xff]   ;;  %v13782_v20 = vld [vmem:[#allocation8 + $0x38] sm:$0xff]   ;;  %s12319_s11 = scalar_lea.sflag [#allocation4], %s14906_s8  ;;  %s14411_s27 = scalar_lea.vmem %s18315_s28, 1024 }
 0x121   : > { %13101 = vmatprep.subr.bf16.mxu1 %v13776_v9  ;;  %13075 = vmatprep.subr.bf16.mxu0 %v13783_v17  ;;  %v574_v21 = vld [vmem:[%s14920_s26 + $0x10] sm:$0xff]  ;;  %v575_v22 = vld [vmem:[%s14920_s26 + $0x18] sm:$0xff]  ;;  %v13787_v58 = vld [vmem:[#allocation7 + $0x20] sm:$0xff]   ;;  %p14412_p4 = scmp.ne.s32.totalorder %s18315_s28, %s14411_s27  ;;  %p18661_p10 = scmp.ne.s32.totalorder %s18464_s29, 0 }
 0x122   : > { %13115 = vmatprep.mubr.bf16.mxu1 %v14970_v16  ;;  %13076 = vmatpush3.bf16.msra.mxu0 %v13783_v17  ;;  %v14975_v23 = vpack.c.bf16 %v575_v22, %v574_v21  ;;  %v13785_v56 = vld [vmem:[#allocation7 + $0x10] sm:$0xff]   ;;  %v13786_v57 = vld [vmem:[#allocation7 + $0x18] sm:$0xff]   ;;  %v13788_v59 = vld [vmem:[#allocation7 + $0x28] sm:$0xff]   ;;  %s14521_s15 = smov [#allocation16]  }
 0x123   : > { %604 = vadd.xlane.f32.xlu0 %v14951_v4  ;;  %606 = vadd.xlane.f32.xlu1 %v14954_v5  ;;  %v13789_v60 = vld [vmem:[#allocation7 + $0x30] sm:$0xff]   ;;  %v13790_v61 = vld [vmem:[#allocation7 + $0x38] sm:$0xff]   ;;  %v576_v62 = vld [vmem:[%s14920_s26 + $0x20] sm:$0xff]  ;;  %p14413_p5 = pnand %p14412_p4, %p18661_p10  ;;  %s14415_s7 = sshll.u32 %s14521_s15, 4  ;;  %s14416_s7 = int_to_ptr.vmem [resolvable:$false] %s14415_s7 }
 0x124   : > { %13102 = vmatpush3.bf16.msra.mxu1 %v13776_v9  ;;  %13077 = vmatprep.subr.bf16.mxu0 %v13784_v18  ;;  %v577_v63 = vld [vmem:[%s14920_s26 + $0x28] sm:$0xff]  ;;  %v582_v9 = vld [vmem:[%s14920_s26 + $0x50] sm:$0xff]  ;;  %v15044_v17 = vld [vmem:[#allocation10 + $0x18] sm:$0xff]   ;;  %s14417_s17 = scalar_lea.vmem %s14416_s7, 2048  ;;  %p14418_p9 = scmp.lt.s32.totalorder %s18315_s28, %s14416_s7 }
 0x125   : > { %13103 = vmatprep.subr.bf16.mxu1 %v13777_v10  ;;  %v15030_v8 = vld [vmem:[#allocation10 + $0x8] sm:$0xff]   ;;  %v15040_v14 = vld [vmem:[#allocation10 + $0x10] sm:$0xff]   ;;  %v15050_v21 = vld [vmem:[#allocation10 + $0x20] sm:$0xff]   ;;  %p14414_p7 = pneg %p14413_p5  ;;  %p14419_p8 = scmp.lt.s32.totalorder %s14417_s17, %s14411_s27 }
 0x126   : > { %13078 = vmatpush3.bf16.msra.mxu0 %v13784_v18  ;;  %v586_v18 = vld [vmem:[%s14920_s26 + $0x70] sm:$0xff]  ;;  %v15054_v22 = vld [vmem:[#allocation10 + $0x28] sm:$0xff]  }
 0x127   : > { %608 = vadd.xlane.f32.xlu0 %v14959_v6  ;;  %610 = vadd.xlane.f32.xlu1 %v14962_v7  ;;  %p14420_p11 = por %p14419_p8, %p14418_p9 }
 0x128   : > { %13104 = vmatpush3.bf16.msra.mxu1 %v13777_v10  ;;  %13079 = vmatprep.subr.bf16.mxu0 %v13785_v56  ;;  %v583_v10 = vld [vmem:[%s14920_s26 + $0x58] sm:$0xff] }
 0x129   : > { %13105 = vmatprep.subr.bf16.mxu1 %v13778_v11  ;;  %v593_v13 = vpack.c.bf16 %v583_v10, %v582_v9  ;;  %p14421_p3 = pnand %p14420_p11, %p14414_p7 }
 0x12a   : > { %13080 = vmatpush3.bf16.msra.mxu0 %v13785_v56 }
 0x12b   : > { %13081 = vmatprep.subr.bf16.mxu0 %v13786_v57 }
 0x12c   : > { %13106 = vmatpush3.bf16.msra.mxu1 %v13778_v11  ;;  %v584_v11 = vld [vmem:[%s14920_s26 + $0x60] sm:$0xff] }
 0x12d   : > { %13107 = vmatprep.subr.bf16.mxu1 %v13779_v12 }
 0x12e   : > { %13082 = vmatpush3.bf16.msra.mxu0 %v13786_v57 }
 0x12f   : > { %13083 = vmatprep.subr.bf16.mxu0 %v13787_v58 }
 0x130   : > { %13108 = vmatpush3.bf16.msra.mxu1 %v13779_v12  ;;  %v585_v12 = vld [vmem:[%s14920_s26 + $0x68] sm:$0xff] }
 0x131   : > { %13109 = vmatprep.subr.bf16.mxu1 %v13780_v15 }
 0x132   : > { %13084 = vmatpush3.bf16.msra.mxu0 %v13787_v58 }
 0x133   : > { %13085 = vmatprep.subr.bf16.mxu0 %v13788_v59 }
 0x134   : > { %13110 = vmatpush3.bf16.msra.mxu1 %v13780_v15  ;;  %v594_v15 = vpack.c.bf16 %v585_v12, %v584_v11 }
 0x135   : > { %13111 = vmatprep.subr.bf16.mxu1 %v13781_v19 }
 0x136   : > { %13086 = vmatpush3.bf16.msra.mxu0 %v13788_v59 }
 0x137   : > { %13087 = vmatprep.subr.bf16.mxu0 %v13789_v60 }
 0x138   : > { %13112 = vmatpush3.bf16.msra.mxu1 %v13781_v19  ;;  %v587_v19 = vld [vmem:[%s14920_s26 + $0x78] sm:$0xff] }
 0x139   : > { %13113 = vmatprep.subr.bf16.mxu1 %v13782_v20 }
 0x13a   : > { %13088 = vmatpush3.bf16.msra.mxu0 %v13789_v60 }
 0x13b   : > { %13089 = vmatprep.subr.bf16.mxu0 %v13790_v61 }
 0x13c   : > { %13114 = vmatpush3.bf16.msra.mxu1 %v13782_v20  ;;  %v595_v20 = vpack.c.bf16 %v587_v19, %v586_v18 }
 0x13e   : > { %13090 = vmatpush3.bf16.msra.mxu0 %v13790_v61 }
 0x13f   : > { %13116 = vmatmul.mubr.bf16.vlgmr.msra.gmra.mrb[0].mxu1 %v14975_v23 }
 0x1a8   : > { %v597_v24 = vpop.xlane.xlu0 %596  ;;  %v601_v25 = vpop.xlane.xlu1 %600 }
 0x1a9   : > { %v613_v26 = vmul.f32 0.0078125, %v597_v24  ;;  %v615_v27 = vmul.f32 0.0078125, %v601_v25  ;;  %v15058_v24 = vld [vmem:[#allocation10 + $0x30] sm:$0xff]   ;;  %v15062_v25 = vld [vmem:[#allocation10 + $0x38] sm:$0xff]  }
 0x1ab   : > { %v14978_v28 = vsub.f32 %v564_v0, %v613_v26  ;;  %v14980_v29 = vsub.f32 %v566_v1, %v615_v27  ;;  %v578_v0 = vld [vmem:[%s14920_s26 + $0x30] sm:$0xff]  ;;  %v15019_v1 = vpack.c.bf16 %v577_v63, %v576_v62 }
 0x1ac   : > { %v599_v30 = vpop.xlane.xlu0 %598  ;;  %v603_v31 = vpop.xlane.xlu1 %602 }
 0x1ad   : > { %v614_v32 = vmul.f32 0.0078125, %v599_v30  ;;  %v629_v33 = vmul.f32 %v14978_v28, %v14978_v28  ;;  %v616_v34 = vmul.f32 0.0078125, %v603_v31  ;;  %v631_v35 = vmul.f32 %v14980_v29, %v14980_v29  ;;  %13119 = vmatprep.mubr.bf16.mxu1 %v15019_v1 }
 0x1af   : > { %637 = vadd.xlane.f32.xlu0 %v629_v33  ;;  %v14987_v36 = vsub.f32 %v14945_v2, %v614_v32  ;;  %v14990_v37 = vsub.f32 %v14948_v3, %v616_v34  ;;  %v579_v2 = vld [vmem:[%s14920_s26 + $0x38] sm:$0xff]  ;;  %v580_v3 = vld [vmem:[%s14920_s26 + $0x40] sm:$0xff] }
 0x1b0   : > { %v605_v38 = vpop.xlane.xlu0 %604  ;;  %v607_v39 = vpop.xlane.xlu1 %606 }
 0x1b1   : > { %v617_v40 = vmul.f32 0.0078125, %v605_v38  ;;  %v630_v41 = vmul.f32 %v14987_v36, %v14987_v36  ;;  %v618_v42 = vmul.f32 0.0078125, %v607_v39  ;;  %v632_v43 = vmul.f32 %v14990_v37, %v14990_v37 }
 0x1b3   : > { %641 = vadd.xlane.f32.xlu0 %v631_v35  ;;  %639 = vadd.xlane.f32.xlu1 %v630_v41  ;;  %v14997_v44 = vsub.f32 %v14951_v4, %v617_v40  ;;  %v15000_v45 = vsub.f32 %v14954_v5, %v618_v42  ;;  %v581_v4 = vld [vmem:[%s14920_s26 + $0x48] sm:$0xff]  ;;  %v15024_v5 = vpack.c.bf16 %v579_v2, %v578_v0 }
 0x1b4   : > { %v609_v46 = vpop.xlane.xlu0 %608  ;;  %v611_v47 = vpop.xlane.xlu1 %610 }
 0x1b5   : > { %v619_v48 = vmul.f32 0.0078125, %v609_v46  ;;  %v633_v49 = vmul.f32 %v14997_v44, %v14997_v44  ;;  %v620_v50 = vmul.f32 0.0078125, %v611_v47  ;;  %v634_v51 = vmul.f32 %v15000_v45, %v15000_v45  ;;  %13120 = vmatmul.mubr.bf16.gmra.mrb[4].mxu1 %v15024_v5 }
 0x1b7   : > { %643 = vadd.xlane.f32.xlu1 %v632_v43  ;;  %645 = vadd.xlane.f32.xlu0 %v633_v49  ;;  %v15007_v52 = vsub.f32 %v14959_v6, %v619_v48  ;;  %v15010_v53 = vsub.f32 %v14962_v7, %v620_v50  ;;  %v592_v6 = vpack.c.bf16 %v581_v4, %v580_v3  ;;  %v15028_v7 = vld [vmem:[#allocation10] sm:$0xff]  }
 0x1b8   : > { %13571 = vmatprep.subr.bf16.mxu1 %v15028_v7  ;;  %13131 = vmatprep.subr.bf16.mxu0 %v15028_v7 }
 0x1b9   : > { %v635_v54 = vmul.f32 %v15007_v52, %v15007_v52  ;;  %v636_v55 = vmul.f32 %v15010_v53, %v15010_v53  ;;  %13123 = vmatprep.mubr.bf16.mxu1 %v592_v6  ;;  %13579 = vmatpush3.bf16.msra.mxu1 %v15028_v7 }
 0x1ba   : > { %13572 = vmatprep.subr.bf16.mxu1 %v15030_v8 }
 0x1bb   : > { %647 = vadd.xlane.f32.xlu1 %v634_v51  ;;  %649 = vadd.xlane.f32.xlu0 %v635_v54 }
 0x1bd   : > { %13580 = vmatpush3.bf16.msra.mxu1 %v15030_v8 }
 0x1be   : > { %13124 = vmatmul.mubr.bf16.gmra.mrb[8].mxu1 %v593_v13  ;;  %13573 = vmatprep.subr.bf16.mxu1 %v15040_v14 }
 0x1bf   : > { %651 = vadd.xlane.f32.xlu1 %v636_v55  ;;  %13127 = vmatprep.mubr.bf16.mxu1 %v594_v15 }
 0x1c1   : > { %13581 = vmatpush3.bf16.msra.mxu1 %v15040_v14 }
 0x1c2   : > { %13574 = vmatprep.subr.bf16.mxu1 %v15044_v17 }
 0x1c5   : > { %13582 = vmatpush3.bf16.msra.mxu1 %v15044_v17 }
 0x1c6   : > { %13128 = vmatmul.mubr.bf16.gmra.mrb[12].mxu1 %v595_v20  ;;  %13575 = vmatprep.subr.bf16.mxu1 %v15050_v21 }
 0x1c7   : > { %13155 = vmatprep.mubr.bf16.mxu1 %v592_v6 }
 0x1c9   : > { %13583 = vmatpush3.bf16.msra.mxu1 %v15050_v21 }
 0x1ca   : > { %13576 = vmatprep.subr.bf16.mxu1 %v15054_v22 }
 0x1cd   : > { %13584 = vmatpush3.bf16.msra.mxu1 %v15054_v22 }
 0x1ce   : > { %13577 = vmatprep.subr.bf16.mxu1 %v15058_v24 }
 0x1d1   : > { %13585 = vmatpush3.bf16.msra.mxu1 %v15058_v24 }
 0x1d2   : > { %13578 = vmatprep.subr.bf16.mxu1 %v15062_v25 }
 0x1d5   : > { %13586 = vmatpush3.bf16.msra.mxu1 %v15062_v25 }
 0x1d8   : > { %13156 = vmatmul.mubr.bf16.vlgmr.msra.gmra.mrb[16].mxu1 %v593_v13 }
 0x1d9   : > { %13159 = vmatprep.mubr.bf16.mxu1 %v594_v15 }
 0x1e0   : > { %13160 = vmatmul.mubr.bf16.gmra.mrb[20].mxu1 %v595_v20 }
 0x212   : > { %v13117_v26 = vpop.f32.mrb[0].mxu1 }
 0x213   : > { %v927_v27 = vpop.f32.mrb[1].mxu1 }
 0x214   : > { %v13118_v30 = vpop.f32.mrb[2].mxu1 }
 0x215   : > { %v15067_v31 = vpack.c.bf16 %v13118_v30, %v13117_v26  ;;  %v930_v32 = vpop.f32.mrb[3].mxu1 }
 0x216   : > { %v15069_v33 = vpack.c.bf16 %v930_v32, %v927_v27 }
 0x218   : > { %2313 = vrot.lane.b32.xlu1 %v15069_v33, %s14513_s18  ;;  %2297 = vrot.lane.b32.xlu0 %v15069_v33, %s14514_s20 }
 0x21c   : > { %2329 = vrot.lane.b32.xlu1 %v15069_v33, %s14515_s19 }
 0x23c   : > { %v638_v34 = vpop.xlane.xlu0 %637 }
 0x23d   : > { %v653_v35 = vmul.f32 0.0078125, %v638_v34 }
 0x23f   : > { %v661_v38 = vadd.f32 1e-05, %v653_v35 }
 0x240   : > { %v640_v39 = vpop.xlane.xlu1 %639  ;;  %v642_v40 = vpop.xlane.xlu0 %641 }
 0x241   : > { %v654_v41 = vmul.f32 0.0078125, %v640_v39  ;;  %v655_v42 = vmul.f32 0.0078125, %v642_v40  ;;  %13887 = vrsqrt.f32 %v661_v38 }
 0x243   : > { %v662_v43 = vadd.f32 1e-05, %v654_v41  ;;  %v663_v46 = vadd.f32 1e-05, %v655_v42 }
 0x244   : > { %v644_v47 = vpop.xlane.xlu1 %643  ;;  %v646_v48 = vpop.xlane.xlu0 %645 }
 0x245   : > { %13889 = vrsqrt.f32 %v662_v43  ;;  %v656_v49 = vmul.f32 0.0078125, %v644_v47  ;;  %v657_v50 = vmul.f32 0.0078125, %v646_v48 }
 0x246   : > { %13891 = vrsqrt.f32 %v663_v46 }
 0x247   : > { %v664_v51 = vadd.f32 1e-05, %v656_v49  ;;  %v665_v54 = vadd.f32 1e-05, %v657_v50 }
 0x248   : > { %v648_v55 = vpop.xlane.xlu1 %647  ;;  %v650_v56 = vpop.xlane.xlu0 %649 }
 0x249   : > { %13893 = vrsqrt.f32 %v664_v51  ;;  %v658_v57 = vmul.f32 0.0078125, %v648_v55  ;;  %v659_v58 = vmul.f32 0.0078125, %v650_v56 }
 0x24a   : > { %13895 = vrsqrt.f32 %v665_v54 }
 0x24b   : > { %v666_v59 = vadd.f32 1e-05, %v658_v57  ;;  %v667_v60 = vadd.f32 1e-05, %v659_v58  ;;  %v13888_v62 = vpop.eup %13887 }
 0x24c   : > { %v652_v61 = vpop.xlane.xlu1 %651  ;;  %v677_v3 = vmul.f32 %v13888_v62, %v14978_v28 }
 0x24d   : > { %13897 = vrsqrt.f32 %v666_v59  ;;  %v660_v63 = vmul.f32 0.0078125, %v652_v61 }
 0x24e   : > { %13899 = vrsqrt.f32 %v667_v60 }
 0x24f   : > { %v13890_v0 = vpop.eup %13889  ;;  %v668_v2 = vadd.f32 1e-05, %v660_v63 }
 0x250   : > { %v678_v4 = vmul.f32 %v13890_v0, %v14987_v36  ;;  %v13892_v6 = vpop.eup %13891 }
 0x251   : > { %13901 = vrsqrt.f32 %v668_v2  ;;  %v679_v11 = vmul.f32 %v13892_v6, %v14980_v29 }
 0x252   : > { %v685_v9 = vpack.c.bf16 %v678_v4, %v677_v3 }
 0x253   : > { %v13894_v10 = vpop.eup %13893 }
 0x254   : > { %13091 = vmatprep.mubr.bf16.mxu0 %v685_v9  ;;  %v680_v12 = vmul.f32 %v13894_v10, %v14990_v37  ;;  %v13896_v13 = vpop.eup %13895 }
 0x255   : > { %v681_v19 = vmul.f32 %v13896_v13, %v14997_v44 }
 0x256   : > { %v686_v15 = vpack.c.bf16 %v680_v12, %v679_v11 }
 0x257   : > { %v13898_v18 = vpop.eup %13897 }
 0x258   : > { %13092 = vmatmul.mubr.bf16.vlgmr.msra.gmra.mrb[0].mxu0 %v686_v15  ;;  %v682_v20 = vmul.f32 %v13898_v18, %v15000_v45  ;;  %v13900_v28 = vpop.eup %13899  ;;  %v1269_v45 = vlaneseq }
 0x259   : > { %13132 = vmatpush3.bf16.msra.mxu0 %v15028_v7  ;;  %v683_v29 = vmul.f32 %v13900_v28, %v15007_v52  ;;  %v18380_v7 = vmov 0  }
 0x25a   : > { %v687_v36 = vpack.c.bf16 %v682_v20, %v681_v19  ;;  %13133 = vmatprep.subr.bf16.mxu0 %v15030_v8 }
 0x25b   : > { %v13902_v26 = vpop.eup %13901 }
 0x25c   : > { %13095 = vmatprep.mubr.bf16.mxu0 %v687_v36  ;;  %v684_v37 = vmul.f32 %v13902_v26, %v15010_v53  ;;  %v15104_v53 = vshrl.u32 %v1269_v45, 7 }
 0x25d   : > { %13134 = vmatpush3.bf16.msra.mxu0 %v15030_v8  ;;  %v15108_v8 = vpack.i.b16 %v18380_v7, %v18380_v7 }
 0x25e   : > { %v688_v27 = vpack.c.bf16 %v684_v37, %v683_v29  ;;  %13135 = vmatprep.subr.bf16.mxu0 %v15040_v14  ;;  %18478 = vst [vmem:[#allocation24_spill] sm:$0xff] %v15104_v53 }
 0x260   : > { %13096 = vmatmul.mubr.bf16.gmra.mrb[4].mxu0 %v688_v27 }
 0x261   : > { %13136 = vmatpush3.bf16.msra.mxu0 %v15040_v14  ;;  %13147 = vmatprep.mubr.bf16.mxu0 %v14970_v16  ;;  %v14516_v16 = vmov 1983009808   ;;  %v2349_v14 = vshrl.u32 %v15069_v33, 16 }
 0x262   : > { %13137 = vmatprep.subr.bf16.mxu0 %v15044_v17  ;;  %v1267_v44 = vunpack.c.l.s4 %v14516_v16 }
 0x264   : > { %v1268_v52 = vunpack.c.0.s8 %v1267_v44 }
 0x265   : > { %13138 = vmatpush3.bf16.msra.mxu0 %v15044_v17 }
 0x266   : > { %13139 = vmatprep.subr.bf16.mxu0 %v15050_v21 }
 0x269   : > { %13140 = vmatpush3.bf16.msra.mxu0 %v15050_v21  ;;  %v14518_v21 = vmov 1934713408  }
 0x26a   : > { %13141 = vmatprep.subr.bf16.mxu0 %v15054_v22 }
 0x26d   : > { %13142 = vmatpush3.bf16.msra.mxu0 %v15054_v22 }
 0x26e   : > { %13143 = vmatprep.subr.bf16.mxu0 %v15058_v24 }
 0x271   : > { %13144 = vmatpush3.bf16.msra.mxu0 %v15058_v24 }
 0x272   : > { %13145 = vmatprep.subr.bf16.mxu0 %v15062_v25 }
 0x275   : > { %13146 = vmatpush3.bf16.msra.mxu0 %v15062_v25 }
 0x278   : > { %13148 = vmatmul.mubr.bf16.vlgmr.msra.gmra.mrb[8].mxu0 %v14975_v23  ;;  %v1298_v23 = vunpack.c.l.s4 %v14518_v21 }
 0x279   : > { %13151 = vmatprep.mubr.bf16.mxu0 %v15019_v1  ;;  %v15112_v1 = vsub.s32 %v1268_v52, %v15104_v53 }
 0x27a   : > { %v1299_v35 = vunpack.c.0.s8 %v1298_v23 }
 0x27c   : > { %v15122_v47 = vsub.s32 %v1299_v35, %v15104_v53 }
 0x280   : > { %13152 = vmatmul.mubr.bf16.gmra.mrb[12].mxu0 %v15024_v5 }
 0x28a   : > { %v2314_v17 = vpop.permute.xlu1 %2313  ;;  %v2298_v22 = vpop.permute.xlu0 %2297 }
 0x28b   : > { %v2347_v5 = vpack.i.b16 %v2298_v22, %v15069_v33  ;;  %v2350_v24 = vshrl.u32 %v2298_v22, 16  ;;  %v2357_v25 = vshrl.u32 %v2314_v17, 16 }
 0x28d   : > { %v2351_v30 = vpack.i.b16 %v2350_v24, %v2349_v14  ;;  %v2473_v32 = vcombine.high %v2347_v5, %v15108_v8  ;;  %v2480_v40 = vrot.slane %v2347_v5, %v15112_v1 }
 0x28e   : > { %v2330_v34 = vpop.permute.xlu1 %2329 }
 0x28f   : > { %v2355_v38 = vpack.i.b16 %v2330_v34, %v2314_v17  ;;  %v2358_v39 = vshrl.u32 %v2330_v34, 16  ;;  %v2539_v41 = vcombine.high %v2351_v30, %v15108_v8  ;;  %v2487_v33 = vrot.slane %v2473_v32, %v15112_v1 }
 0x290   : > { %v2546_v48 = vrot.slane %v2351_v30, %v15112_v1  ;;  %v13121_v30 = vpop.f32.mrb[4].mxu1 }
 0x291   : > { %v2359_v42 = vpack.i.b16 %v2358_v39, %v2357_v25  ;;  %v2488_v43 = vcombine.high %v2355_v38, %v15108_v8  ;;  %v2495_v46 = vrot.slane %v2355_v38, %v15112_v1  ;;  %v2553_v49 = vrot.slane %v2539_v41, %v15112_v1  ;;  %v943_v34 = vpop.f32.mrb[5].mxu1 }
 0x292   : > { %v13122_v38 = vpop.f32.mrb[6].mxu1  ;;  %v18382_v41 = vmov 0.0  }
 0x293   : > { %v2502_v50 = vrot.slane %v2488_v43, %v15112_v1  ;;  %v2554_v51 = vcombine.high %v2359_v42, %v15108_v8  ;;  %v2561_v54 = vrot.slane %v2359_v42, %v15112_v1  ;;  %v2503_v55 = vcombine.low %v2480_v40, %v2495_v46  ;;  %13163 = vmatprep.subr.bf16.mxu1 %v18382_v41 }
 0x294   : > { %v2504_v56 = vcombine.high %v2480_v40, %v2495_v46  ;;  %v15150_v39 = vpack.c.bf16 %v13122_v38, %v13121_v30  ;;  %v946_v40 = vpop.f32.mrb[7].mxu1  ;;  %13187 = vmatprep.subr.bf16.mxu0 %v18382_v41  ;;  %13165 = vmatprep.mubr.msk.bf16.mxu1 %vm14520_vm1, %v18382_v41 }
 0x295   : > { %v2568_v57 = vrot.slane %v2554_v51, %v15112_v1  ;;  %v2519_v58 = vcombine.low %v2487_v33, %v2502_v50  ;;  %v2520_v59 = vcombine.high %v2487_v33, %v2502_v50  ;;  %v2511_v60 = vrot.slane %v2503_v55, %v15122_v47  ;;  %v13125_v33 = vpop.f32.mrb[8].mxu1  ;;  %13189 = vmatprep.mubr.msk.bf16.mxu0 %vm14520_vm1, %v18382_v41 }
 0x296   : > { %v2518_v61 = vrot.slane %v2504_v56, %v15122_v47  ;;  %v2569_v62 = vcombine.low %v2546_v48, %v2561_v54  ;;  %v2570_v63 = vcombine.high %v2546_v48, %v2561_v54  ;;  %v15154_v43 = vpack.c.bf16 %v946_v40, %v943_v34  ;;  %v959_v48 = vpop.f32.mrb[9].mxu1 }
 0x297   : > { %v2527_v0 = vrot.slane %v2519_v58, %v15122_v47  ;;  %v2534_v2 = vrot.slane %v2520_v59, %v15122_v47  ;;  %v2585_v3 = vcombine.low %v2553_v49, %v2568_v57  ;;  %v2586_v4 = vcombine.high %v2553_v49, %v2568_v57  ;;  %v13126_v49 = vpop.f32.mrb[10].mxu1 }
 0x298   : > { %v2577_v6 = vrot.slane %v2569_v62, %v15122_v47  ;;  %v2584_v9 = vrot.slane %v2570_v63, %v15122_v47  ;;  %v3529_v12 = vcombine.low %v2511_v60, %v2518_v61  ;;  %v12552_v13 = vcombine.high %v2511_v60, %v2518_v61  ;;  %v962_v51 = vpop.f32.mrb[11].mxu1 }
 0x299   : > { %v2593_v10 = vrot.slane %v2585_v3, %v15122_v47  ;;  %v2600_v11 = vrot.slane %v2586_v4, %v15122_v47  ;;  %v3545_v15 = vcombine.low %v2527_v0, %v2534_v2  ;;  %v12553_v18 = vcombine.high %v2527_v0, %v2534_v2  ;;  %v13129_v57 = vpop.f32.mrb[12].mxu1 }
 0x29a   : > { %v3579_v19 = vcombine.low %v2577_v6, %v2584_v9  ;;  %v12554_v20 = vcombine.high %v2577_v6, %v2584_v9  ;;  %v3536_v26 = vrot.slane %v3529_v12, %v15112_v1  ;;  %v3544_v29 = vrot.slane %v12552_v13, %v15112_v1  ;;  %v975_v58 = vpop.f32.mrb[13].mxu1 }
 0x29b   : > { %v3595_v28 = vcombine.low %v2593_v10, %v2600_v11  ;;  %v12555_v36 = vcombine.high %v2593_v10, %v2600_v11  ;;  %v3552_v37 = vrot.slane %v3545_v15, %v15112_v1  ;;  %v3560_v27 = vrot.slane %v12553_v18, %v15112_v1  ;;  %v13130_v60 = vpop.f32.mrb[14].mxu1  ;;  %v12511_v11 = vld [vmem:[%s18365_s3] ss:$0 sm:$0xff] }
 0x29c   : > { %v3586_v16 = vrot.slane %v3579_v19, %v15112_v1  ;;  %v3594_v44 = vrot.slane %v12554_v20, %v15112_v1  ;;  %v3561_v14 = vcombine.low %v3536_v26, %v3544_v29  ;;  %v15158_v50 = vpack.c.bf16 %v13126_v49, %v13125_v33  ;;  %v978_v62 = vpop.f32.mrb[15].mxu1 }
 0x29d   : > { %v3602_v45 = vrot.slane %v3595_v28, %v15112_v1  ;;  %v3610_v52 = vrot.slane %v12555_v36, %v15112_v1  ;;  %v3569_v17 = vcombine.low %v3552_v37, %v3560_v27  ;;  %v15160_v54 = vpack.c.bf16 %v962_v51, %v959_v48 }
 0x29e   : > { %v3611_v21 = vcombine.low %v3586_v16, %v3594_v44  ;;  %v3568_v22 = vrot.slane %v3561_v14, %v15122_v47  ;;  %v15164_v61 = vpack.c.bf16 %v13130_v60, %v13129_v57  ;;  %v15166_v63 = vpack.c.bf16 %v978_v62, %v975_v58 }
 0x29f   : > { %v3619_v23 = vcombine.low %v3602_v45, %v3610_v52  ;;  %v3576_v5 = vrot.slane %v3569_v17, %v15122_v47 }
 0x2a0   : > { %v3618_v24 = vrot.slane %v3611_v21, %v15122_v47  ;;  %18479 = vst [vmem:[#allocation25_spill] sm:$0xff] %v15164_v61 }
 0x2a1   : > { %v3626_v25 = vrot.slane %v3619_v23, %v15122_v47  ;;  %v3577_v32 = vcombine.low %v3568_v22, %v3576_v5  ;;  %v15168_v0 = vcombine.high %v3568_v22, %v3576_v5 }
 0x2a3   : > { %v3627_v35 = vcombine.low %v3618_v24, %v3626_v25  ;;  %v4332_v55 = vshrl.u32 %v3577_v32, 16  ;;  %v15170_v2 = vcombine.high %v3618_v24, %v3626_v25  ;;  %v4338_v4 = vshrl.u32 %v15168_v0, 16 }
 0x2a5   : > { %v4331_v42 = vpack.i.b16 %v3627_v35, %v3577_v32  ;;  %v4333_v56 = vshrl.u32 %v3627_v35, 16  ;;  %v4337_v3 = vpack.i.b16 %v15170_v2, %v15168_v0  ;;  %v4339_v6 = vshrl.u32 %v15170_v2, 16 }
 0x2a7   : > { %v6598_v46 = vsel %vm6593_vm0, %v4331_v42, 0  ;;  %v15162_v59 = vpack.i.b16 %v4333_v56, %v4332_v55  ;;  %v15176_v9 = vpack.i.b16 %v4339_v6, %v4338_v4 }
 0x2a8   : > { %13164 = vmatpush3.bf16.xpose.msra.mxu1 %v6598_v46 }
 0x2a9   : > { %13169 = vmatprep.subr.bf16.mxu1 %v18382_v41 }
 0x2ab   : > { %v15254_v34 = vpop.f32.mrb[16].mxu1 }
 0x2ac   : > { %v15261_v55 = vpop.f32.mrb[17].mxu1 }
 0x2ad   : > { %v15265_v60 = vpop.f32.mrb[18].mxu1 }
 0x2ae   : > { %v15269_v6 = vpop.f32.mrb[19].mxu1 }
 0x32b   : > { %v13093_v10 = vpop.f32.mrb[0].mxu0 }
 0x32c   : > { %v794_v12 = vpop.f32.mrb[1].mxu0  ;;  %v803_v15 = vadd.f32 %v13093_v10, %v12511_v11 }
 0x32d   : > { %v13094_v13 = vpop.f32.mrb[2].mxu0  ;;  %v795_v20 = vadd.f32 %v12511_v11, %v794_v12 }
 0x32e   : > { %v806_v18 = vadd.f32 %v13094_v13, %v12511_v11  ;;  %v797_v19 = vpop.f32.mrb[3].mxu0 }
 0x32f   : > { %v798_v28 = vadd.f32 %v12511_v11, %v797_v19 }
 0x330   : > { %v15181_v36 = vpack.c.bf16 %v806_v18, %v803_v15 }
 0x331   : > { %v825_v26 = vpack.c.bf16 %v798_v28, %v795_v20 }
 0x333   : > { %1179 = vrot.lane.b32.xlu0 %v825_v26, %s14513_s18  ;;  %1171 = vrot.lane.b32.xlu1 %v825_v26, %s14514_s20  ;;  %v13097_v29 = vpop.f32.mrb[4].mxu0  ;;  %v1199_v35 = vshrl.u32 %v825_v26, 16 }
 0x334   : > { %v810_v37 = vpop.f32.mrb[5].mxu0  ;;  %v819_v16 = vadd.f32 %v13097_v29, %v12511_v11 }
 0x335   : > { %v13098_v27 = vpop.f32.mrb[6].mxu0  ;;  %v811_v52 = vadd.f32 %v12511_v11, %v810_v37 }
 0x336   : > { %v822_v44 = vadd.f32 %v13098_v27, %v12511_v11  ;;  %v813_v45 = vpop.f32.mrb[7].mxu0 }
 0x337   : > { %v814_v14 = vadd.f32 %v12511_v11, %v813_v45  ;;  %2299 = vrot.lane.b32.xlu0 %v15067_v31, %s14514_s20  ;;  %1187 = vrot.lane.b32.xlu1 %v825_v26, %s14515_s19 }
 0x338   : > { %v15188_v17 = vpack.c.bf16 %v822_v44, %v819_v16 }
 0x339   : > { %v15190_v21 = vpack.c.bf16 %v814_v14, %v811_v52 }
 0x33b   : > { %2331 = vrot.lane.b32.xlu0 %v15067_v31, %s14515_s19  ;;  %2315 = vrot.lane.b32.xlu1 %v15067_v31, %s14513_s18 }
 0x33f   : > { %2317 = vrot.lane.b32.xlu0 %v15154_v43, %s14513_s18  ;;  %2301 = vrot.lane.b32.xlu1 %v15154_v43, %s14514_s20 }
 0x343   : > { %1173 = vrot.lane.b32.xlu0 %v15181_v36, %s14514_s20  ;;  %2333 = vrot.lane.b32.xlu1 %v15154_v43, %s14515_s19 }
 0x347   : > { %1189 = vrot.lane.b32.xlu0 %v15181_v36, %s14515_s19  ;;  %1181 = vrot.lane.b32.xlu1 %v15181_v36, %s14513_s18 }
 0x34b   : > { %2319 = vrot.lane.b32.xlu0 %v15150_v39, %s14513_s18  ;;  %2303 = vrot.lane.b32.xlu1 %v15150_v39, %s14514_s20 }
 0x34f   : > { %2305 = vrot.lane.b32.xlu0 %v15160_v54, %s14514_s20  ;;  %2335 = vrot.lane.b32.xlu1 %v15150_v39, %s14515_s19 }
 0x353   : > { %2337 = vrot.lane.b32.xlu0 %v15160_v54, %s14515_s19  ;;  %2321 = vrot.lane.b32.xlu1 %v15160_v54, %s14513_s18 }
 0x357   : > { %2307 = vrot.lane.b32.xlu0 %v15158_v50, %s14514_s20  ;;  %1175 = vrot.lane.b32.xlu1 %v15190_v21, %s14514_s20 }
 0x35b   : > { %1183 = vrot.lane.b32.xlu0 %v15190_v21, %s14513_s18  ;;  %1191 = vrot.lane.b32.xlu1 %v15190_v21, %s14515_s19 }
 0x35f   : > { %2339 = vrot.lane.b32.xlu0 %v15158_v50, %s14515_s19  ;;  %2323 = vrot.lane.b32.xlu1 %v15158_v50, %s14513_s18 }
 0x363   : > { %2325 = vrot.lane.b32.xlu0 %v15166_v63, %s14513_s18  ;;  %2309 = vrot.lane.b32.xlu1 %v15166_v63, %s14514_s20 }
 0x367   : > { %1177 = vrot.lane.b32.xlu0 %v15188_v17, %s14514_s20  ;;  %2341 = vrot.lane.b32.xlu1 %v15166_v63, %s14515_s19 }
 0x36b   : > { %1193 = vrot.lane.b32.xlu0 %v15188_v17, %s14515_s19  ;;  %1185 = vrot.lane.b32.xlu1 %v15188_v17, %s14513_s18 }
 0x36f   : > { %2311 = vrot.lane.b32.xlu1 %v15164_v61, %s14514_s20  ;;  %2327 = vrot.lane.b32.xlu0 %v15164_v61, %s14513_s18 }
 0x373   : > { %2343 = vrot.lane.b32.xlu1 %v15164_v61, %s14515_s19 }
 0x3a5   : > { %v1172_v23 = vpop.permute.xlu1 %1171  ;;  %v1180_v22 = vpop.permute.xlu0 %1179 }
 0x3a6   : > { %v1200_v24 = vshrl.u32 %v1172_v23, 16  ;;  %v1207_v25 = vshrl.u32 %v1180_v22, 16  ;;  %v1197_v38 = vpack.i.b16 %v1172_v23, %v825_v26 }
 0x3a8   : > { %v1201_v42 = vpack.i.b16 %v1200_v24, %v1199_v35  ;;  %v1265_v48 = vcombine.high %v1197_v38, %v15108_v8  ;;  %v1272_v62 = vrot.slane %v1197_v38, %v15112_v1  ;;  %v2365_v24 = vshrl.u32 %v15067_v31, 16 }
 0x3a9   : > { %v1188_v5 = vpop.permute.xlu1 %1187  ;;  %v2300_v58 = vpop.permute.xlu0 %2299 }
 0x3aa   : > { %v1205_v30 = vpack.i.b16 %v1188_v5, %v1180_v22  ;;  %v1208_v32 = vshrl.u32 %v1188_v5, 16  ;;  %v1331_v49 = vcombine.high %v1201_v42, %v15108_v8  ;;  %v1279_v10 = vrot.slane %v1265_v48, %v15112_v1 }
 0x3ab   : > { %v1338_v11 = vrot.slane %v1201_v42, %v15112_v1  ;;  %v2366_v38 = vshrl.u32 %v2300_v58, 16  ;;  %v2363_v2 = vpack.i.b16 %v2300_v58, %v15067_v31 }
 0x3ac   : > { %v1209_v40 = vpack.i.b16 %v1208_v32, %v1207_v25  ;;  %v1280_v46 = vcombine.high %v1205_v30, %v15108_v8  ;;  %v1287_v51 = vrot.slane %v1205_v30, %v15112_v1  ;;  %v1345_v12 = vrot.slane %v1331_v49, %v15112_v1 }
 0x3ad   : > { %v2316_v37 = vpop.permute.xlu1 %2315  ;;  %v2332_v27 = vpop.permute.xlu0 %2331  ;;  %v15285_v25 = vsel %vm6593_vm0, %v15162_v59, 0  ;;  %v15291_v30 = vsel %vm6593_vm0, %v4337_v3, 0 }
 0x3ae   : > { %v1346_v33 = vcombine.high %v1209_v40, %v15108_v8  ;;  %v1294_v56 = vrot.slane %v1280_v46, %v15112_v1  ;;  %v1353_v57 = vrot.slane %v1209_v40, %v15112_v1  ;;  %v1295_v13 = vcombine.low %v1272_v62, %v1287_v51 }
 0x3af   : > { %v1296_v15 = vcombine.high %v1272_v62, %v1287_v51  ;;  %v2381_v40 = vshrl.u32 %v15154_v43, 16  ;;  %v2371_v48 = vpack.i.b16 %v2332_v27, %v2316_v37  ;;  %v2373_v3 = vshrl.u32 %v2316_v37, 16 }
 0x3b0   : > { %v1360_v4 = vrot.slane %v1346_v33, %v15112_v1  ;;  %v1311_v18 = vcombine.low %v1279_v10, %v1294_v56  ;;  %v1312_v19 = vcombine.high %v1279_v10, %v1294_v56  ;;  %v1361_v20 = vcombine.low %v1338_v11, %v1353_v57 }
 0x3b1   : > { %v1362_v28 = vcombine.high %v1338_v11, %v1353_v57  ;;  %v1303_v16 = vrot.slane %v1295_v13, %v15122_v47  ;;  %v1310_v44 = vrot.slane %v1296_v15, %v15122_v47  ;;  %v2302_v49 = vpop.permute.xlu1 %2301  ;;  %v15294_v51 = vpop.permute.xlu0 %2317  ;;  %v2374_v62 = vshrl.u32 %v2332_v27, 16 }
 0x3b2   : > { %v1377_v26 = vcombine.low %v1345_v12, %v1360_v4  ;;  %v1378_v29 = vcombine.high %v1345_v12, %v1360_v4  ;;  %v1319_v45 = vrot.slane %v1311_v18, %v15122_v47  ;;  %v1326_v52 = vrot.slane %v1312_v19, %v15122_v47 }
 0x3b3   : > { %v1369_v14 = vrot.slane %v1361_v20, %v15122_v47  ;;  %v1376_v23 = vrot.slane %v1362_v28, %v15122_v47  ;;  %v1793_v32 = vcombine.low %v1303_v16, %v1310_v44  ;;  %v12536_v35 = vcombine.high %v1303_v16, %v1310_v44 }
 0x3b4   : > { %v1385_v22 = vrot.slane %v1377_v26, %v15122_v47  ;;  %v1392_v5 = vrot.slane %v1378_v29, %v15122_v47  ;;  %v1843_v46 = vcombine.low %v1319_v45, %v1326_v52  ;;  %v12538_v33 = vcombine.high %v1319_v45, %v1326_v52 }
 0x3b5   : > { %v1818_v42 = vcombine.low %v1369_v14, %v1376_v23  ;;  %v12537_v59 = vcombine.high %v1369_v14, %v1376_v23  ;;  %v15300_v4 = vsel %vm6593_vm0, %v15176_v9, 0  ;;  %v1800_v10 = vrot.slane %v1793_v32, %v15112_v1  ;;  %v2334_v37 = vpop.permute.xlu1 %2333  ;;  %v15315_v16 = vpop.permute.xlu0 %1173 }
 0x3b6   : > { %v1868_v56 = vcombine.low %v1385_v22, %v1392_v5  ;;  %v12539_v57 = vcombine.high %v1385_v22, %v1392_v5  ;;  %v1808_v11 = vrot.slane %v12536_v35, %v15112_v1  ;;  %v2367_v12 = vpack.i.b16 %v2366_v38, %v2365_v24 }
 0x3b7   : > { %v1825_v15 = vrot.slane %v1818_v42, %v15112_v1  ;;  %v1850_v18 = vrot.slane %v1843_v46, %v15112_v1  ;;  %v1858_v19 = vrot.slane %v12538_v33, %v15112_v1  ;;  %v2620_v31 = vcombine.high %v2371_v48, %v15108_v8 }
 0x3b8   : > { %v1833_v58 = vrot.slane %v12537_v59, %v15112_v1  ;;  %v1875_v9 = vrot.slane %v1868_v56, %v15112_v1  ;;  %v1883_v20 = vrot.slane %v12539_v57, %v15112_v1  ;;  %v2627_v28 = vrot.slane %v2371_v48, %v15112_v1 }
 0x3b9   : > { %v2605_v26 = vcombine.high %v2363_v2, %v15108_v8  ;;  %v2375_v29 = vpack.i.b16 %v2374_v62, %v2373_v3  ;;  %v1221_v27 = vshrl.u32 %v15181_v36, 16  ;;  %v2612_v45 = vrot.slane %v2363_v2, %v15112_v1 }
 0x3ba   : > { %v2671_v52 = vcombine.high %v2367_v12, %v15108_v8  ;;  %v2379_v14 = vpack.i.b16 %v2302_v49, %v15154_v43  ;;  %v1809_v22 = vcombine.low %v1800_v10, %v1808_v11  ;;  %v1859_v5 = vcombine.low %v1850_v18, %v1858_v19  ;;  %v1182_v19 = vpop.permute.xlu1 %1181 }
 0x3bb   : > { %v2634_v24 = vrot.slane %v2620_v31, %v15112_v1  ;;  %v1834_v35 = vcombine.low %v1825_v15, %v1833_v58  ;;  %v1884_v38 = vcombine.low %v1875_v9, %v1883_v20  ;;  %v2635_v42 = vcombine.low %v2612_v45, %v2627_v28  ;;  %v1190_v31 = vpop.permute.xlu0 %1189 }
 0x3bc   : > { %v2636_v46 = vcombine.high %v2612_v45, %v2627_v28  ;;  %v2619_v33 = vrot.slane %v2605_v26, %v15112_v1  ;;  %v2686_v48 = vcombine.high %v2375_v29, %v15108_v8  ;;  %v2693_v59 = vrot.slane %v2375_v29, %v15112_v1 }
 0x3bd   : > { %v2382_v56 = vshrl.u32 %v2302_v49, 16  ;;  %v2678_v57 = vrot.slane %v2367_v12, %v15112_v1  ;;  %v2685_v2 = vrot.slane %v2671_v52, %v15112_v1  ;;  %v2737_v3 = vcombine.high %v2379_v14, %v15108_v8 }
 0x3be   : > { %v15332_v10 = vrot.slane %v1809_v22, %v15122_v47  ;;  %v15335_v11 = vrot.slane %v1859_v5, %v15122_v47  ;;  %v2651_v15 = vcombine.low %v2619_v33, %v2634_v24  ;;  %v2652_v18 = vcombine.high %v2619_v33, %v2634_v24 }
 0x3bf   : > { %v15338_v49 = vrot.slane %v1834_v35, %v15122_v47  ;;  %v15341_v12 = vrot.slane %v1884_v38, %v15122_v47  ;;  %v15344_v58 = vrot.slane %v2635_v42, %v15122_v47  ;;  %v15347_v9 = vrot.slane %v2636_v46, %v15122_v47 }
 0x3c0   : > { %v2700_v20 = vrot.slane %v2686_v48, %v15112_v1  ;;  %v2701_v28 = vcombine.low %v2678_v57, %v2693_v59  ;;  %v2383_v26 = vpack.i.b16 %v2382_v56, %v2381_v40  ;;  %v2744_v29 = vrot.slane %v2379_v14, %v15112_v1 }
 0x3c1   : > { %v2702_v45 = vcombine.high %v2678_v57, %v2693_v59  ;;  %v15354_v52 = vrot.slane %v2737_v3, %v15112_v1  ;;  %v2387_v22 = vpack.i.b16 %v2334_v37, %v15294_v51  ;;  %v1227_v5 = vpack.i.b16 %v1190_v31, %v1182_v19 }
 0x3c2   : > { %v15358_v24 = vrot.slane %v2651_v15, %v15122_v47  ;;  %v15361_v35 = vrot.slane %v2652_v18, %v15122_v47  ;;  %v2389_v38 = vshrl.u32 %v15294_v51, 16  ;;  %v2390_v42 = vshrl.u32 %v2334_v37, 16 }
 0x3c3   : > { %v1219_v40 = vpack.i.b16 %v15315_v16, %v15181_v36  ;;  %v1229_v14 = vshrl.u32 %v1182_v19, 16  ;;  %v1230_v46 = vshrl.u32 %v1190_v31, 16  ;;  %v2717_v33 = vcombine.low %v2685_v2, %v2700_v20 }
 0x3c4   : > { %v2718_v48 = vcombine.high %v2685_v2, %v2700_v20  ;;  %v1222_v56 = vshrl.u32 %v15315_v16, 16  ;;  %v15372_v57 = vrot.slane %v2701_v28, %v15122_v47  ;;  %v15375_v51 = vrot.slane %v2702_v45, %v15122_v47 }
 0x3c5   : > { %v2752_v37 = vcombine.high %v2387_v22, %v15108_v8  ;;  %v1412_v3 = vcombine.high %v1227_v5, %v15108_v8  ;;  %v2391_v18 = vpack.i.b16 %v2390_v42, %v2389_v38  ;;  %v2759_v19 = vrot.slane %v2387_v22, %v15112_v1 }
 0x3c6   : > { %v2803_v16 = vcombine.high %v2383_v26, %v15108_v8  ;;  %v15386_v31 = vrot.slane %v2383_v26, %v15112_v1  ;;  %v1397_v20 = vcombine.high %v1219_v40, %v15108_v8  ;;  %v1231_v28 = vpack.i.b16 %v1230_v46, %v1229_v14  ;;  %v15404_v46 = vpop.f32.mrb[8].mxu0 }
 0x3c7   : > { %v15390_v45 = vrot.slane %v2717_v33, %v15122_v47  ;;  %v15393_v44 = vrot.slane %v2718_v48, %v15122_v47  ;;  %v1223_v62 = vpack.i.b16 %v1222_v56, %v1221_v27  ;;  %v1419_v38 = vrot.slane %v1227_v5, %v15112_v1  ;;  %18480 = vst [vmem:[#allocation26_spill] sm:$0xff] %v15404_v46  ;;  %v15408_v27 = vpop.f32.mrb[9].mxu0 }
 0x3c8   : > { %v2766_v42 = vrot.slane %v2752_v37, %v15112_v1  ;;  %v1426_v14 = vrot.slane %v1412_v3, %v15112_v1  ;;  %v2767_v33 = vcombine.low %v2744_v29, %v2759_v19  ;;  %v2768_v48 = vcombine.high %v2744_v29, %v2759_v19  ;;  %18481 = vst [vmem:[#allocation27_spill] sm:$0xff] %v15408_v27  ;;  %v15416_v3 = vpop.f32.mrb[10].mxu0 }
 0x3c9   : > { %v2818_v32 = vcombine.high %v2391_v18, %v15108_v8  ;;  %v1404_v36 = vrot.slane %v1219_v40, %v15112_v1  ;;  %v15411_v5 = vrot.slane %v2803_v16, %v15112_v1  ;;  %v1411_v56 = vrot.slane %v1397_v20, %v15112_v1  ;;  %18482 = vst [vmem:[#allocation28_spill] sm:$0xff] %v15416_v3 }
 0x3ca   : > { %v1478_v23 = vcombine.high %v1231_v28, %v15108_v8  ;;  %v1485_v37 = vrot.slane %v1231_v28, %v15112_v1  ;;  %v2825_v7 = vrot.slane %v2391_v18, %v15112_v1  ;;  %v1463_v29 = vcombine.high %v1223_v62, %v15108_v8 }
 0x3cb   : > { %v1427_v19 = vcombine.low %v1404_v36, %v1419_v38  ;;  %v1428_v26 = vcombine.high %v1404_v36, %v1419_v38  ;;  %v2783_v40 = vcombine.low %v15354_v52, %v2766_v42  ;;  %v1470_v22 = vrot.slane %v1223_v62, %v15112_v1 }
 0x3cc   : > { %v1443_v16 = vcombine.low %v1411_v56, %v1426_v14  ;;  %v1444_v2 = vcombine.high %v1411_v56, %v1426_v14  ;;  %v15423_v20 = vrot.slane %v2767_v33, %v15122_v47  ;;  %v15426_v59 = vrot.slane %v2768_v48, %v15122_v47  ;;  %v2304_v56 = vpop.permute.xlu1 %2303 }
 0x3cd   : > { %v2784_v28 = vcombine.high %v15354_v52, %v2766_v42  ;;  %v2832_v18 = vrot.slane %v2818_v32, %v15112_v1  ;;  %v1492_v43 = vrot.slane %v1478_v23, %v15112_v1  ;;  %v1493_v13 = vcombine.low %v1470_v22, %v1485_v37  ;;  %v15444_v42 = vpop.f32.mrb[11].mxu0 }
 0x3ce   : > { %v1494_v38 = vcombine.high %v1470_v22, %v1485_v37  ;;  %v2195_v36 = vpack.i.b16 %v15338_v49, %v15332_v10  ;;  %v2833_v62 = vcombine.low %v15386_v31, %v2825_v7  ;;  %v2834_v14 = vcombine.high %v15386_v31, %v2825_v7  ;;  %18483 = vst [vmem:[#allocation29_spill] sm:$0xff] %v15444_v42  ;;  %v15453_v37 = vpop.permute.xlu0 %2319 }
 0x3cf   : > { %v1435_v33 = vrot.slane %v1427_v19, %v15122_v47  ;;  %v1442_v48 = vrot.slane %v1428_v26, %v15122_v47  ;;  %v15438_v52 = vrot.slane %v2783_v40, %v15122_v47  ;;  %v1477_v32 = vrot.slane %v1463_v29, %v15112_v1 }
 0x3d0   : > { %v1451_v23 = vrot.slane %v1443_v16, %v15122_v47  ;;  %v1458_v22 = vrot.slane %v1444_v2, %v15122_v47  ;;  %13166 = vmatmul.mubr.msk.bf16.vlgmr.msra.gmra.mrb[24].mxu1 %vm6593_vm0, %v2195_v36  ;;  %v15447_v7 = vrot.slane %v2784_v28, %v15122_v47  ;;  %v1501_v29 = vrot.slane %v1493_v13, %v15122_v47 }
 0x3d1   : > { %13170 = vmatpush3.bf16.xpose.msra.mxu1 %v15285_v25  ;;  %13171 = vmatprep.mubr.msk.bf16.mxu1 %vm14520_vm1, %v18382_v41  ;;  %v1508_v19 = vrot.slane %v1494_v38, %v15122_v47  ;;  %v1509_v40 = vcombine.low %v1477_v32, %v1492_v43  ;;  %v1510_v16 = vcombine.high %v1477_v32, %v1492_v43  ;;  %v2398_v31 = vshrl.u32 %v2304_v56, 16  ;;  %v15488_v43 = vpop.f32.mrb[12].mxu0 }
 0x3d2   : > { %13175 = vmatprep.subr.bf16.mxu1 %v18382_v41  ;;  %v2849_v28 = vcombine.low %v15411_v5, %v2832_v18  ;;  %v2850_v36 = vcombine.high %v15411_v5, %v2832_v18  ;;  %v1893_v26 = vcombine.low %v1435_v33, %v1442_v48  ;;  %v15465_v25 = vrot.slane %v2833_v62, %v15122_v47  ;;  %v2336_v5 = vpop.permute.xlu1 %2335 }
 0x3d3   : > { %v12540_v15 = vcombine.high %v1435_v33, %v1442_v48  ;;  %v1943_v0 = vcombine.low %v1451_v23, %v1458_v22  ;;  %v12542_v2 = vcombine.high %v1451_v23, %v1458_v22  ;;  %v15468_v13 = vrot.slane %v2834_v14, %v15122_v47  ;;  %18485 = vst [vmem:[#allocation30_spill] sm:$0xff] %v15488_v43 }
 0x3d4   : > { %v2395_v32 = vpack.i.b16 %v2304_v56, %v15150_v39  ;;  %v1517_v18 = vrot.slane %v1509_v40, %v15122_v47  ;;  %v1524_v62 = vrot.slane %v1510_v16, %v15122_v47  ;;  %v1918_v41 = vcombine.low %v1501_v29, %v1508_v19  ;;  %v2306_v56 = vpop.permute.xlu0 %2305 }
 0x3d5   : > { %v12541_v33 = vcombine.high %v1501_v29, %v1508_v19  ;;  %v15478_v48 = vrot.slane %v2849_v28, %v15122_v47  ;;  %v15481_v14 = vrot.slane %v2850_v36, %v15122_v47  ;;  %v15484_v23 = vrot.slane %v1893_v26, %v15112_v1  ;;  %v15500_v28 = vpop.f32.mrb[13].mxu0 }
 0x3d6   : > { %v18484_v22 = vshrl.u32 %v15150_v39, 16  ;;  %v15491_v40 = vrot.slane %v12540_v15, %v15112_v1  ;;  %v15494_v29 = vrot.slane %v1943_v0, %v15112_v1  ;;  %v15497_v19 = vrot.slane %v12542_v2, %v15112_v1  ;;  %18488 = vst [vmem:[#allocation33_spill] sm:$0xff] %v15500_v28  ;;  %v15508_v36 = vpop.f32.mrb[14].mxu0  ;;  %v15525_v42 = vpop.permute.xlu1 %2321 }
 0x3d7   : > { %v2403_v16 = vpack.i.b16 %v2336_v5, %v15453_v37  ;;  %v2869_v26 = vcombine.high %v2395_v32, %v15108_v8  ;;  %v2405_v15 = vshrl.u32 %v15453_v37, 16  ;;  %18489 = vst [vmem:[#allocation34_spill] sm:$0xff] %v15508_v36  ;;  %v15511_v0 = vrot.slane %v1918_v41, %v15112_v1 }
 0x3d8   : > { %v2399_v38 = vpack.i.b16 %v2398_v31, %v18484_v22  ;;  %18486 = vst [vmem:[#allocation31_spill] sm:$0xff] %v15494_v29  ;;  %18487 = vst [vmem:[#allocation32_spill] sm:$0xff] %v15497_v19  ;;  %v15514_v2 = vrot.slane %v12541_v33, %v15112_v1  ;;  %v1968_v22 = vcombine.low %v1517_v18, %v1524_v62  ;;  %v2406_v39 = vshrl.u32 %v2336_v5, 16  ;;  %v2338_v27 = vpop.permute.xlu0 %2337 }
 0x3d9   : > { %v12543_v53 = vcombine.high %v1517_v18, %v1524_v62  ;;  %v2196_v43 = vshrl.u32 %v15332_v10, 16  ;;  %v2197_v31 = vshrl.u32 %v15338_v49, 16  ;;  %v2876_v41 = vrot.slane %v2395_v32, %v15112_v1 }
 0x3da   : > { %v2935_v28 = vcombine.high %v2399_v38, %v15108_v8  ;;  %v2884_v33 = vcombine.high %v2403_v16, %v15108_v8  ;;  %v2883_v18 = vrot.slane %v2869_v26, %v15112_v1  ;;  %v2891_v5 = vrot.slane %v2403_v16, %v15112_v1 }
 0x3db   : > { %v2414_v62 = vshrl.u32 %v2306_v56, 16  ;;  %v2198_v3 = vpack.i.b16 %v2197_v31, %v2196_v43  ;;  %v15532_v37 = vrot.slane %v1968_v22, %v15112_v1  ;;  %v15535_v36 = vrot.slane %v12543_v53, %v15112_v1 }
 0x3dc   : > { %v2942_v32 = vrot.slane %v2399_v38, %v15112_v1  ;;  %v15539_v19 = vrot.slane %v2935_v28, %v15112_v1  ;;  %v2407_v26 = vpack.i.b16 %v2406_v39, %v2405_v15  ;;  %v2411_v16 = vpack.i.b16 %v2306_v56, %v15160_v54  ;;  %v15553_v28 = vpop.f32.mrb[15].mxu0 }
 0x3dd   : > { %18490 = vst [vmem:[#allocation35_spill] sm:$0xff] %v15532_v37  ;;  %18491 = vst [vmem:[#allocation36_spill] sm:$0xff] %v15535_v36  ;;  %v2421_v29 = vshrl.u32 %v15525_v42, 16  ;;  %13172 = vmatmul.mubr.msk.bf16.vlgmr.msra.gmra.mrb[28].mxu1 %vm6593_vm0, %v2198_v3  ;;  %v2898_v43 = vrot.slane %v2884_v33, %v15112_v1  ;;  %v15546_v31 = vpack.i.b16 %v2338_v27, %v15525_v42  ;;  %v2422_v22 = vshrl.u32 %v2338_v27, 16 }
 0x3de   : > { %13176 = vmatpush3.bf16.xpose.msra.mxu1 %v15291_v30  ;;  %v18492_v53 = vcombine.low %v15358_v24, %v15361_v35  ;;  %18493 = vst [vmem:[#allocation37_spill] sm:$0xff] %v15553_v28  ;;  %v2899_v56 = vcombine.low %v2876_v41, %v2891_v5  ;;  %v18494_v39 = vshrl.u32 %v15160_v54, 16  ;;  %v18495_v3 = vcombine.low %v15344_v58, %v15347_v9 }
 0x3df   : > { %v18496_v30 = vcombine.high %v15344_v58, %v15347_v9  ;;  %v18497_v33 = vmov 0.0   ;;  %v18498_v46 = vcombine.high %v15358_v24, %v15361_v35  ;;  %v2957_v9 = vrot.slane %v2407_v26, %v15112_v1 }
 0x3e0   : > { %v3652_v38 = vrot.slane %v18492_v53, %v15112_v1  ;;  %v2415_v15 = vpack.i.b16 %v2414_v62, %v18494_v39  ;;  %v3636_v42 = vrot.slane %v18495_v3, %v15112_v1  ;;  %13177 = vmatprep.mubr.msk.bf16.mxu1 %vm14520_vm1, %v18497_v33  ;;  %v2900_v53 = vcombine.high %v2876_v41, %v2891_v5 }
 0x3e1   : > { %v3644_v27 = vrot.slane %v18496_v30, %v15112_v1  ;;  %v3660_v54 = vrot.slane %v18498_v46, %v15112_v1  ;;  %v18499_v62 = vcombine.low %v15372_v57, %v15375_v51  ;;  %v18500_v3 = vcombine.high %v15372_v57, %v15375_v51  ;;  %13181 = vmatprep.subr.bf16.mxu1 %v18497_v33 }
 0x3e2   : > { %v3001_v41 = vcombine.high %v2411_v16, %v15108_v8  ;;  %v3695_v24 = vcombine.low %v15390_v45, %v15393_v44  ;;  %v12559_v35 = vcombine.high %v15390_v45, %v15393_v44  ;;  %v2915_v46 = vcombine.low %v2883_v18, %v2898_v43  ;;  %v15599_v45 = vpop.permute.xlu1 %1175 }
 0x3e3   : > { %v3686_v39 = vrot.slane %v18499_v62, %v15112_v1  ;;  %v3694_v58 = vrot.slane %v18500_v3, %v15112_v1  ;;  %v2916_v5 = vcombine.high %v2883_v18, %v2898_v43  ;;  %v2950_v30 = vcombine.high %v2407_v26, %v15108_v8  ;;  %v15601_v18 = vpop.permute.xlu0 %2307 }
 0x3e4   : > { %v3669_v62 = vcombine.low %v3652_v38, %v3660_v54  ;;  %v3661_v28 = vcombine.low %v3636_v42, %v3644_v27  ;;  %v3702_v57 = vrot.slane %v3695_v24, %v15112_v1  ;;  %v3710_v51 = vrot.slane %v12559_v35, %v15112_v1 }
 0x3e5   : > { %v3711_v3 = vcombine.low %v3686_v39, %v3694_v58  ;;  %v15590_v37 = vrot.slane %v2899_v56, %v15122_v47  ;;  %v15593_v36 = vrot.slane %v2900_v53, %v15122_v47  ;;  %v15596_v61 = vrot.slane %v2411_v16, %v15112_v1 }
 0x3e6   : > { %v3067_v44 = vcombine.high %v2415_v15, %v15108_v8  ;;  %v2965_v26 = vcombine.low %v2942_v32, %v2957_v9  ;;  %v15604_v43 = vrot.slane %v3001_v41, %v15112_v1  ;;  %v3676_v38 = vrot.slane %v3669_v62, %v15122_v47 }
 0x3e7   : > { %18501 = vst [vmem:[#allocation38_spill] sm:$0xff] %v15590_v37  ;;  %18502 = vst [vmem:[#allocation39_spill] sm:$0xff] %v15593_v36  ;;  %v3719_v56 = vcombine.low %v3702_v57, %v3710_v51  ;;  %v15608_v42 = vrot.slane %v2915_v46, %v15122_v47  ;;  %v2964_v27 = vrot.slane %v2950_v30, %v15112_v1  ;;  %v1184_v57 = vpop.permute.xlu0 %1183  ;;  %v18505_v51 = vmov 0  }
 0x3e8   : > { %v2966_v16 = vcombine.high %v2942_v32, %v2957_v9  ;;  %v15612_v53 = vrot.slane %v2415_v15, %v15112_v1  ;;  %v15615_v54 = vrot.slane %v2916_v5, %v15122_v47  ;;  %v3668_v39 = vrot.slane %v3661_v28, %v15122_v47 }
 0x3e9   : > { %18503 = vst [vmem:[#allocation40_spill] sm:$0xff] %v15608_v42  ;;  %v3718_v58 = vrot.slane %v3711_v3, %v15122_v47  ;;  %v3726_v41 = vrot.slane %v3719_v56, %v15122_v47  ;;  %v15623_v35 = vrot.slane %v3067_v44, %v15112_v1  ;;  %v2423_v46 = vpack.i.b16 %v2422_v22, %v2421_v29  ;;  %v1192_v22 = vpop.permute.xlu1 %1191 }
 0x3ea   : > { %18504 = vst [vmem:[#allocation41_spill] sm:$0xff] %v15615_v54  ;;  %v3016_v32 = vcombine.high %v15546_v31, %v15108_v8  ;;  %v15628_v15 = vrot.slane %v2965_v26, %v15122_v47  ;;  %v15632_v9 = vcombine.low %v3668_v39, %v3676_v38  ;;  %v15637_v30 = vrot.slane %v2966_v16, %v15122_v47 }
 0x3eb   : > { %v15634_v5 = vcombine.low %v3718_v58, %v3726_v41  ;;  %v2981_v62 = vcombine.low %v15539_v19, %v2964_v27  ;;  %v3023_v29 = vrot.slane %v15546_v31, %v15112_v1  ;;  %v15644_v3 = vcombine.high %v15338_v49, %v18505_v51 }
 0x3ec   : > { %v2982_v44 = vcombine.high %v15539_v19, %v2964_v27  ;;  %v15653_v16 = vcombine.high %v15332_v10, %v18505_v51  ;;  %v3030_v28 = vrot.slane %v3016_v32, %v15112_v1  ;;  %v3082_v49 = vcombine.high %v2423_v46, %v15108_v8 }
 0x3ed   : > { %v4343_v56 = vpack.i.b16 %v15634_v5, %v15632_v9  ;;  %v3089_v24 = vrot.slane %v2423_v46, %v15112_v1  ;;  %v1246_v27 = vshrl.u32 %v1192_v22, 16  ;;  %v1245_v26 = vshrl.u32 %v1184_v57, 16 }
 0x3ee   : > { %v2201_v36 = vpack.i.b16 %v15644_v3, %v15653_v16  ;;  %v15664_v37 = vrot.slane %v2981_v62, %v15122_v47  ;;  %v3031_v10 = vcombine.low %v15596_v61, %v3023_v29  ;;  %v3032_v31 = vcombine.high %v15596_v61, %v3023_v29 }
 0x3ef   : > { %v6782_v19 = vsel %vm6593_vm0, %v4343_v56, 0  ;;  %v1243_v32 = vpack.i.b16 %v1192_v22, %v1184_v57  ;;  %v15669_v54 = vrot.slane %v2982_v44, %v15122_v47  ;;  %v1238_v42 = vshrl.u32 %v15599_v45, 16 }
 0x3f0   : > { %18506 = vst [vmem:[#allocation42_spill] sm:$0xff] %v15664_v37  ;;  %13188 = vmatpush3.bf16.xpose.msra.mxu0 %v6782_v19  ;;  %13178 = vmatmul.mubr.msk.bf16.vlgmr.msra.gmra.mrb[32].mxu1 %vm6593_vm0, %v2201_v36  ;;  %v3047_v62 = vcombine.low %v15604_v43, %v3030_v28  ;;  %v3048_v61 = vcombine.high %v15604_v43, %v3030_v28 }
 0x3f1   : > { %13199 = vmatprep.subr.bf16.mxu0 %v18497_v33  ;;  %v3097_v29 = vcombine.low %v15612_v53, %v3089_v24  ;;  %v1235_v22 = vpack.i.b16 %v15599_v45, %v15190_v21  ;;  %13182 = vmatpush3.bf16.xpose.msra.mxu1 %v15300_v4  ;;  %v3096_v57 = vrot.slane %v3082_v49, %v15112_v1 }
 0x3f2   : > { %v1247_v44 = vpack.i.b16 %v1246_v27, %v1245_v26  ;;  %v15685_v19 = vcombine.high %v3668_v39, %v3676_v38  ;;  %v15687_v56 = vcombine.high %v3718_v58, %v3726_v41  ;;  %13183 = vmatprep.mubr.msk.bf16.mxu1 %vm14520_vm1, %v18497_v33  ;;  %v15692_v36 = vrot.slane %v3031_v10, %v15122_v47 }
 0x3f3   : > { %v15695_v43 = vrot.slane %v3032_v31, %v15122_v47  ;;  %v3098_v45 = vcombine.high %v15612_v53, %v3089_v24  ;;  %v1544_v4 = vcombine.high %v1243_v32, %v15108_v8  ;;  %13193 = vmatprep.subr.bf16.mxu1 %v18497_v33  ;;  %v18509_v38 = vshrl.u32 %v15190_v21, 16 }
 0x3f4   : > { %18507 = vst [vmem:[#allocation43_spill] sm:$0xff] %v15692_v36  ;;  %v1551_v58 = vrot.slane %v1243_v32, %v15112_v1  ;;  %v2207_v41 = vpack.i.b16 %v15341_v12, %v15335_v11  ;;  %v4349_v28 = vpack.i.b16 %v15687_v56, %v15685_v19  ;;  %v15708_v26 = vrot.slane %v3047_v62, %v15122_v47 }
 0x3f5   : > { %18508 = vst [vmem:[#allocation44_spill] sm:$0xff] %v15695_v43  ;;  %v1239_v39 = vpack.i.b16 %v1238_v42, %v18509_v38  ;;  %v15711_v53 = vrot.slane %v3048_v61, %v15122_v47  ;;  %v15714_v24 = vrot.slane %v3097_v29, %v15122_v47  ;;  %v1529_v21 = vcombine.high %v1235_v22, %v15108_v8 }
 0x3f6   : > { %v1536_v42 = vrot.slane %v1235_v22, %v15112_v1  ;;  %v1610_v31 = vcombine.high %v1247_v44, %v15108_v8  ;;  %v1617_v49 = vrot.slane %v1247_v44, %v15112_v1  ;;  %v6874_v27 = vsel %vm6593_vm0, %v4349_v28, 0 }
 0x3f7   : > { %13190 = vmatmul.mubr.msk.bf16.vlgmr.msra.gmra.mrb[16].mxu0 %vm6593_vm0, %v2207_v41  ;;  %v15723_v10 = vrot.slane %v3098_v45, %v15122_v47  ;;  %v2427_v32 = vpack.i.b16 %v15601_v18, %v15158_v50  ;;  %v2430_v62 = vshrl.u32 %v15601_v18, 16  ;;  %v1558_v61 = vrot.slane %v1544_v4, %v15112_v1 }
 0x3f8   : > { %13200 = vmatpush3.bf16.xpose.msra.mxu0 %v6874_v27  ;;  %13201 = vmatprep.mubr.msk.bf16.mxu0 %vm14520_vm1, %v18497_v33  ;;  %v1595_v29 = vcombine.high %v1239_v39, %v15108_v8  ;;  %v1602_v22 = vrot.slane %v1239_v39, %v15112_v1  ;;  %v1559_v44 = vcombine.low %v1536_v42, %v1551_v58 }
 0x3f9   : > { %v1560_v38 = vcombine.high %v1536_v42, %v1551_v58  ;;  %13211 = vmatprep.subr.bf16.mxu0 %v18497_v33  ;;  %v3113_v45 = vcombine.low %v15623_v35, %v3096_v57  ;;  %v3114_v41 = vcombine.high %v15623_v35, %v3096_v57  ;;  %v1543_v4 = vrot.slane %v1529_v21, %v15112_v1 }
 0x3fa   : > { %v1624_v27 = vrot.slane %v1610_v31, %v15112_v1  ;;  %v1625_v46 = vcombine.low %v1602_v22, %v1617_v49  ;;  %v1626_v39 = vcombine.high %v1602_v22, %v1617_v49  ;;  %v18510_v42 = vshrl.u32 %v15158_v50, 16 }
 0x3fb   : > { %v3133_v35 = vcombine.high %v2427_v32, %v15108_v8  ;;  %v1575_v57 = vcombine.low %v1543_v4, %v1558_v61  ;;  %v1609_v18 = vrot.slane %v1595_v29, %v15112_v1  ;;  %v1567_v21 = vrot.slane %v1559_v44, %v15122_v47 }
 0x3fc   : > { %v15746_v37 = vpack.i.b16 %v2430_v62, %v18510_v42  ;;  %v1574_v28 = vrot.slane %v1560_v38, %v15122_v47  ;;  %v1576_v43 = vcombine.high %v1543_v4, %v1558_v61  ;;  %v15753_v31 = vrot.slane %v3113_v45, %v15122_v47  ;;  %v15775_v42 = vpop.permute.xlu1 %2323  ;;  %v15777_v62 = vpop.permute.xlu0 %2339 }
 0x3fd   : > { %v15756_v49 = vrot.slane %v3114_v41, %v15122_v47  ;;  %v1633_v22 = vrot.slane %v1625_v46, %v15122_v47  ;;  %v1640_v44 = vrot.slane %v1626_v39, %v15122_v47  ;;  %v1641_v61 = vcombine.low %v1609_v18, %v1624_v27 }
 0x3fe   : > { %18511 = vst [vmem:[#allocation45_spill] sm:$0xff] %v15753_v31  ;;  %v15767_v38 = vrot.slane %v2427_v32, %v15112_v1  ;;  %v15770_v45 = vrot.slane %v3133_v35, %v15112_v1  ;;  %v1583_v4 = vrot.slane %v1575_v57, %v15122_v47  ;;  %v1590_v46 = vrot.slane %v1576_v43, %v15122_v47 }
 0x3ff   : > { %18512 = vst [vmem:[#allocation46_spill] sm:$0xff] %v15756_v49  ;;  %v1642_v29 = vcombine.high %v1609_v18, %v1624_v27  ;;  %v1993_v39 = vcombine.low %v1567_v21, %v1574_v28  ;;  %v12544_v50 = vcombine.high %v1567_v21, %v1574_v28  ;;  %v2202_v32 = vshrl.u32 %v15653_v16, 16 }
 0x400   : > { %v2203_v58 = vshrl.u32 %v15644_v3, 16  ;;  %v4344_v35 = vshrl.u32 %v15632_v9, 16  ;;  %v4345_v31 = vshrl.u32 %v15634_v5, 16  ;;  %v15785_v41 = vrot.slane %v1641_v61, %v15122_v47 }
 0x401   : > { %v2018_v57 = vcombine.low %v1633_v22, %v1640_v44  ;;  %v12545_v49 = vcombine.high %v1633_v22, %v1640_v44  ;;  %v2435_v36 = vpack.i.b16 %v15777_v62, %v15775_v42  ;;  %v15791_v28 = vcombine.high %v15335_v11, %v18505_v51 }
 0x402   : > { %v2204_v43 = vpack.i.b16 %v2203_v58, %v2202_v32  ;;  %v4346_v18 = vpack.i.b16 %v4345_v31, %v4344_v35  ;;  %v15795_v3 = vcombine.high %v15341_v12, %v18505_v51  ;;  %v18513_v9 = vcombine.low %v15423_v20, %v15426_v59 }
 0x403   : > { %v18514_v16 = vcombine.high %v15423_v20, %v15426_v59  ;;  %v18515_v58 = vcombine.low %v15438_v52, %v15447_v7  ;;  %v18516_v31 = vcombine.high %v15438_v52, %v15447_v7  ;;  %v18517_v59 = vcombine.low %v15465_v25, %v15468_v13 }
 0x404   : > { %v3736_v5 = vrot.slane %v18513_v9, %v15112_v1  ;;  %13184 = vmatmul.mubr.msk.bf16.vlgmr.msra.gmra.mrb[36].mxu1 %vm6593_vm0, %v2204_v43  ;;  %v6828_v44 = vsel %vm6593_vm0, %v4346_v18, 0  ;;  %v2213_v61 = vpack.i.b16 %v15795_v3, %v15791_v28  ;;  %v18518_v32 = vcombine.high %v15465_v25, %v15468_v13  ;;  %v2310_v25 = vpop.permute.xlu1 %2309 }
 0x405   : > { %v3744_v27 = vrot.slane %v18514_v16, %v15112_v1  ;;  %v3752_v21 = vrot.slane %v18515_v58, %v15112_v1  ;;  %v3760_v22 = vrot.slane %v18516_v31, %v15112_v1  ;;  %v3786_v20 = vrot.slane %v18517_v59, %v15112_v1  ;;  %13194 = vmatpush3.bf16.xpose.msra.mxu1 %v6828_v44  ;;  %v2326_v59 = vpop.permute.xlu0 %2325 }
 0x406   : > { %v3794_v35 = vrot.slane %v18518_v32, %v15112_v1  ;;  %v2043_v9 = vcombine.low %v1583_v4, %v1590_v46  ;;  %v3795_v7 = vcombine.low %v15478_v48, %v15481_v14  ;;  %v12563_v43 = vcombine.high %v15478_v48, %v15481_v14  ;;  %13202 = vmatmul.mubr.msk.bf16.vlgmr.msra.gmra.mrb[20].mxu0 %vm6593_vm0, %v2213_v61 }
 0x407   : > { %v3769_v52 = vcombine.low %v3752_v21, %v3760_v22  ;;  %v1656_v18 = vrot.slane %v1642_v29, %v15122_v47  ;;  %v12546_v16 = vcombine.high %v1583_v4, %v1590_v46  ;;  %v2437_v58 = vshrl.u32 %v15775_v42, 16  ;;  %13195 = vmatprep.mubr.msk.bf16.mxu1 %vm14520_vm1, %v18497_v33  ;;  %13205 = vmatprep.subr.bf16.mxu1 %v18497_v33 }
 0x408   : > { %v3148_v31 = vcombine.high %v2435_v36, %v15108_v8  ;;  %v3761_v13 = vcombine.low %v3736_v5, %v3744_v27  ;;  %v3802_v21 = vrot.slane %v3795_v7, %v15112_v1  ;;  %v3810_v22 = vrot.slane %v12563_v43, %v15112_v1  ;;  %13213 = vmatprep.mubr.msk.bf16.mxu0 %vm14520_vm1, %v18497_v33 }
 0x409   : > { %v3811_v44 = vcombine.low %v3786_v20, %v3794_v35  ;;  %v15839_v48 = vrot.slane %v1993_v39, %v15112_v1  ;;  %v15842_v14 = vrot.slane %v12544_v50, %v15112_v1  ;;  %v15845_v29 = vrot.slane %v2018_v57, %v15112_v1 }
 0x40a   : > { %v3155_v4 = vrot.slane %v2435_v36, %v15112_v1  ;;  %v15851_v42 = vrot.slane %v12545_v49, %v15112_v1  ;;  %v2438_v46 = vshrl.u32 %v15777_v62, 16  ;;  %v3776_v5 = vrot.slane %v3769_v52, %v15122_v47 }
 0x40b   : > { %v3819_v39 = vcombine.low %v3802_v21, %v3810_v22  ;;  %v15856_v27 = vrot.slane %v2043_v9, %v15112_v1  ;;  %v15859_v50 = vrot.slane %v12546_v16, %v15112_v1  ;;  %v2068_v57 = vcombine.low %v15785_v41, %v1656_v18  ;;  %v2342_v22 = vpop.permute.xlu1 %2341 }
 0x40c   : > { %v2443_v36 = vpack.i.b16 %v2310_v25, %v15166_v63  ;;  %v3162_v61 = vrot.slane %v3148_v31, %v15112_v1  ;;  %v3768_v49 = vrot.slane %v3761_v13, %v15122_v47  ;;  %v3818_v62 = vrot.slane %v3811_v44, %v15122_v47 }
 0x40d   : > { %18519 = vst [vmem:[#allocation47_spill] sm:$0xff] %v15856_v27  ;;  %18520 = vst [vmem:[#allocation48_spill] sm:$0xff] %v15859_v50  ;;  %v3826_v20 = vrot.slane %v3819_v39, %v15122_v47  ;;  %v15869_v32 = vrot.slane %v15746_v37, %v15112_v1  ;;  %v12547_v35 = vcombine.high %v15785_v41, %v1656_v18  ;;  %v2446_v18 = vshrl.u32 %v2310_v25, 16  ;;  %v15912_v50 = vpop.permute.xlu0 %1177 }
 0x40e   : > { %v3163_v9 = vcombine.low %v15767_v38, %v3155_v4  ;;  %v3164_v52 = vcombine.high %v15767_v38, %v3155_v4  ;;  %v18521_v7 = vcombine.high %v15746_v37, %v15108_v8  ;;  %v2439_v16 = vpack.i.b16 %v2438_v46, %v2437_v58 }
 0x40f   : > { %v15880_v31 = vcombine.low %v3768_v49, %v3776_v5  ;;  %v15882_v13 = vcombine.low %v3818_v62, %v3826_v20  ;;  %v3265_v38 = vcombine.high %v2443_v36, %v15108_v8  ;;  %v15892_v44 = vrot.slane %v2068_v57, %v15112_v1 }
 0x410   : > { %v15878_v43 = vrot.slane %v18521_v7, %v15112_v1  ;;  %v3179_v58 = vcombine.low %v15770_v45, %v3162_v61  ;;  %v15898_v46 = vrot.slane %v12547_v35, %v15112_v1  ;;  %v15901_v39 = vrot.slane %v3163_v9, %v15122_v47 }
 0x411   : > { %18522 = vst [vmem:[#allocation49_spill] sm:$0xff] %v15892_v44  ;;  %v4355_v4 = vpack.i.b16 %v15882_v13, %v15880_v31  ;;  %v15904_v25 = vrot.slane %v3164_v52, %v15122_v47  ;;  %v3180_v7 = vcombine.high %v15770_v45, %v3162_v61  ;;  %v3214_v37 = vcombine.high %v2439_v16, %v15108_v8 }
 0x412   : > { %v15909_v57 = vrot.slane %v2443_v36, %v15112_v1  ;;  %v2451_v41 = vpack.i.b16 %v2342_v22, %v2326_v59  ;;  %v3221_v35 = vrot.slane %v2439_v16, %v15112_v1  ;;  %v18523_v9 = vshrl.u32 %v15166_v63, 16 }
 0x413   : > { %v6966_v21 = vsel %vm6593_vm0, %v4355_v4, 0  ;;  %v15918_v52 = vrot.slane %v3265_v38, %v15112_v1  ;;  %v2453_v44 = vshrl.u32 %v2326_v59, 16  ;;  %v15921_v45 = vrot.slane %v3179_v58, %v15122_v47 }
 0x414   : > { %v2447_v27 = vpack.i.b16 %v2446_v18, %v18523_v9  ;;  %13212 = vmatpush3.bf16.xpose.msra.mxu0 %v6966_v21  ;;  %v2454_v36 = vshrl.u32 %v2342_v22, 16  ;;  %v2208_v61 = vshrl.u32 %v15335_v11, 16  ;;  %v2209_v4 = vshrl.u32 %v15341_v12, 16 }
 0x415   : > { %13223 = vmatprep.subr.bf16.mxu0 %v18497_v33  ;;  %v15927_v16 = vrot.slane %v3180_v7, %v15122_v47  ;;  %v4350_v18 = vshrl.u32 %v15685_v19, 16  ;;  %v4351_v59 = vshrl.u32 %v15687_v56, 16  ;;  %v3228_v21 = vrot.slane %v3214_v37, %v15112_v1 }
 0x416   : > { %v3287_v38 = vrot.slane %v2451_v41, %v15112_v1  ;;  %v2210_v22 = vpack.i.b16 %v2209_v4, %v2208_v61  ;;  %v18524_v11 = vcombine.low %v15484_v23, %v15491_v40  ;;  %v18525_v7 = vcombine.low %v15511_v0, %v15514_v2  ;;  %v1186_v40 = vpop.permute.xlu1 %1185 }
 0x417   : > { %v4352_v58 = vpack.i.b16 %v4351_v59, %v4350_v18  ;;  %v15947_v19 = vcombine.high %v3768_v49, %v3776_v5  ;;  %v15949_v56 = vcombine.high %v3818_v62, %v3826_v20  ;;  %v3229_v37 = vcombine.low %v15869_v32, %v3221_v35  ;;  %v1194_v18 = vpop.permute.xlu0 %1193 }
 0x418   : > { %v15939_v12 = vrot.slane %v18524_v11, %v15122_v47  ;;  %v15945_v9 = vrot.slane %v18525_v7, %v15122_v47  ;;  %v2455_v4 = vpack.i.b16 %v2454_v36, %v2453_v44  ;;  %v3280_v23 = vcombine.high %v2451_v41, %v15108_v8  ;;  %13196 = vmatmul.mubr.msk.bf16.vlgmr.msra.gmra.mrb[40].mxu1 %vm6593_vm0, %v2210_v22 }
 0x419   : > { %v3230_v0 = vcombine.high %v15869_v32, %v3221_v35  ;;  %v6920_v2 = vsel %vm6593_vm0, %v4352_v58, 0  ;;  %v4361_v49 = vpack.i.b16 %v15949_v56, %v15947_v19  ;;  %13207 = vmatprep.mubr.msk.bf16.mxu1 %vm14520_vm1, %v18497_v33  ;;  %v3245_v62 = vcombine.low %v15878_v43, %v3228_v21 }
 0x41a   : > { %v2219_v5 = vpack.i.b16 %v15945_v9, %v15939_v12  ;;  %v3331_v41 = vcombine.high %v2447_v27, %v15108_v8  ;;  %v3295_v32 = vcombine.low %v15909_v57, %v3287_v38  ;;  %13206 = vmatpush3.bf16.xpose.msra.mxu1 %v6920_v2  ;;  %v3296_v44 = vcombine.high %v15909_v57, %v3287_v38 }
 0x41b   : > { %v1261_v35 = vshrl.u32 %v1186_v40, 16  ;;  %v1262_v36 = vshrl.u32 %v1194_v18, 16  ;;  %v7058_v59 = vsel %vm6593_vm0, %v4361_v49, 0  ;;  %13217 = vmatprep.subr.bf16.mxu1 %v18497_v33  ;;  %v15974_v22 = vrot.slane %v3229_v37, %v15122_v47 }
 0x41c   : > { %13214 = vmatmul.mubr.msk.bf16.vlgmr.msra.gmra.mrb[24].mxu0 %vm6593_vm0, %v2219_v5  ;;  %v3294_v58 = vrot.slane %v3280_v23, %v15112_v1  ;;  %v3353_v7 = vrot.slane %v2455_v4, %v15112_v1  ;;  %v15981_v57 = vrot.slane %v3230_v0, %v15122_v47  ;;  %v3246_v38 = vcombine.high %v15878_v43, %v3228_v21 }
 0x41d   : > { %13224 = vmatpush3.bf16.xpose.msra.mxu0 %v7058_v59  ;;  %v1254_v2 = vshrl.u32 %v15912_v50, 16  ;;  %v1259_v5 = vpack.i.b16 %v1194_v18, %v1186_v40  ;;  %13225 = vmatprep.mubr.msk.bf16.mxu0 %vm14520_vm1, %v18497_v33  ;;  %v3338_v37 = vrot.slane %v2447_v27, %v15112_v1  ;;  %v15989_v49 = vrot.slane %v3331_v41, %v15112_v1 }
 0x41e   : > { %v3346_v23 = vcombine.high %v2455_v4, %v15108_v8  ;;  %v1251_v59 = vpack.i.b16 %v15912_v50, %v15188_v17  ;;  %13235 = vmatprep.subr.bf16.mxu0 %v18497_v33  ;;  %v15996_v43 = vrot.slane %v3245_v62, %v15122_v47  ;;  %v15999_v21 = vrot.slane %v3295_v32, %v15122_v47 }
 0x41f   : > { %v16002_v40 = vrot.slane %v3296_v44, %v15122_v47  ;;  %v1263_v27 = vpack.i.b16 %v1262_v36, %v1261_v35  ;;  %v3311_v18 = vcombine.low %v15918_v52, %v3294_v58  ;;  %v3312_v0 = vcombine.high %v15918_v52, %v3294_v58 }
 0x420   : > { %v3361_v4 = vcombine.low %v3338_v37, %v3353_v7  ;;  %v16008_v50 = vpack.c.bf16 %v15265_v60, %v15254_v34  ;;  %v16011_v41 = vrot.slane %v3246_v38, %v15122_v47  ;;  %v18527_v32 = vshrl.u32 %v15188_v17, 16 }
 0x421   : > { %v1683_v35 = vrot.slane %v1259_v5, %v15112_v1  ;;  %v3360_v36 = vrot.slane %v3346_v23, %v15112_v1  ;;  %v1661_v52 = vcombine.high %v1251_v59, %v15108_v8  ;;  %v1676_v58 = vcombine.high %v1259_v5, %v15108_v8 }
 0x422   : > { %18526 = vst [vmem:[#allocation50_spill] sm:$0xff] %v16008_v50  ;;  %v1255_v44 = vpack.i.b16 %v1254_v2, %v18527_v32  ;;  %v16023_v34 = vpack.c.bf16 %v15269_v6, %v15261_v55  ;;  %v3362_v38 = vcombine.high %v3338_v37, %v3353_v7  ;;  %v1668_v61 = vrot.slane %v1251_v59, %v15112_v1 }
 0x423   : > { %v1749_v17 = vrot.slane %v1263_v27, %v15112_v1  ;;  %v16030_v2 = vrot.slane %v3311_v18, %v15122_v47  ;;  %v16033_v23 = vrot.slane %v3312_v0, %v15122_v47  ;;  %v16036_v5 = vrot.slane %v3361_v4, %v15122_v47 }
 0x424   : > { %18528 = vst [vmem:[#allocation51_spill] sm:$0xff] %v16023_v34  ;;  %4457 = vrot.lane.b32.xlu1 %v16023_v34, %s14513_s18  ;;  %v1734_v6 = vrot.slane %v1255_v44, %v15112_v1  ;;  %v1691_v7 = vcombine.low %v1668_v61, %v1683_v35  ;;  %v2214_v37 = vshrl.u32 %v15791_v28, 16  ;;  %v2215_v59 = vshrl.u32 %v15795_v3, 16  ;;  %4441 = vrot.lane.b32.xlu0 %v16023_v34, %s14514_s20 }
 0x425   : > { %v3377_v18 = vcombine.low %v15989_v49, %v3360_v36  ;;  %v16049_v0 = vrot.slane %v1661_v52, %v15112_v1  ;;  %v16052_v4 = vrot.slane %v1676_v58, %v15112_v1  ;;  %v1692_v32 = vcombine.high %v1668_v61, %v1683_v35 }
 0x426   : > { %v1742_v55 = vcombine.high %v1263_v27, %v15108_v8  ;;  %v1757_v63 = vcombine.low %v1734_v6, %v1749_v17  ;;  %v2216_v60 = vpack.i.b16 %v2215_v59, %v2214_v37  ;;  %v4357_v28 = vshrl.u32 %v15882_v13, 16 }
 0x427   : > { %18529 = vst [vmem:[#allocation52_spill] sm:$0xff] %v16049_v0  ;;  %18530 = vst [vmem:[#allocation53_spill] sm:$0xff] %v16052_v4  ;;  %v1758_v62 = vcombine.high %v1734_v6, %v1749_v17  ;;  %v4356_v3 = vshrl.u32 %v15880_v31, 16  ;;  %v16059_v11 = vcombine.high %v15939_v12, %v18505_v51  ;;  %v16063_v52 = vcombine.high %v15945_v9, %v18505_v51 }
 0x428   : > { %4473 = vrot.lane.b32.xlu1 %v16023_v34, %s14515_s19  ;;  %v16068_v61 = vrot.slane %v3362_v38, %v15122_v47  ;;  %v3378_v27 = vcombine.high %v15989_v49, %v3360_v36  ;;  %v1727_v13 = vcombine.high %v1255_v44, %v15108_v8  ;;  %v1699_v31 = vrot.slane %v1691_v7, %v15122_v47  ;;  %v18538_v36 = vld [vmem:[#allocation40_spill] sm:$0xff]  ;;  %v18539_v44 = vld [vmem:[#allocation41_spill] sm:$0xff] }
 0x429   : > { %13208 = vmatmul.mubr.msk.bf16.vlgmr.msra.gmra.mrb[44].mxu1 %vm6593_vm0, %v2216_v60  ;;  %v1706_v35 = vrot.slane %v1692_v32, %v15122_v47  ;;  %v1707_v58 = vcombine.low %v16049_v0, %v16052_v4  ;;  %v4358_v17 = vpack.i.b16 %v4357_v28, %v4356_v3  ;;  %v2225_v6 = vpack.i.b16 %v16063_v52, %v16059_v11 }
 0x42a   : > { %13219 = vmatprep.mubr.msk.bf16.mxu1 %vm14520_vm1, %v18497_v33  ;;  %v16088_v60 = vrot.slane %v1742_v55, %v15112_v1  ;;  %4459 = vrot.lane.b32.xlu0 %v16008_v50, %s14513_s18  ;;  %v16093_v38 = vrot.slane %v3377_v18, %v15122_v47  ;;  %v1765_v7 = vrot.slane %v1757_v63, %v15122_v47 }
 0x42b   : > { %v1772_v37 = vrot.slane %v1758_v62, %v15122_v47  ;;  %v7012_v59 = vsel %vm6593_vm0, %v4358_v17, 0  ;;  %13226 = vmatmul.mubr.msk.bf16.vlgmr.msra.gmra.mrb[28].mxu0 %vm6593_vm0, %v2225_v6  ;;  %v16102_v55 = vrot.slane %v3378_v27, %v15122_v47  ;;  %v16109_v63 = vrot.slane %v1727_v13, %v15112_v1  ;;  %v2312_v27 = vpop.permute.xlu1 %2311  ;;  %v18534_v13 = vld [vmem:[#allocation38_spill] sm:$0xff] }
 0x42c   : > { %18531 = vst [vmem:[#allocation54_spill] sm:$0xff] %v16088_v60  ;;  %4443 = vrot.lane.b32.xlu1 %v16008_v50, %s14514_s20  ;;  %13218 = vmatpush3.bf16.xpose.msra.mxu1 %v7012_v59  ;;  %v16114_v28 = vrot.slane %v1707_v58, %v15122_v47  ;;  %v2093_v3 = vcombine.low %v1699_v31, %v1706_v35  ;;  %v18535_v59 = vld [vmem:[#allocation39_spill] sm:$0xff] }
 0x42d   : > { %18532 = vst [vmem:[#allocation55_spill] sm:$0xff] %v16109_v63  ;;  %v12548_v17 = vcombine.high %v1699_v31, %v1706_v35  ;;  %13229 = vmatprep.subr.bf16.mxu1 %v18497_v33  ;;  %v1773_v6 = vcombine.low %v16109_v63, %v16088_v60  ;;  %v18536_v18 = vcombine.low %v18534_v13, %v18535_v59 }
 0x42e   : > { %18533 = vst [vmem:[#allocation56_spill] sm:$0xff] %v16114_v28  ;;  %v18537_v58 = vcombine.high %v18534_v13, %v18535_v59  ;;  %13237 = vmatprep.mubr.msk.bf16.mxu0 %vm14520_vm1, %v18497_v33  ;;  %v2118_v31 = vcombine.low %v1765_v7, %v1772_v37  ;;  %v12549_v35 = vcombine.high %v1765_v7, %v1772_v37 }
 0x42f   : > { %v3836_v32 = vrot.slane %v18536_v18, %v15112_v1  ;;  %v18540_v20 = vcombine.low %v18538_v36, %v18539_v44  ;;  %v18541_v34 = vcombine.high %v18538_v36, %v18539_v44  ;;  %v18542_v59 = vcombine.low %v15628_v15, %v15637_v30  ;;  %v16157_v0 = vpop.permute.xlu1 %2343 }
 0x430   : > { %v3844_v62 = vrot.slane %v18537_v58, %v15112_v1  ;;  %4475 = vrot.lane.b32.xlu1 %v16008_v50, %s14515_s19  ;;  %v18543_v7 = vcombine.high %v15628_v15, %v15637_v30  ;;  %v2220_v44 = vshrl.u32 %v15939_v12, 16  ;;  %v2221_v36 = vshrl.u32 %v15945_v9, 16  ;;  %v18545_v12 = vld [vmem:[#allocation25_spill] sm:$0xff] }
 0x431   : > { %v3852_v49 = vrot.slane %v18540_v20, %v15112_v1  ;;  %v3860_v18 = vrot.slane %v18541_v34, %v15112_v1  ;;  %v3886_v58 = vrot.slane %v18542_v59, %v15112_v1  ;;  %v18544_v20 = vld [vmem:[#allocation42_spill] sm:$0xff]  ;;  %v4362_v50 = vshrl.u32 %v15947_v19, 16 }
 0x432   : > { %v3861_v13 = vcombine.low %v3836_v32, %v3844_v62  ;;  %v3894_v37 = vrot.slane %v18543_v7, %v15112_v1  ;;  %v3895_v28 = vcombine.low %v18544_v20, %v15669_v54  ;;  %v12567_v34 = vcombine.high %v18544_v20, %v15669_v54  ;;  %v18547_v7 = vld [vmem:[#allocation28_spill] sm:$0xff] }
 0x433   : > { %v3869_v4 = vcombine.low %v3852_v49, %v3860_v18  ;;  %v2462_v32 = vshrl.u32 %v2312_v27, 16  ;;  %v2222_v49 = vpack.i.b16 %v2221_v36, %v2220_v44  ;;  %v4363_v18 = vshrl.u32 %v15949_v56, 16 }
 0x434   : > { %v3902_v62 = vrot.slane %v3895_v28, %v15112_v1  ;;  %v3911_v59 = vcombine.low %v3886_v58, %v3894_v37  ;;  %v3910_v30 = vrot.slane %v12567_v34, %v15112_v1  ;;  %v16163_v54 = vrot.slane %v2093_v3, %v15112_v1  ;;  %v18546_v58 = vld [vmem:[#allocation26_spill] sm:$0xff] }
 0x435   : > { %v3876_v15 = vrot.slane %v3869_v4, %v15122_v47  ;;  %v16166_v9 = vpack.i.b16 %v2312_v27, %v18545_v12  ;;  %v3868_v28 = vrot.slane %v3861_v13, %v15122_v47  ;;  %v16171_v19 = vpack.c.bf16 %v18547_v7, %v18546_v58  ;;  %13220 = vmatmul.mubr.msk.bf16.vlgmr.msra.gmra.mrb[48].mxu1 %vm6593_vm0, %v2222_v49 }
 0x436   : > { %v16174_v37 = vrot.slane %v1773_v6, %v15122_v47  ;;  %v16177_v4 = vrot.slane %v12548_v17, %v15112_v1  ;;  %v3919_v20 = vcombine.low %v3902_v62, %v3910_v30  ;;  %v4364_v56 = vpack.i.b16 %v4363_v18, %v4362_v50  ;;  %13231 = vmatprep.mubr.msk.bf16.mxu1 %vm14520_vm1, %v18497_v33  ;;  %v18551_v62 = vld [vmem:[#allocation36_spill] sm:$0xff] }
 0x437   : > { %18548 = vst [vmem:[#allocation38_spill] sm:$0xff] %v16171_v19  ;;  %v16181_v3 = vrot.slane %v2118_v31, %v15112_v1  ;;  %v16184_v27 = vrot.slane %v12549_v35, %v15112_v1  ;;  %v3877_v34 = vcombine.low %v3868_v28, %v3876_v15  ;;  %4435 = vrot.lane.b32.xlu1 %v16171_v19, %s14514_s20  ;;  %v18550_v17 = vshrl.u32 %v18545_v12, 16 }
 0x438   : > { %18549 = vst [vmem:[#allocation39_spill] sm:$0xff] %v16174_v37  ;;  %v3918_v50 = vrot.slane %v3911_v59, %v15122_v47  ;;  %v3926_v31 = vrot.slane %v3919_v20, %v15122_v47  ;;  %v7104_v35 = vsel %vm6593_vm0, %v4364_v56, 0  ;;  %4451 = vrot.lane.b32.xlu0 %v16171_v19, %s14513_s18  ;;  %v3397_v44 = vcombine.high %v16166_v9, %v15108_v8 }
 0x439   : > { %v16193_v6 = vpack.i.b16 %v2462_v32, %v18550_v17  ;;  %v16204_v36 = vrot.slane %v16166_v9, %v15112_v1  ;;  %13230 = vmatpush3.bf16.xpose.msra.mxu1 %v7104_v35  ;;  %v18552_v32 = vld [vmem:[#allocation35_spill] sm:$0xff]  ;;  %v16208_v49 = vcombine.high %v3868_v28, %v3876_v15  ;;  %v2227_v18 = vshrl.u32 %v16063_v52, 16 }
 0x43a   : > { %v1984_v30 = vcombine.low %v18552_v32, %v18551_v62  ;;  %v3927_v59 = vcombine.low %v3918_v50, %v3926_v31  ;;  %13241 = vmatprep.subr.bf16.mxu1 %v18497_v33  ;;  %v18553_v12 = vcombine.low %v15708_v26, %v15711_v53  ;;  %v18554_v9 = vcombine.high %v15708_v26, %v15711_v53  ;;  %v18557_v26 = vld [vmem:[#allocation43_spill] sm:$0xff]  ;;  %v18558_v53 = vld [vmem:[#allocation44_spill] sm:$0xff] }
 0x43b   : > { %v2226_v20 = vshrl.u32 %v16059_v11, 16  ;;  %v4368_v56 = vshrl.u32 %v3877_v34, 16  ;;  %v18555_v15 = vcombine.low %v15714_v24, %v15723_v10  ;;  %v18556_v52 = vcombine.high %v15714_v24, %v15723_v10  ;;  %4467 = vrot.lane.b32.xlu1 %v16171_v19, %s14515_s19  ;;  %v18561_v10 = vld [vmem:[#allocation46_spill] sm:$0xff] }
 0x43c   : > { %v3952_v58 = vrot.slane %v18553_v12, %v15112_v1  ;;  %v3960_v7 = vrot.slane %v18554_v9, %v15112_v1  ;;  %v4367_v35 = vpack.i.b16 %v3927_v59, %v3877_v34  ;;  %v4369_v62 = vshrl.u32 %v3927_v59, 16 }
 0x43d   : > { %v3986_v28 = vrot.slane %v18555_v15, %v15112_v1  ;;  %v3994_v17 = vrot.slane %v18556_v52, %v15112_v1  ;;  %v18559_v11 = vcombine.low %v18557_v26, %v18558_v53  ;;  %v18560_v12 = vcombine.high %v18557_v26, %v18558_v53  ;;  %v2328_v15 = vpop.permute.xlu0 %2327  ;;  %v18562_v52 = vld [vmem:[#allocation45_spill] sm:$0xff] }
 0x43e   : > { %v1991_v13 = vrot.slane %v1984_v30, %v15122_v47  ;;  %v3928_v24 = vcombine.high %v3918_v50, %v3926_v31  ;;  %v3995_v37 = vcombine.low %v18562_v52, %v18561_v10  ;;  %v12571_v34 = vcombine.high %v18562_v52, %v18561_v10  ;;  %v18564_v30 = vld [vmem:[#allocation29_spill] sm:$0xff]  ;;  %v18565_v10 = vld [vmem:[#allocation31_spill] sm:$0xff]  ;;  %v18566_v52 = vld [vmem:[#allocation32_spill] sm:$0xff] }
 0x43f   : > { %v3936_v32 = vrot.slane %v18559_v11, %v15112_v1  ;;  %v3944_v9 = vrot.slane %v18560_v12, %v15112_v1  ;;  %v7150_v59 = vsel %vm6593_vm0, %v4367_v35, 0  ;;  %v2228_v19 = vpack.i.b16 %v2227_v18, %v2226_v20  ;;  %v18563_v12 = vld [vmem:[#allocation27_spill] sm:$0xff] }
 0x440   : > { %v4370_v60 = vpack.i.b16 %v4369_v62, %v4368_v56  ;;  %v3969_v11 = vcombine.low %v3952_v58, %v3960_v7  ;;  %13236 = vmatpush3.bf16.xpose.msra.mxu0 %v7150_v59  ;;  %v4002_v63 = vrot.slane %v3995_v37, %v15112_v1  ;;  %v4010_v26 = vrot.slane %v12571_v34, %v15112_v1  ;;  %v18569_v34 = vld [vmem:[#allocation34_spill] sm:$0xff] }
 0x441   : > { %v4011_v53 = vcombine.low %v3986_v28, %v3994_v17  ;;  %v16249_v50 = vpack.c.bf16 %v18564_v30, %v18563_v12  ;;  %v16252_v31 = vpack.i.b16 %v16157_v0, %v2328_v15  ;;  %v18567_v35 = vcombine.low %v18565_v10, %v18566_v52  ;;  %13247 = vmatprep.subr.bf16.mxu0 %v18497_v33 }
 0x442   : > { %13232 = vmatmul.mubr.msk.bf16.vlgmr.msra.gmra.mrb[52].mxu1 %vm6593_vm0, %v2228_v19  ;;  %v7196_v37 = vsel %vm6593_vm0, %v4370_v60, 0  ;;  %v3961_v58 = vcombine.low %v3936_v32, %v3944_v9  ;;  %v3463_v7 = vcombine.high %v16193_v6, %v15108_v8  ;;  %v2469_v20 = vshrl.u32 %v2328_v15, 16  ;;  %v18568_v15 = vld [vmem:[#allocation30_spill] sm:$0xff] }
 0x443   : > { %v1966_v18 = vrot.slane %v18567_v35, %v15122_v47  ;;  %13242 = vmatpush3.bf16.xpose.msra.mxu1 %v7196_v37  ;;  %v4019_v56 = vcombine.low %v4002_v63, %v4010_v26  ;;  %4449 = vrot.lane.b32.xlu1 %v16249_v50, %s14513_s18  ;;  %v4375_v28 = vshrl.u32 %v3928_v24, 16  ;;  %v4373_v17 = vpack.i.b16 %v3928_v24, %v16208_v49 }
 0x444   : > { %v3976_v62 = vrot.slane %v3969_v11, %v15122_v47  ;;  %13243 = vmatprep.mubr.msk.bf16.mxu1 %vm14520_vm1, %v18497_v33  ;;  %13253 = vmatprep.subr.bf16.mxu1 %v18497_v33  ;;  %v2233_v60 = vshrl.u32 %v1991_v13, 16  ;;  %v4374_v19 = vshrl.u32 %v16208_v49, 16  ;;  %v4018_v9 = vrot.slane %v4011_v53, %v15122_v47 }
 0x445   : > { %v2231_v32 = vpack.i.b16 %v1991_v13, %v1966_v18  ;;  %v4026_v63 = vrot.slane %v4019_v56, %v15122_v47  ;;  %v16275_v59 = vpack.c.bf16 %v18569_v34, %v18568_v15  ;;  %4433 = vrot.lane.b32.xlu0 %v16249_v50, %s14514_s20  ;;  %v1992_v24 = vcombine.high %v1991_v13, %v18505_v51 }
 0x446   : > { %v3968_v11 = vrot.slane %v3961_v58, %v15122_v47  ;;  %v2232_v26 = vshrl.u32 %v1966_v18, 16  ;;  %v4376_v12 = vpack.i.b16 %v4375_v28, %v4374_v19  ;;  %v16282_v49 = vrot.slane %v3397_v44, %v15112_v1 }
 0x447   : > { %v16286_v53 = vrot.slane %v16193_v6, %v15112_v1  ;;  %v3412_v30 = vcombine.high %v16252_v31, %v15108_v8  ;;  %v4027_v10 = vcombine.low %v4018_v9, %v4026_v63  ;;  %4465 = vrot.lane.b32.xlu1 %v16249_v50, %s14515_s19  ;;  %13238 = vmatmul.mubr.msk.bf16.vlgmr.msra.gmra.mrb[32].mxu0 %vm6593_vm0, %v2231_v32  ;;  %v7242_v13 = vsel %vm6593_vm0, %v4373_v17, 0 }
 0x448   : > { %v1967_v52 = vcombine.high %v1966_v18, %v18505_v51  ;;  %v3977_v35 = vcombine.low %v3968_v11, %v3976_v62  ;;  %v2234_v44 = vpack.i.b16 %v2233_v60, %v2232_v26  ;;  %v16296_v37 = vrot.slane %v3463_v7, %v15112_v1  ;;  %13248 = vmatpush3.bf16.xpose.msra.mxu0 %v7242_v13 }
 0x449   : > { %v18570_v6 = vshrl.u32 %v16157_v0, 16  ;;  %v16304_v56 = vrot.slane %v16252_v31, %v15112_v1  ;;  %13249 = vmatprep.mubr.msk.bf16.mxu0 %vm14520_vm1, %v18497_v33  ;;  %13259 = vmatprep.subr.bf16.mxu0 %v18497_v33  ;;  %v7288_v18 = vsel %vm6593_vm0, %v4376_v12, 0  ;;  %v4381_v7 = vshrl.u32 %v4027_v10, 16 }
 0x44a   : > { %v2237_v28 = vpack.i.b16 %v1992_v24, %v1967_v52  ;;  %13244 = vmatmul.mubr.msk.bf16.vlgmr.msra.gmra.mrb[56].mxu1 %vm6593_vm0, %v2234_v44  ;;  %v18571_v0 = vcombine.low %v15921_v45, %v15927_v16  ;;  %v4379_v17 = vpack.i.b16 %v4027_v10, %v3977_v35  ;;  %v2239_v31 = vshrl.u32 %v1992_v24, 16  ;;  %4455 = vrot.lane.b32.xlu0 %v16275_v59, %s14513_s18 }
 0x44b   : > { %v16300_v58 = vpack.i.b16 %v18570_v6, %v2469_v20  ;;  %13254 = vmatpush3.bf16.xpose.msra.mxu1 %v7288_v18  ;;  %4439 = vrot.lane.b32.xlu1 %v16275_v59, %s14514_s20  ;;  %v18572_v60 = vcombine.high %v15921_v45, %v15927_v16  ;;  %v18573_v32 = vcombine.low %v15974_v22, %v15981_v57  ;;  %v4380_v34 = vshrl.u32 %v3977_v35, 16  ;;  %v18576_v6 = vld [vmem:[#allocation33_spill] sm:$0xff] }
 0x44c   : > { %v4052_v20 = vrot.slane %v18571_v0, %v15112_v1  ;;  %13255 = vmatprep.mubr.msk.bf16.mxu1 %vm14520_vm1, %v18497_v33  ;;  %13265 = vmatprep.subr.bf16.mxu1 %v18497_v33  ;;  %v18574_v24 = vcombine.high %v15974_v22, %v15981_v57  ;;  %v4095_v45 = vcombine.low %v15996_v43, %v16011_v41  ;;  %v2238_v10 = vshrl.u32 %v1967_v52, 16  ;;  %v18577_v35 = vld [vmem:[#allocation37_spill] sm:$0xff] }
 0x44d   : > { %v4060_v19 = vrot.slane %v18572_v60, %v15112_v1  ;;  %v4086_v15 = vrot.slane %v18573_v32, %v15112_v1  ;;  %v12575_v16 = vcombine.high %v15996_v43, %v16011_v41  ;;  %v4028_v12 = vcombine.high %v4018_v9, %v4026_v63 }
 0x44e   : > { %v4094_v26 = vrot.slane %v18574_v24, %v15112_v1  ;;  %v18575_v13 = vcombine.low %v15901_v39, %v15904_v25  ;;  %v16342_v18 = vpack.c.bf16 %v18577_v35, %v18576_v6  ;;  %v4382_v22 = vpack.i.b16 %v4381_v7, %v4380_v34 }
 0x44f   : > { %v18578_v57 = vcombine.high %v15901_v39, %v15904_v25  ;;  %v4102_v41 = vrot.slane %v4095_v45, %v15112_v1  ;;  %v4110_v9 = vrot.slane %v12575_v16, %v15112_v1  ;;  %v16353_v63 = vrot.slane %v3412_v30, %v15112_v1  ;;  %4471 = vrot.lane.b32.xlu1 %v16275_v59, %s14515_s19 }
 0x450   : > { %v4036_v44 = vrot.slane %v18575_v13, %v15112_v1  ;;  %v18579_v52 = vcombine.low %v15845_v29, %v15851_v42  ;;  %v3978_v60 = vcombine.high %v3968_v11, %v3976_v62  ;;  %v2240_v32 = vpack.i.b16 %v2239_v31, %v2238_v10  ;;  %13250 = vmatmul.mubr.msk.bf16.vlgmr.msra.gmra.mrb[36].mxu0 %vm6593_vm0, %v2237_v28 }
 0x451   : > { %v4044_v43 = vrot.slane %v18578_v57, %v15112_v1  ;;  %v7334_v39 = vsel %vm6593_vm0, %v4379_v17, 0  ;;  %v4069_v25 = vcombine.low %v4052_v20, %v4060_v19  ;;  %v4111_v7 = vcombine.low %v4086_v15, %v4094_v26  ;;  %13261 = vmatprep.mubr.msk.bf16.mxu0 %vm14520_vm1, %v18497_v33  ;;  %4437 = vrot.lane.b32.xlu0 %v16342_v18, %s14514_s20 }
 0x452   : > { %v2041_v0 = vrot.slane %v18579_v52, %v15122_v47  ;;  %v4119_v34 = vcombine.low %v4102_v41, %v4110_v9  ;;  %v3427_v30 = vcombine.low %v16204_v36, %v16304_v56  ;;  %v3478_v24 = vcombine.high %v16300_v58, %v15108_v8  ;;  %13260 = vmatpush3.bf16.xpose.msra.mxu0 %v7334_v39 }
 0x453   : > { %v18580_v29 = vcombine.low %v15839_v48, %v15842_v14  ;;  %13271 = vmatprep.subr.bf16.mxu0 %v18497_v33  ;;  %13256 = vmatmul.mubr.msk.bf16.vlgmr.msra.gmra.mrb[60].mxu1 %vm6593_vm0, %v2240_v32  ;;  %v7380_v62 = vsel %vm6593_vm0, %v4382_v22, 0  ;;  %v4061_v11 = vcombine.low %v4036_v44, %v4044_v43  ;;  %v4387_v20 = vshrl.u32 %v4028_v12, 16 }
 0x454   : > { %v4126_v28 = vrot.slane %v4119_v34, %v15122_v47  ;;  %v3428_v17 = vcombine.high %v16204_v36, %v16304_v56  ;;  %v16381_v31 = vrot.slane %v16300_v58, %v15112_v1  ;;  %v4385_v19 = vpack.i.b16 %v4028_v12, %v3978_v60  ;;  %13266 = vmatpush3.bf16.xpose.msra.mxu1 %v7380_v62 }
 0x455   : > { %v2016_v42 = vrot.slane %v18580_v29, %v15122_v47  ;;  %4453 = vrot.lane.b32.xlu1 %v16342_v18, %s14513_s18  ;;  %v4076_v48 = vrot.slane %v4069_v25, %v15122_v47  ;;  %v4118_v14 = vrot.slane %v4111_v7, %v15122_v47  ;;  %13267 = vmatprep.mubr.msk.bf16.mxu1 %vm14520_vm1, %v18497_v33  ;;  %v2245_v15 = vshrl.u32 %v2041_v0, 16  ;;  %v18581_v25 = vld [vmem:[#allocation49_spill] sm:$0xff] }
 0x456   : > { %13277 = vmatprep.subr.bf16.mxu1 %v18497_v33  ;;  %v4386_v26 = vshrl.u32 %v3978_v60, 16  ;;  %v3443_v58 = vcombine.low %v16282_v49, %v16353_v63  ;;  %v3444_v45 = vcombine.high %v16282_v49, %v16353_v63  ;;  %v3492_v16 = vrot.slane %v3478_v24, %v15112_v1 }
 0x457   : > { %v2243_v12 = vpack.i.b16 %v2041_v0, %v2016_v42  ;;  %v4068_v10 = vrot.slane %v4061_v11, %v15122_v47  ;;  %v4127_v13 = vcombine.low %v4118_v14, %v4126_v28  ;;  %v2244_v44 = vshrl.u32 %v2016_v42, 16 }
 0x458   : > { %v4388_v6 = vpack.i.b16 %v4387_v20, %v4386_v26  ;;  %v16399_v35 = vrot.slane %v3427_v30, %v15122_v47  ;;  %v3493_v22 = vcombine.low %v16286_v53, %v16381_v31  ;;  %v2042_v57 = vcombine.high %v2041_v0, %v18505_v51 }
 0x459   : > { %4469 = vrot.lane.b32.xlu1 %v16342_v18, %s14515_s19  ;;  %v4195_v49 = vcombine.low %v16093_v38, %v16102_v55  ;;  %13262 = vmatmul.mubr.msk.bf16.vlgmr.msra.gmra.mrb[40].mxu0 %vm6593_vm0, %v2243_v12  ;;  %v7426_v43 = vsel %vm6593_vm0, %v4385_v19, 0  ;;  %v4077_v41 = vcombine.low %v4068_v10, %v4076_v48  ;;  %v2246_v9 = vpack.i.b16 %v2245_v15, %v2244_v44 }
 0x45a   : > { %v12579_v63 = vcombine.high %v16093_v38, %v16102_v55  ;;  %v16413_v52 = vrot.slane %v3443_v58, %v15122_v47  ;;  %v3509_v0 = vcombine.low %v16296_v37, %v3492_v16  ;;  %13272 = vmatpush3.bf16.xpose.msra.mxu0 %v7426_v43  ;;  %13273 = vmatprep.mubr.msk.bf16.mxu0 %vm14520_vm1, %v18497_v33  ;;  %v7472_v32 = vsel %vm6593_vm0, %v4388_v6, 0 }
 0x45b   : > { %v2017_v60 = vcombine.high %v2016_v42, %v18505_v51  ;;  %13283 = vmatprep.subr.bf16.mxu0 %v18497_v33  ;;  %13268 = vmatmul.mubr.msk.bf16.vlgmr.msra.gmra.mrb[64].mxu1 %vm6593_vm0, %v2246_v9  ;;  %v4393_v39 = vshrl.u32 %v4127_v13, 16  ;;  %v4202_v38 = vrot.slane %v4195_v49, %v15112_v1  ;;  %v2084_v7 = vcombine.low %v18581_v25, %v15898_v46 }
 0x45c   : > { %v4210_v55 = vrot.slane %v12579_v63, %v15112_v1  ;;  %13278 = vmatpush3.bf16.xpose.msra.mxu1 %v7472_v32  ;;  %13279 = vmatprep.mubr.msk.bf16.mxu1 %vm14520_vm1, %v18497_v33  ;;  %v2251_v34 = vshrl.u32 %v2042_v57, 16  ;;  %v18582_v30 = vcombine.low %v16030_v2, %v16033_v23  ;;  %v18583_v29 = vcombine.high %v16030_v2, %v16033_v23 }
 0x45d   : > { %v4391_v62 = vpack.i.b16 %v4127_v13, %v4077_v41  ;;  %13289 = vmatprep.subr.bf16.mxu1 %v18497_v33  ;;  %v4392_v11 = vshrl.u32 %v4077_v41, 16  ;;  %v18584_v46 = vcombine.low %v16036_v5, %v16068_v61  ;;  %v18585_v19 = vcombine.high %v16036_v5, %v16068_v61 }
 0x45e   : > { %v4152_v24 = vrot.slane %v18582_v30, %v15112_v1  ;;  %v4160_v42 = vrot.slane %v18583_v29, %v15112_v1  ;;  %v3510_v26 = vcombine.high %v16296_v37, %v3492_v16  ;;  %v2249_v58 = vpack.i.b16 %v2042_v57, %v2017_v60 }
 0x45f   : > { %v4186_v20 = vrot.slane %v18584_v46, %v15112_v1  ;;  %v4194_v15 = vrot.slane %v18585_v19, %v15112_v1  ;;  %v18586_v2 = vcombine.low %v15999_v21, %v16002_v40  ;;  %v18587_v12 = vcombine.high %v15999_v21, %v16002_v40  ;;  %v13161_v46 = vpop.f32.mrb[20].mxu1 }
 0x460   : > { %v4128_v44 = vcombine.high %v4118_v14, %v4126_v28  ;;  %v2250_v6 = vshrl.u32 %v2017_v60, 16  ;;  %v4394_v49 = vpack.i.b16 %v4393_v39, %v4392_v11  ;;  %v4219_v43 = vcombine.low %v4202_v38, %v4210_v55  ;;  %v18588_v14 = vld [vmem:[#allocation47_spill] sm:$0xff]  ;;  %v1144_v36 = vpop.f32.mrb[21].mxu1 }
 0x461   : > { %v4136_v23 = vrot.slane %v18586_v2, %v15112_v1  ;;  %v4144_v13 = vrot.slane %v18587_v12, %v15112_v1  ;;  %v16455_v5 = vrot.slane %v3444_v45, %v15122_v47  ;;  %v3494_v61 = vcombine.high %v16286_v53, %v16381_v31  ;;  %13274 = vmatmul.mubr.msk.bf16.vlgmr.msra.gmra.mrb[44].mxu0 %vm6593_vm0, %v2249_v58  ;;  %v18589_v45 = vld [vmem:[#allocation48_spill] sm:$0xff] }
 0x462   : > { %v4078_v37 = vcombine.high %v4068_v10, %v4076_v48  ;;  %v4169_v16 = vcombine.low %v4152_v24, %v4160_v42  ;;  %v7518_v57 = vsel %vm6593_vm0, %v4391_v62, 0  ;;  %v2091_v41 = vrot.slane %v2084_v7, %v15122_v47  ;;  %13285 = vmatprep.mubr.msk.bf16.mxu0 %vm14520_vm1, %v18497_v33 }
 0x463   : > { %v2252_v21 = vpack.i.b16 %v2251_v34, %v2250_v6  ;;  %v4211_v40 = vcombine.low %v4186_v20, %v4194_v15  ;;  %v3517_v28 = vrot.slane %v3509_v0, %v15122_v47  ;;  %13284 = vmatpush3.bf16.xpose.msra.mxu0 %v7518_v57  ;;  %v18590_v53 = vcombine.low %v18588_v14, %v18589_v45 }
 0x464   : > { %v4161_v48 = vcombine.low %v4136_v23, %v4144_v13  ;;  %v3524_v10 = vrot.slane %v3510_v26, %v15122_v47  ;;  %13295 = vmatprep.subr.bf16.mxu0 %v18497_v33  ;;  %v7564_v9 = vsel %vm6593_vm0, %v4394_v49, 0  ;;  %v4226_v63 = vrot.slane %v4219_v43, %v15122_v47  ;;  %v13162_v23 = vpop.f32.mrb[22].mxu1 }
 0x465   : > { %v2066_v31 = vrot.slane %v18590_v53, %v15122_v47  ;;  %13280 = vmatmul.mubr.msk.bf16.vlgmr.msra.gmra.mrb[68].mxu1 %vm6593_vm0, %v2252_v21  ;;  %v4399_v0 = vshrl.u32 %v4128_v44, 16  ;;  %v3501_v60 = vrot.slane %v3493_v22, %v15122_v47  ;;  %v3508_v32 = vrot.slane %v3494_v61, %v15122_v47 }
 0x466   : > { %13290 = vmatpush3.bf16.xpose.msra.mxu1 %v7564_v9  ;;  %v4176_v39 = vrot.slane %v4169_v16, %v15122_v47  ;;  %13291 = vmatprep.mubr.msk.bf16.mxu1 %vm14520_vm1, %v18497_v33  ;;  %v4397_v38 = vpack.i.b16 %v4128_v44, %v4078_v37  ;;  %v4218_v55 = vrot.slane %v4211_v40, %v15122_v47  ;;  %v2257_v25 = vshrl.u32 %v2091_v41, 16  ;;  %v1147_v44 = vpop.f32.mrb[23].mxu1  ;;  %v18592_v9 = vld [vmem:[#allocation54_spill] sm:$0xff] }
 0x467   : > { %13301 = vmatprep.subr.bf16.mxu1 %v18497_v33  ;;  %v4398_v7 = vshrl.u32 %v4078_v37, 16  ;;  %v3442_v22 = vrot.slane %v3428_v17, %v15122_v47  ;;  %v2255_v34 = vpack.i.b16 %v2091_v41, %v2066_v31  ;;  %v4168_v30 = vrot.slane %v4161_v48, %v15122_v47 }
 0x468   : > { %v2256_v24 = vshrl.u32 %v2066_v31, 16  ;;  %v4227_v29 = vcombine.low %v4218_v55, %v4226_v63  ;;  %v4295_v62 = vcombine.low %v3517_v28, %v3524_v10  ;;  %v12583_v11 = vcombine.high %v3517_v28, %v3524_v10  ;;  %v18591_v10 = vld [vmem:[#allocation55_spill] sm:$0xff] }
 0x469   : > { %v4400_v42 = vpack.i.b16 %v4399_v0, %v4398_v7  ;;  %v4245_v20 = vcombine.low %v16413_v52, %v16455_v5  ;;  %v12581_v19 = vcombine.high %v16413_v52, %v16455_v5  ;;  %v2092_v15 = vcombine.high %v2091_v41, %v18505_v51 }
 0x46a   : > { %v4177_v26 = vcombine.low %v4168_v30, %v4176_v39  ;;  %v4279_v56 = vcombine.low %v3501_v60, %v3508_v32  ;;  %v12582_v17 = vcombine.high %v3501_v60, %v3508_v32  ;;  %13286 = vmatmul.mubr.msk.bf16.vlgmr.msra.gmra.mrb[48].mxu0 %vm6593_vm0, %v2255_v34  ;;  %v7610_v58 = vsel %vm6593_vm0, %v4397_v38, 0 }
 0x46b   : > { %v2258_v2 = vpack.i.b16 %v2257_v25, %v2256_v24  ;;  %v4229_v12 = vcombine.low %v16399_v35, %v3442_v22  ;;  %v12580_v13 = vcombine.high %v16399_v35, %v3442_v22  ;;  %13296 = vmatpush3.bf16.xpose.msra.mxu0 %v7610_v58  ;;  %13297 = vmatprep.mubr.msk.bf16.mxu0 %vm14520_vm1, %v18497_v33  ;;  %v7656_v6 = vsel %vm6593_vm0, %v4400_v42, 0  ;;  %v18595_v22 = vld [vmem:[#allocation53_spill] sm:$0xff]  ;;  %v18598_v58 = vld [vmem:[#allocation56_spill] sm:$0xff] }
 0x46c   : > { %v2067_v52 = vcombine.high %v2066_v31, %v18505_v51  ;;  %13307 = vmatprep.subr.bf16.mxu0 %v18497_v33  ;;  %v4405_v49 = vshrl.u32 %v4227_v29, 16  ;;  %v4302_v43 = vrot.slane %v4295_v62, %v15112_v1  ;;  %v4310_v5 = vrot.slane %v12583_v11, %v15112_v1 }
 0x46d   : > { %13292 = vmatmul.mubr.msk.bf16.vlgmr.msra.gmra.mrb[72].mxu1 %vm6593_vm0, %v2258_v2  ;;  %v2134_v35 = vcombine.low %v16181_v3, %v16184_v27  ;;  %v2263_v61 = vshrl.u32 %v2092_v15, 16  ;;  %v4404_v37 = vshrl.u32 %v4177_v26, 16  ;;  %v4252_v16 = vrot.slane %v4245_v20, %v15112_v1 }
 0x46e   : > { %13302 = vmatpush3.bf16.xpose.msra.mxu1 %v7656_v6  ;;  %13303 = vmatprep.mubr.msk.bf16.mxu1 %vm14520_vm1, %v18497_v33  ;;  %v4403_v57 = vpack.i.b16 %v4227_v29, %v4177_v26  ;;  %v4260_v41 = vrot.slane %v12581_v19, %v15112_v1  ;;  %v4286_v21 = vrot.slane %v4279_v56, %v15112_v1  ;;  %v2262_v28 = vshrl.u32 %v2067_v52, 16 }
 0x46f   : > { %13313 = vmatprep.subr.bf16.mxu1 %v18497_v33  ;;  %v4294_v40 = vrot.slane %v12582_v17, %v15112_v1  ;;  %v2109_v3 = vcombine.low %v16163_v54, %v16177_v4  ;;  %v2261_v27 = vpack.i.b16 %v2092_v15, %v2067_v52  ;;  %v4236_v14 = vrot.slane %v4229_v12, %v15112_v1 }
 0x470   : > { %v4228_v45 = vcombine.high %v4218_v55, %v4226_v63  ;;  %v4406_v53 = vpack.i.b16 %v4405_v49, %v4404_v37  ;;  %v4244_v31 = vrot.slane %v12580_v13, %v15112_v1  ;;  %v4319_v48 = vcombine.low %v4302_v43, %v4310_v5  ;;  %v18594_v55 = vld [vmem:[#allocation52_spill] sm:$0xff] }
 0x471   : > { %v18593_v0 = vcombine.high %v18591_v10, %v18592_v9  ;;  %v2141_v32 = vrot.slane %v2134_v35, %v15122_v47  ;;  %v4178_v38 = vcombine.high %v4168_v30, %v4176_v39  ;;  %v2264_v25 = vpack.i.b16 %v2263_v61, %v2262_v28 }
 0x472   : > { %13298 = vmatmul.mubr.msk.bf16.vlgmr.msra.gmra.mrb[52].mxu0 %vm6593_vm0, %v2261_v27  ;;  %v7702_v54 = vsel %vm6593_vm0, %v4403_v57, 0  ;;  %v4269_v4 = vcombine.low %v4252_v16, %v4260_v41  ;;  %v4311_v7 = vcombine.low %v4286_v21, %v4294_v40  ;;  %v16523_v63 = vpack.c.bf16 %v13162_v23, %v13161_v46  ;;  %v18597_v46 = vld [vmem:[#allocation39_spill] sm:$0xff] }
 0x473   : > { %v1788_v60 = vrot.slane %v18593_v0, %v15122_v47  ;;  %v18596_v34 = vcombine.high %v18594_v55, %v18595_v22  ;;  %13308 = vmatpush3.bf16.xpose.msra.mxu0 %v7702_v54  ;;  %13309 = vmatprep.mubr.msk.bf16.mxu0 %vm14520_vm1, %v18497_v33  ;;  %v2116_v39 = vrot.slane %v2109_v3, %v15122_v47  ;;  %v7748_v29 = vsel %vm6593_vm0, %v4406_v53, 0 }
 0x474   : > { %v16532_v30 = vpack.c.bf16 %v1147_v44, %v1144_v36  ;;  %13319 = vmatprep.subr.bf16.mxu0 %v18497_v33  ;;  %v4261_v42 = vcombine.low %v4236_v14, %v4244_v31  ;;  %v4326_v62 = vrot.slane %v4319_v48, %v15122_v47  ;;  %v4411_v11 = vshrl.u32 %v4228_v45, 16 }
 0x475   : > { %v1722_v24 = vrot.slane %v18596_v34, %v15122_v47  ;;  %13304 = vmatmul.mubr.msk.bf16.vlgmr.msra.gmra.mrb[76].mxu1 %vm6593_vm0, %v2264_v25  ;;  %v2168_v20 = vcombine.low %v18597_v46, %v1788_v60  ;;  %v12551_v19 = vcombine.high %v18597_v46, %v1788_v60  ;;  %v4409_v15 = vpack.i.b16 %v4228_v45, %v4178_v38 }
 0x476   : > { %13314 = vmatpush3.bf16.xpose.msra.mxu1 %v7748_v29  ;;  %13315 = vmatprep.mubr.msk.bf16.mxu1 %vm14520_vm1, %v18497_v33  ;;  %v4276_v26 = vrot.slane %v4269_v4, %v15122_v47  ;;  %v4318_v36 = vrot.slane %v4311_v7, %v15122_v47  ;;  %v2269_v56 = vshrl.u32 %v2141_v32, 16  ;;  %v4410_v17 = vshrl.u32 %v4178_v38, 16 }
 0x477   : > { %13325 = vmatprep.subr.bf16.mxu1 %v18497_v33  ;;  %v2143_v2 = vcombine.low %v18598_v58, %v1722_v24  ;;  %v12550_v23 = vcombine.high %v18598_v58, %v1722_v24  ;;  %v2267_v12 = vpack.i.b16 %v2141_v32, %v2116_v39  ;;  %v4268_v13 = vrot.slane %v4261_v42, %v15122_v47 }
 0x478   : > { %v4327_v52 = vcombine.low %v4318_v36, %v4326_v62  ;;  %v2268_v44 = vshrl.u32 %v2116_v39, 16  ;;  %v4412_v6 = vpack.i.b16 %v4411_v11, %v4410_v17  ;;  %v2175_v49 = vrot.slane %v2168_v20, %v15112_v1 }
 0x479   : > { %v2183_v43 = vrot.slane %v12551_v19, %v15112_v1  ;;  %v7794_v5 = vsel %vm6593_vm0, %v4409_v15, 0  ;;  %v2142_v35 = vcombine.high %v2141_v32, %v18505_v51  ;;  %v4277_v61 = vcombine.low %v4268_v13, %v4276_v26 }
 0x47a   : > { %13310 = vmatmul.mubr.msk.bf16.vlgmr.msra.gmra.mrb[56].mxu0 %vm6593_vm0, %v2267_v12  ;;  %v2270_v37 = vpack.i.b16 %v2269_v56, %v2268_v44  ;;  %v2150_v16 = vrot.slane %v2143_v2, %v15112_v1  ;;  %v2158_v57 = vrot.slane %v12550_v23, %v15112_v1  ;;  %v2117_v41 = vcombine.high %v2116_v39, %v18505_v51 }
 0x47b   : > { %13320 = vmatpush3.bf16.xpose.msra.mxu0 %v7794_v5  ;;  %13321 = vmatprep.mubr.msk.bf16.mxu0 %vm14520_vm1, %v18497_v33  ;;  %v7840_v21 = vsel %vm6593_vm0, %v4412_v6, 0  ;;  %v4417_v40 = vshrl.u32 %v4327_v52, 16  ;;  %v4415_v3 = vpack.i.b16 %v4327_v52, %v4277_v61  ;;  %v2184_v27 = vcombine.low %v2175_v49, %v2183_v43 }
 0x47c   : > { %13331 = vmatprep.subr.bf16.mxu0 %v18497_v33  ;;  %v2275_v28 = vshrl.u32 %v2142_v35, 16  ;;  %v4416_v14 = vshrl.u32 %v4277_v61, 16  ;;  %v2159_v45 = vcombine.low %v2150_v16, %v2158_v57  ;;  %v2273_v53 = vpack.i.b16 %v2142_v35, %v2117_v41 }
 0x47d   : > { %13316 = vmatmul.mubr.msk.bf16.vlgmr.msra.gmra.mrb[80].mxu1 %vm6593_vm0, %v2270_v37  ;;  %v4328_v31 = vcombine.high %v4318_v36, %v4326_v62  ;;  %v2274_v48 = vshrl.u32 %v2117_v41, 16  ;;  %v7886_v9 = vsel %vm6593_vm0, %v4415_v3, 0  ;;  %v2191_v0 = vrot.slane %v2184_v27, %v15122_v47 }
 0x47e   : > { %13326 = vmatpush3.bf16.xpose.msra.mxu1 %v7840_v21  ;;  %13327 = vmatprep.mubr.msk.bf16.mxu1 %vm14520_vm1, %v18497_v33  ;;  %v4418_v10 = vpack.i.b16 %v4417_v40, %v4416_v14  ;;  %v4278_v60 = vcombine.high %v4268_v13, %v4276_v26  ;;  %v2166_v38 = vrot.slane %v2159_v45, %v15122_v47  ;;  %v4533_v27 = vshrl.u32 %v16275_v59, 16 }
 0x47f   : > { %13337 = vmatprep.subr.bf16.mxu1 %v18497_v33  ;;  %v2276_v32 = vpack.i.b16 %v2275_v28, %v2274_v48  ;;  %v4423_v54 = vshrl.u32 %v4328_v31, 16  ;;  %v2281_v7 = vshrl.u32 %v2191_v0, 16  ;;  %v2192_v29 = vcombine.high %v2191_v0, %v18505_v51 }
 0x480   : > { %v7932_v25 = vsel %vm6593_vm0, %v4418_v10, 0  ;;  %v4421_v4 = vpack.i.b16 %v4328_v31, %v4278_v60  ;;  %v4422_v55 = vshrl.u32 %v4278_v60, 16  ;;  %v2279_v22 = vpack.i.b16 %v2191_v0, %v2166_v38 }
 0x481   : > { %v2280_v34 = vshrl.u32 %v2166_v38, 16  ;;  %v2167_v62 = vcombine.high %v2166_v38, %v18505_v51  ;;  %v2287_v46 = vshrl.u32 %v2192_v29, 16  ;;  %v4485_v31 = vshrl.u32 %v16249_v50, 16 }
 0x482   : > { %13322 = vmatmul.mubr.msk.bf16.vlgmr.msra.gmra.mrb[60].mxu0 %vm6593_vm0, %v2273_v53  ;;  %v4424_v24 = vpack.i.b16 %v4423_v54, %v4422_v55  ;;  %v7978_v39 = vsel %vm6593_vm0, %v4421_v4, 0 }
 0x483   : > { %13332 = vmatpush3.bf16.xpose.msra.mxu0 %v7886_v9  ;;  %13333 = vmatprep.mubr.msk.bf16.mxu0 %vm14520_vm1, %v18497_v33  ;;  %v2282_v42 = vpack.i.b16 %v2281_v7, %v2280_v34  ;;  %v2285_v20 = vpack.i.b16 %v2192_v29, %v2167_v62  ;;  %v2286_v19 = vshrl.u32 %v2167_v62, 16 }
 0x484   : > { %13343 = vmatprep.subr.bf16.mxu0 %v18497_v33  ;;  %v8024_v11 = vsel %vm6593_vm0, %v4424_v24, 0 }
 0x485   : > { %13328 = vmatmul.mubr.msk.bf16.vlgmr.msra.gmra.mrb[84].mxu1 %vm6593_vm0, %v2276_v32  ;;  %v2288_v15 = vpack.i.b16 %v2287_v46, %v2286_v19 }
 0x486   : > { %13338 = vmatpush3.bf16.xpose.msra.mxu1 %v7932_v25  ;;  %13339 = vmatprep.mubr.msk.bf16.mxu1 %vm14520_vm1, %v18497_v33 }
 0x487   : > { %13349 = vmatprep.subr.bf16.mxu1 %v18497_v33 }
 0x48a   : > { %13334 = vmatmul.mubr.msk.bf16.vlgmr.msra.gmra.mrb[64].mxu0 %vm6593_vm0, %v2279_v22 }
 0x48b   : > { %13344 = vmatpush3.bf16.xpose.msra.mxu0 %v7978_v39  ;;  %13345 = vmatprep.mubr.msk.bf16.mxu0 %vm14520_vm1, %v18497_v33 }
 0x48c   : > { %13355 = vmatprep.subr.bf16.mxu0 %v18497_v33 }
 0x48d   : > { %13340 = vmatmul.mubr.msk.bf16.vlgmr.msra.gmra.mrb[88].mxu1 %vm6593_vm0, %v2282_v42 }
 0x48e   : > { %13350 = vmatpush3.bf16.xpose.msra.mxu1 %v8024_v11  ;;  %13351 = vmatprep.mubr.msk.bf16.mxu1 %vm14520_vm1, %v18497_v33 }
 0x48f   : > { %13361 = vmatprep.subr.bf16.mxu1 %v18497_v33 }
 0x492   : > { %13346 = vmatmul.mubr.msk.bf16.vlgmr.msra.gmra.mrb[68].mxu0 %vm6593_vm0, %v2285_v20 }
 0x493   : > { %13357 = vmatprep.mubr.msk.bf16.mxu0 %vm14520_vm1, %v18497_v33 }
 0x495   : > { %13352 = vmatmul.mubr.msk.bf16.vlgmr.msra.gmra.mrb[92].mxu1 %vm6593_vm0, %v2288_v15 }
 0x496   : > { %13363 = vmatprep.mubr.msk.bf16.mxu1 %vm14520_vm1, %v18497_v33  ;;  %v16594_v26 = vpop.permute.xlu1 %4457  ;;  %v16608_v44 = vpop.permute.xlu0 %4441 }
 0x497   : > { %18599 = vst [vmem:[#allocation40_spill] sm:$0xff] %v16594_v26  ;;  %18603 = vst [vmem:[#allocation26_spill] sm:$0xff] %v16608_v44 }
 0x49a   : > { %v16596_v36 = vpop.permute.xlu1 %4473 }
 0x49b   : > { %18600 = vst [vmem:[#allocation41_spill] sm:$0xff] %v16596_v36 }
 0x49c   : > { %v16612_v49 = vpop.permute.xlu0 %4459 }
 0x49d   : > { %18604 = vst [vmem:[#allocation28_spill] sm:$0xff] %v16612_v49 }
 0x49e   : > { %v16598_v56 = vpop.permute.xlu1 %4443 }
 0x49f   : > { %18601 = vst [vmem:[#allocation42_spill] sm:$0xff] %v16598_v56 }
 0x4a2   : > { %v16602_v58 = vpop.permute.xlu1 %4475 }
 0x4a3   : > { %v16600_v17 = vpop.f32.mrb[24].mxu1  ;;  %18602 = vst [vmem:[#allocation25_spill] sm:$0xff] %v16602_v58 }
 0x4a4   : > { %v13167_v2 = vpop.f32.mrb[25].mxu1  ;;  %v8067_v52 = vsel %vm8066_vm2, %v16600_v17, -inf }
 0x4a5   : > { %v6637_v23 = vpop.f32.mrb[26].mxu1  ;;  %8068 = vmax.xlane.f32.xlu0 %v8067_v52 }
 0x4a6   : > { %v13168_v12 = vpop.f32.mrb[27].mxu1 }
 0x4a9   : > { %v16604_v13 = vpop.permute.xlu1 %4435 }
 0x4aa   : > { %v16616_v16 = vpop.permute.xlu0 %4451 }
 0x4ad   : > { %v16610_v6 = vpop.permute.xlu1 %4467 }
 0x4b0   : > { %v16614_v43 = vpop.f32.mrb[28].mxu1 }
 0x4b1   : > { %v13173_v5 = vpop.f32.mrb[29].mxu1  ;;  %v8070_v57 = vsel %vm8066_vm2, %v16614_v43, -inf }
 0x4b2   : > { %v6683_v61 = vpop.f32.mrb[30].mxu1  ;;  %8071 = vmax.xlane.f32.xlu1 %v8070_v57 }
 0x4b3   : > { %v13174_v37 = vpop.f32.mrb[31].mxu1 }
 0x4b5   : > { %v4450_v35 = vpop.permute.xlu1 %4449 }
 0x4b6   : > { %v4493_v28 = vshrl.u32 %v4450_v35, 16 }
 0x4b7   : > { %v4434_v21 = vpop.permute.xlu0 %4433 }
 0x4b8   : > { %v4483_v53 = vpack.i.b16 %v4434_v21, %v16249_v50  ;;  %v4486_v48 = vshrl.u32 %v4434_v21, 16 }
 0x4b9   : > { %v4466_v41 = vpop.permute.xlu1 %4465 }
 0x4ba   : > { %v4491_v3 = vpack.i.b16 %v4466_v41, %v4450_v35  ;;  %v4494_v14 = vshrl.u32 %v4466_v41, 16  ;;  %v4609_v25 = vcombine.high %v4483_v53, %v15108_v8  ;;  %v4487_v7 = vpack.i.b16 %v4486_v48, %v4485_v31 }
 0x4bb   : > { %v4616_v55 = vrot.slane %v4483_v53, %v15112_v1 }
 0x4bc   : > { %v4624_v9 = vcombine.high %v4491_v3, %v15108_v8  ;;  %v4456_v0 = vpop.permute.xlu0 %4455  ;;  %v4495_v60 = vpack.i.b16 %v4494_v14, %v4493_v28  ;;  %v4631_v4 = vrot.slane %v4491_v3, %v15112_v1  ;;  %v4623_v29 = vrot.slane %v4609_v25, %v15112_v1 }
 0x4bd   : > { %v4440_v40 = vpop.permute.xlu1 %4439  ;;  %v4541_v42 = vshrl.u32 %v4456_v0, 16  ;;  %v4675_v23 = vcombine.high %v4487_v7, %v15108_v8  ;;  %v4682_v12 = vrot.slane %v4487_v7, %v15112_v1 }
 0x4be   : > { %v4534_v45 = vshrl.u32 %v4440_v40, 16  ;;  %v4531_v10 = vpack.i.b16 %v4440_v40, %v16275_v59  ;;  %v4638_v24 = vrot.slane %v4624_v9, %v15112_v1  ;;  %v4690_v11 = vcombine.high %v4495_v60, %v15108_v8 }
 0x4bf   : > { %v4697_v46 = vrot.slane %v4495_v60, %v15112_v1  ;;  %v4639_v15 = vcombine.low %v4616_v55, %v4631_v4  ;;  %v4640_v2 = vcombine.high %v4616_v55, %v4631_v4  ;;  %v4689_v31 = vrot.slane %v4675_v23, %v15112_v1 }
 0x4c0   : > { %v4535_v32 = vpack.i.b16 %v4534_v45, %v4533_v27  ;;  %v5005_v34 = vcombine.high %v4531_v10, %v15108_v8  ;;  %v5012_v52 = vrot.slane %v4531_v10, %v15112_v1  ;;  %v4655_v37 = vcombine.low %v4623_v29, %v4638_v24 }
 0x4c1   : > { %v4472_v38 = vpop.permute.xlu1 %4471  ;;  %v4656_v57 = vcombine.high %v4623_v29, %v4638_v24  ;;  %v4704_v40 = vrot.slane %v4690_v11, %v15112_v1  ;;  %v4647_v45 = vrot.slane %v4639_v15, %v15122_v47  ;;  %v4654_v53 = vrot.slane %v4640_v2, %v15122_v47 }
 0x4c2   : > { %v4539_v22 = vpack.i.b16 %v4472_v38, %v4456_v0  ;;  %v4542_v39 = vshrl.u32 %v4472_v38, 16  ;;  %v5071_v20 = vcombine.high %v4535_v32, %v15108_v8  ;;  %v5019_v5 = vrot.slane %v5005_v34, %v15112_v1 }
 0x4c3   : > { %v16626_v54 = vpop.f32.mrb[32].mxu1  ;;  %v5078_v3 = vrot.slane %v4535_v32, %v15112_v1  ;;  %v4705_v48 = vcombine.low %v4682_v12, %v4697_v46  ;;  %v4706_v9 = vcombine.high %v4682_v12, %v4697_v46  ;;  %v4663_v25 = vrot.slane %v4655_v37, %v15122_v47 }
 0x4c4   : > { %v13179_v50 = vpop.f32.mrb[33].mxu1  ;;  %v5020_v19 = vcombine.high %v4539_v22, %v15108_v8  ;;  %v5027_v35 = vrot.slane %v4539_v22, %v15112_v1  ;;  %v4543_v41 = vpack.i.b16 %v4542_v39, %v4541_v42  ;;  %v5085_v27 = vrot.slane %v5071_v20, %v15112_v1 }
 0x4c5   : > { %v6729_v59 = vpop.f32.mrb[34].mxu1  ;;  %v4670_v32 = vrot.slane %v4656_v57, %v15122_v47  ;;  %v4722_v24 = vcombine.high %v4689_v31, %v4704_v40  ;;  %v5665_v23 = vcombine.low %v4647_v45, %v4654_v53  ;;  %v12584_v12 = vcombine.high %v4647_v45, %v4654_v53 }
 0x4c6   : > { %v13180_v62 = vpop.f32.mrb[35].mxu1  ;;  %v5034_v28 = vrot.slane %v5020_v19, %v15112_v1  ;;  %v5035_v0 = vcombine.low %v5012_v52, %v5027_v35  ;;  %v5036_v60 = vcombine.high %v5012_v52, %v5027_v35  ;;  %v5086_v7 = vcombine.high %v4543_v41, %v15108_v8 }
 0x4c7   : > { %v5093_v34 = vrot.slane %v4543_v41, %v15112_v1  ;;  %v4721_v59 = vcombine.low %v4689_v31, %v4704_v40  ;;  %v5681_v35 = vcombine.low %v4663_v25, %v4670_v32  ;;  %v12585_v37 = vcombine.high %v4663_v25, %v4670_v32 }
 0x4c8   : > { %v5051_v38 = vcombine.low %v5019_v5, %v5034_v28  ;;  %v5052_v4 = vcombine.high %v5019_v5, %v5034_v28  ;;  %v16655_v55 = vrot.slane %v5035_v0, %v15122_v47  ;;  %v16658_v22 = vrot.slane %v5036_v60, %v15122_v47 }
 0x4c9   : > { %v5100_v29 = vrot.slane %v5086_v7, %v15112_v1  ;;  %v5101_v42 = vcombine.low %v5078_v3, %v5093_v34  ;;  %v5102_v62 = vcombine.high %v5078_v3, %v5093_v34  ;;  %v4720_v40 = vrot.slane %v4706_v9, %v15122_v47 }
 0x4ca   : > { %v16642_v61 = vpop.f32.mrb[16].mxu0  ;;  %v16661_v50 = vrot.slane %v5051_v38, %v15122_v47  ;;  %v16665_v39 = vrot.slane %v5052_v4, %v15122_v47  ;;  %v5965_v11 = vcombine.low %v16655_v55, %v16658_v22  ;;  %v12596_v46 = vcombine.high %v16655_v55, %v16658_v22 }
 0x4cb   : > { %v13191_v21 = vpop.f32.mrb[17].mxu0  ;;  %v5117_v20 = vcombine.low %v5085_v27, %v5100_v29  ;;  %v5118_v19 = vcombine.high %v5085_v27, %v5100_v29  ;;  %v16677_v52 = vrot.slane %v5101_v42, %v15122_v47  ;;  %v16680_v5 = vrot.slane %v5102_v62, %v15122_v47 }
 0x4cc   : > { %v6821_v14 = vpop.f32.mrb[18].mxu0  ;;  %v5981_v15 = vcombine.low %v16661_v50, %v16665_v39  ;;  %v12597_v2 = vcombine.high %v16661_v50, %v16665_v39  ;;  %v4713_v21 = vrot.slane %v4705_v48, %v15122_v47  ;;  %v4729_v45 = vrot.slane %v4721_v59, %v15122_v47 }
 0x4cd   : > { %v13192_v10 = vpop.f32.mrb[19].mxu0  ;;  %v16683_v57 = vrot.slane %v5117_v20, %v15122_v47  ;;  %v16686_v41 = vrot.slane %v5118_v19, %v15122_v47  ;;  %v6015_v3 = vcombine.low %v16677_v52, %v16680_v5  ;;  %v12598_v27 = vcombine.high %v16677_v52, %v16680_v5 }
 0x4ce   : > { %v4736_v53 = vrot.slane %v4722_v24, %v15122_v47  ;;  %v5672_v31 = vrot.slane %v5665_v23, %v15112_v1  ;;  %v5680_v48 = vrot.slane %v12584_v12, %v15112_v1  ;;  %v5688_v10 = vrot.slane %v5681_v35, %v15112_v1 }
 0x4cf   : > { %v6031_v28 = vcombine.low %v16683_v57, %v16686_v41  ;;  %v12599_v14 = vcombine.high %v16683_v57, %v16686_v41  ;;  %v5696_v9 = vrot.slane %v12585_v37, %v15112_v1  ;;  %v5715_v60 = vcombine.low %v4713_v21, %v4720_v40 }
 0x4d0   : > { %v12586_v38 = vcombine.high %v4713_v21, %v4720_v40  ;;  %v5731_v7 = vcombine.low %v4729_v45, %v4736_v53  ;;  %v5697_v34 = vcombine.low %v5672_v31, %v5680_v48  ;;  %v12587_v62 = vcombine.high %v4729_v45, %v4736_v53 }
 0x4d1   : > { %v5705_v59 = vcombine.low %v5688_v10, %v5696_v9  ;;  %v5722_v20 = vrot.slane %v5715_v60, %v15112_v1  ;;  %v8079_v31 = vsel %vm8066_vm2, %v16642_v61, -inf  ;;  %v5988_v55 = vrot.slane %v5981_v15, %v15112_v1 }
 0x4d2   : > { %v5730_v19 = vrot.slane %v12586_v38, %v15112_v1  ;;  %v5704_v12 = vrot.slane %v5697_v34, %v15122_v47  ;;  %v5738_v37 = vrot.slane %v5731_v7, %v15112_v1  ;;  %v5746_v21 = vrot.slane %v12587_v62, %v15112_v1  ;;  %8080 = vmax.xlane.f32.xlu0 %v8079_v31 }
 0x4d3   : > { %v5712_v35 = vrot.slane %v5705_v59, %v15122_v47  ;;  %v8073_v34 = vsel %vm8066_vm2, %v16626_v54, -inf  ;;  %v5996_v22 = vrot.slane %v12597_v2, %v15112_v1  ;;  %v6038_v15 = vrot.slane %v6031_v28, %v15112_v1 }
 0x4d4   : > { %v5747_v40 = vcombine.low %v5722_v20, %v5730_v19  ;;  %v5755_v53 = vcombine.low %v5738_v37, %v5746_v21  ;;  %v5980_v37 = vrot.slane %v12596_v46, %v15112_v1 }
 0x4d5   : > { %v5713_v48 = vcombine.low %v5704_v12, %v5712_v35  ;;  %v16719_v9 = vcombine.high %v5704_v12, %v5712_v35  ;;  %v5972_v35 = vrot.slane %v5965_v11, %v15112_v1  ;;  %v6005_v2 = vcombine.low %v5988_v55, %v5996_v22 }
 0x4d6   : > { %v5754_v45 = vrot.slane %v5747_v40, %v15122_v47  ;;  %v5762_v60 = vrot.slane %v5755_v53, %v15122_v47 }
 0x4d7   : > { %v16704_v0 = vpop.f32.mrb[36].mxu1  ;;  %v6477_v7 = vshrl.u32 %v16719_v9, 16  ;;  %v5997_v46 = vcombine.low %v5972_v35, %v5980_v37  ;;  %v6012_v52 = vrot.slane %v6005_v2, %v15122_v47 }
 0x4d8   : > { %v13185_v25 = vpop.f32.mrb[37].mxu1  ;;  %v5763_v38 = vcombine.low %v5754_v45, %v5762_v60  ;;  %v8076_v50 = vsel %vm8066_vm2, %v16704_v0, -inf }
 0x4d9   : > { %v16706_v32 = vpop.f32.mrb[20].mxu0  ;;  %v6775_v4 = vpop.f32.mrb[38].mxu1  ;;  %v6469_v25 = vshrl.u32 %v5713_v48, 16  ;;  %v6004_v39 = vrot.slane %v5997_v46, %v15122_v47 }
 0x4da   : > { %v13203_v24 = vpop.f32.mrb[21].mxu0  ;;  %v13186_v29 = vpop.f32.mrb[39].mxu1  ;;  %v8085_v10 = vsel %vm8066_vm2, %v16706_v32, -inf  ;;  %v16722_v4 = vcombine.high %v5754_v45, %v5762_v60  ;;  %v6467_v59 = vpack.i.b16 %v5763_v38, %v5713_v48  ;;  %v6030_v60 = vrot.slane %v12598_v27, %v15112_v1 }
 0x4db   : > { %v6913_v42 = vpop.f32.mrb[22].mxu0  ;;  %8086 = vmax.xlane.f32.xlu0 %v8085_v10  ;;  %v6470_v24 = vshrl.u32 %v5763_v38, 16  ;;  %v6022_v10 = vrot.slane %v6015_v3, %v15112_v1  ;;  %v6046_v3 = vrot.slane %v12599_v14, %v15112_v1 }
 0x4dc   : > { %v13204_v23 = vpop.f32.mrb[23].mxu0  ;;  %v6478_v42 = vshrl.u32 %v16722_v4, 16  ;;  %13356 = vmatpush3.bf16.msra.mxu0 %v6467_v59 }
 0x4dd   : > { %v6471_v62 = vpack.i.b16 %v6470_v24, %v6469_v25  ;;  %13367 = vmatprep.subr.bf16.mxu0 %v18497_v33  ;;  %v6047_v38 = vcombine.low %v6022_v10, %v6030_v60  ;;  %v6055_v5 = vcombine.low %v6038_v15, %v6046_v3  ;;  %v16779_v25 = vcombine.low %v6004_v39, %v6012_v52 }
 0x4de   : > { %v16732_v19 = vpack.i.b16 %v6478_v42, %v6477_v7  ;;  %v16782_v7 = vcombine.high %v6004_v39, %v6012_v52 }
 0x4df   : > { %8074 = vmax.xlane.f32.xlu0 %v8073_v34  ;;  %13362 = vmatpush3.bf16.msra.mxu1 %v6471_v62  ;;  %v6054_v27 = vrot.slane %v6047_v38, %v15122_v47  ;;  %18605 = vst [vmem:[#allocation36_spill] sm:$0xff] %v16779_v25  ;;  %v6062_v28 = vrot.slane %v6055_v5, %v15122_v47  ;;  %v6517_v24 = vshrl.u32 %v16779_v25, 16 }
 0x4e0   : > { %13373 = vmatprep.subr.bf16.mxu1 %v18497_v33  ;;  %18606 = vst [vmem:[#allocation35_spill] sm:$0xff] %v16782_v7 }
 0x4e1   : > { %v16784_v34 = vcombine.low %v6054_v27, %v6062_v28  ;;  %v16786_v59 = vcombine.high %v6054_v27, %v6062_v28 }
 0x4e3   : > { %18607 = vst [vmem:[#allocation43_spill] sm:$0xff] %v16784_v34  ;;  %18608 = vst [vmem:[#allocation44_spill] sm:$0xff] %v16786_v59  ;;  %v6518_v42 = vshrl.u32 %v16784_v34, 16  ;;  %v6526_v35 = vshrl.u32 %v16786_v59, 16 }
 0x4eb   : > { %v16730_v20 = vpop.f32.mrb[40].mxu1 }
 0x4ec   : > { %v13197_v23 = vpop.f32.mrb[41].mxu1  ;;  %v8082_v12 = vsel %vm8066_vm2, %v16730_v20, -inf }
 0x4ed   : > { %8083 = vmax.xlane.f32.xlu1 %v8082_v12  ;;  %v6867_v21 = vpop.f32.mrb[42].mxu1  ;;  %v6525_v12 = vshrl.u32 %v16782_v7, 16 }
 0x4ee   : > { %v13198_v31 = vpop.f32.mrb[43].mxu1  ;;  %v16800_v21 = vpack.i.b16 %v6518_v42, %v6517_v24 }
 0x4ef   : > { %v16745_v40 = vpop.f32.mrb[24].mxu0 }
 0x4f0   : > { %v13215_v48 = vpop.f32.mrb[25].mxu0  ;;  %v8091_v45 = vsel %vm8066_vm2, %v16745_v40, -inf  ;;  %18609 = vst [vmem:[#allocation46_spill] sm:$0xff] %v16800_v21 }
 0x4f1   : > { %8092 = vmax.xlane.f32.xlu0 %v8091_v45  ;;  %v7005_v53 = vpop.f32.mrb[26].mxu0  ;;  %v16804_v45 = vpack.i.b16 %v6526_v35, %v6525_v12 }
 0x4f2   : > { %v13216_v11 = vpop.f32.mrb[27].mxu0 }
 0x4f3   : > { %18610 = vst [vmem:[#allocation45_spill] sm:$0xff] %v16804_v45 }
 0x4f5   : > { %8077 = vmax.xlane.f32.xlu0 %v8076_v50 }
 0x4fc   : > { %v16792_v14 = vpop.f32.mrb[44].mxu1 }
 0x4fd   : > { %v13209_v62 = vpop.f32.mrb[45].mxu1  ;;  %v8088_v23 = vsel %vm8066_vm2, %v16792_v14, -inf }
 0x4fe   : > { %8089 = vmax.xlane.f32.xlu1 %v8088_v23  ;;  %v6959_v37 = vpop.f32.mrb[46].mxu1  ;;  %v16802_v31 = vpop.f32.mrb[28].mxu0 }
 0x4ff   : > { %v13210_v48 = vpop.f32.mrb[47].mxu1  ;;  %v13227_v53 = vpop.f32.mrb[29].mxu0  ;;  %v8097_v11 = vsel %vm8066_vm2, %v16802_v31, -inf }
 0x500   : > { %8098 = vmax.xlane.f32.xlu0 %v8097_v11  ;;  %v7097_v55 = vpop.f32.mrb[30].mxu0 }
 0x501   : > { %v13228_v22 = vpop.f32.mrb[31].mxu0 }
 0x508   : > { %v16808_v46 = vpop.f32.mrb[48].mxu1 }
 0x509   : > { %v13221_v10 = vpop.f32.mrb[49].mxu1  ;;  %v8094_v60 = vsel %vm8066_vm2, %v16808_v46, -inf }
 0x50a   : > { %8095 = vmax.xlane.f32.xlu1 %v8094_v60  ;;  %v7051_v15 = vpop.f32.mrb[50].mxu1 }
 0x50b   : > { %v13222_v50 = vpop.f32.mrb[51].mxu1 }
 0x515   : > { %v16812_v39 = vpop.f32.mrb[52].mxu1 }
 0x516   : > { %v13233_v2 = vpop.f32.mrb[53].mxu1  ;;  %v8100_v3 = vsel %vm8066_vm2, %v16812_v39, -inf }
 0x517   : > { %8101 = vmax.xlane.f32.xlu1 %v8100_v3  ;;  %v7143_v38 = vpop.f32.mrb[54].mxu1 }
 0x518   : > { %v13234_v52 = vpop.f32.mrb[55].mxu1 }
 0x51a   : > { %v16816_v5 = vpop.f32.mrb[32].mxu0 }
 0x51b   : > { %v13239_v27 = vpop.f32.mrb[33].mxu0  ;;  %v8103_v28 = vsel %vm8066_vm2, %v16816_v5, -inf }
 0x51c   : > { %8104 = vmax.xlane.f32.xlu0 %v8103_v28  ;;  %v7189_v24 = vpop.f32.mrb[34].mxu0 }
 0x51d   : > { %v16820_v42 = vpop.f32.mrb[56].mxu1  ;;  %v13240_v62 = vpop.f32.mrb[35].mxu0 }
 0x51e   : > { %v13245_v23 = vpop.f32.mrb[57].mxu1  ;;  %v8106_v12 = vsel %vm8066_vm2, %v16820_v42, -inf }
 0x51f   : > { %8107 = vmax.xlane.f32.xlu1 %v8106_v12  ;;  %v7235_v35 = vpop.f32.mrb[58].mxu1 }
 0x520   : > { %v13246_v37 = vpop.f32.mrb[59].mxu1 }
 0x523   : > { %v16824_v48 = vpop.f32.mrb[36].mxu0 }
 0x524   : > { %v13251_v53 = vpop.f32.mrb[37].mxu0  ;;  %v8109_v11 = vsel %vm8066_vm2, %v16824_v48, -inf }
 0x525   : > { %8110 = vmax.xlane.f32.xlu0 %v8109_v11  ;;  %v7281_v55 = vpop.f32.mrb[38].mxu0 }
 0x526   : > { %v16828_v22 = vpop.f32.mrb[60].mxu1  ;;  %v13252_v10 = vpop.f32.mrb[39].mxu0 }
 0x527   : > { %v13257_v60 = vpop.f32.mrb[61].mxu1  ;;  %v8112_v15 = vsel %vm8066_vm2, %v16828_v22, -inf }
 0x528   : > { %8113 = vmax.xlane.f32.xlu1 %v8112_v15  ;;  %v7327_v50 = vpop.f32.mrb[62].mxu1 }
 0x529   : > { %v13258_v2 = vpop.f32.mrb[63].mxu1 }
 0x52c   : > { %v16832_v3 = vpop.f32.mrb[40].mxu0 }
 0x52d   : > { %v13263_v38 = vpop.f32.mrb[41].mxu0  ;;  %v8115_v52 = vsel %vm8066_vm2, %v16832_v3, -inf }
 0x52e   : > { %8116 = vmax.xlane.f32.xlu0 %v8115_v52  ;;  %v7373_v27 = vpop.f32.mrb[42].mxu0  ;;  %v16836_v28 = vpop.f32.mrb[64].mxu1 }
 0x52f   : > { %v13264_v24 = vpop.f32.mrb[43].mxu0  ;;  %v13269_v62 = vpop.f32.mrb[65].mxu1 }
 0x530   : > { %v7419_v23 = vpop.f32.mrb[66].mxu1 }
 0x531   : > { %v13270_v12 = vpop.f32.mrb[67].mxu1 }
 0x534   : > { %v16838_v35 = vpop.f32.mrb[44].mxu0 }
 0x535   : > { %v13275_v37 = vpop.f32.mrb[45].mxu0  ;;  %v8121_v53 = vsel %vm8066_vm2, %v16838_v35, -inf }
 0x536   : > { %8122 = vmax.xlane.f32.xlu0 %v8121_v53  ;;  %v7465_v11 = vpop.f32.mrb[46].mxu0 }
 0x537   : > { %v13276_v10 = vpop.f32.mrb[47].mxu0 }
 0x538   : > { %v16842_v55 = vpop.f32.mrb[68].mxu1 }
 0x539   : > { %v13281_v60 = vpop.f32.mrb[69].mxu1 }
 0x53a   : > { %v7511_v15 = vpop.f32.mrb[70].mxu1 }
 0x53b   : > { %v13282_v50 = vpop.f32.mrb[71].mxu1 }
 0x53d   : > { %v16844_v2 = vpop.f32.mrb[48].mxu0 }
 0x53e   : > { %v13287_v38 = vpop.f32.mrb[49].mxu0  ;;  %v8127_v52 = vsel %vm8066_vm2, %v16844_v2, -inf }
 0x53f   : > { %8128 = vmax.xlane.f32.xlu0 %v8127_v52  ;;  %v7557_v27 = vpop.f32.mrb[50].mxu0 }
 0x540   : > { %v16848_v24 = vpop.f32.mrb[72].mxu1  ;;  %v13288_v62 = vpop.f32.mrb[51].mxu0  ;;  %v8118_v27 = vsel %vm8066_vm2, %v16836_v28, -inf }
 0x541   : > { %v13293_v23 = vpop.f32.mrb[73].mxu1  ;;  %v8130_v51 = vsel %vm8066_vm2, %v16848_v24, -inf }
 0x542   : > { %v7603_v12 = vpop.f32.mrb[74].mxu1 }
 0x543   : > { %v13294_v37 = vpop.f32.mrb[75].mxu1 }
 0x545   : > { %v16850_v53 = vpop.f32.mrb[52].mxu0 }
 0x546   : > { %v13299_v11 = vpop.f32.mrb[53].mxu0  ;;  %v8133_v10 = vsel %vm8066_vm2, %v16850_v53, -inf }
 0x547   : > { %8134 = vmax.xlane.f32.xlu1 %v8133_v10  ;;  %v7649_v60 = vpop.f32.mrb[54].mxu0 }
 0x548   : > { %v16854_v15 = vpop.f32.mrb[76].mxu1  ;;  %v13300_v50 = vpop.f32.mrb[55].mxu0 }
 0x549   : > { %v13305_v38 = vpop.f32.mrb[77].mxu1 }
 0x54a   : > { %v7695_v52 = vpop.f32.mrb[78].mxu1  ;;  %v16864_v38 = vpop.permute.xlu0 %4437 }
 0x54b   : > { %v13306_v62 = vpop.f32.mrb[79].mxu1  ;;  %8119 = vmax.xlane.f32.xlu1 %v8118_v27  ;;  %v8124_v52 = vsel %vm8066_vm2, %v16842_v55, -inf }
 0x54d   : > { %v16858_v23 = vpop.f32.mrb[56].mxu0 }
 0x54e   : > { %v13311_v12 = vpop.f32.mrb[57].mxu0  ;;  %v8139_v37 = vsel %vm8066_vm2, %v16858_v23, -inf }
 0x54f   : > { %8140 = vmax.xlane.f32.xlu1 %v8139_v37  ;;  %v7741_v11 = vpop.f32.mrb[58].mxu0  ;;  %v8069_v37 = vpop.xlane.xlu0 %8068 }
 0x550   : > { %v16862_v10 = vpop.f32.mrb[80].mxu1  ;;  %v13312_v60 = vpop.f32.mrb[59].mxu0 }
 0x551   : > { %v13317_v41 = vpop.f32.mrb[81].mxu1 }
 0x552   : > { %v7787_v50 = vpop.f32.mrb[82].mxu1 }
 0x553   : > { %v13318_v62 = vpop.f32.mrb[83].mxu1  ;;  %8125 = vmax.xlane.f32.xlu1 %v8124_v52  ;;  %v8163_v52 = vsub.f32 %v16600_v17, %v8069_v37  ;;  %v16885_v17 = vpop.permute.xlu1 %4453 }
 0x555   : > { %v16868_v27 = vpop.f32.mrb[60].mxu0 }
 0x556   : > { %v13323_v12 = vpop.f32.mrb[61].mxu0  ;;  %v8145_v57 = vsel %vm8066_vm2, %v16868_v27, -inf }
 0x557   : > { %8146 = vmax.xlane.f32.xlu1 %v8145_v57  ;;  %v7833_v11 = vpop.f32.mrb[62].mxu0  ;;  %v16899_v58 = vpop.permute.xlu1 %4469 }
 0x558   : > { %v16872_v29 = vpop.f32.mrb[84].mxu1  ;;  %v13324_v41 = vpop.f32.mrb[63].mxu0 }
 0x559   : > { %v13329_v60 = vpop.f32.mrb[85].mxu1  ;;  %v8195_v41 = vmul.f32 1.442695, %v8163_v52 }
 0x55a   : > { %v7879_v50 = vpop.f32.mrb[86].mxu1 }
 0x55b   : > { %v13330_v45 = vpop.f32.mrb[87].mxu1  ;;  %8131 = vmax.xlane.f32.xlu1 %v8130_v51  ;;  %13903 = vpow2.f32 %v8195_v41 }
 0x55c   : > { %v8136_v45 = vsel %vm8066_vm2, %v16854_v15, -inf }
 0x55d   : > { %v16877_v62 = vpop.f32.mrb[64].mxu0 }
 0x55e   : > { %v13335_v12 = vpop.f32.mrb[65].mxu0  ;;  %v8151_v21 = vsel %vm8066_vm2, %v16877_v62, -inf }
 0x55f   : > { %8152 = vmax.xlane.f32.xlu0 %v8151_v21  ;;  %v7925_v57 = vpop.f32.mrb[66].mxu0  ;;  %v8142_v21 = vsel %vm8066_vm2, %v16862_v10, -inf }
 0x560   : > { %v16881_v11 = vpop.f32.mrb[88].mxu1  ;;  %v13336_v60 = vpop.f32.mrb[67].mxu0 }
 0x561   : > { %v13341_v50 = vpop.f32.mrb[89].mxu1  ;;  %v8154_v41 = vsel %vm8066_vm2, %v16881_v11, -inf }
 0x562   : > { %v7971_v49 = vpop.f32.mrb[90].mxu1 }
 0x563   : > { %v13342_v51 = vpop.f32.mrb[91].mxu1  ;;  %8137 = vmax.xlane.f32.xlu0 %v8136_v45 }
 0x564   : > { %v8148_v51 = vsel %vm8066_vm2, %v16872_v29, -inf }
 0x565   : > { %v16887_v37 = vpop.f32.mrb[68].mxu0 }
 0x566   : > { %v13347_v12 = vpop.f32.mrb[69].mxu0  ;;  %v8157_v52 = vsel %vm8066_vm2, %v16887_v37, -inf }
 0x567   : > { %8143 = vmax.xlane.f32.xlu0 %v8142_v21  ;;  %8158 = vmax.xlane.f32.xlu1 %v8157_v52  ;;  %v8017_v49 = vpop.f32.mrb[70].mxu0  ;;  %v16903_v52 = vpop.eup %13903 }
 0x568   : > { %v16893_v57 = vpop.f32.mrb[92].mxu1  ;;  %v13348_v60 = vpop.f32.mrb[71].mxu0 }
 0x569   : > { %v13353_v50 = vpop.f32.mrb[93].mxu1  ;;  %v8160_v21 = vsel %vm8066_vm2, %v16893_v57, -inf  ;;  %v8072_v49 = vpop.xlane.xlu1 %8071  ;;  %v8259_v60 = vsel %vm8066_vm2, %v16903_v52, 0.0 }
 0x56a   : > { %v8063_v45 = vpop.f32.mrb[94].mxu1  ;;  %v8164_v50 = vsub.f32 %v16614_v43, %v8072_v49 }
 0x56b   : > { %v13354_v12 = vpop.f32.mrb[95].mxu1  ;;  %8149 = vmax.xlane.f32.xlu0 %v8148_v51  ;;  %8155 = vmax.xlane.f32.xlu1 %v8154_v41  ;;  %v8081_v45 = vpop.xlane.xlu0 %8080 }
 0x56c   : > { %v8167_v12 = vsub.f32 %v16642_v61, %v8081_v45  ;;  %v8197_v56 = vmul.f32 1.442695, %v8164_v50 }
 0x56e   : > { %v8203_v7 = vmul.f32 1.442695, %v8167_v12 }
 0x56f   : > { %8161 = vmax.xlane.f32.xlu0 %v8160_v21  ;;  %v8087_v51 = vpop.xlane.xlu0 %8086 }
 0x570   : > { %13905 = vpow2.f32 %v8203_v7  ;;  %v8169_v41 = vsub.f32 %v16706_v32, %v8087_v51 }
 0x571   : > { %13907 = vpow2.f32 %v8197_v56 }
 0x572   : > { %v8207_v59 = vmul.f32 1.442695, %v8169_v41 }
 0x573   : > { %8260 = vadd.xlane.f32.xlu0 %v8259_v60  ;;  %v8075_v25 = vpop.xlane.xlu0 %8074 }
 0x574   : > { %13909 = vpow2.f32 %v8207_v59  ;;  %v8165_v21 = vsub.f32 %v16626_v54, %v8075_v25 }
 0x576   : > { %v8199_v34 = vmul.f32 1.442695, %v8165_v21 }
 0x578   : > { %13911 = vpow2.f32 %v8199_v34 }
 0x57a   : > { %v16911_v43 = vpop.eup %13905  ;;  %v8084_v41 = vpop.xlane.xlu1 %8083 }
 0x57b   : > { %v8271_v61 = vsel %vm8066_vm2, %v16911_v43, 0.0  ;;  %v16916_v60 = vpop.eup %13907 }
 0x57c   : > { %8272 = vadd.xlane.f32.xlu0 %v8271_v61  ;;  %v8262_v25 = vsel %vm8066_vm2, %v16916_v60, 0.0 }
 0x57e   : > { %v8093_v44 = vpop.xlane.xlu0 %8092  ;;  %v16918_v32 = vpop.eup %13909 }
 0x57f   : > { %v8171_v49 = vsub.f32 %v16745_v40, %v8093_v44  ;;  %v8277_v44 = vsel %vm8066_vm2, %v16918_v32, 0.0 }
 0x580   : > { %8263 = vadd.xlane.f32.xlu0 %v8262_v25 }
 0x581   : > { %v8211_v7 = vmul.f32 1.442695, %v8171_v49 }
 0x582   : > { %v8078_v56 = vpop.xlane.xlu0 %8077  ;;  %v16925_v40 = vpop.eup %13911 }
 0x583   : > { %13913 = vpow2.f32 %v8211_v7  ;;  %v8166_v54 = vsub.f32 %v16704_v0, %v8078_v56  ;;  %v8265_v59 = vsel %vm8066_vm2, %v16925_v40, 0.0  ;;  %v8168_v7 = vsub.f32 %v16730_v20, %v8084_v41 }
 0x584   : > { %8278 = vadd.xlane.f32.xlu0 %v8277_v44  ;;  %8266 = vadd.xlane.f32.xlu1 %v8265_v59 }
 0x585   : > { %v8201_v34 = vmul.f32 1.442695, %v8166_v54  ;;  %v8205_v44 = vmul.f32 1.442695, %v8168_v7 }
 0x587   : > { %13915 = vpow2.f32 %v8201_v34 }
 0x58b   : > { %v8090_v61 = vpop.xlane.xlu1 %8089 }
 0x58d   : > { %v16929_v50 = vpop.eup %13913  ;;  %v8099_v51 = vpop.xlane.xlu0 %8098 }
 0x58e   : > { %v8283_v0 = vsel %vm8066_vm2, %v16929_v50, 0.0  ;;  %v8173_v21 = vsub.f32 %v16802_v31, %v8099_v51  ;;  %v8170_v31 = vsub.f32 %v16792_v14, %v8090_v61 }
 0x58f   : > { %8284 = vadd.xlane.f32.xlu0 %v8283_v0 }
 0x590   : > { %v8215_v56 = vmul.f32 1.442695, %v8173_v21  ;;  %v8209_v41 = vmul.f32 1.442695, %v8170_v31 }
 0x591   : > { %v16933_v45 = vpop.eup %13915 }
 0x592   : > { %v8268_v12 = vsel %vm8066_vm2, %v16933_v45, 0.0  ;;  %13917 = vpow2.f32 %v8215_v56 }
 0x593   : > { %8269 = vadd.xlane.f32.xlu0 %v8268_v12  ;;  %13919 = vpow2.f32 %v8205_v44 }
 0x595   : > { %4461 = vrot.lane.b32.xlu1 %v16532_v30, %s14513_s18 }
 0x597   : > { %v8096_v34 = vpop.xlane.xlu1 %8095 }
 0x598   : > { %v8172_v0 = vsub.f32 %v16808_v46, %v8096_v34 }
 0x599   : > { %4477 = vrot.lane.b32.xlu1 %v16532_v30, %s14515_s19 }
 0x59a   : > { %v8213_v26 = vmul.f32 1.442695, %v8172_v0 }
 0x59c   : > { %v16952_v21 = vpop.eup %13917 }
 0x59d   : > { %v8289_v7 = vsel %vm8066_vm2, %v16952_v21, 0.0  ;;  %v16956_v14 = vpop.eup %13919 }
 0x5a4   : > { %v8102_v36 = vpop.xlane.xlu1 %8101 }
 0x5a5   : > { %v8174_v20 = vsub.f32 %v16812_v39, %v8102_v36 }
 0x5a9   : > { %4445 = vrot.lane.b32.xlu0 %v16532_v30, %s14514_s20  ;;  %v8105_v49 = vpop.xlane.xlu0 %8104 }
 0x5aa   : > { %v8175_v59 = vsub.f32 %v16816_v5, %v8105_v49  ;;  %v8217_v5 = vmul.f32 1.442695, %v8174_v20 }
 0x5ac   : > { %v8219_v51 = vmul.f32 1.442695, %v8175_v59  ;;  %v8108_v49 = vpop.xlane.xlu1 %8107 }
 0x5ad   : > { %v8176_v36 = vsub.f32 %v16820_v42, %v8108_v49 }
 0x5b2   : > { %v8111_v54 = vpop.xlane.xlu0 %8110 }
 0x5b3   : > { %v8177_v25 = vsub.f32 %v16824_v48, %v8111_v54 }
 0x5b5   : > { %v8223_v12 = vmul.f32 1.442695, %v8177_v25  ;;  %v8221_v25 = vmul.f32 1.442695, %v8176_v36 }
 0x5b7   : > { %13921 = vpow2.f32 %v8223_v12  ;;  %v16978_v12 = vpop.xlane.xlu1 %8113 }
 0x5b8   : > { %13923 = vpow2.f32 %v8219_v51 }
 0x5b9   : > { %13925 = vpow2.f32 %v8213_v26  ;;  %v8274_v26 = vsel %vm8066_vm2, %v16956_v14, 0.0 }
 0x5ba   : > { %13927 = vpow2.f32 %v8209_v41 }
 0x5bb   : > { %v16950_v48 = vpop.xlane.xlu0 %8116  ;;  %13929 = vpow2.f32 %v8217_v5 }
 0x5bd   : > { %8290 = vadd.xlane.f32.xlu1 %v8289_v7 }
 0x5c1   : > { %v16960_v61 = vpop.eup %13921  ;;  %8275 = vadd.xlane.f32.xlu1 %v8274_v26 }
 0x5c2   : > { %v16964_v54 = vpop.eup %13923  ;;  %v8301_v34 = vsel %vm8066_vm2, %v16960_v61, 0.0 }
 0x5c3   : > { %v8123_v46 = vpop.xlane.xlu0 %8122  ;;  %v16968_v44 = vpop.eup %13925  ;;  %v8295_v42 = vsel %vm8066_vm2, %v16964_v54, 0.0 }
 0x5c4   : > { %v8181_v39 = vsub.f32 %v16838_v35, %v8123_v46  ;;  %v16972_v35 = vpop.eup %13927  ;;  %v8286_v59 = vsel %vm8066_vm2, %v16968_v44, 0.0 }
 0x5c5   : > { %8296 = vadd.xlane.f32.xlu1 %v8295_v42  ;;  %v16976_v0 = vpop.eup %13929  ;;  %v8280_v31 = vsel %vm8066_vm2, %v16972_v35, 0.0 }
 0x5c6   : > { %v8231_v56 = vmul.f32 1.442695, %v8181_v39  ;;  %v8292_v51 = vsel %vm8066_vm2, %v16976_v0, 0.0 }
 0x5c8   : > { %13931 = vpow2.f32 %v8231_v56  ;;  %8302 = vadd.xlane.f32.xlu0 %v8301_v34 }
 0x5c9   : > { %13933 = vpow2.f32 %v8221_v25  ;;  %8281 = vadd.xlane.f32.xlu1 %v8280_v31 }
 0x5cc   : > { %8287 = vadd.xlane.f32.xlu0 %v8286_v59 }
 0x5d0   : > { %8293 = vadd.xlane.f32.xlu0 %v8292_v51 }
 0x5d2   : > { %v16984_v20 = vpop.eup %13931 }
 0x5d3   : > { %18611 = vst [vmem:[#allocation27_spill] sm:$0xff] %v16984_v20  ;;  %v8313_v49 = vsel %vm8066_vm2, %v16984_v20, 0.0  ;;  %v16989_v46 = vpop.eup %13933 }
 0x5d4   : > { %v8135_v41 = vpop.xlane.xlu1 %8134  ;;  %8314 = vadd.xlane.f32.xlu0 %v8313_v49  ;;  %v8298_v56 = vsel %vm8066_vm2, %v16989_v46, 0.0  ;;  %v8129_v49 = vpop.xlane.xlu0 %8128 }
 0x5d5   : > { %v8185_v5 = vsub.f32 %v16850_v53, %v8135_v41 }
 0x5d7   : > { %v8239_v7 = vmul.f32 1.442695, %v8185_v5 }
 0x5d8   : > { %v8120_v36 = vpop.xlane.xlu1 %8119  ;;  %8299 = vadd.xlane.f32.xlu0 %v8298_v56 }
 0x5d9   : > { %13935 = vpow2.f32 %v8239_v7  ;;  %v8180_v39 = vsub.f32 %v16836_v28, %v8120_v36 }
 0x5da   : > { %4447 = vrot.lane.b32.xlu1 %v16523_v63, %s14514_s20 }
 0x5db   : > { %v8229_v26 = vmul.f32 1.442695, %v8180_v39 }
 0x5dc   : > { %v16994_v25 = vpop.xlane.xlu1 %8140 }
 0x5dd   : > { %13937 = vpow2.f32 %v8229_v26 }
 0x5e0   : > { %v8126_v53 = vpop.xlane.xlu1 %8125 }
 0x5e1   : > { %v8182_v34 = vsub.f32 %v16842_v55, %v8126_v53  ;;  %v8179_v53 = vsub.f32 %v16832_v3, %v16950_v48 }
 0x5e3   : > { %v16999_v42 = vpop.eup %13935  ;;  %v8233_v59 = vmul.f32 1.442695, %v8182_v34 }
 0x5e4   : > { %18612 = vst [vmem:[#allocation29_spill] sm:$0xff] %v16999_v42  ;;  %v8147_v31 = vpop.xlane.xlu1 %8146  ;;  %v8325_v28 = vsel %vm8066_vm2, %v16999_v42, 0.0 }
 0x5e5   : > { %13939 = vpow2.f32 %v8233_v59  ;;  %v8189_v51 = vsub.f32 %v16868_v27, %v8147_v31  ;;  %8326 = vadd.xlane.f32.xlu0 %v8325_v28  ;;  %v8227_v31 = vmul.f32 1.442695, %v8179_v53  ;;  %v8183_v28 = vsub.f32 %v16844_v2, %v8129_v49 }
 0x5e6   : > { %v4510_v2 = vshrl.u32 %v16610_v6, 16  ;;  %v4509_v49 = vshrl.u32 %v16616_v16, 16  ;;  %v8178_v27 = vsub.f32 %v16828_v22, %v16978_v12 }
 0x5e7   : > { %v17004_v41 = vpop.eup %13937  ;;  %v8247_v5 = vmul.f32 1.442695, %v8189_v51 }
 0x5e8   : > { %18613 = vst [vmem:[#allocation31_spill] sm:$0xff] %v17004_v41  ;;  %v8132_v7 = vpop.xlane.xlu1 %8131  ;;  %v8310_v55 = vsel %vm8066_vm2, %v17004_v41, 0.0  ;;  %v8225_v12 = vmul.f32 1.442695, %v8178_v27 }
 0x5e9   : > { %13941 = vpow2.f32 %v8247_v5  ;;  %v8184_v36 = vsub.f32 %v16848_v24, %v8132_v7  ;;  %8311 = vadd.xlane.f32.xlu0 %v8310_v55  ;;  %v18616_v7 = vld [vmem:[#allocation38_spill] sm:$0xff] }
 0x5ea   : > { %v4501_v55 = vshrl.u32 %v18616_v7, 16  ;;  %v4499_v48 = vpack.i.b16 %v16604_v13, %v18616_v7 }
 0x5eb   : > { %v8237_v39 = vmul.f32 1.442695, %v8184_v36  ;;  %v4502_v36 = vshrl.u32 %v16604_v13, 16 }
 0x5ec   : > { %v17009_v56 = vpop.xlane.xlu0 %8152  ;;  %v4741_v7 = vcombine.high %v4499_v48, %v15108_v8 }
 0x5ed   : > { %13943 = vpow2.f32 %v8237_v39  ;;  %v4507_v39 = vpack.i.b16 %v16610_v6, %v16616_v16  ;;  %v4503_v13 = vpack.i.b16 %v4502_v36, %v4501_v55  ;;  %v4748_v16 = vrot.slane %v4499_v48, %v15112_v1 }
 0x5ee   : > { %13945 = vpow2.f32 %v8227_v31  ;;  %v4511_v31 = vpack.i.b16 %v4510_v2, %v4509_v49 }
 0x5ef   : > { %v17013_v26 = vpop.eup %13939  ;;  %v4756_v6 = vcombine.high %v4507_v39, %v15108_v8  ;;  %v4814_v27 = vrot.slane %v4503_v13, %v15112_v1 }
 0x5f0   : > { %18614 = vst [vmem:[#allocation32_spill] sm:$0xff] %v17013_v26  ;;  %v17017_v34 = vpop.xlane.xlu0 %8137  ;;  %v8316_v59 = vsel %vm8066_vm2, %v17013_v26, 0.0  ;;  %v4822_v2 = vcombine.high %v4511_v31, %v15108_v8 }
 0x5f1   : > { %8317 = vadd.xlane.f32.xlu0 %v8316_v59  ;;  %v4770_v48 = vrot.slane %v4756_v6, %v15112_v1  ;;  %v4526_v6 = vshrl.u32 %v16899_v58, 16 }
 0x5f3   : > { %v17021_v24 = vpop.eup %13941 }
 0x5f4   : > { %18615 = vst [vmem:[#allocation30_spill] sm:$0xff] %v17021_v24  ;;  %v8144_v51 = vpop.xlane.xlu0 %8143  ;;  %v8337_v5 = vsel %vm8066_vm2, %v17021_v24, 0.0  ;;  %v8235_v24 = vmul.f32 1.442695, %v8183_v28  ;;  %v8187_v28 = vsub.f32 %v16858_v23, %v16994_v25  ;;  %v4829_v23 = vrot.slane %v4511_v31, %v15112_v1 }
 0x5f5   : > { %v8188_v3 = vsub.f32 %v16862_v10, %v8144_v51  ;;  %8338 = vadd.xlane.f32.xlu0 %v8337_v5  ;;  %v4515_v31 = vpack.i.b16 %v16864_v38, %v16342_v18 }
 0x5f6   : > { %v8243_v49 = vmul.f32 1.442695, %v8187_v28 }
 0x5f7   : > { %v17033_v53 = vpop.eup %13943  ;;  %v8245_v59 = vmul.f32 1.442695, %v8188_v3  ;;  %v4763_v3 = vrot.slane %v4507_v39, %v15112_v1  ;;  %v4517_v39 = vshrl.u32 %v16342_v18, 16 }
 0x5f8   : > { %18617 = vst [vmem:[#allocation34_spill] sm:$0xff] %v17033_v53  ;;  %v8150_v10 = vpop.xlane.xlu0 %8149  ;;  %v8322_v51 = vsel %vm8066_vm2, %v17033_v53, 0.0 }
 0x5f9   : > { %v8190_v5 = vsub.f32 %v16872_v29, %v8150_v10  ;;  %8323 = vadd.xlane.f32.xlu0 %v8322_v51  ;;  %13947 = vpow2.f32 %v8245_v59  ;;  %v4807_v29 = vcombine.high %v4503_v13, %v15108_v8  ;;  %v4755_v59 = vrot.slane %v4741_v7, %v15112_v1 }
 0x5fa   : > { %13949 = vpow2.f32 %v8235_v24  ;;  %v4771_v24 = vcombine.low %v4748_v16, %v4763_v3  ;;  %v4772_v25 = vcombine.high %v4748_v16, %v4763_v3  ;;  %v8186_v10 = vsub.f32 %v16854_v15, %v17017_v34 }
 0x5fb   : > { %v8249_v22 = vmul.f32 1.442695, %v8190_v5  ;;  %v4821_v5 = vrot.slane %v4807_v29, %v15112_v1  ;;  %v4525_v7 = vshrl.u32 %v16885_v17, 16  ;;  %v4518_v13 = vshrl.u32 %v16864_v38, 16 }
 0x5fc   : > { %v17048_v55 = vpop.xlane.xlu0 %8161  ;;  %v4787_v36 = vcombine.low %v4755_v59, %v4770_v48  ;;  %v4523_v16 = vpack.i.b16 %v16899_v58, %v16885_v17  ;;  %v4788_v15 = vcombine.high %v4755_v59, %v4770_v48  ;;  %v4836_v34 = vrot.slane %v4822_v2, %v15112_v1 }
 0x5fd   : > { %13951 = vpow2.f32 %v8249_v22  ;;  %v17065_v22 = vpop.eup %13945  ;;  %v4837_v3 = vcombine.low %v4814_v27, %v4829_v23  ;;  %v4779_v29 = vrot.slane %v4771_v24, %v15122_v47  ;;  %v4786_v53 = vrot.slane %v4772_v25, %v15122_v47 }
 0x5fe   : > { %13953 = vpow2.f32 %v8225_v12  ;;  %v4838_v12 = vcombine.high %v4814_v27, %v4829_v23  ;;  %v8241_v42 = vmul.f32 1.442695, %v8186_v10  ;;  %v4527_v26 = vpack.i.b16 %v4526_v6, %v4525_v7 }
 0x5ff   : > { %v4519_v41 = vpack.i.b16 %v4518_v13, %v4517_v39  ;;  %v8307_v18 = vsel %vm8066_vm2, %v17065_v22, 0.0  ;;  %v17083_v17 = vrot.slane %v4787_v36, %v15122_v47  ;;  %v4888_v59 = vcombine.high %v4523_v16, %v15108_v8 }
 0x600   : > { %v8261_v51 = vpop.xlane.xlu0 %8260  ;;  %v4873_v48 = vcombine.high %v4515_v31, %v15108_v8  ;;  %8308 = vadd.xlane.f32.xlu1 %v8307_v18  ;;  %v17090_v39 = vrot.slane %v4788_v15, %v15122_v47  ;;  %v17093_v24 = vrot.slane %v4837_v3, %v15122_v47  ;;  %v17096_v2 = vrot.slane %v4838_v12, %v15122_v47 }
 0x601   : > { %13955 = vrcp.f32 %v8261_v51  ;;  %v4853_v23 = vcombine.low %v4821_v5, %v4836_v34  ;;  %v4854_v36 = vcombine.high %v4821_v5, %v4836_v34  ;;  %v4895_v25 = vrot.slane %v4523_v16, %v15112_v1 }
 0x602   : > { %13957 = vpow2.f32 %v8243_v49  ;;  %v4880_v49 = vrot.slane %v4515_v31, %v15112_v1  ;;  %v4954_v10 = vcombine.high %v4527_v26, %v15108_v8  ;;  %v4939_v51 = vcombine.high %v4519_v41, %v15108_v8 }
 0x603   : > { %v17072_v28 = vpop.eup %13947  ;;  %13959 = vpow2.f32 %v8241_v42  ;;  %v5765_v15 = vcombine.low %v4779_v29, %v4786_v53  ;;  %v4902_v5 = vrot.slane %v4888_v59, %v15112_v1  ;;  %v4887_v16 = vrot.slane %v4873_v48, %v15112_v1 }
 0x604   : > { %18618 = vst [vmem:[#allocation33_spill] sm:$0xff] %v17072_v28  ;;  %v8334_v58 = vsel %vm8066_vm2, %v17072_v28, 0.0  ;;  %v17080_v38 = vpop.eup %13949  ;;  %v4861_v42 = vrot.slane %v4853_v23, %v15122_v47  ;;  %v12588_v31 = vcombine.high %v4779_v29, %v4786_v53  ;;  %v4961_v34 = vrot.slane %v4527_v26, %v15112_v1 }
 0x605   : > { %18619 = vst [vmem:[#allocation37_spill] sm:$0xff] %v17080_v38  ;;  %8335 = vadd.xlane.f32.xlu0 %v8334_v58  ;;  %v8319_v6 = vsel %vm8066_vm2, %v17080_v38, 0.0  ;;  %v4946_v3 = vrot.slane %v4519_v41, %v15112_v1  ;;  %v4868_v58 = vrot.slane %v4854_v36, %v15122_v47  ;;  %v5781_v18 = vcombine.low %v17083_v17, %v17090_v39 }
 0x606   : > { %8320 = vadd.xlane.f32.xlu1 %v8319_v6  ;;  %v12589_v59 = vcombine.high %v17083_v17, %v17090_v39  ;;  %v4968_v48 = vrot.slane %v4954_v10, %v15112_v1  ;;  %v17126_v29 = vrot.slane %v5765_v15, %v15112_v1  ;;  %v4904_v23 = vcombine.high %v4880_v49, %v4895_v25 }
 0x607   : > { %v17087_v27 = vpop.eup %13951  ;;  %v4919_v36 = vcombine.low %v4887_v16, %v4902_v5  ;;  %v4920_v6 = vcombine.high %v4887_v16, %v4902_v5  ;;  %v5780_v17 = vrot.slane %v12588_v31, %v15112_v1  ;;  %v5815_v39 = vcombine.low %v17093_v24, %v17096_v2 }
 0x608   : > { %18620 = vst [vmem:[#allocation49_spill] sm:$0xff] %v17087_v27  ;;  %v8340_v7 = vsel %vm8066_vm2, %v17087_v27, 0.0  ;;  %v17106_v13 = vpop.eup %13953  ;;  %v4903_v27 = vcombine.low %v4880_v49, %v4895_v25  ;;  %v4969_v10 = vcombine.low %v4946_v3, %v4961_v34  ;;  %v12591_v28 = vcombine.high %v4861_v42, %v4868_v58  ;;  %v17134_v49 = vpop.xlane.xlu1 %8158 }
 0x609   : > { %18621 = vst [vmem:[#allocation47_spill] sm:$0xff] %v17106_v13  ;;  %8341 = vadd.xlane.f32.xlu0 %v8340_v7  ;;  %v4953_v7 = vrot.slane %v4939_v51, %v15112_v1  ;;  %v8304_v26 = vsel %vm8066_vm2, %v17106_v13, 0.0  ;;  %v4970_v15 = vcombine.high %v4946_v3, %v4961_v34  ;;  %v8273_v5 = vpop.xlane.xlu0 %8272  ;;  %v5788_v34 = vrot.slane %v5781_v18, %v15112_v1 }
 0x60a   : > { %8305 = vadd.xlane.f32.xlu1 %v8304_v26  ;;  %v4911_v38 = vrot.slane %v4903_v27, %v15122_v47  ;;  %v18624_v27 = vpack.i.b16 %v16722_v4, %v16719_v9  ;;  %v5796_v3 = vrot.slane %v12589_v59, %v15112_v1  ;;  %v5846_v9 = vrot.slane %v12591_v28, %v15112_v1 }
 0x60b   : > { %v13956_v12 = vpop.eup %13955  ;;  %v4985_v13 = vcombine.low %v4953_v7, %v4968_v48  ;;  %v4986_v25 = vcombine.high %v4953_v7, %v4968_v48  ;;  %v4984_v4 = vrot.slane %v4970_v15, %v15122_v47 }
 0x60c   : > { %v8387_v53 = vmul.f32 %v13956_v12, %v16903_v52  ;;  %v17123_v41 = vpop.eup %13957  ;;  %v12590_v52 = vcombine.high %v17093_v24, %v17096_v2  ;;  %v5831_v12 = vcombine.low %v4861_v42, %v4868_v58  ;;  %v4927_v24 = vrot.slane %v4919_v36, %v15122_v47  ;;  %v8156_v36 = vpop.xlane.xlu1 %8155 }
 0x60d   : > { %18622 = vst [vmem:[#allocation48_spill] sm:$0xff] %v17123_v41  ;;  %v8331_v16 = vsel %vm8066_vm2, %v17123_v41, 0.0  ;;  %v17139_v31 = vpop.eup %13959  ;;  %v4934_v2 = vrot.slane %v4920_v6, %v15122_v47  ;;  %v4977_v42 = vrot.slane %v4969_v10, %v15122_v47  ;;  %v5822_v58 = vrot.slane %v5815_v39, %v15112_v1  ;;  %v8264_v6 = vpop.xlane.xlu0 %8263 }
 0x60e   : > { %v8419_v51 = vpack.c.bf16 %v8387_v53, %v8387_v53  ;;  %18623 = vst [vmem:[#allocation55_spill] sm:$0xff] %v17139_v31  ;;  %v4918_v53 = vrot.slane %v4904_v23, %v15122_v47  ;;  %8332 = vadd.xlane.f32.xlu1 %v8331_v16  ;;  %v5830_v48 = vrot.slane %v12590_v52, %v15112_v1  ;;  %v8328_v18 = vsel %vm8066_vm2, %v17139_v31, 0.0 }
 0x60f   : > { %v5838_v7 = vrot.slane %v5831_v12, %v15112_v1  ;;  %v4993_v26 = vrot.slane %v4985_v13, %v15122_v47  ;;  %v5000_v23 = vrot.slane %v4986_v25, %v15122_v47  ;;  %13961 = vrcp.f32 %v8264_v6 }
 0x610   : > { %13358 = vmatmul.mubr.msk.bf16.vlgmr.msra.gmra.mrb[72].mxu0 %vm8066_vm2, %v8419_v51  ;;  %v5865_v59 = vcombine.low %v4911_v38, %v4918_v53  ;;  %v12592_v39 = vcombine.high %v4911_v38, %v4918_v53  ;;  %v5881_v10 = vcombine.low %v4927_v24, %v4934_v2  ;;  %v12593_v51 = vcombine.high %v4927_v24, %v4934_v2 }
 0x611   : > { %13368 = vmatpush3.bf16.msra.mxu0 %v18624_v27  ;;  %13369 = vmatprep.mubr.msk.bf16.mxu0 %vm14520_vm1, %v18497_v33  ;;  %v5797_v52 = vcombine.low %v17126_v29, %v5780_v17  ;;  %v5805_v28 = vcombine.low %v5788_v34, %v5796_v3  ;;  %v5847_v12 = vcombine.low %v5822_v58, %v5830_v48  ;;  %v8267_v41 = vpop.xlane.xlu1 %8266  ;;  %13963 = vrcp.f32 %v8273_v5  ;;  %v8279_v6 = vpop.xlane.xlu0 %8278 }
 0x612   : > { %13379 = vmatprep.subr.bf16.mxu0 %v18497_v33  ;;  %8329 = vadd.xlane.f32.xlu1 %v8328_v18  ;;  %v5855_v15 = vcombine.low %v5838_v7, %v5846_v9  ;;  %v5915_v16 = vcombine.low %v4977_v42, %v4984_v4  ;;  %v12594_v13 = vcombine.high %v4977_v42, %v4984_v4  ;;  %13965 = vrcp.f32 %v8267_v41 }
 0x613   : > { %v5931_v27 = vcombine.low %v4993_v26, %v5000_v23  ;;  %v12595_v25 = vcombine.high %v4993_v26, %v5000_v23  ;;  %v5872_v20 = vrot.slane %v5865_v59, %v15112_v1  ;;  %v5880_v31 = vrot.slane %v12592_v39, %v15112_v1 }
 0x614   : > { %v5888_v38 = vrot.slane %v5881_v10, %v15112_v1  ;;  %v5896_v53 = vrot.slane %v12593_v51, %v15112_v1  ;;  %v5804_v29 = vrot.slane %v5797_v52, %v15122_v47  ;;  %v5812_v17 = vrot.slane %v5805_v28, %v15122_v47 }
 0x615   : > { %v5854_v24 = vrot.slane %v5847_v12, %v15122_v47  ;;  %v5862_v2 = vrot.slane %v5855_v15, %v15122_v47  ;;  %v4462_v42 = vpop.permute.xlu1 %4461  ;;  %v5922_v34 = vrot.slane %v5915_v16, %v15112_v1  ;;  %v5930_v5 = vrot.slane %v12594_v13, %v15112_v1 }
 0x616   : > { %v5938_v3 = vrot.slane %v5931_v27, %v15112_v1  ;;  %v5946_v41 = vrot.slane %v12595_v25, %v15112_v1  ;;  %v5897_v48 = vcombine.low %v5872_v20, %v5880_v31  ;;  %v5905_v7 = vcombine.low %v5888_v38, %v5896_v53 }
 0x617   : > { %13967 = vrcp.f32 %v8279_v6  ;;  %v5813_v4 = vcombine.low %v5804_v29, %v5812_v17  ;;  %v5863_v26 = vcombine.low %v5854_v24, %v5862_v2  ;;  %v17177_v23 = vcombine.high %v5804_v29, %v5812_v17 }
 0x618   : > { %v8192_v18 = vsub.f32 %v16881_v11, %v8156_v36  ;;  %v5947_v10 = vcombine.low %v5922_v34, %v5930_v5  ;;  %v5955_v51 = vcombine.low %v5938_v3, %v5946_v41  ;;  %v4589_v52 = vshrl.u32 %v4462_v42, 16 }
 0x619   : > { %v13962_v9 = vpop.eup %13961  ;;  %v4478_v39 = vpop.permute.xlu1 %4477  ;;  %v17181_v31 = vcombine.high %v5854_v24, %v5862_v2  ;;  %v17184_v16 = vrot.slane %v5897_v48, %v15122_v47  ;;  %v6485_v25 = vshrl.u32 %v5813_v4, 16  ;;  %v17187_v11 = vrot.slane %v5905_v7, %v15122_v47 }
 0x61a   : > { %v8388_v59 = vmul.f32 %v13962_v9, %v16916_v60  ;;  %v4587_v28 = vpack.i.b16 %v4478_v39, %v4462_v42  ;;  %v4590_v20 = vshrl.u32 %v4478_v39, 16  ;;  %v8253_v36 = vmul.f32 1.442695, %v8192_v18 }
 0x61b   : > { %v13964_v13 = vpop.eup %13963  ;;  %v6486_v6 = vshrl.u32 %v5863_v26, 16  ;;  %v17191_v38 = vrot.slane %v5947_v10, %v15122_v47  ;;  %v17194_v53 = vrot.slane %v5955_v51, %v15122_v47  ;;  %v6483_v17 = vpack.i.b16 %v5863_v26, %v5813_v4 }
 0x61c   : > { %v8285_v58 = vpop.xlane.xlu0 %8284  ;;  %v8420_v12 = vpack.c.bf16 %v8388_v59, %v8388_v59  ;;  %v4591_v27 = vpack.i.b16 %v4590_v20, %v4589_v52  ;;  %v13966_v60 = vpop.eup %13965  ;;  %v6491_v24 = vpack.i.b16 %v17181_v31, %v17177_v23  ;;  %v8193_v2 = vsub.f32 %v16887_v37, %v17134_v49 }
 0x61d   : > { %v8389_v29 = vmul.f32 %v13966_v60, %v16925_v40  ;;  %v8391_v42 = vmul.f32 %v13964_v13, %v16911_v43  ;;  %v5416_v34 = vcombine.high %v4587_v28, %v15108_v8  ;;  %v4581_v5 = vshrl.u32 %v16532_v30, 16 }
 0x61e   : > { %13364 = vmatmul.mubr.msk.bf16.vlgmr.msra.gmra.mrb[96].mxu1 %vm8066_vm2, %v8420_v12  ;;  %v17213_v37 = vcombine.low %v17184_v16, %v17187_v11  ;;  %v5482_v43 = vcombine.high %v4591_v27, %v15108_v8  ;;  %v17216_v49 = vpack.i.b16 %v6486_v6, %v6485_v25  ;;  %v17220_v48 = vcombine.low %v17191_v38, %v17194_v53 }
 0x61f   : > { %4463 = vrot.lane.b32.xlu0 %v16523_v63, %s14513_s18  ;;  %13374 = vmatpush3.bf16.msra.mxu1 %v16732_v19  ;;  %v8421_v41 = vpack.c.bf16 %v8389_v29, %v8389_v29  ;;  %v8255_v18 = vmul.f32 1.442695, %v8193_v2  ;;  %v5430_v59 = vrot.slane %v5416_v34, %v15112_v1  ;;  %v8423_v39 = vpack.c.bf16 %v8391_v42, %v8391_v42 }
 0x620   : > { %v8270_v15 = vpop.xlane.xlu0 %8269  ;;  %13375 = vmatprep.mubr.msk.bf16.mxu1 %vm14520_vm1, %v18497_v33  ;;  %13385 = vmatprep.subr.bf16.mxu1 %v18497_v33  ;;  %v5489_v12 = vrot.slane %v4591_v27, %v15112_v1 }
 0x621   : > { %13969 = vrcp.f32 %v8270_v15  ;;  %v13968_v7 = vpop.eup %13967  ;;  %13370 = vmatmul.mubr.msk.bf16.vlgmr.msra.gmra.mrb[76].mxu0 %vm8066_vm2, %v8421_v41 }
 0x622   : > { %13971 = vpow2.f32 %v8253_v36  ;;  %13380 = vmatpush3.bf16.msra.mxu0 %v6483_v17  ;;  %13381 = vmatprep.mubr.msk.bf16.mxu0 %vm14520_vm1, %v18497_v33  ;;  %v8393_v20 = vmul.f32 %v13968_v7, %v16918_v32 }
 0x623   : > { %4479 = vrot.lane.b32.xlu1 %v16523_v63, %s14515_s19  ;;  %13973 = vrcp.f32 %v8285_v58  ;;  %13391 = vmatprep.subr.bf16.mxu0 %v18497_v33  ;;  %v5496_v58 = vrot.slane %v5482_v43, %v15112_v1 }
 0x624   : > { %v4446_v3 = vpop.permute.xlu0 %4445  ;;  %13975 = vpow2.f32 %v8255_v18 }
 0x625   : > { %v4579_v19 = vpack.i.b16 %v4446_v3, %v16532_v30  ;;  %v4582_v40 = vshrl.u32 %v4446_v3, 16  ;;  %v5423_v30 = vrot.slane %v4587_v28, %v15112_v1 }
 0x627   : > { %v4583_v9 = vpack.i.b16 %v4582_v40, %v4581_v5  ;;  %v5401_v4 = vcombine.high %v4579_v19, %v15108_v8  ;;  %v5408_v26 = vrot.slane %v4579_v19, %v15112_v1 }
 0x629   : > { %v5415_v10 = vrot.slane %v5401_v4, %v15112_v1  ;;  %v5431_v51 = vcombine.low %v5408_v26, %v5423_v30  ;;  %v5432_v52 = vcombine.high %v5408_v26, %v5423_v30  ;;  %v5467_v28 = vcombine.high %v4583_v9, %v15108_v8  ;;  %13382 = vmatmul.mubr.msk.bf16.vlgmr.msra.gmra.mrb[80].mxu0 %vm8066_vm2, %v8423_v39 }
 0x62a   : > { %v5474_v15 = vrot.slane %v4583_v9, %v15112_v1  ;;  %13392 = vmatpush3.bf16.msra.mxu0 %v6491_v24  ;;  %13393 = vmatprep.mubr.msk.bf16.mxu0 %vm14520_vm1, %v18497_v33 }
 0x62b   : > { %v13970_v13 = vpop.eup %13969  ;;  %v5439_v25 = vrot.slane %v5431_v51, %v15122_v47  ;;  %v5446_v60 = vrot.slane %v5432_v52, %v15122_v47  ;;  %v5447_v36 = vcombine.low %v5415_v10, %v5430_v59  ;;  %v5448_v6 = vcombine.high %v5415_v10, %v5430_v59  ;;  %13403 = vmatprep.subr.bf16.mxu0 %v18497_v33 }
 0x62c   : > { %v8390_v29 = vmul.f32 %v13970_v13, %v16933_v45  ;;  %v5481_v17 = vrot.slane %v5467_v28, %v15112_v1  ;;  %v5497_v2 = vcombine.low %v5474_v15, %v5489_v12  ;;  %v5498_v42 = vcombine.high %v5474_v15, %v5489_v12  ;;  %v17247_v9 = vpop.eup %13971 }
 0x62d   : > { %v5455_v32 = vrot.slane %v5447_v36, %v15122_v47  ;;  %v5462_v27 = vrot.slane %v5448_v6, %v15122_v47  ;;  %v6265_v34 = vcombine.low %v5439_v25, %v5446_v60  ;;  %v12608_v5 = vcombine.high %v5439_v25, %v5446_v60  ;;  %v13974_v39 = vpop.eup %13973 }
 0x62e   : > { %v5505_v3 = vrot.slane %v5497_v2, %v15122_v47  ;;  %v5512_v19 = vrot.slane %v5498_v42, %v15122_v47  ;;  %v5513_v40 = vcombine.low %v5481_v17, %v5496_v58  ;;  %v5514_v41 = vcombine.high %v5481_v17, %v5496_v58 }
 0x62f   : > { %v6272_v43 = vrot.slane %v6265_v34, %v15112_v1  ;;  %v6280_v45 = vrot.slane %v12608_v5, %v15112_v1  ;;  %v6281_v7 = vcombine.low %v5455_v32, %v5462_v27  ;;  %v12609_v30 = vcombine.high %v5455_v32, %v5462_v27 }
 0x630   : > { %v5521_v4 = vrot.slane %v5513_v40, %v15122_v47  ;;  %v5528_v26 = vrot.slane %v5514_v41, %v15122_v47  ;;  %v6315_v59 = vcombine.low %v5505_v3, %v5512_v19  ;;  %v12610_v10 = vcombine.high %v5505_v3, %v5512_v19 }
 0x631   : > { %v6288_v51 = vrot.slane %v6281_v7, %v15112_v1  ;;  %v6296_v52 = vrot.slane %v12609_v30, %v15112_v1  ;;  %v8422_v28 = vpack.c.bf16 %v8390_v29, %v8390_v29  ;;  %v6297_v24 = vcombine.low %v6272_v43, %v6280_v45 }
 0x632   : > { %v6322_v12 = vrot.slane %v6315_v59, %v15112_v1  ;;  %v6330_v58 = vrot.slane %v12610_v10, %v15112_v1  ;;  %v6331_v15 = vcombine.low %v5521_v4, %v5528_v26  ;;  %v12611_v13 = vcombine.high %v5521_v4, %v5528_v26  ;;  %v18627_v10 = vld [vmem:[#allocation40_spill] sm:$0xff] }
 0x633   : > { %13376 = vmatmul.mubr.msk.bf16.vlgmr.msra.gmra.mrb[100].mxu1 %vm8066_vm2, %v8422_v28  ;;  %v6305_v18 = vcombine.low %v6288_v51, %v6296_v52  ;;  %v8425_v6 = vpack.c.bf16 %v8393_v20, %v8393_v20  ;;  %v6304_v29 = vrot.slane %v6297_v24, %v15122_v47  ;;  %v18625_v2 = vsub.f32 %v16877_v62, %v17009_v56  ;;  %v18628_v52 = vld [vmem:[#allocation41_spill] sm:$0xff] }
 0x634   : > { %13386 = vmatpush3.bf16.msra.mxu1 %v17216_v49  ;;  %13387 = vmatprep.mubr.msk.bf16.mxu1 %vm14520_vm1, %v18497_v33  ;;  %v6338_v25 = vrot.slane %v6331_v15, %v15112_v1  ;;  %v6346_v60 = vrot.slane %v12611_v13, %v15112_v1  ;;  %v6347_v36 = vcombine.low %v6322_v12, %v6330_v58  ;;  %v8346_v45 = vsel %vm8066_vm2, %v17247_v9, 0.0  ;;  %v18630_v58 = vld [vmem:[#allocation26_spill] sm:$0xff] }
 0x635   : > { %13397 = vmatprep.subr.bf16.mxu1 %v18497_v33  ;;  %v6312_v17 = vrot.slane %v6305_v18, %v15122_v47  ;;  %v8251_v42 = vmul.f32 1.442695, %v18625_v2  ;;  %v6499_v49 = vpack.i.b16 %v17220_v48, %v17213_v37  ;;  %13394 = vmatmul.mubr.msk.bf16.vlgmr.msra.gmra.mrb[84].mxu0 %vm8066_vm2, %v8425_v6  ;;  %v8395_v62 = vmul.f32 %v13974_v39, %v16929_v50  ;;  %v17301_v50 = vpop.eup %13975  ;;  %v18629_v39 = vld [vmem:[#allocation51_spill] sm:$0xff] }
 0x636   : > { %v6355_v32 = vcombine.low %v6338_v25, %v6346_v60  ;;  %13405 = vmatprep.mubr.msk.bf16.mxu0 %vm14520_vm1, %v18497_v33  ;;  %v6354_v20 = vrot.slane %v6347_v36, %v15122_v47  ;;  %v17288_v56 = vcombine.high %v17184_v16, %v17187_v11  ;;  %v17292_v3 = vcombine.high %v17191_v38, %v17194_v53 }
 0x637   : > { %v17276_v27 = vcombine.low %v6304_v29, %v6312_v17  ;;  %v17278_v34 = vcombine.high %v6304_v29, %v6312_v17  ;;  %13404 = vmatpush3.bf16.msra.mxu0 %v6499_v49  ;;  %13977 = vpow2.f32 %v8251_v42  ;;  %v18626_v19 = vsub.f32 %v16893_v57, %v17048_v55 }
 0x638   : > { %v6362_v5 = vrot.slane %v6355_v32, %v15122_v47  ;;  %13415 = vmatprep.subr.bf16.mxu0 %v18497_v33  ;;  %v8427_v7 = vpack.c.bf16 %v8395_v62, %v8395_v62  ;;  %v6507_v30 = vpack.i.b16 %v17292_v3, %v17288_v56  ;;  %v8349_v59 = vsel %vm8066_vm2, %v17301_v50, 0.0 }
 0x639   : > { %v8257_v40 = vmul.f32 1.442695, %v18626_v19  ;;  %v6565_v16 = vshrl.u32 %v17276_v27, 16  ;;  %v6573_v11 = vshrl.u32 %v17278_v34, 16  ;;  %v4557_v51 = vshrl.u32 %v18627_v10, 16 }
 0x63a   : > { %v17297_v41 = vcombine.low %v6354_v20, %v6362_v5  ;;  %v17299_v43 = vcombine.high %v6354_v20, %v6362_v5  ;;  %v4558_v28 = vshrl.u32 %v18628_v52, 16  ;;  %v4549_v12 = vshrl.u32 %v18629_v39, 16 }
 0x63b   : > { %13979 = vpow2.f32 %v8257_v40  ;;  %v4550_v15 = vshrl.u32 %v18630_v58, 16  ;;  %v4555_v24 = vpack.i.b16 %v18628_v52, %v18627_v10  ;;  %v4547_v18 = vpack.i.b16 %v18630_v58, %v18629_v39 }
 0x63c   : > { %v6563_v38 = vpack.i.b16 %v17297_v41, %v17276_v27  ;;  %v6571_v57 = vpack.i.b16 %v17299_v43, %v17278_v34  ;;  %v6566_v55 = vshrl.u32 %v17297_v41, 16  ;;  %v6574_v53 = vshrl.u32 %v17299_v43, 16 }
 0x63d   : > { %13406 = vmatmul.mubr.msk.bf16.vlgmr.msra.gmra.mrb[88].mxu0 %vm8066_vm2, %v8427_v7  ;;  %v4559_v25 = vpack.i.b16 %v4558_v28, %v4557_v51  ;;  %v4551_v60 = vpack.i.b16 %v4550_v15, %v4549_v12  ;;  %v5152_v29 = vcombine.high %v4555_v24, %v15108_v8  ;;  %v5137_v17 = vcombine.high %v4547_v18, %v15108_v8 }
 0x63e   : > { %8347 = vadd.xlane.f32.xlu0 %v8346_v45  ;;  %v17315_v4 = vpack.i.b16 %v6566_v55, %v6565_v16  ;;  %v17317_v26 = vpack.i.b16 %v6574_v53, %v6573_v11  ;;  %13416 = vmatpush3.bf16.msra.mxu0 %v6507_v30  ;;  %v5159_v49 = vrot.slane %v4555_v24, %v15112_v1 }
 0x63f   : > { %13417 = vmatprep.mubr.msk.bf16.mxu0 %vm14520_vm1, %v18497_v33  ;;  %13427 = vmatprep.subr.bf16.mxu0 %v18497_v33  ;;  %v5218_v2 = vcombine.high %v4559_v25, %v15108_v8  ;;  %v5203_v42 = vcombine.high %v4551_v60, %v15108_v8  ;;  %v5144_v32 = vrot.slane %v4547_v18, %v15112_v1 }
 0x640   : > { %v5166_v5 = vrot.slane %v5152_v29, %v15112_v1  ;;  %v5151_v62 = vrot.slane %v5137_v17, %v15112_v1  ;;  %v5225_v19 = vrot.slane %v4559_v25, %v15112_v1  ;;  %v5210_v45 = vrot.slane %v4551_v60, %v15112_v1 }
 0x641   : > { %v17329_v13 = vpop.eup %13977  ;;  %v5232_v40 = vrot.slane %v5218_v2, %v15112_v1  ;;  %v5217_v16 = vrot.slane %v5203_v42, %v15112_v1  ;;  %v5167_v11 = vcombine.low %v5144_v32, %v5159_v49  ;;  %v5168_v53 = vcombine.high %v5144_v32, %v5159_v49 }
 0x642   : > { %8350 = vadd.xlane.f32.xlu0 %v8349_v59  ;;  %v8343_v36 = vsel %vm8066_vm2, %v17329_v13, 0.0  ;;  %v5183_v7 = vcombine.low %v5151_v62, %v5166_v5  ;;  %v5184_v30 = vcombine.high %v5151_v62, %v5166_v5  ;;  %v5233_v59 = vcombine.low %v5210_v45, %v5225_v19 }
 0x643   : > { %v5234_v10 = vcombine.high %v5210_v45, %v5225_v19  ;;  %v5249_v51 = vcombine.low %v5217_v16, %v5232_v40  ;;  %v5250_v52 = vcombine.high %v5217_v16, %v5232_v40  ;;  %v5175_v28 = vrot.slane %v5167_v11, %v15122_v47 }
 0x644   : > { %v5182_v12 = vrot.slane %v5168_v53, %v15122_v47  ;;  %v5191_v58 = vrot.slane %v5183_v7, %v15122_v47  ;;  %v5198_v15 = vrot.slane %v5184_v30, %v15122_v47  ;;  %v5241_v18 = vrot.slane %v5233_v59, %v15122_v47 }
 0x645   : > { %v17337_v6 = vpop.eup %13979  ;;  %v5248_v25 = vrot.slane %v5234_v10, %v15122_v47  ;;  %v5257_v60 = vrot.slane %v5249_v51, %v15122_v47  ;;  %v6493_v30 = vshrl.u32 %v17177_v23, 16  ;;  %v6494_v59 = vshrl.u32 %v17181_v31, 16  ;;  %v18632_v23 = vld [vmem:[#allocation36_spill] sm:$0xff] }
 0x646   : > { %v8352_v20 = vsel %vm8066_vm2, %v17337_v6, 0.0  ;;  %v6065_v17 = vcombine.low %v5175_v28, %v5182_v12  ;;  %v12600_v2 = vcombine.high %v5175_v28, %v5182_v12  ;;  %v6081_v42 = vcombine.low %v5191_v58, %v5198_v15 }
 0x647   : > { %8344 = vadd.xlane.f32.xlu1 %v8343_v36  ;;  %v5264_v36 = vrot.slane %v5250_v52, %v15122_v47  ;;  %v12601_v49 = vcombine.high %v5191_v58, %v5198_v15  ;;  %v12602_v5 = vcombine.high %v5241_v18, %v5248_v25  ;;  %v18631_v58 = vld [vmem:[#allocation43_spill] sm:$0xff] }
 0x648   : > { %v6072_v11 = vrot.slane %v6065_v17, %v15112_v1  ;;  %v6088_v53 = vrot.slane %v6081_v42, %v15112_v1  ;;  %v18633_v15 = vpack.i.b16 %v18631_v58, %v18632_v23  ;;  %v18637_v23 = vld [vmem:[#allocation50_spill] sm:$0xff] }
 0x649   : > { %v6131_v62 = vcombine.low %v5257_v60, %v5264_v36  ;;  %v12603_v19 = vcombine.high %v5257_v60, %v5264_v36  ;;  %v6096_v10 = vrot.slane %v12601_v49, %v15112_v1  ;;  %v6130_v52 = vrot.slane %v12602_v5, %v15112_v1 }
 0x64a   : > { %v8291_v55 = vpop.xlane.xlu1 %8290  ;;  %v6495_v60 = vpack.i.b16 %v6494_v59, %v6493_v30  ;;  %v6501_v49 = vshrl.u32 %v17213_v37, 16  ;;  %v6502_v5 = vshrl.u32 %v17220_v48, 16  ;;  %v18634_v37 = vld [vmem:[#allocation44_spill] sm:$0xff] }
 0x64b   : > { %8353 = vadd.xlane.f32.xlu1 %v8352_v20  ;;  %13981 = vrcp.f32 %v8291_v55  ;;  %v6115_v20 = vcombine.low %v5241_v18, %v5248_v25  ;;  %v6080_v55 = vrot.slane %v12600_v2, %v15112_v1  ;;  %v6138_v28 = vrot.slane %v6131_v62, %v15112_v1 }
 0x64c   : > { %v6105_v36 = vcombine.low %v6088_v53, %v6096_v10 }
 0x64d   : > { %v6097_v18 = vcombine.low %v6072_v11, %v6080_v55 }
 0x64e   : > { %v8276_v39 = vpop.xlane.xlu1 %8275 }
 0x64f   : > { %13983 = vrcp.f32 %v8276_v39  ;;  %v6146_v39 = vrot.slane %v12603_v19, %v15112_v1 }
 0x652   : > { %v8297_v29 = vpop.xlane.xlu1 %8296 }
 0x653   : > { %13985 = vrcp.f32 %v8297_v29 }
 0x655   : > { %v8303_v24 = vpop.xlane.xlu0 %8302  ;;  %v13982_v32 = vpop.eup %13981 }
 0x656   : > { %v8397_v40 = vmul.f32 %v13982_v32, %v16952_v21  ;;  %13987 = vrcp.f32 %v8303_v24  ;;  %v8282_v16 = vpop.xlane.xlu1 %8281  ;;  %v6122_v21 = vrot.slane %v6115_v20, %v15112_v1  ;;  %v17387_v32 = vrot.slane %v6097_v18, %v15122_v47  ;;  %v18639_v18 = vld [vmem:[#allocation25_spill] sm:$0xff] }
 0x657   : > { %13989 = vrcp.f32 %v8282_v16  ;;  %v18635_v16 = vld [vmem:[#allocation35_spill] sm:$0xff] }
 0x658   : > { %v8429_v7 = vpack.c.bf16 %v8397_v40, %v8397_v40  ;;  %v6147_v29 = vcombine.low %v6122_v21, %v6130_v52  ;;  %v18636_v11 = vpack.i.b16 %v18634_v37, %v18635_v16  ;;  %v6509_v21 = vshrl.u32 %v17288_v56, 16 }
 0x659   : > { %v8288_v45 = vpop.xlane.xlu0 %8287  ;;  %v13984_v51 = vpop.eup %13983  ;;  %v6510_v52 = vshrl.u32 %v17292_v3, 16 }
 0x65a   : > { %v8392_v12 = vmul.f32 %v13984_v51, %v16956_v14  ;;  %13418 = vmatmul.mubr.msk.bf16.vlgmr.msra.gmra.mrb[92].mxu0 %vm8066_vm2, %v8429_v7  ;;  %13991 = vrcp.f32 %v8288_v45  ;;  %v6155_v14 = vcombine.low %v6138_v28, %v6146_v39  ;;  %v17394_v62 = vrot.slane %v6147_v29, %v15122_v47  ;;  %v18641_v29 = vld [vmem:[#allocation46_spill] sm:$0xff] }
 0x65b   : > { %13428 = vmatpush3.bf16.msra.mxu0 %v18633_v15  ;;  %13429 = vmatprep.mubr.msk.bf16.mxu0 %vm14520_vm1, %v18497_v33  ;;  %v6503_v7 = vpack.i.b16 %v6502_v5, %v6501_v49  ;;  %v6511_v39 = vpack.i.b16 %v6510_v52, %v6509_v21  ;;  %v4565_v15 = vshrl.u32 %v18637_v23, 16 }
 0x65c   : > { %v8424_v24 = vpack.c.bf16 %v8392_v12, %v8392_v12  ;;  %13439 = vmatprep.subr.bf16.mxu0 %v18497_v33  ;;  %v17397_v19 = vrot.slane %v6155_v14, %v15122_v47 }
 0x65d   : > { %v8294_v31 = vpop.xlane.xlu0 %8293  ;;  %v13986_v25 = vpop.eup %13985 }
 0x65e   : > { %v8399_v17 = vmul.f32 %v13986_v25, %v16964_v54  ;;  %13388 = vmatmul.mubr.msk.bf16.vlgmr.msra.gmra.mrb[104].mxu1 %vm8066_vm2, %v8424_v24  ;;  %v17391_v54 = vrot.slane %v6105_v36, %v15122_v47  ;;  %13993 = vrcp.f32 %v8294_v31  ;;  %v17416_v30 = vcombine.low %v17394_v62, %v17397_v19  ;;  %v18638_v31 = vld [vmem:[#allocation42_spill] sm:$0xff] }
 0x65f   : > { %13398 = vmatpush3.bf16.msra.mxu1 %v6495_v60  ;;  %13399 = vmatprep.mubr.msk.bf16.mxu1 %vm14520_vm1, %v18497_v33  ;;  %v4566_v24 = vshrl.u32 %v18638_v31, 16  ;;  %v4574_v25 = vshrl.u32 %v18639_v18, 16  ;;  %v18640_v60 = vld [vmem:[#allocation28_spill] sm:$0xff] }
 0x660   : > { %v13988_v2 = vpop.eup %13987  ;;  %v8431_v42 = vpack.c.bf16 %v8399_v17, %v8399_v17  ;;  %13409 = vmatprep.subr.bf16.mxu1 %v18497_v33  ;;  %v4573_v36 = vshrl.u32 %v18640_v60, 16  ;;  %v4563_v17 = vpack.i.b16 %v18638_v31, %v18637_v23 }
 0x661   : > { %v13990_v20 = vpop.eup %13989  ;;  %v17400_v45 = vpop.xlane.xlu0 %8314  ;;  %v8401_v48 = vmul.f32 %v13988_v2, %v16960_v61  ;;  %v4571_v2 = vpack.i.b16 %v18639_v18, %v18640_v60 }
 0x662   : > { %v8394_v40 = vmul.f32 %v13990_v20, %v16972_v35  ;;  %13430 = vmatmul.mubr.msk.bf16.vlgmr.msra.gmra.mrb[96].mxu0 %vm8066_vm2, %v8431_v42  ;;  %v17412_v35 = vcombine.low %v17387_v32, %v17391_v54  ;;  %v4567_v42 = vpack.i.b16 %v4566_v24, %v4565_v15  ;;  %v4575_v49 = vpack.i.b16 %v4574_v25, %v4573_v36  ;;  %v17475_v15 = vpop.permute.xlu1 %4447 }
 0x663   : > { %13440 = vmatpush3.bf16.msra.mxu0 %v18636_v11  ;;  %13441 = vmatprep.mubr.msk.bf16.mxu0 %vm14520_vm1, %v18497_v33  ;;  %v8433_v10 = vpack.c.bf16 %v8401_v48, %v8401_v48  ;;  %v5269_v5 = vcombine.high %v4563_v17, %v15108_v8  ;;  %v18642_v11 = vld [vmem:[#allocation45_spill] sm:$0xff]  ;;  %v5276_v48 = vrot.slane %v4563_v17, %v15112_v1 }
 0x664   : > { %v8426_v55 = vpack.c.bf16 %v8394_v40, %v8394_v40  ;;  %13451 = vmatprep.subr.bf16.mxu0 %v18497_v33  ;;  %v13992_v53 = vpop.eup %13991  ;;  %v6531_v51 = vpack.i.b16 %v17416_v30, %v17412_v35  ;;  %v5284_v40 = vcombine.high %v4571_v2, %v15108_v8  ;;  %v5350_v37 = vcombine.high %v4575_v49, %v15108_v8 }
 0x665   : > { %v8396_v61 = vmul.f32 %v13992_v53, %v16968_v44  ;;  %v8300_v59 = vpop.xlane.xlu0 %8299  ;;  %v5283_v53 = vrot.slane %v5269_v5, %v15112_v1 }
 0x666   : > { %13400 = vmatmul.mubr.msk.bf16.vlgmr.msra.gmra.mrb[108].mxu1 %vm8066_vm2, %v8426_v55  ;;  %13995 = vrcp.f32 %v8300_v59  ;;  %v5291_v55 = vrot.slane %v4571_v2, %v15112_v1 }
 0x667   : > { %13410 = vmatpush3.bf16.msra.mxu1 %v6503_v7  ;;  %13411 = vmatprep.mubr.msk.bf16.mxu1 %vm14520_vm1, %v18497_v33  ;;  %v8428_v28 = vpack.c.bf16 %v8396_v61, %v8396_v61  ;;  %v5298_v7 = vrot.slane %v5284_v40, %v15112_v1  ;;  %v5342_v61 = vrot.slane %v4567_v42, %v15112_v1 }
 0x668   : > { %13421 = vmatprep.subr.bf16.mxu1 %v18497_v33  ;;  %v13994_v44 = vpop.eup %13993  ;;  %v5299_v21 = vcombine.low %v5276_v48, %v5291_v55  ;;  %v5300_v52 = vcombine.high %v5276_v48, %v5291_v55 }
 0x669   : > { %v8398_v56 = vmul.f32 %v13994_v44, %v16976_v0  ;;  %v5315_v44 = vcombine.low %v5283_v53, %v5298_v7 }
 0x66a   : > { %13442 = vmatmul.mubr.msk.bf16.vlgmr.msra.gmra.mrb[100].mxu0 %vm8066_vm2, %v8433_v10  ;;  %v5357_v10 = vrot.slane %v4575_v49, %v15112_v1  ;;  %v5307_v31 = vrot.slane %v5299_v21, %v15122_v47  ;;  %v5314_v24 = vrot.slane %v5300_v52, %v15122_v47 }
 0x66b   : > { %13452 = vmatpush3.bf16.msra.mxu0 %v6531_v51  ;;  %13453 = vmatprep.mubr.msk.bf16.mxu0 %vm14520_vm1, %v18497_v33  ;;  %v8430_v12 = vpack.c.bf16 %v8398_v56, %v8398_v56  ;;  %v5364_v51 = vrot.slane %v5350_v37, %v15112_v1  ;;  %v5323_v18 = vrot.slane %v5315_v44, %v15122_v47 }
 0x66c   : > { %13463 = vmatprep.subr.bf16.mxu0 %v18497_v33  ;;  %v5365_v56 = vcombine.low %v5342_v61, %v5357_v10  ;;  %v12604_v49 = vcombine.high %v5307_v31, %v5314_v24 }
 0x66e   : > { %13412 = vmatmul.mubr.msk.bf16.vlgmr.msra.gmra.mrb[112].mxu1 %vm8066_vm2, %v8428_v28  ;;  %v5373_v60 = vrot.slane %v5365_v56, %v15122_v47 }
 0x66f   : > { %13422 = vmatpush3.bf16.msra.mxu1 %v6511_v39  ;;  %13423 = vmatprep.mubr.msk.bf16.mxu1 %vm14520_vm1, %v18497_v33  ;;  %v5316_v39 = vcombine.high %v5283_v53, %v5298_v7  ;;  %v6180_v7 = vrot.slane %v12604_v49, %v15112_v1  ;;  %v6534_v49 = vshrl.u32 %v17416_v30, 16 }
 0x670   : > { %13433 = vmatprep.subr.bf16.mxu1 %v18497_v33  ;;  %v13996_v58 = vpop.eup %13995 }
 0x671   : > { %v8400_v0 = vmul.f32 %v13996_v58, %v16989_v46  ;;  %v5335_v46 = vcombine.high %v4567_v42, %v15108_v8  ;;  %v5330_v25 = vrot.slane %v5316_v39, %v15122_v47  ;;  %v6165_v42 = vcombine.low %v5307_v31, %v5314_v24 }
 0x672   : > { %v17436_v3 = vpop.xlane.xlu0 %8326  ;;  %v17500_v39 = vcombine.high %v17387_v32, %v17391_v54  ;;  %v17509_v31 = vcombine.high %v17394_v62, %v17397_v19 }
 0x673   : > { %v8432_v20 = vpack.c.bf16 %v8400_v0, %v8400_v0  ;;  %v5349_v59 = vrot.slane %v5335_v46, %v15112_v1  ;;  %v12605_v5 = vcombine.high %v5323_v18, %v5330_v25  ;;  %v6172_v55 = vrot.slane %v6165_v42, %v15112_v1 }
 0x674   : > { %v6533_v42 = vshrl.u32 %v17412_v35, 16 }
 0x675   : > { %v5381_v58 = vcombine.low %v5349_v59, %v5364_v51  ;;  %v5382_v23 = vcombine.high %v5349_v59, %v5364_v51  ;;  %v6196_v59 = vrot.slane %v12605_v5, %v15112_v1  ;;  %v6197_v56 = vcombine.low %v6172_v55, %v6180_v7 }
 0x676   : > { %13424 = vmatmul.mubr.msk.bf16.vlgmr.msra.gmra.mrb[116].mxu1 %vm8066_vm2, %v8430_v12  ;;  %v17448_v14 = vpop.xlane.xlu0 %8311  ;;  %v5366_v12 = vcombine.high %v5342_v61, %v5357_v10  ;;  %v4595_v5 = vpack.i.b16 %v17475_v15, %v16523_v63 }
 0x677   : > { %13434 = vmatpush3.bf16.msra.mxu1 %v18641_v29  ;;  %13435 = vmatprep.mubr.msk.bf16.mxu1 %vm14520_vm1, %v18497_v33  ;;  %v5389_v29 = vrot.slane %v5381_v58, %v15122_v47  ;;  %v5396_v0 = vrot.slane %v5382_v23, %v15122_v47  ;;  %v6204_v54 = vrot.slane %v6197_v56, %v15122_v47 }
 0x678   : > { %13445 = vmatprep.subr.bf16.mxu1 %v18497_v33  ;;  %v5380_v36 = vrot.slane %v5366_v12, %v15122_v47 }
 0x679   : > { %v6231_v37 = vcombine.low %v5389_v29, %v5396_v0 }
 0x67a   : > { %v6215_v40 = vcombine.low %v5373_v60, %v5380_v36  ;;  %v12606_v46 = vcombine.high %v5373_v60, %v5380_v36 }
 0x67b   : > { %v6238_v52 = vrot.slane %v6231_v37, %v15112_v1  ;;  %v18643_v37 = vld [vmem:[#allocation27_spill] sm:$0xff] }
 0x67c   : > { %v6222_v51 = vrot.slane %v6215_v40, %v15112_v1  ;;  %v6230_v21 = vrot.slane %v12606_v46, %v15112_v1 }
 0x67e   : > { %13436 = vmatmul.mubr.msk.bf16.vlgmr.msra.gmra.mrb[120].mxu1 %vm8066_vm2, %v8432_v20  ;;  %v17459_v16 = vpop.xlane.xlu0 %8317  ;;  %v6181_v20 = vcombine.low %v5323_v18, %v5330_v25  ;;  %v6247_v24 = vcombine.low %v6222_v51, %v6230_v21 }
 0x67f   : > { %13446 = vmatpush3.bf16.msra.mxu1 %v18642_v11  ;;  %13447 = vmatprep.mubr.msk.bf16.mxu1 %vm14520_vm1, %v18497_v33  ;;  %v12607_v11 = vcombine.high %v5389_v29, %v5396_v0  ;;  %v6539_v29 = vpack.i.b16 %v17509_v31, %v17500_v39 }
 0x680   : > { %13457 = vmatprep.subr.bf16.mxu1 %v18497_v33  ;;  %v6188_v61 = vrot.slane %v6181_v20, %v15112_v1  ;;  %v6254_v62 = vrot.slane %v6247_v24, %v15122_v47 }
 0x681   : > { %v6246_v44 = vrot.slane %v12607_v11, %v15112_v1 }
 0x682   : > { %v17473_v28 = vpop.xlane.xlu0 %8338 }
 0x683   : > { %v6255_v18 = vcombine.low %v6238_v52, %v6246_v44 }
 0x685   : > { %v6262_v19 = vrot.slane %v6255_v18, %v15122_v47 }
 0x686   : > { %v17485_v17 = vpop.xlane.xlu0 %8323 }
 0x68d   : > { %v8309_v2 = vpop.xlane.xlu1 %8308 }
 0x68e   : > { %13997 = vrcp.f32 %v8309_v2 }
 0x68f   : > { %13999 = vrcp.f32 %v17400_v45  ;;  %v6205_v45 = vcombine.low %v6188_v61, %v6196_v59  ;;  %v17534_v61 = vcombine.low %v6254_v62, %v6262_v19 }
 0x691   : > { %v6212_v60 = vrot.slane %v6205_v45, %v15122_v47 }
 0x692   : > { %v17488_v53 = vpop.xlane.xlu0 %8335 }
 0x693   : > { %v8321_v48 = vpop.xlane.xlu1 %8320  ;;  %v17530_v40 = vcombine.low %v6204_v54, %v6212_v60 }
 0x695   : > { %v6547_v18 = vpack.i.b16 %v17534_v61, %v17530_v40 }
 0x696   : > { %v17503_v58 = vpop.xlane.xlu0 %8341 }
 0x697   : > { %v8306_v10 = vpop.xlane.xlu1 %8305 }
 0x698   : > { %14001 = vrcp.f32 %v8306_v10  ;;  %v13998_v12 = vpop.eup %13997 }
 0x699   : > { %14003 = vrcp.f32 %v17448_v14  ;;  %v8403_v25 = vmul.f32 %v13998_v12, %v17065_v22  ;;  %v4598_v14 = vshrl.u32 %v17475_v15, 16  ;;  %v14000_v0 = vpop.eup %13999  ;;  %v4597_v22 = vshrl.u32 %v16523_v63, 16 }
 0x69a   : > { %14005 = vrcp.f32 %v8321_v48  ;;  %v4464_v2 = vpop.permute.xlu0 %4463  ;;  %v8405_v11 = vmul.f32 %v14000_v0, %v18643_v37  ;;  %v18644_v48 = vld [vmem:[#allocation47_spill] sm:$0xff]  ;;  %v6535_v63 = vpack.i.b16 %v6534_v49, %v6533_v42  ;;  %v5533_v15 = vcombine.high %v4595_v5, %v15108_v8 }
 0x69b   : > { %v17505_v23 = vpop.xlane.xlu1 %8332  ;;  %v8435_v32 = vpack.c.bf16 %v8403_v25, %v8403_v25  ;;  %v4599_v46 = vpack.i.b16 %v4598_v14, %v4597_v22  ;;  %14007 = vrcp.f32 %v17459_v16  ;;  %v4605_v35 = vshrl.u32 %v4464_v2, 16  ;;  %v18645_v16 = vld [vmem:[#allocation31_spill] sm:$0xff] }
 0x69c   : > { %14009 = vrcp.f32 %v17436_v3  ;;  %v8437_v56 = vpack.c.bf16 %v8405_v11, %v8405_v11  ;;  %v6541_v3 = vshrl.u32 %v17500_v39, 16  ;;  %v5547_v14 = vrot.slane %v5533_v15, %v15112_v1 }
 0x69d   : > { %13454 = vmatmul.mubr.msk.bf16.vlgmr.msra.gmra.mrb[104].mxu0 %vm8066_vm2, %v8435_v32  ;;  %v5599_v44 = vcombine.high %v4599_v46, %v15108_v8  ;;  %v6542_v32 = vshrl.u32 %v17509_v31, 16  ;;  %v17556_v0 = vcombine.high %v6254_v62, %v6262_v19  ;;  %v5540_v39 = vrot.slane %v4595_v5, %v15112_v1 }
 0x69e   : > { %13464 = vmatpush3.bf16.msra.mxu0 %v6539_v29  ;;  %13465 = vmatprep.mubr.msk.bf16.mxu0 %vm14520_vm1, %v18497_v33  ;;  %v5606_v31 = vrot.slane %v4599_v46, %v15112_v1  ;;  %14011 = vrcp.f32 %v17485_v17 }
 0x69f   : > { %v17515_v36 = vpop.xlane.xlu1 %8329  ;;  %13475 = vmatprep.subr.bf16.mxu0 %v18497_v33  ;;  %v5613_v22 = vrot.slane %v5599_v44, %v15112_v1  ;;  %14013 = vrcp.f32 %v17505_v23  ;;  %v6543_v5 = vpack.i.b16 %v6542_v32, %v6541_v3  ;;  %v6549_v23 = vshrl.u32 %v17530_v40, 16 }
 0x6a0   : > { %14015 = vrcp.f32 %v17515_v36 }
 0x6a1   : > { %14017 = vrcp.f32 %v17473_v28 }
 0x6a2   : > { %v14002_v20 = vpop.eup %14001  ;;  %14019 = vrcp.f32 %v17488_v53 }
 0x6a3   : > { %v8402_v55 = vmul.f32 %v14002_v20, %v18644_v48  ;;  %v4480_v7 = vpop.permute.xlu1 %4479  ;;  %v14004_v10 = vpop.eup %14003  ;;  %14021 = vrcp.f32 %v17503_v58 }
 0x6a4   : > { %v4603_v30 = vpack.i.b16 %v4480_v7, %v4464_v2  ;;  %v4606_v59 = vshrl.u32 %v4480_v7, 16  ;;  %v14006_v45 = vpop.eup %14005  ;;  %v8404_v12 = vmul.f32 %v14004_v10, %v18645_v16  ;;  %v18646_v2 = vld [vmem:[#allocation37_spill] sm:$0xff] }
 0x6a5   : > { %v8434_v51 = vpack.c.bf16 %v8402_v55, %v8402_v55  ;;  %13466 = vmatmul.mubr.msk.bf16.vlgmr.msra.gmra.mrb[108].mxu0 %vm8066_vm2, %v8437_v56  ;;  %v8407_v42 = vmul.f32 %v14006_v45, %v18646_v2  ;;  %v14008_v11 = vpop.eup %14007  ;;  %v18648_v45 = vld [vmem:[#allocation29_spill] sm:$0xff] }
 0x6a6   : > { %v4607_v21 = vpack.i.b16 %v4606_v59, %v4605_v35  ;;  %v5548_v52 = vcombine.high %v4603_v30, %v15108_v8  ;;  %13476 = vmatpush3.bf16.msra.mxu0 %v6547_v18  ;;  %v5555_v49 = vrot.slane %v4603_v30, %v15112_v1  ;;  %13477 = vmatprep.mubr.msk.bf16.mxu0 %vm14520_vm1, %v18497_v33  ;;  %v14010_v35 = vpop.eup %14009 }
 0x6a7   : > { %13448 = vmatmul.mubr.msk.bf16.vlgmr.msra.gmra.mrb[124].mxu1 %vm8066_vm2, %v8434_v51  ;;  %13487 = vmatprep.subr.bf16.mxu0 %v18497_v33  ;;  %v8439_v17 = vpack.c.bf16 %v8407_v42, %v8407_v42  ;;  %v18647_v51 = vld [vmem:[#allocation32_spill] sm:$0xff]  ;;  %v8409_v16 = vmul.f32 %v14010_v35, %v18648_v45  ;;  %v18653_v45 = vld [vmem:[#allocation33_spill] sm:$0xff] }
 0x6a8   : > { %v5614_v24 = vcombine.high %v4607_v21, %v15108_v8  ;;  %13458 = vmatpush3.bf16.msra.mxu1 %v6535_v63  ;;  %v5562_v25 = vrot.slane %v5548_v52, %v15112_v1  ;;  %13459 = vmatprep.mubr.msk.bf16.mxu1 %vm14520_vm1, %v18497_v33  ;;  %v5621_v29 = vrot.slane %v4607_v21, %v15112_v1  ;;  %v6550_v52 = vshrl.u32 %v17534_v61, 16  ;;  %v14012_v32 = vpop.eup %14011 }
 0x6a9   : > { %v17554_v8 = vcombine.high %v6204_v54, %v6212_v60  ;;  %13469 = vmatprep.subr.bf16.mxu1 %v18497_v33  ;;  %v8436_v54 = vpack.c.bf16 %v8404_v12, %v8404_v12  ;;  %v5563_v7 = vcombine.low %v5540_v39, %v5555_v49  ;;  %v5564_v46 = vcombine.high %v5540_v39, %v5555_v49  ;;  %v14014_v49 = vpop.eup %14013 }
 0x6aa   : > { %v5628_v20 = vrot.slane %v5614_v24, %v15112_v1  ;;  %v5579_v60 = vcombine.low %v5547_v14, %v5562_v25  ;;  %v5580_v62 = vcombine.high %v5547_v14, %v5562_v25  ;;  %v5629_v48 = vcombine.low %v5606_v31, %v5621_v29 }
 0x6ab   : > { %v5630_v55 = vcombine.high %v5606_v31, %v5621_v29  ;;  %v6555_v10 = vpack.i.b16 %v17556_v0, %v17554_v8  ;;  %v8406_v63 = vmul.f32 %v14008_v11, %v18647_v51  ;;  %v5571_v40 = vrot.slane %v5563_v7, %v15122_v47  ;;  %v18649_v31 = vld [vmem:[#allocation34_spill] sm:$0xff] }
 0x6ac   : > { %v5645_v19 = vcombine.low %v5613_v22, %v5628_v20  ;;  %v5646_v37 = vcombine.high %v5613_v22, %v5628_v20  ;;  %v5587_v15 = vrot.slane %v5579_v60, %v15122_v47  ;;  %v5594_v21 = vrot.slane %v5580_v62, %v15122_v47 }
 0x6ad   : > { %13478 = vmatmul.mubr.msk.bf16.vlgmr.msra.gmra.mrb[112].mxu0 %vm8066_vm2, %v8439_v17  ;;  %v5637_v44 = vrot.slane %v5629_v48, %v15122_v47  ;;  %v5644_v56 = vrot.slane %v5630_v55, %v15122_v47  ;;  %v5578_v12 = vrot.slane %v5564_v46, %v15122_v47  ;;  %v8438_v25 = vpack.c.bf16 %v8406_v63, %v8406_v63  ;;  %v18650_v48 = vld [vmem:[#allocation48_spill] sm:$0xff]  ;;  %v14016_v17 = vpop.eup %14015  ;;  %v18652_v63 = vld [vmem:[#allocation30_spill] sm:$0xff] }
 0x6ae   : > { %v5653_v30 = vrot.slane %v5645_v19, %v15122_v47  ;;  %v5660_v59 = vrot.slane %v5646_v37, %v15122_v47  ;;  %13488 = vmatpush3.bf16.msra.mxu0 %v6555_v10  ;;  %13489 = vmatprep.mubr.msk.bf16.mxu0 %vm14520_vm1, %v18497_v33  ;;  %v6381_v18 = vcombine.low %v5587_v15, %v5594_v21  ;;  %v6557_v60 = vshrl.u32 %v17554_v8, 16 }
 0x6af   : > { %13460 = vmatmul.mubr.msk.bf16.vlgmr.msra.gmra.mrb[128].mxu1 %vm8066_vm2, %v8436_v54  ;;  %13499 = vmatprep.subr.bf16.mxu0 %v18497_v33  ;;  %v6551_v3 = vpack.i.b16 %v6550_v52, %v6549_v23  ;;  %v12613_v14 = vcombine.high %v5587_v15, %v5594_v21  ;;  %v6415_v29 = vcombine.low %v5637_v44, %v5644_v56  ;;  %v6558_v11 = vshrl.u32 %v17556_v0, 16  ;;  %v14018_v0 = vpop.eup %14017 }
 0x6b0   : > { %13470 = vmatpush3.bf16.msra.mxu1 %v6543_v5  ;;  %13471 = vmatprep.mubr.msk.bf16.mxu1 %vm14520_vm1, %v18497_v33  ;;  %v6431_v61 = vcombine.low %v5653_v30, %v5660_v59  ;;  %v12615_v24 = vcombine.high %v5653_v30, %v5660_v59  ;;  %v12614_v22 = vcombine.high %v5637_v44, %v5644_v56  ;;  %v18651_v59 = vld [vmem:[#allocation55_spill] sm:$0xff]  ;;  %v14020_v56 = vpop.eup %14019 }
 0x6b1   : > { %13481 = vmatprep.subr.bf16.mxu1 %v18497_v33  ;;  %v6365_v2 = vcombine.low %v5571_v40, %v5578_v12  ;;  %v8441_v42 = vpack.c.bf16 %v8409_v16, %v8409_v16  ;;  %v12612_v20 = vcombine.high %v5571_v40, %v5578_v12  ;;  %v8408_v54 = vmul.f32 %v14012_v32, %v18649_v31  ;;  %v18654_v12 = vld [vmem:[#allocation49_spill] sm:$0xff] }
 0x6b2   : > { %v6438_v36 = vrot.slane %v6431_v61, %v15112_v1  ;;  %v6446_v39 = vrot.slane %v12615_v24, %v15112_v1  ;;  %v6388_v28 = vrot.slane %v6381_v18, %v15112_v1  ;;  %v6396_v62 = vrot.slane %v12613_v14, %v15112_v1 }
 0x6b3   : > { %v6422_v19 = vrot.slane %v6415_v29, %v15112_v1  ;;  %v6430_v37 = vrot.slane %v12614_v22, %v15112_v1  ;;  %v8411_v55 = vmul.f32 %v14014_v49, %v18650_v48  ;;  %v6372_v8 = vrot.slane %v6365_v2, %v15112_v1 }
 0x6b4   : > { %v6380_v5 = vrot.slane %v12612_v20, %v15112_v1  ;;  %v6455_v7 = vcombine.low %v6438_v36, %v6446_v39  ;;  %v8440_v46 = vpack.c.bf16 %v8408_v54, %v8408_v54  ;;  %v6559_v27 = vpack.i.b16 %v6558_v11, %v6557_v60 }
 0x6b5   : > { %13490 = vmatmul.mubr.msk.bf16.vlgmr.msra.gmra.mrb[116].mxu0 %vm8066_vm2, %v8441_v42  ;;  %v6405_v41 = vcombine.low %v6388_v28, %v6396_v62  ;;  %v8443_v35 = vpack.c.bf16 %v8411_v55, %v8411_v55  ;;  %v8410_v10 = vmul.f32 %v14016_v17, %v18651_v59  ;;  %v8413_v15 = vmul.f32 %v14018_v0, %v18652_v63 }
 0x6b6   : > { %13500 = vmatpush3.bf16.msra.mxu0 %v6563_v38  ;;  %13501 = vmatprep.mubr.msk.bf16.mxu0 %vm14520_vm1, %v18497_v33  ;;  %v6447_v38 = vcombine.low %v6422_v19, %v6430_v37  ;;  %v6397_v30 = vcombine.low %v6372_v8, %v6380_v5  ;;  %v6462_v53 = vrot.slane %v6455_v7, %v15122_v47  ;;  %v18655_v5 = vmov 0  }
 0x6b7   : > { %13472 = vmatmul.mubr.msk.bf16.vlgmr.msra.gmra.mrb[132].mxu1 %vm8066_vm2, %v8438_v25  ;;  %13511 = vmatprep.subr.bf16.mxu0 %v18497_v33  ;;  %v6412_v23 = vrot.slane %v6405_v41, %v15122_v47  ;;  %v8442_v44 = vpack.c.bf16 %v8410_v10, %v8410_v10  ;;  %v8445_v43 = vpack.c.bf16 %v8413_v15, %v8413_v15 }
 0x6b8   : > { %13482 = vmatpush3.bf16.msra.mxu1 %v6551_v3  ;;  %13483 = vmatprep.mubr.msk.bf16.mxu1 %vm14520_vm1, %v18497_v33  ;;  %v6454_v51 = vrot.slane %v6447_v38, %v15122_v47  ;;  %v6404_v21 = vrot.slane %v6397_v30, %v15122_v47  ;;  %v8412_v16 = vmul.f32 %v14020_v56, %v18653_v45 }
 0x6b9   : > { %13493 = vmatprep.subr.bf16.mxu1 %v18497_v33 }
 0x6ba   : > { %v6463_v52 = vcombine.low %v6454_v51, %v6462_v53  ;;  %v6413_v34 = vcombine.low %v6404_v21, %v6412_v23  ;;  %v8444_v58 = vpack.c.bf16 %v8412_v16, %v8412_v16  ;;  %v6464_v22 = vcombine.high %v6454_v51, %v6462_v53 }
 0x6bb   : > { %v6414_v2 = vcombine.high %v6404_v21, %v6412_v23 }
 0x6bc   : > { %v6582_v24 = vshrl.u32 %v6463_v52, 16  ;;  %v6581_v25 = vshrl.u32 %v6413_v34, 16  ;;  %v6590_v49 = vshrl.u32 %v6464_v22, 16 }
 0x6bd   : > { %13502 = vmatmul.mubr.msk.bf16.vlgmr.msra.gmra.mrb[120].mxu0 %vm8066_vm2, %v8443_v35  ;;  %v6589_v20 = vshrl.u32 %v6414_v2, 16  ;;  %v6587_v48 = vpack.i.b16 %v6464_v22, %v6414_v2 }
 0x6be   : > { %13512 = vmatpush3.bf16.msra.mxu0 %v6571_v57  ;;  %13513 = vmatprep.mubr.msk.bf16.mxu0 %vm14520_vm1, %v18497_v33  ;;  %v6579_v57 = vpack.i.b16 %v6463_v52, %v6413_v34  ;;  %v6583_v29 = vpack.i.b16 %v6582_v24, %v6581_v25 }
 0x6bf   : > { %13484 = vmatmul.mubr.msk.bf16.vlgmr.msra.gmra.mrb[136].mxu1 %vm8066_vm2, %v8440_v46  ;;  %13523 = vmatprep.subr.bf16.mxu0 %v18497_v33  ;;  %v6591_v39 = vpack.i.b16 %v6590_v49, %v6589_v20 }
 0x6c0   : > { %13494 = vmatpush3.bf16.msra.mxu1 %v6559_v27  ;;  %13495 = vmatprep.mubr.msk.bf16.mxu1 %vm14520_vm1, %v18497_v33 }
 0x6c1   : > { %13505 = vmatprep.subr.bf16.mxu1 %v18497_v33 }
 0x6c5   : > { %13514 = vmatmul.mubr.msk.bf16.vlgmr.msra.gmra.mrb[124].mxu0 %vm8066_vm2, %v8445_v43 }
 0x6c6   : > { %13524 = vmatpush3.bf16.msra.mxu0 %v6579_v57  ;;  %13525 = vmatprep.mubr.msk.bf16.mxu0 %vm14520_vm1, %v18497_v33 }
 0x6c7   : > { %13496 = vmatmul.mubr.msk.bf16.vlgmr.msra.gmra.mrb[140].mxu1 %vm8066_vm2, %v8442_v44  ;;  %13535 = vmatprep.subr.bf16.mxu0 %v18497_v33 }
 0x6c8   : > { %13506 = vmatpush3.bf16.msra.mxu1 %v17315_v4  ;;  %13507 = vmatprep.mubr.msk.bf16.mxu1 %vm14520_vm1, %v18497_v33  ;;  %v14022_v4 = vpop.eup %14021 }
 0x6c9   : > { %13517 = vmatprep.subr.bf16.mxu1 %v18497_v33  ;;  %v8414_v61 = vmul.f32 %v14022_v4, %v18654_v12 }
 0x6cb   : > { %v8348_v40 = vpop.xlane.xlu0 %8347  ;;  %v8446_v32 = vpack.c.bf16 %v8414_v61, %v8414_v61 }
 0x6cc   : > { %14023 = vrcp.f32 %v8348_v40 }
 0x6cf   : > { %13508 = vmatmul.mubr.msk.bf16.vlgmr.msra.gmra.mrb[144].mxu1 %vm8066_vm2, %v8444_v58  ;;  %v8351_v3 = vpop.xlane.xlu0 %8350 }
 0x6d0   : > { %13518 = vmatpush3.bf16.msra.mxu1 %v17317_v26  ;;  %13519 = vmatprep.mubr.msk.bf16.mxu1 %vm14520_vm1, %v18497_v33 }
 0x6d1   : > { %13529 = vmatprep.subr.bf16.mxu1 %v18497_v33 }
 0x6d4   : > { %v8345_v18 = vpop.xlane.xlu1 %8344 }
 0x6d5   : > { %14025 = vrcp.f32 %v8345_v18 }
 0x6d6   : > { %v14024_v14 = vpop.eup %14023  ;;  %14027 = vrcp.f32 %v8351_v3 }
 0x6d7   : > { %13520 = vmatmul.mubr.msk.bf16.vlgmr.msra.gmra.mrb[148].mxu1 %vm8066_vm2, %v8446_v32  ;;  %v8416_v42 = vmul.f32 %v14024_v14, %v17247_v9 }
 0x6d8   : > { %13530 = vmatpush3.bf16.msra.mxu1 %v6583_v29  ;;  %v8354_v26 = vpop.xlane.xlu1 %8353  ;;  %13531 = vmatprep.mubr.msk.bf16.mxu1 %vm14520_vm1, %v18497_v33 }
 0x6d9   : > { %14029 = vrcp.f32 %v8354_v26  ;;  %13541 = vmatprep.subr.bf16.mxu1 %v18497_v33  ;;  %v8448_v36 = vpack.c.bf16 %v8416_v42, %v8416_v42 }
 0x6df   : > { %v14026_v31 = vpop.eup %14025  ;;  %13532 = vmatmul.mubr.msk.bf16.vlgmr.msra.gmra.mrb[152].mxu1 %vm8066_vm2, %v8448_v36 }
 0x6e0   : > { %v8415_v54 = vmul.f32 %v14026_v31, %v17329_v13  ;;  %13542 = vmatpush3.bf16.msra.mxu1 %v6591_v39  ;;  %13543 = vmatprep.mubr.msk.bf16.mxu1 %vm14520_vm1, %v18497_v33  ;;  %v14028_v62 = vpop.eup %14027 }
 0x6e1   : > { %v8417_v13 = vmul.f32 %v14028_v62, %v17301_v50 }
 0x6e2   : > { %v8447_v19 = vpack.c.bf16 %v8415_v54, %v8415_v54 }
 0x6e3   : > { %v8488_v28 = vpop.f32.mrb[72].mxu0  ;;  %v14030_v37 = vpop.eup %14029  ;;  %v8449_v7 = vpack.c.bf16 %v8417_v13, %v8417_v13 }
 0x6e4   : > { %v13359_v60 = vpop.f32.mrb[73].mxu0  ;;  %v8418_v55 = vmul.f32 %v14030_v37, %v17337_v6  ;;  %13526 = vmatmul.mubr.msk.bf16.vlgmr.msra.gmra.mrb[128].mxu0 %vm8066_vm2, %v8447_v19 }
 0x6e5   : > { %v8491_v9 = vpop.f32.mrb[74].mxu0  ;;  %13536 = vmatpush3.bf16.msra.mxu0 %v6587_v48  ;;  %13537 = vmatprep.mubr.msk.bf16.mxu0 %vm14520_vm1, %v18497_v33 }
 0x6e6   : > { %v13360_v11 = vpop.f32.mrb[75].mxu0  ;;  %v8450_v8 = vpack.c.bf16 %v8418_v55, %v8418_v55 }
 0x6e8   : > { %13544 = vmatmul.mubr.msk.bf16.vlgmr.msra.gmra.mrb[156].mxu1 %vm8066_vm2, %v8450_v8 }
 0x6e9   : > { %11523 = vmatprep.mubr.bf16.mxu1 %v18655_v5 }
 0x6ec   : > { %13538 = vmatmul.mubr.msk.bf16.vlgmr.msra.gmra.mrb[132].mxu0 %vm8066_vm2, %v8449_v7 }
 0x6f1   : > { %v8531_v46 = vpop.f32.mrb[96].mxu1 }
 0x6f2   : > { %v13365_v17 = vpop.f32.mrb[97].mxu1 }
 0x6f3   : > { %v8534_v27 = vpop.f32.mrb[98].mxu1 }
 0x6f4   : > { %v13366_v6 = vpop.f32.mrb[99].mxu1  ;;  %v8574_v41 = vpop.f32.mrb[76].mxu0 }
 0x6f5   : > { %v9827_v38 = vcombine.low %v8488_v28, %v8574_v41  ;;  %v9828_v35 = vcombine.high %v8488_v28, %v8574_v41  ;;  %v13371_v0 = vpop.f32.mrb[77].mxu0 }
 0x6f6   : > { %v8577_v30 = vpop.f32.mrb[78].mxu0 }
 0x6f7   : > { %v13372_v33 = vpop.f32.mrb[79].mxu0  ;;  %v9835_v52 = vrot.slane %v9827_v38, %v15112_v1  ;;  %v9842_v44 = vrot.slane %v9828_v35, %v15112_v1 }
 0x6fc   : > { %v17669_v53 = vpop.f32.mrb[80].mxu0 }
 0x6fd   : > { %v13383_v50 = vpop.f32.mrb[81].mxu0 }
 0x6fe   : > { %v8663_v59 = vpop.f32.mrb[82].mxu0 }
 0x6ff   : > { %v13384_v10 = vpop.f32.mrb[83].mxu0 }
 0x706   : > { %v8617_v23 = vpop.f32.mrb[100].mxu1 }
 0x707   : > { %v9843_v51 = vcombine.low %v8531_v46, %v8617_v23  ;;  %v9844_v63 = vcombine.high %v8531_v46, %v8617_v23  ;;  %v13377_v15 = vpop.f32.mrb[101].mxu1 }
 0x708   : > { %v8620_v21 = vpop.f32.mrb[102].mxu1  ;;  %v8746_v57 = vpop.f32.mrb[84].mxu0 }
 0x709   : > { %v9851_v56 = vrot.slane %v9843_v51, %v15112_v1  ;;  %v9858_v34 = vrot.slane %v9844_v63, %v15112_v1  ;;  %v13378_v43 = vpop.f32.mrb[103].mxu1  ;;  %v13395_v4 = vpop.f32.mrb[85].mxu0  ;;  %v9895_v12 = vcombine.low %v17669_v53, %v8746_v57  ;;  %v9896_v61 = vcombine.high %v17669_v53, %v8746_v57 }
 0x70a   : > { %v8749_v24 = vpop.f32.mrb[86].mxu0 }
 0x70b   : > { %v9859_v45 = vcombine.low %v9835_v52, %v9851_v56  ;;  %v9860_v16 = vcombine.high %v9835_v52, %v9851_v56  ;;  %v9875_v40 = vcombine.low %v9842_v44, %v9858_v34  ;;  %v9876_v58 = vcombine.high %v9842_v44, %v9858_v34  ;;  %v13396_v14 = vpop.f32.mrb[87].mxu0 }
 0x70c   : > { %v9903_v44 = vrot.slane %v9895_v12, %v15112_v1  ;;  %v9910_v56 = vrot.slane %v9896_v61, %v15112_v1 }
 0x70d   : > { %v9867_v18 = vrot.slane %v9859_v45, %v15122_v47  ;;  %v9874_v25 = vrot.slane %v9860_v16, %v15122_v47  ;;  %v9883_v3 = vrot.slane %v9875_v40, %v15122_v47  ;;  %v9890_v32 = vrot.slane %v9876_v58, %v15122_v47 }
 0x70f   : > { %v10371_v29 = vcombine.low %v9867_v18, %v9874_v25  ;;  %v12680_v22 = vcombine.high %v9867_v18, %v9874_v25  ;;  %v10387_v26 = vcombine.low %v9883_v3, %v9890_v32  ;;  %v12681_v2 = vcombine.high %v9883_v3, %v9890_v32 }
 0x710   : > { %v17685_v39 = vpop.f32.mrb[88].mxu0 }
 0x711   : > { %v10378_v42 = vrot.slane %v10371_v29, %v15112_v1  ;;  %v10386_v49 = vrot.slane %v12680_v22, %v15112_v1  ;;  %v10394_v20 = vrot.slane %v10387_v26, %v15112_v1  ;;  %v10402_v36 = vrot.slane %v12681_v2, %v15112_v1  ;;  %v13407_v31 = vpop.f32.mrb[89].mxu0 }
 0x712   : > { %v8835_v9 = vpop.f32.mrb[90].mxu0 }
 0x713   : > { %v10404_v54 = vcombine.high %v10378_v42, %v10386_v49  ;;  %v10420_v28 = vcombine.high %v10394_v20, %v10402_v36  ;;  %v10403_v60 = vcombine.low %v10378_v42, %v10386_v49  ;;  %v10419_v62 = vcombine.low %v10394_v20, %v10402_v36  ;;  %v13408_v19 = vpop.f32.mrb[91].mxu0 }
 0x715   : > { %v17688_v37 = vrot.slane %v10404_v54, %v15122_v47  ;;  %v17691_v11 = vrot.slane %v10420_v28, %v15122_v47  ;;  %v17694_v48 = vrot.slane %v10403_v60, %v15122_v47  ;;  %v17697_v55 = vrot.slane %v10419_v62, %v15122_v47 }
 0x717   : > { %v10437_v13 = vcombine.low %v17688_v37, %v17691_v11  ;;  %v10436_v8 = vcombine.high %v17694_v48, %v17697_v55  ;;  %v10438_v7 = vcombine.high %v17688_v37, %v17691_v11  ;;  %v10435_v46 = vcombine.low %v17694_v48, %v17697_v55 }
 0x72d   : > { %v17707_v17 = vpop.f32.mrb[92].mxu0 }
 0x72e   : > { %v9963_v27 = vcombine.low %v17685_v39, %v17707_v17  ;;  %v9964_v6 = vcombine.high %v17685_v39, %v17707_v17  ;;  %v13419_v41 = vpop.f32.mrb[93].mxu0 }
 0x72f   : > { %v8921_v38 = vpop.f32.mrb[94].mxu0 }
 0x730   : > { %v13420_v35 = vpop.f32.mrb[95].mxu0 }
 0x731   : > { %v8703_v0 = vpop.f32.mrb[104].mxu1 }
 0x732   : > { %v13389_v30 = vpop.f32.mrb[105].mxu1 }
 0x733   : > { %v8706_v33 = vpop.f32.mrb[106].mxu1 }
 0x734   : > { %v13390_v53 = vpop.f32.mrb[107].mxu1 }
 0x735   : > { %v17713_v50 = vpop.f32.mrb[96].mxu0 }
 0x736   : > { %v13431_v59 = vpop.f32.mrb[97].mxu0 }
 0x737   : > { %v9007_v10 = vpop.f32.mrb[98].mxu0 }
 0x738   : > { %v13432_v23 = vpop.f32.mrb[99].mxu0 }
 0x739   : > { %v8789_v51 = vpop.f32.mrb[108].mxu1 }
 0x73a   : > { %v9911_v63 = vcombine.low %v8703_v0, %v8789_v51  ;;  %v9912_v15 = vcombine.high %v8703_v0, %v8789_v51  ;;  %v13401_v21 = vpop.f32.mrb[109].mxu1 }
 0x73b   : > { %v8792_v52 = vpop.f32.mrb[110].mxu1  ;;  %v9978_v21 = vrot.slane %v9964_v6, %v15112_v1 }
 0x73c   : > { %v9919_v34 = vrot.slane %v9911_v63, %v15112_v1  ;;  %v9926_v43 = vrot.slane %v9912_v15, %v15112_v1  ;;  %v13402_v57 = vpop.f32.mrb[111].mxu1  ;;  %v9971_v15 = vrot.slane %v9963_v27, %v15112_v1 }
 0x73d   : > { %v17719_v45 = vpop.f32.mrb[100].mxu0 }
 0x73e   : > { %v9927_v16 = vcombine.low %v9903_v44, %v9919_v34  ;;  %v9928_v40 = vcombine.high %v9903_v44, %v9919_v34  ;;  %v9943_v58 = vcombine.low %v9910_v56, %v9926_v43  ;;  %v9944_v4 = vcombine.high %v9910_v56, %v9926_v43  ;;  %v13443_v24 = vpop.f32.mrb[101].mxu0 }
 0x73f   : > { %v10031_v18 = vcombine.low %v17713_v50, %v17719_v45  ;;  %v10032_v12 = vcombine.high %v17713_v50, %v17719_v45  ;;  %v9093_v25 = vpop.f32.mrb[102].mxu0 }
 0x740   : > { %v9935_v61 = vrot.slane %v9927_v16, %v15122_v47  ;;  %v9942_v3 = vrot.slane %v9928_v40, %v15122_v47  ;;  %v9951_v32 = vrot.slane %v9943_v58, %v15122_v47  ;;  %v9958_v14 = vrot.slane %v9944_v4, %v15122_v47  ;;  %v13444_v29 = vpop.f32.mrb[103].mxu0 }
 0x741   : > { %v8875_v22 = vpop.f32.mrb[112].mxu1 }
 0x742   : > { %v10439_v26 = vcombine.low %v9935_v61, %v9942_v3  ;;  %v12682_v2 = vcombine.high %v9935_v61, %v9942_v3  ;;  %v10455_v42 = vcombine.low %v9951_v32, %v9958_v14  ;;  %v12683_v49 = vcombine.high %v9951_v32, %v9958_v14  ;;  %v13413_v20 = vpop.f32.mrb[113].mxu1 }
 0x743   : > { %v8878_v36 = vpop.f32.mrb[114].mxu1 }
 0x744   : > { %v10446_v31 = vrot.slane %v10439_v26, %v15112_v1  ;;  %v10454_v54 = vrot.slane %v12682_v2, %v15112_v1  ;;  %v10462_v28 = vrot.slane %v10455_v42, %v15112_v1  ;;  %v10470_v60 = vrot.slane %v12683_v49, %v15112_v1  ;;  %v13414_v62 = vpop.f32.mrb[115].mxu1 }
 0x745   : > { %v13799_v62 = vld [vmem:[#allocation11] sm:$0xff]  }
 0x746   : > { %v10472_v9 = vcombine.high %v10446_v31, %v10454_v54  ;;  %v10488_v19 = vcombine.high %v10462_v28, %v10470_v60  ;;  %v10471_v41 = vcombine.low %v10446_v31, %v10454_v54  ;;  %v10487_v38 = vcombine.low %v10462_v28, %v10470_v60  ;;  %13547 = vmatprep.subr.bf16.mxu0 %v13799_v62 }
 0x747   : > { %13548 = vmatpush3.bf16.msra.mxu0 %v13799_v62  ;;  %v13804_v62 = vld [vmem:[#allocation11 + $0x28] sm:$0xff]  }
 0x748   : > { %v10486_v35 = vrot.slane %v10472_v9, %v15122_v47  ;;  %v10502_v0 = vrot.slane %v10488_v19, %v15122_v47  ;;  %v17736_v30 = vrot.slane %v10471_v41, %v15122_v47  ;;  %v17739_v33 = vrot.slane %v10487_v38, %v15122_v47  ;;  %v13800_v9 = vld [vmem:[#allocation11 + $0x8] sm:$0xff]  }
 0x749   : > { %v8961_v53 = vpop.f32.mrb[116].mxu1  ;;  %13549 = vmatprep.subr.bf16.mxu0 %v13800_v9 }
 0x74a   : > { %v9979_v59 = vcombine.low %v8875_v22, %v8961_v53  ;;  %v9980_v10 = vcombine.high %v8875_v22, %v8961_v53  ;;  %v13425_v23 = vpop.f32.mrb[117].mxu1  ;;  %v10505_v51 = vcombine.low %v10486_v35, %v10502_v0  ;;  %v10504_v63 = vcombine.high %v17736_v30, %v17739_v33  ;;  %v13802_v53 = vld [vmem:[#allocation11 + $0x18] sm:$0xff]  }
 0x74b   : > { %v8964_v52 = vpop.f32.mrb[118].mxu1  ;;  %v10506_v44 = vcombine.high %v10486_v35, %v10502_v0  ;;  %v10503_v56 = vcombine.low %v17736_v30, %v17739_v33  ;;  %v13801_v0 = vld [vmem:[#allocation11 + $0x10] sm:$0xff]   ;;  %13550 = vmatpush3.bf16.msra.mxu0 %v13800_v9 }
 0x74c   : > { %v9987_v34 = vrot.slane %v9979_v59, %v15112_v1  ;;  %v9994_v43 = vrot.slane %v9980_v10, %v15112_v1  ;;  %v13426_v57 = vpop.f32.mrb[119].mxu1  ;;  %v13720_v16 = vpack.i.bf16 %v10505_v51, %v10437_v13  ;;  %v13715_v27 = vpack.i.bf16 %v10504_v63, %v10436_v8  ;;  %13551 = vmatprep.subr.bf16.mxu0 %v13801_v0  ;;  %v13803_v59 = vld [vmem:[#allocation11 + $0x20] sm:$0xff]  }
 0x74d   : > { %v13725_v39 = vpack.i.bf16 %v10506_v44, %v10438_v7 }
 0x74e   : > { %v9995_v17 = vcombine.low %v9971_v15, %v9987_v34  ;;  %v9996_v6 = vcombine.high %v9971_v15, %v9987_v34  ;;  %v10011_v40 = vcombine.low %v9978_v21, %v9994_v43  ;;  %v10012_v58 = vcombine.high %v9978_v21, %v9994_v43  ;;  %13721 = vrot.lane.b32.xlu1 %v13720_v16, %s14513_s18 }
 0x74f   : > { %13716 = vrot.lane.b32.xlu0 %v13715_v27, %s14515_s19  ;;  %13552 = vmatpush3.bf16.msra.mxu0 %v13801_v0  ;;  %v10039_v34 = vrot.slane %v10031_v18, %v15112_v1  ;;  %v10046_v43 = vrot.slane %v10032_v12, %v15112_v1 }
 0x750   : > { %v10003_v4 = vrot.slane %v9995_v17, %v15122_v47  ;;  %v10010_v13 = vrot.slane %v9996_v6, %v15122_v47  ;;  %v10019_v24 = vrot.slane %v10011_v40, %v15122_v47  ;;  %v10026_v8 = vrot.slane %v10012_v58, %v15122_v47  ;;  %13553 = vmatprep.subr.bf16.mxu0 %v13802_v53 }
 0x751   : > { %v9047_v25 = vpop.f32.mrb[120].mxu1 }
 0x752   : > { %v10507_v61 = vcombine.low %v10003_v4, %v10010_v13  ;;  %v12684_v37 = vcombine.high %v10003_v4, %v10010_v13  ;;  %v10523_v11 = vcombine.low %v10019_v24, %v10026_v8  ;;  %v12685_v7 = vcombine.high %v10019_v24, %v10026_v8  ;;  %v13437_v3 = vpop.f32.mrb[121].mxu1 }
 0x753   : > { %13726 = vrot.lane.b32.xlu0 %v13725_v39, %s14514_s20  ;;  %v9050_v32 = vpop.f32.mrb[122].mxu1  ;;  %13554 = vmatpush3.bf16.msra.mxu0 %v13802_v53 }
 0x754   : > { %v10514_v14 = vrot.slane %v10507_v61, %v15112_v1  ;;  %v10522_v29 = vrot.slane %v12684_v37, %v15112_v1  ;;  %v10530_v22 = vrot.slane %v10523_v11, %v15112_v1  ;;  %v10538_v26 = vrot.slane %v12685_v7, %v15112_v1  ;;  %v13438_v2 = vpop.f32.mrb[123].mxu1  ;;  %13555 = vmatprep.subr.bf16.mxu0 %v13803_v59 }
 0x756   : > { %v10539_v42 = vcombine.low %v10514_v14, %v10522_v29  ;;  %v10555_v49 = vcombine.low %v10530_v22, %v10538_v26  ;;  %v10540_v20 = vcombine.high %v10514_v14, %v10522_v29  ;;  %v10556_v36 = vcombine.high %v10530_v22, %v10538_v26 }
 0x757   : > { %13556 = vmatpush3.bf16.msra.mxu0 %v13803_v59 }
 0x758   : > { %v17776_v31 = vrot.slane %v10539_v42, %v15122_v47  ;;  %v17779_v54 = vrot.slane %v10555_v49, %v15122_v47  ;;  %v17782_v28 = vrot.slane %v10540_v20, %v15122_v47  ;;  %v17785_v60 = vrot.slane %v10556_v36, %v15122_v47  ;;  %13557 = vmatprep.subr.bf16.mxu0 %v13804_v62 }
 0x75a   : > { %v10572_v19 = vcombine.high %v17776_v31, %v17779_v54  ;;  %v10573_v41 = vcombine.low %v17782_v28, %v17785_v60  ;;  %v10574_v38 = vcombine.high %v17782_v28, %v17785_v60  ;;  %v10571_v35 = vcombine.low %v17776_v31, %v17779_v54 }
 0x75b   : > { %13558 = vmatpush3.bf16.msra.mxu0 %v13804_v62 }
 0x770   : > { %v17795_v10 = vpop.f32.mrb[104].mxu0 }
 0x771   : > { %v13455_v23 = vpop.f32.mrb[105].mxu0 }
 0x772   : > { %v9179_v51 = vpop.f32.mrb[106].mxu0 }
 0x773   : > { %v13456_v63 = vpop.f32.mrb[107].mxu0 }
 0x778   : > { %v9262_v57 = vpop.f32.mrb[108].mxu0 }
 0x779   : > { %v10099_v17 = vcombine.low %v17795_v10, %v9262_v57  ;;  %v10100_v6 = vcombine.high %v17795_v10, %v9262_v57  ;;  %v13467_v40 = vpop.f32.mrb[109].mxu0 }
 0x77a   : > { %v9133_v15 = vpop.f32.mrb[124].mxu1  ;;  %v9265_v4 = vpop.f32.mrb[110].mxu0 }
 0x77b   : > { %v10047_v21 = vcombine.low %v9047_v25, %v9133_v15  ;;  %v10048_v52 = vcombine.high %v9047_v25, %v9133_v15  ;;  %v13449_v44 = vpop.f32.mrb[125].mxu1  ;;  %v13468_v25 = vpop.f32.mrb[111].mxu0  ;;  %v10114_v40 = vrot.slane %v10100_v6, %v15112_v1 }
 0x77c   : > { %v9136_v16 = vpop.f32.mrb[126].mxu1 }
 0x77d   : > { %v10055_v27 = vrot.slane %v10047_v21, %v15112_v1  ;;  %v10062_v39 = vrot.slane %v10048_v52, %v15112_v1  ;;  %v13450_v58 = vpop.f32.mrb[127].mxu1  ;;  %v13805_v52 = vld [vmem:[#allocation11 + $0x30] sm:$0xff]  }
 0x77e   : > { %13559 = vmatprep.subr.bf16.mxu0 %v13805_v52 }
 0x77f   : > { %v10063_v13 = vcombine.low %v10039_v34, %v10055_v27  ;;  %v10064_v18 = vcombine.high %v10039_v34, %v10055_v27  ;;  %v10079_v24 = vcombine.low %v10046_v43, %v10062_v39  ;;  %v10080_v8 = vcombine.high %v10046_v43, %v10062_v39  ;;  %13560 = vmatpush3.bf16.msra.mxu0 %v13805_v52 }
 0x780   : > { %v17813_v29 = vpop.f32.mrb[112].mxu0  ;;  %v10107_v39 = vrot.slane %v10099_v17, %v15112_v1 }
 0x781   : > { %v10071_v50 = vrot.slane %v10063_v13, %v15122_v47  ;;  %v10078_v45 = vrot.slane %v10064_v18, %v15122_v47  ;;  %v10087_v12 = vrot.slane %v10079_v24, %v15122_v47  ;;  %v10094_v61 = vrot.slane %v10080_v8, %v15122_v47  ;;  %v13479_v20 = vpop.f32.mrb[113].mxu0 }
 0x782   : > { %v9219_v37 = vpop.f32.mrb[128].mxu1  ;;  %v9351_v9 = vpop.f32.mrb[114].mxu0 }
 0x783   : > { %v10575_v11 = vcombine.low %v10071_v50, %v10078_v45  ;;  %v12686_v7 = vcombine.high %v10071_v50, %v10078_v45  ;;  %v10591_v3 = vcombine.low %v10087_v12, %v10094_v61  ;;  %v12687_v32 = vcombine.high %v10087_v12, %v10094_v61  ;;  %v13461_v14 = vpop.f32.mrb[129].mxu1  ;;  %v13480_v0 = vpop.f32.mrb[115].mxu0 }
 0x784   : > { %v9222_v22 = vpop.f32.mrb[130].mxu1 }
 0x785   : > { %v10582_v26 = vrot.slane %v10575_v11, %v15112_v1  ;;  %v10590_v2 = vrot.slane %v12686_v7, %v15112_v1  ;;  %v10598_v42 = vrot.slane %v10591_v3, %v15112_v1  ;;  %v10606_v49 = vrot.slane %v12687_v32, %v15112_v1  ;;  %v13462_v36 = vpop.f32.mrb[131].mxu1  ;;  %v13806_v11 = vld [vmem:[#allocation11 + $0x38] sm:$0xff]  }
 0x786   : > { %13561 = vmatprep.subr.bf16.mxu0 %v13806_v11 }
 0x787   : > { %v10607_v53 = vcombine.low %v10582_v26, %v10590_v2  ;;  %v10623_v59 = vcombine.low %v10598_v42, %v10606_v49  ;;  %v10608_v10 = vcombine.high %v10582_v26, %v10590_v2  ;;  %v10624_v23 = vcombine.high %v10598_v42, %v10606_v49  ;;  %13562 = vmatpush3.bf16.msra.mxu0 %v13806_v11 }
 0x788   : > { %v9434_v58 = vpop.f32.mrb[116].mxu0 }
 0x789   : > { %v17820_v51 = vrot.slane %v10607_v53, %v15122_v47  ;;  %v17823_v63 = vrot.slane %v10623_v59, %v15122_v47  ;;  %v10622_v15 = vrot.slane %v10608_v10, %v15122_v47  ;;  %v10638_v21 = vrot.slane %v10624_v23, %v15122_v47  ;;  %v13491_v45 = vpop.f32.mrb[117].mxu0 }
 0x78a   : > { %v9305_v44 = vpop.f32.mrb[132].mxu1  ;;  %v10167_v25 = vcombine.low %v17813_v29, %v9434_v58  ;;  %v10168_v50 = vcombine.high %v17813_v29, %v9434_v58  ;;  %v9437_v17 = vpop.f32.mrb[118].mxu0 }
 0x78b   : > { %v10115_v34 = vcombine.low %v9219_v37, %v9305_v44  ;;  %v10116_v43 = vcombine.high %v9219_v37, %v9305_v44  ;;  %v13473_v57 = vpop.f32.mrb[133].mxu1  ;;  %v10640_v16 = vcombine.high %v17820_v51, %v17823_v63  ;;  %v10641_v27 = vcombine.low %v10622_v15, %v10638_v21  ;;  %v13492_v29 = vpop.f32.mrb[119].mxu0 }
 0x78c   : > { %v9308_v4 = vpop.f32.mrb[134].mxu1  ;;  %v10642_v13 = vcombine.high %v10622_v15, %v10638_v21  ;;  %v10639_v18 = vcombine.low %v17820_v51, %v17823_v63  ;;  %v10182_v45 = vrot.slane %v10168_v50, %v15112_v1 }
 0x78d   : > { %v10123_v24 = vrot.slane %v10115_v34, %v15112_v1  ;;  %v10130_v8 = vrot.slane %v10116_v43, %v15112_v1  ;;  %v13474_v12 = vpop.f32.mrb[135].mxu1  ;;  %v13730_v6 = vpack.i.bf16 %v10640_v16, %v10572_v19  ;;  %v13735_v61 = vpack.i.bf16 %v10641_v27, %v10573_v41 }
 0x78e   : > { %v13740_v37 = vpack.i.bf16 %v10642_v13, %v10574_v38 }
 0x78f   : > { %v10131_v7 = vcombine.low %v10107_v39, %v10123_v24  ;;  %v10132_v3 = vcombine.high %v10107_v39, %v10123_v24  ;;  %v10147_v32 = vcombine.low %v10114_v40, %v10130_v8  ;;  %v10148_v14 = vcombine.high %v10114_v40, %v10130_v8  ;;  %13731 = vrot.lane.b32.xlu1 %v13730_v6, %s14515_s19 }
 0x790   : > { %v17851_v20 = vpop.f32.mrb[120].mxu0  ;;  %v10175_v8 = vrot.slane %v10167_v25, %v15112_v1 }
 0x791   : > { %v10139_v22 = vrot.slane %v10131_v7, %v15122_v47  ;;  %v10146_v19 = vrot.slane %v10132_v3, %v15122_v47  ;;  %v10155_v26 = vrot.slane %v10147_v32, %v15122_v47  ;;  %v10162_v41 = vrot.slane %v10148_v14, %v15122_v47  ;;  %v13503_v59 = vpop.f32.mrb[121].mxu0 }
 0x792   : > { %v9391_v28 = vpop.f32.mrb[136].mxu1  ;;  %v9523_v23 = vpop.f32.mrb[122].mxu0 }
 0x793   : > { %v10643_v60 = vcombine.low %v10139_v22, %v10146_v19  ;;  %v12688_v38 = vcombine.high %v10139_v22, %v10146_v19  ;;  %v10659_v2 = vcombine.low %v10155_v26, %v10162_v41  ;;  %v12689_v42 = vcombine.high %v10155_v26, %v10162_v41  ;;  %v13485_v49 = vpop.f32.mrb[137].mxu1  ;;  %13736 = vrot.lane.b32.xlu1 %v13735_v61, %s14513_s18  ;;  %v13504_v15 = vpop.f32.mrb[123].mxu0 }
 0x794   : > { %v9394_v36 = vpop.f32.mrb[138].mxu1 }
 0x795   : > { %v10650_v62 = vrot.slane %v10643_v60, %v15112_v1  ;;  %v10658_v9 = vrot.slane %v12688_v38, %v15112_v1  ;;  %v10666_v0 = vrot.slane %v10659_v2, %v15112_v1  ;;  %v10674_v53 = vrot.slane %v12689_v42, %v15112_v1  ;;  %v13486_v10 = vpop.f32.mrb[139].mxu1 }
 0x797   : > { %v10675_v21 = vcombine.low %v10650_v62, %v10658_v9  ;;  %v10691_v52 = vcombine.low %v10666_v0, %v10674_v53  ;;  %v10676_v44 = vcombine.high %v10650_v62, %v10658_v9  ;;  %v10692_v34 = vcombine.high %v10666_v0, %v10674_v53  ;;  %13741 = vrot.lane.b32.xlu1 %v13740_v37, %s14514_s20 }
 0x798   : > { %v9606_v12 = vpop.f32.mrb[124].mxu0 }
 0x799   : > { %v17860_v43 = vrot.slane %v10675_v21, %v15122_v47  ;;  %v17863_v57 = vrot.slane %v10691_v52, %v15122_v47  ;;  %v17866_v16 = vrot.slane %v10676_v44, %v15122_v47  ;;  %v17869_v27 = vrot.slane %v10692_v34, %v15122_v47  ;;  %v13515_v32 = vpop.f32.mrb[125].mxu0 }
 0x79a   : > { %v9477_v39 = vpop.f32.mrb[140].mxu1  ;;  %v10235_v7 = vcombine.low %v17851_v20, %v9606_v12  ;;  %v10236_v3 = vcombine.high %v17851_v20, %v9606_v12  ;;  %v9609_v14 = vpop.f32.mrb[126].mxu0 }
 0x79b   : > { %v10183_v40 = vcombine.low %v9391_v28, %v9477_v39  ;;  %v10184_v58 = vcombine.high %v9391_v28, %v9477_v39  ;;  %v13497_v4 = vpop.f32.mrb[141].mxu1  ;;  %v10708_v13 = vcombine.high %v17860_v43, %v17863_v57  ;;  %v10709_v24 = vcombine.low %v17866_v16, %v17869_v27  ;;  %v13516_v26 = vpop.f32.mrb[127].mxu0 }
 0x79c   : > { %v9480_v17 = vpop.f32.mrb[142].mxu1  ;;  %v10710_v6 = vcombine.high %v17866_v16, %v17869_v27  ;;  %v10707_v61 = vcombine.low %v17860_v43, %v17863_v57 }
 0x79d   : > { %v10191_v37 = vrot.slane %v10183_v40, %v15112_v1  ;;  %v10198_v11 = vrot.slane %v10184_v58, %v15112_v1  ;;  %v13498_v25 = vpop.f32.mrb[143].mxu1  ;;  %v10243_v17 = vrot.slane %v10235_v7, %v15112_v1 }
 0x79f   : > { %v10199_v50 = vcombine.low %v10175_v8, %v10191_v37  ;;  %v10200_v29 = vcombine.high %v10175_v8, %v10191_v37  ;;  %v10215_v22 = vcombine.low %v10182_v45, %v10198_v11  ;;  %v10216_v19 = vcombine.high %v10182_v45, %v10198_v11 }
 0x7a0   : > { %v10250_v37 = vrot.slane %v10236_v3, %v15112_v1 }
 0x7a1   : > { %v10207_v41 = vrot.slane %v10199_v50, %v15122_v47  ;;  %v10214_v28 = vrot.slane %v10200_v29, %v15122_v47  ;;  %v10223_v60 = vrot.slane %v10215_v22, %v15122_v47  ;;  %v10230_v38 = vrot.slane %v10216_v19, %v15122_v47 }
 0x7a2   : > { %v9563_v2 = vpop.f32.mrb[144].mxu1 }
 0x7a3   : > { %v10711_v42 = vcombine.low %v10207_v41, %v10214_v28  ;;  %v12690_v49 = vcombine.high %v10207_v41, %v10214_v28  ;;  %v10727_v20 = vcombine.low %v10223_v60, %v10230_v38  ;;  %v12691_v36 = vcombine.high %v10223_v60, %v10230_v38  ;;  %v13509_v62 = vpop.f32.mrb[145].mxu1 }
 0x7a4   : > { %v9566_v9 = vpop.f32.mrb[146].mxu1 }
 0x7a5   : > { %v10718_v0 = vrot.slane %v10711_v42, %v15112_v1  ;;  %v10726_v53 = vrot.slane %v12690_v49, %v15112_v1  ;;  %v10734_v59 = vrot.slane %v10727_v20, %v15112_v1  ;;  %v10742_v10 = vrot.slane %v12691_v36, %v15112_v1  ;;  %v13510_v23 = vpop.f32.mrb[147].mxu1 }
 0x7a7   : > { %v10743_v15 = vcombine.low %v10718_v0, %v10726_v53  ;;  %v10759_v21 = vcombine.low %v10734_v59, %v10742_v10  ;;  %v10744_v52 = vcombine.high %v10718_v0, %v10726_v53  ;;  %v10760_v44 = vcombine.high %v10734_v59, %v10742_v10 }
 0x7a9   : > { %v17894_v34 = vrot.slane %v10743_v15, %v15122_v47  ;;  %v17897_v16 = vrot.slane %v10759_v21, %v15122_v47  ;;  %v10758_v27 = vrot.slane %v10744_v52, %v15122_v47  ;;  %v10774_v39 = vrot.slane %v10760_v44, %v15122_v47 }
 0x7aa   : > { %v9649_v40 = vpop.f32.mrb[148].mxu1 }
 0x7ab   : > { %v10251_v58 = vcombine.low %v9563_v2, %v9649_v40  ;;  %v10252_v4 = vcombine.high %v9563_v2, %v9649_v40  ;;  %v13521_v8 = vpop.f32.mrb[149].mxu1  ;;  %v10776_v45 = vcombine.high %v17894_v34, %v17897_v16  ;;  %v10777_v12 = vcombine.low %v10758_v27, %v10774_v39 }
 0x7ac   : > { %v9652_v11 = vpop.f32.mrb[150].mxu1  ;;  %v10778_v32 = vcombine.high %v10758_v27, %v10774_v39  ;;  %v10775_v25 = vcombine.low %v17894_v34, %v17897_v16 }
 0x7ad   : > { %v10259_v14 = vrot.slane %v10251_v58, %v15112_v1  ;;  %v10266_v50 = vrot.slane %v10252_v4, %v15112_v1  ;;  %v13522_v29 = vpop.f32.mrb[151].mxu1  ;;  %v13745_v22 = vpack.i.bf16 %v10776_v45, %v10708_v13  ;;  %v13750_v19 = vpack.i.bf16 %v10777_v12, %v10709_v24 }
 0x7ae   : > { %v13755_v26 = vpack.i.bf16 %v10778_v32, %v10710_v6 }
 0x7af   : > { %v10267_v41 = vcombine.low %v10243_v17, %v10259_v14  ;;  %v10268_v28 = vcombine.high %v10243_v17, %v10259_v14  ;;  %v10283_v60 = vcombine.low %v10250_v37, %v10266_v50  ;;  %v10284_v38 = vcombine.high %v10250_v37, %v10266_v50  ;;  %13746 = vrot.lane.b32.xlu0 %v13745_v22, %s14515_s19 }
 0x7b1   : > { %v10275_v7 = vrot.slane %v10267_v41, %v15122_v47  ;;  %v10282_v3 = vrot.slane %v10268_v28, %v15122_v47  ;;  %v10291_v2 = vrot.slane %v10283_v60, %v15122_v47  ;;  %v10298_v42 = vrot.slane %v10284_v38, %v15122_v47 }
 0x7b2   : > { %v9735_v49 = vpop.f32.mrb[152].mxu1 }
 0x7b3   : > { %v10779_v20 = vcombine.low %v10275_v7, %v10282_v3  ;;  %v12692_v36 = vcombine.high %v10275_v7, %v10282_v3  ;;  %v10795_v13 = vcombine.low %v10291_v2, %v10298_v42  ;;  %v12693_v24 = vcombine.high %v10291_v2, %v10298_v42  ;;  %13751 = vrot.lane.b32.xlu0 %v13750_v19, %s14513_s18  ;;  %v13533_v6 = vpop.f32.mrb[153].mxu1 }
 0x7b4   : > { %v9738_v62 = vpop.f32.mrb[154].mxu1 }
 0x7b5   : > { %v10786_v9 = vrot.slane %v10779_v20, %v15112_v1  ;;  %v10794_v0 = vrot.slane %v12692_v36, %v15112_v1  ;;  %v10802_v53 = vrot.slane %v10795_v13, %v15112_v1  ;;  %v10810_v59 = vrot.slane %v12693_v24, %v15112_v1  ;;  %v13534_v10 = vpop.f32.mrb[155].mxu1 }
 0x7b7   : > { %13756 = vrot.lane.b32.xlu0 %v13755_v26, %s14514_s20  ;;  %v9692_v23 = vpop.f32.mrb[128].mxu0  ;;  %v10811_v15 = vcombine.low %v10786_v9, %v10794_v0  ;;  %v10827_v21 = vcombine.low %v10802_v53, %v10810_v59  ;;  %v10812_v52 = vcombine.high %v10786_v9, %v10794_v0  ;;  %v10828_v44 = vcombine.high %v10802_v53, %v10810_v59 }
 0x7b8   : > { %v13527_v27 = vpop.f32.mrb[129].mxu0 }
 0x7b9   : > { %v9695_v39 = vpop.f32.mrb[130].mxu0  ;;  %v17921_v40 = vrot.slane %v10811_v15, %v15122_v47  ;;  %v17924_v58 = vrot.slane %v10827_v21, %v15122_v47  ;;  %v17927_v4 = vrot.slane %v10812_v52, %v15122_v47  ;;  %v17930_v8 = vrot.slane %v10828_v44, %v15122_v47 }
 0x7ba   : > { %v13528_v45 = vpop.f32.mrb[131].mxu0 }
 0x7bb   : > { %v9821_v12 = vpop.f32.mrb[156].mxu1  ;;  %v10844_v17 = vcombine.high %v17921_v40, %v17924_v58  ;;  %v10845_v37 = vcombine.low %v17927_v4, %v17930_v8  ;;  %v10846_v11 = vcombine.high %v17927_v4, %v17930_v8  ;;  %v10843_v32 = vcombine.low %v17921_v40, %v17924_v58  ;;  %v12696_v40 = vld [vmem:[%s18656_s0] ss:$0 sm:$0xff] }
 0x7bc   : > { %v10319_v14 = vcombine.low %v9735_v49, %v9821_v12  ;;  %v10320_v50 = vcombine.high %v9735_v49, %v9821_v12  ;;  %v13545_v29 = vpop.f32.mrb[157].mxu1 }
 0x7bd   : > { %v9824_v22 = vpop.f32.mrb[158].mxu1 }
 0x7be   : > { %v13546_v19 = vpop.f32.mrb[159].mxu1  ;;  %v10327_v7 = vrot.slane %v10319_v14, %v15112_v1  ;;  %v10334_v3 = vrot.slane %v10320_v50, %v15112_v1 }
 0x7bf   : > { %v9778_v26 = vpop.f32.mrb[132].mxu0 }
 0x7c0   : > { %v10303_v41 = vcombine.low %v9692_v23, %v9778_v26  ;;  %v10304_v28 = vcombine.high %v9692_v23, %v9778_v26  ;;  %v13539_v60 = vpop.f32.mrb[133].mxu0  ;;  %v13722_v6 = vpop.permute.xlu1 %13721 }
 0x7c1   : > { %v9781_v38 = vpop.f32.mrb[134].mxu0  ;;  %v13717_v62 = vpop.permute.xlu0 %13716  ;;  %v13724_v10 = vunpack.i.h.bf16 %v13722_v6  ;;  %v13723_v23 = vunpack.i.l.bf16 %v13722_v6 }
 0x7c2   : > { %v10311_v2 = vrot.slane %v10303_v41, %v15112_v1  ;;  %v10318_v42 = vrot.slane %v10304_v28, %v15112_v1  ;;  %v13540_v20 = vpop.f32.mrb[135].mxu0  ;;  %v13719_v15 = vunpack.i.h.bf16 %v13717_v62  ;;  %v13718_v21 = vunpack.i.l.bf16 %v13717_v62 }
 0x7c4   : > { %v10335_v36 = vcombine.low %v10311_v2, %v10327_v7  ;;  %v10336_v13 = vcombine.high %v10311_v2, %v10327_v7  ;;  %v10351_v49 = vcombine.low %v10318_v42, %v10334_v3  ;;  %v10352_v24 = vcombine.high %v10318_v42, %v10334_v3 }
 0x7c5   : > { %v11012_v45 = vsel %vm6593_vm0, %v10503_v56, %v13719_v15  ;;  %v11011_v12 = vsel %vm6593_vm0, %v10435_v46, %v13718_v21  ;;  %v13727_v14 = vpop.permute.xlu0 %13726 }
 0x7c6   : > { %v10343_v9 = vrot.slane %v10335_v36, %v15122_v47  ;;  %v10350_v0 = vrot.slane %v10336_v13, %v15122_v47  ;;  %v10359_v53 = vrot.slane %v10351_v49, %v15122_v47  ;;  %v10366_v59 = vrot.slane %v10352_v24, %v15122_v47 }
 0x7c7   : > { %v13729_v26 = vunpack.i.h.bf16 %v13727_v14  ;;  %v13728_v41 = vunpack.i.l.bf16 %v13727_v14  ;;  %v11020_v30 = vsel %vm11019_vm3, %v11011_v12, %v13723_v23  ;;  %v11021_v33 = vsel %vm11019_vm3, %v11012_v45, %v13724_v10 }
 0x7c8   : > { %v10847_v52 = vcombine.low %v10343_v9, %v10350_v0  ;;  %v12694_v44 = vcombine.high %v10343_v9, %v10350_v0  ;;  %v10863_v27 = vcombine.low %v10359_v53, %v10366_v59  ;;  %v12695_v39 = vcombine.high %v10359_v53, %v10366_v59 }
 0x7c9   : > { %v11029_v28 = vsel %vm11028_vm4, %v11020_v30, %v13728_v41  ;;  %v11030_v60 = vsel %vm11028_vm4, %v11021_v33, %v13729_v26 }
 0x7ca   : > { %v10854_v50 = vrot.slane %v10847_v52, %v15112_v1  ;;  %v10862_v29 = vrot.slane %v12694_v44, %v15112_v1  ;;  %v10870_v22 = vrot.slane %v10863_v27, %v15112_v1  ;;  %v10878_v19 = vrot.slane %v12695_v39, %v15112_v1 }
 0x7cb   : > { %v11037_v38 = vpack.c.bf16 %v11030_v60, %v11029_v28 }
 0x7cc   : > { %v10879_v56 = vcombine.low %v10854_v50, %v10862_v29  ;;  %v10895_v48 = vcombine.low %v10870_v22, %v10878_v19  ;;  %v10880_v55 = vcombine.high %v10854_v50, %v10862_v29  ;;  %v10896_v46 = vcombine.high %v10870_v22, %v10878_v19 }
 0x7cd   : > { %13563 = vmatprep.mubr.bf16.mxu0 %v11037_v38 }
 0x7ce   : > { %v10887_v7 = vrot.slane %v10879_v56, %v15122_v47  ;;  %v10903_v3 = vrot.slane %v10895_v48, %v15122_v47  ;;  %v10894_v1 = vrot.slane %v10880_v55, %v15122_v47  ;;  %v10910_v2 = vrot.slane %v10896_v46, %v15122_v47 }
 0x7d0   : > { %v10912_v42 = vcombine.high %v10887_v7, %v10903_v3  ;;  %v10911_v20 = vcombine.low %v10887_v7, %v10903_v3  ;;  %v10913_v36 = vcombine.low %v10894_v1, %v10910_v2  ;;  %v10914_v13 = vcombine.high %v10894_v1, %v10910_v2  ;;  %v14175_v2 = vld [vmem:[%s14912_s13] sm:$0xff] }
 0x7d2   : > { %v13760_v49 = vpack.i.bf16 %v10912_v42, %v10844_v17  ;;  %v13765_v24 = vpack.i.bf16 %v10913_v36, %v10845_v37  ;;  %v13770_v6 = vpack.i.bf16 %v10914_v13, %v10846_v11  ;;  %v14176_v36 = vld [vmem:[%s14912_s13 + $0x8] sm:$0xff] }
 0x7d4   : > { %13761 = vrot.lane.b32.xlu1 %v13760_v49, %s14515_s19  ;;  %v14177_v49 = vld [vmem:[%s14912_s13 + $0x10] sm:$0xff] }
 0x7d8   : > { %13766 = vrot.lane.b32.xlu1 %v13765_v24, %s14513_s18 }
 0x7dc   : > { %13771 = vrot.lane.b32.xlu1 %v13770_v6, %s14514_s20  ;;  %s18660_s20 = sld [smem:[#allocation66_spill]] }
 0x7e2   : > { %s18313_s19 = scalar_lea.hbm %s18660_s20, %s12810_s30 }
 0x801   : > { %v13732_v47 = vpop.permute.xlu1 %13731 }
 0x802   : > { %v13734_v9 = vunpack.i.h.bf16 %v13732_v47  ;;  %v13733_v0 = vunpack.i.l.bf16 %v13732_v47  ;;  %v14178_v47 = vld [vmem:[%s14912_s13 + $0x18] sm:$0xff] }
 0x804   : > { %v11013_v37 = vsel %vm6593_vm0, %v10571_v35, %v13733_v0  ;;  %v11014_v4 = vsel %vm6593_vm0, %v10639_v18, %v13734_v9 }
 0x805   : > { %v13737_v62 = vpop.permute.xlu1 %13736 }
 0x806   : > { %v13739_v53 = vunpack.i.h.bf16 %v13737_v62  ;;  %v13738_v17 = vunpack.i.l.bf16 %v13737_v62 }
 0x808   : > { %v11022_v10 = vsel %vm11019_vm3, %v11013_v37, %v13738_v17  ;;  %v11023_v23 = vsel %vm11019_vm3, %v11014_v4, %v13739_v53  ;;  %v14179_v4 = vld [vmem:[%s14912_s13 + $0x20] sm:$0xff] }
 0x809   : > { %v13742_v59 = vpop.permute.xlu1 %13741 }
 0x80a   : > { %v13744_v8 = vunpack.i.h.bf16 %v13742_v59  ;;  %v13743_v11 = vunpack.i.l.bf16 %v13742_v59 }
 0x80c   : > { %v11031_v15 = vsel %vm11028_vm4, %v11022_v10, %v13743_v11  ;;  %v11032_v21 = vsel %vm11028_vm4, %v11023_v23, %v13744_v8  ;;  %v14180_v23 = vld [vmem:[%s14912_s13 + $0x28] sm:$0xff] }
 0x80d   : > { %v11038_v52 = vpack.c.bf16 %v11032_v21, %v11031_v15  ;;  %v14181_v21 = vld [vmem:[%s14912_s13 + $0x30] sm:$0xff] }
 0x80f   : > { %13564 = vmatmul.mubr.bf16.vlgmr.msra.gmra.mrb[136].mxu0 %v11038_v52 }
 0x821   : > { %v13747_v31 = vpop.permute.xlu0 %13746 }
 0x822   : > { %v13749_v35 = vunpack.i.h.bf16 %v13747_v31  ;;  %v13748_v44 = vunpack.i.l.bf16 %v13747_v31  ;;  %v14182_v31 = vld [vmem:[%s14912_s13 + $0x38] sm:$0xff] }
 0x824   : > { %v11016_v18 = vsel %vm6593_vm0, %v10775_v25, %v13749_v35  ;;  %v11015_v39 = vsel %vm6593_vm0, %v10707_v61, %v13748_v44  ;;  %v13807_v35 = vld [vmem:[#allocation13] ss:$16 sps:$4 sm:$0xff]   ;;  %v13809_v44 = vld [vmem:[#allocation13 + $0x4] ss:$16 sps:$4 sm:$0xff]  }
 0x825   : > { %v13752_v54 = vpop.permute.xlu0 %13751  ;;  %11491 = vmatprep.subr.bf16.mxu1 %v13809_v44 }
 0x826   : > { %v13754_v27 = vunpack.i.h.bf16 %v13752_v54  ;;  %v13753_v51 = vunpack.i.l.bf16 %v13752_v54  ;;  %11492 = vmatpush1.bf16.msra.mxu1 %v13807_v35 }
 0x828   : > { %v11024_v14 = vsel %vm11019_vm3, %v11015_v39, %v13753_v51  ;;  %v11025_v50 = vsel %vm11019_vm3, %v11016_v18, %v13754_v27  ;;  %v13810_v27 = vld [vmem:[#allocation13 + $0x8] ss:$16 sps:$4 sm:$0xff]   ;;  %v13812_v51 = vld [vmem:[#allocation13 + $0xc] ss:$16 sps:$4 sm:$0xff]   ;;  %v13813_v39 = vld [vmem:[#allocation13 + $0x20] ss:$16 sps:$4 sm:$0xff]  }
 0x829   : > { %v13757_v63 = vpop.permute.xlu0 %13756  ;;  %v13818_v18 = vld [vmem:[#allocation13 + $0x2c] ss:$16 sps:$4 sm:$0xff]   ;;  %11564 = vmatprep.subr.bf16.mxu0 %v13812_v51 }
 0x82a   : > { %v13759_v45 = vunpack.i.h.bf16 %v13757_v63  ;;  %v13758_v12 = vunpack.i.l.bf16 %v13757_v63  ;;  %v13815_v63 = vld [vmem:[#allocation13 + $0x24] ss:$16 sps:$4 sm:$0xff]   ;;  %11565 = vmatpush1.bf16.msra.mxu0 %v13810_v27 }
 0x82b   : > { %11493 = vmatprep.subr.bf16.mxu1 %v13815_v63  ;;  %11566 = vmatprep.subr.bf16.mxu0 %v13818_v18 }
 0x82c   : > { %v11033_v29 = vsel %vm11028_vm4, %v11024_v14, %v13758_v12  ;;  %v11034_v22 = vsel %vm11028_vm4, %v11025_v50, %v13759_v45  ;;  %v13816_v45 = vld [vmem:[#allocation13 + $0x28] ss:$16 sps:$4 sm:$0xff]   ;;  %v13821_v12 = vld [vmem:[#allocation13 + $0x44] ss:$16 sps:$4 sm:$0xff]   ;;  %v13824_v14 = vld [vmem:[#allocation13 + $0x4c] ss:$16 sps:$4 sm:$0xff]   ;;  %11494 = vmatpush1.bf16.msra.mxu1 %v13813_v39 }
 0x82d   : > { %v11039_v19 = vpack.c.bf16 %v11034_v22, %v11033_v29  ;;  %v13819_v50 = vld [vmem:[#allocation13 + $0x40] ss:$16 sps:$4 sm:$0xff]   ;;  %11495 = vmatprep.subr.bf16.mxu1 %v13821_v12  ;;  %v13822_v29 = vld [vmem:[#allocation13 + $0x48] ss:$16 sps:$4 sm:$0xff]  }
 0x82e   : > { %11567 = vmatpush1.bf16.msra.mxu0 %v13816_v45 }
 0x82f   : > { %13567 = vmatprep.mubr.bf16.mxu0 %v11039_v19  ;;  %11568 = vmatprep.subr.bf16.mxu0 %v13824_v14 }
 0x830   : > { %11496 = vmatpush1.bf16.msra.mxu1 %v13819_v50 }
 0x832   : > { %11569 = vmatpush1.bf16.msra.mxu0 %v13822_v29 }
 0x846   : > { %v13762_v34 = vpop.permute.xlu1 %13761 }
 0x847   : > { %v13764_v25 = vunpack.i.h.bf16 %v13762_v34  ;;  %v13763_v26 = vunpack.i.l.bf16 %v13762_v34 }
 0x849   : > { %v11017_v61 = vsel %vm6593_vm0, %v10843_v32, %v13763_v26  ;;  %v11018_v30 = vsel %vm6593_vm0, %v10911_v20, %v13764_v25 }
 0x84a   : > { %v13767_v16 = vpop.permute.xlu1 %13766 }
 0x84b   : > { %v13769_v41 = vunpack.i.h.bf16 %v13767_v16  ;;  %v13768_v43 = vunpack.i.l.bf16 %v13767_v16 }
 0x84d   : > { %v11026_v48 = vsel %vm11019_vm3, %v11017_v61, %v13768_v43  ;;  %v11027_v55 = vsel %vm11019_vm3, %v11018_v30, %v13769_v41 }
 0x84e   : > { %v13772_v57 = vpop.permute.xlu1 %13771 }
 0x84f   : > { %v13774_v33 = vunpack.i.h.bf16 %v13772_v57  ;;  %v13773_v56 = vunpack.i.l.bf16 %v13772_v57 }
 0x851   : > { %v11035_v46 = vsel %vm11028_vm4, %v11026_v48, %v13773_v56  ;;  %v11036_v28 = vsel %vm11028_vm4, %v11027_v55, %v13774_v33 }
 0x852   : > { %v11040_v60 = vpack.c.bf16 %v11036_v28, %v11035_v46  ;;  %v13825_v28 = vld [vmem:[#allocation13 + $0x60] ss:$16 sps:$4 sm:$0xff]  }
 0x854   : > { %13568 = vmatmul.mubr.bf16.gmra.mrb[140].mxu0 %v11040_v60  ;;  %v13827_v60 = vld [vmem:[#allocation13 + $0x64] ss:$16 sps:$4 sm:$0xff]  }
 0x855   : > { %11596 = vmatprep.mubr.bf16.mxu0 %v18655_v5  ;;  %11497 = vmatprep.subr.bf16.mxu1 %v13827_v60 }
 0x856   : > { %11498 = vmatpush1.bf16.msra.mxu1 %v13825_v28 }
 0x8e2   : > { %v13565_v58 = vpop.f32.mrb[136].mxu0 }
 0x8e3   : > { %v11146_v32 = vpop.f32.mrb[137].mxu0  ;;  %v11155_v1 = vadd.f32 %v13565_v58, %v12696_v40  ;;  %v13830_v58 = vld [vmem:[#allocation13 + $0x6c] ss:$16 sps:$4 sm:$0xff]  }
 0x8e4   : > { %v11147_v38 = vadd.f32 %v12696_v40, %v11146_v32  ;;  %v13566_v7 = vpop.f32.mrb[138].mxu0  ;;  %11570 = vmatprep.subr.bf16.mxu0 %v13830_v58  ;;  %v13831_v32 = vld [vmem:[#allocation13 + $0x80] ss:$16 sps:$4 sm:$0xff]  }
 0x8e5   : > { %v11149_v3 = vpop.f32.mrb[139].mxu0  ;;  %v18025_v24 = vadd.f32 %v14177_v49, %v11155_v1  ;;  %v11158_v6 = vadd.f32 %v13566_v7, %v12696_v40  ;;  %v13834_v7 = vld [vmem:[#allocation13 + $0x88] ss:$16 sps:$4 sm:$0xff]   ;;  %v13837_v1 = vld [vmem:[#allocation13 + $0xa0] ss:$16 sps:$4 sm:$0xff]  }
 0x8e6   : > { %v18018_v42 = vadd.f32 %v14175_v2, %v11147_v38  ;;  %v11150_v20 = vadd.f32 %v12696_v40, %v11149_v3  ;;  %v13833_v38 = vld [vmem:[#allocation13 + $0x84] ss:$16 sps:$4 sm:$0xff]   ;;  %v13836_v3 = vld [vmem:[#allocation13 + $0x8c] ss:$16 sps:$4 sm:$0xff]  }
 0x8e7   : > { %v18030_v62 = vadd.f32 %v14178_v47, %v11158_v6  ;;  %11499 = vmatprep.subr.bf16.mxu1 %v13833_v38  ;;  %v13839_v2 = vld [vmem:[#allocation13 + $0xa4] ss:$16 sps:$4 sm:$0xff]   ;;  %v13848_v6 = vld [vmem:[#allocation13 + $0xcc] ss:$16 sps:$4 sm:$0xff]   ;;  %v13843_v47 = vld [vmem:[#allocation13 + $0xc0] ss:$16 sps:$4 sm:$0xff]  }
 0x8e8   : > { %v18021_v13 = vadd.f32 %v14176_v36, %v11150_v20  ;;  %11185 = vadd.xlane.f32.xlu0 %v18018_v42  ;;  %11500 = vmatpush1.bf16.msra.mxu1 %v13831_v32  ;;  %v13840_v20 = vld [vmem:[#allocation13 + $0xa8] ss:$16 sps:$4 sm:$0xff]   ;;  %v13842_v36 = vld [vmem:[#allocation13 + $0xac] ss:$16 sps:$4 sm:$0xff]   ;;  %v13845_v49 = vld [vmem:[#allocation13 + $0xc4] ss:$16 sps:$4 sm:$0xff]  }
 0x8e9   : > { %11501 = vmatprep.subr.bf16.mxu1 %v13839_v2 }
 0x8ea   : > { %11187 = vadd.xlane.f32.xlu1 %v18021_v13 }
 0x8ec   : > { %11189 = vadd.xlane.f32.xlu0 %v18025_v24  ;;  %11502 = vmatpush1.bf16.msra.mxu1 %v13837_v1 }
 0x8ed   : > { %11503 = vmatprep.subr.bf16.mxu1 %v13845_v49 }
 0x8f0   : > { %11191 = vadd.xlane.f32.xlu0 %v18030_v62  ;;  %11504 = vmatpush1.bf16.msra.mxu1 %v13843_v47 }
 0x927   : > { %v13569_v9 = vpop.f32.mrb[140].mxu0 }
 0x928   : > { %v11162_v0 = vpop.f32.mrb[141].mxu0  ;;  %v11171_v37 = vadd.f32 %v13569_v9, %v12696_v40  ;;  %v13846_v9 = vld [vmem:[#allocation13 + $0xc8] ss:$16 sps:$4 sm:$0xff]  }
 0x929   : > { %v11163_v53 = vadd.f32 %v12696_v40, %v11162_v0  ;;  %v13570_v17 = vpop.f32.mrb[142].mxu0  ;;  %v13851_v0 = vld [vmem:[#allocation13 + $0xe4] ss:$16 sps:$4 sm:$0xff]  }
 0x92a   : > { %v11165_v59 = vpop.f32.mrb[143].mxu0  ;;  %v11174_v10 = vadd.f32 %v13570_v17, %v12696_v40  ;;  %v18041_v52 = vadd.f32 %v14181_v21, %v11171_v37  ;;  %v13849_v17 = vld [vmem:[#allocation13 + $0xe0] ss:$16 sps:$4 sm:$0xff]   ;;  %11505 = vmatprep.subr.bf16.mxu1 %v13851_v0 }
 0x92b   : > { %v18034_v8 = vadd.f32 %v14179_v4, %v11163_v53  ;;  %v11166_v11 = vadd.f32 %v12696_v40, %v11165_v59  ;;  %v13828_v40 = vld [vmem:[#allocation13 + $0x68] ss:$16 sps:$4 sm:$0xff]   ;;  %v13854_v53 = vld [vmem:[#allocation13 + $0xec] ss:$16 sps:$4 sm:$0xff]   ;;  %11506 = vmatpush1.bf16.msra.mxu1 %v13849_v17 }
 0x92c   : > { %v18045_v54 = vadd.f32 %v14182_v31, %v11174_v10  ;;  %11571 = vmatpush1.bf16.msra.mxu0 %v13828_v40  ;;  %v13852_v59 = vld [vmem:[#allocation13 + $0xe8] ss:$16 sps:$4 sm:$0xff]  }
 0x92d   : > { %v18037_v15 = vadd.f32 %v14180_v23, %v11166_v11  ;;  %11193 = vadd.xlane.f32.xlu0 %v18034_v8  ;;  %11572 = vmatprep.subr.bf16.mxu0 %v13836_v3 }
 0x92f   : > { %11195 = vadd.xlane.f32.xlu1 %v18037_v15 }
 0x930   : > { %11573 = vmatpush1.bf16.msra.mxu0 %v13834_v7 }
 0x931   : > { %11197 = vadd.xlane.f32.xlu0 %v18041_v52  ;;  %11574 = vmatprep.subr.bf16.mxu0 %v13842_v36 }
 0x933   : > { %11199 = vadd.xlane.f32.xlu1 %v18045_v54 }
 0x934   : > { %11575 = vmatpush1.bf16.msra.mxu0 %v13840_v20 }
 0x935   : > { %11576 = vmatprep.subr.bf16.mxu0 %v13848_v6 }
 0x938   : > { %11577 = vmatpush1.bf16.msra.mxu0 %v13846_v9 }
 0x939   : > { %11578 = vmatprep.subr.bf16.mxu0 %v13854_v53 }
 0x93c   : > { %11579 = vmatpush1.bf16.msra.mxu0 %v13852_v59 }
 0x975   : > { %v11186_v22 = vpop.xlane.xlu0 %11185 }
 0x976   : > { %v11201_v19 = vmul.f32 0.0078125, %v11186_v22 }
 0x977   : > { %v11188_v34 = vpop.xlane.xlu1 %11187 }
 0x978   : > { %v18050_v16 = vsub.f32 %v18018_v42, %v11201_v19  ;;  %v11202_v25 = vmul.f32 0.0078125, %v11188_v34 }
 0x979   : > { %v11190_v26 = vpop.xlane.xlu0 %11189 }
 0x97a   : > { %v18053_v41 = vsub.f32 %v18021_v13, %v11202_v25  ;;  %v11203_v43 = vmul.f32 0.0078125, %v11190_v26  ;;  %v11217_v57 = vmul.f32 %v18050_v16, %v18050_v16 }
 0x97c   : > { %v18058_v61 = vsub.f32 %v18025_v24, %v11203_v43  ;;  %11225 = vadd.xlane.f32.xlu0 %v11217_v57  ;;  %v11218_v30 = vmul.f32 %v18053_v41, %v18053_v41 }
 0x97d   : > { %v11192_v33 = vpop.xlane.xlu0 %11191 }
 0x97e   : > { %v11204_v56 = vmul.f32 0.0078125, %v11192_v33  ;;  %11227 = vadd.xlane.f32.xlu1 %v11218_v30  ;;  %v11219_v48 = vmul.f32 %v18058_v61, %v18058_v61 }
 0x980   : > { %v18065_v55 = vsub.f32 %v18030_v62, %v11204_v56  ;;  %11229 = vadd.xlane.f32.xlu0 %v11219_v48 }
 0x982   : > { %v11220_v46 = vmul.f32 %v18065_v55, %v18065_v55 }
 0x984   : > { %11231 = vadd.xlane.f32.xlu1 %v11220_v46 }
 0x9ba   : > { %v11194_v37 = vpop.xlane.xlu0 %11193 }
 0x9bb   : > { %v11205_v4 = vmul.f32 0.0078125, %v11194_v37 }
 0x9bc   : > { %v11196_v11 = vpop.xlane.xlu1 %11195 }
 0x9bd   : > { %v18070_v10 = vsub.f32 %v18034_v8, %v11205_v4  ;;  %v11206_v23 = vmul.f32 0.0078125, %v11196_v11 }
 0x9be   : > { %v11198_v21 = vpop.xlane.xlu0 %11197 }
 0x9bf   : > { %v18073_v31 = vsub.f32 %v18037_v15, %v11206_v23  ;;  %v11207_v35 = vmul.f32 0.0078125, %v11198_v21  ;;  %v11221_v44 = vmul.f32 %v18070_v10, %v18070_v10 }
 0x9c0   : > { %v11200_v27 = vpop.xlane.xlu1 %11199 }
 0x9c1   : > { %v18078_v51 = vsub.f32 %v18041_v52, %v11207_v35  ;;  %v11208_v63 = vmul.f32 0.0078125, %v11200_v27  ;;  %11233 = vadd.xlane.f32.xlu0 %v11221_v44  ;;  %v11222_v18 = vmul.f32 %v18073_v31, %v18073_v31  ;;  %v13855_v35 = vld [vmem:[#allocation14 + $0x40] sm:$0xff]   ;;  %v13859_v27 = vld [vmem:[#allocation14 + $0x48] sm:$0xff]  }
 0x9c2   : > { %12995 = vmatprep.subr.bf16.mxu1 %v13855_v35  ;;  %v13858_v44 = vld [vmem:[#allocation14 + $0x80] sm:$0xff]  }
 0x9c3   : > { %v18083_v39 = vsub.f32 %v18045_v54, %v11208_v63  ;;  %11235 = vadd.xlane.f32.xlu1 %v11222_v18  ;;  %v11223_v45 = vmul.f32 %v18078_v51, %v18078_v51  ;;  %v13860_v63 = vld [vmem:[#allocation14 + $0xc8] sm:$0xff]  }
 0x9c4   : > { %v13861_v18 = vld [vmem:[#allocation14 + $0x8] sm:$0xff]  }
 0x9c5   : > { %11237 = vadd.xlane.f32.xlu0 %v11223_v45  ;;  %v11224_v12 = vmul.f32 %v18083_v39, %v18083_v39  ;;  %v13862_v45 = vld [vmem:[#allocation14 + $0x88] sm:$0xff]  }
 0x9c7   : > { %11239 = vadd.xlane.f32.xlu1 %v11224_v12  ;;  %v13864_v12 = vld [vmem:[#allocation14 + $0xd0] sm:$0xff]  }
 0xa09   : > { %v11226_v14 = vpop.xlane.xlu0 %11225 }
 0xa0a   : > { %v11241_v50 = vmul.f32 0.0078125, %v11226_v14  ;;  %v13867_v14 = vld [vmem:[#allocation14 + $0x58] sm:$0xff]  }
 0xa0b   : > { %v11228_v29 = vpop.xlane.xlu1 %11227 }
 0xa0c   : > { %v11249_v22 = vadd.f32 1e-05, %v11241_v50  ;;  %v11242_v19 = vmul.f32 0.0078125, %v11228_v29  ;;  %v13868_v50 = vld [vmem:[#allocation14 + $0xd8] sm:$0xff]  }
 0xa0d   : > { %v11230_v34 = vpop.xlane.xlu0 %11229  ;;  %v13869_v29 = vld [vmem:[#allocation14 + $0x18] sm:$0xff]  }
 0xa0e   : > { %14031 = vrsqrt.f32 %v11249_v22  ;;  %v11250_v25 = vadd.f32 1e-05, %v11242_v19  ;;  %v11243_v26 = vmul.f32 0.0078125, %v11230_v34  ;;  %v13870_v22 = vld [vmem:[#allocation14 + $0x98] sm:$0xff]   ;;  %v13871_v19 = vld [vmem:[#allocation14 + $0x60] sm:$0xff]  }
 0xa0f   : > { %v13872_v34 = vld [vmem:[#allocation14 + $0xe0] sm:$0xff]  }
 0xa10   : > { %14033 = vrsqrt.f32 %v11250_v25  ;;  %v11251_v43 = vadd.f32 1e-05, %v11243_v26  ;;  %v13873_v25 = vld [vmem:[#allocation14 + $0x20] sm:$0xff]  }
 0xa11   : > { %v11232_v57 = vpop.xlane.xlu1 %11231  ;;  %v13874_v26 = vld [vmem:[#allocation14 + $0xa0] sm:$0xff]  }
 0xa12   : > { %v11244_v30 = vmul.f32 0.0078125, %v11232_v57  ;;  %14035 = vrsqrt.f32 %v11251_v43  ;;  %v13875_v43 = vld [vmem:[#allocation14 + $0x68] sm:$0xff]  }
 0xa13   : > { %v13876_v57 = vld [vmem:[#allocation14 + $0xe8] sm:$0xff]  }
 0xa14   : > { %v11252_v33 = vadd.f32 1e-05, %v11244_v30  ;;  %v13877_v30 = vld [vmem:[#allocation14 + $0x28] sm:$0xff]  }
 0xa16   : > { %14037 = vrsqrt.f32 %v11252_v33  ;;  %v13878_v33 = vld [vmem:[#allocation14 + $0xa8] sm:$0xff]  }
 0xa18   : > { %v14032_v56 = vpop.eup %14031 }
 0xa19   : > { %v11265_v46 = vmul.f32 %v14032_v56, %v18050_v16  ;;  %v13879_v56 = vld [vmem:[#allocation14 + $0x70] sm:$0xff]  }
 0xa1a   : > { %v14034_v48 = vpop.eup %14033 }
 0xa1b   : > { %v11266_v28 = vmul.f32 %v14034_v48, %v18053_v41  ;;  %v13880_v48 = vld [vmem:[#allocation14 + $0xf0] sm:$0xff]  }
 0xa1c   : > { %v14036_v40 = vpop.eup %14035 }
 0xa1d   : > { %v11273_v60 = vpack.c.bf16 %v11266_v28, %v11265_v46  ;;  %v11267_v38 = vmul.f32 %v14036_v40, %v18058_v61  ;;  %v13881_v46 = vld [vmem:[#allocation14 + $0x30] sm:$0xff]   ;;  %v13884_v40 = vld [vmem:[#allocation14 + $0xf8] sm:$0xff]  }
 0xa1e   : > { %v13882_v28 = vld [vmem:[#allocation14 + $0xb0] sm:$0xff]  }
 0xa1f   : > { %11524 = vmatmul.mubr.bf16.vlgmr.msra.gmra.mrb[160].mxu1 %v11273_v60  ;;  %11597 = vmatmul.mubr.bf16.vlgmr.msra.gmra.mrb[144].mxu0 %v11273_v60  ;;  %v13883_v60 = vld [vmem:[#allocation14 + $0x78] sm:$0xff]  }
 0xa20   : > { %v14038_v58 = vpop.eup %14037  ;;  %11533 = vmatprep.mubr.bf16.mxu1 %v18655_v5  ;;  %11606 = vmatprep.mubr.bf16.mxu0 %v18655_v5 }
 0xa21   : > { %v11268_v32 = vmul.f32 %v14038_v58, %v18065_v55  ;;  %v13885_v58 = vld [vmem:[#allocation14 + $0x38] sm:$0xff]  }
 0xa23   : > { %v11274_v7 = vpack.c.bf16 %v11268_v32, %v11267_v38  ;;  %v13886_v32 = vld [vmem:[#allocation14 + $0xb8] sm:$0xff]   ;;  %v18657_v38 = vld [vmem:[#allocation24_spill] sm:$0xff] }
 0xa27   : > { %11534 = vmatmul.mubr.bf16.gmra.mrb[164].mxu1 %v11274_v7  ;;  %11607 = vmatmul.mubr.bf16.gmra.mrb[148].mxu0 %v11274_v7  ;;  %v11313_v7 = vsub.s32 0, %v18657_v38 }
 0xa28   : > { %11543 = vmatprep.mubr.bf16.mxu1 %v18655_v5  ;;  %11616 = vmatprep.mubr.bf16.mxu0 %v18655_v5 }
 0xa4e   : > { %v11234_v16 = vpop.xlane.xlu0 %11233 }
 0xa4f   : > { %v11245_v41 = vmul.f32 0.0078125, %v11234_v16  ;;  %v11321_v16 = vsub.s32 2, %v18657_v38 }
 0xa50   : > { %v11236_v3 = vpop.xlane.xlu1 %11235 }
 0xa51   : > { %v11253_v1 = vadd.f32 1e-05, %v11245_v41  ;;  %v11246_v2 = vmul.f32 0.0078125, %v11236_v3  ;;  %v11309_v41 = vld [vmem:[%s18658_s16] sm:$0xf]  ;;  %v11317_v3 = vsub.s32 1, %v18657_v38 }
 0xa52   : > { %v11238_v20 = vpop.xlane.xlu0 %11237 }
 0xa53   : > { %14039 = vrsqrt.f32 %v11253_v1  ;;  %v11254_v36 = vadd.f32 1e-05, %v11246_v2  ;;  %v11247_v49 = vmul.f32 0.0078125, %v11238_v20  ;;  %v11325_v1 = vsub.s32 3, %v18657_v38 }
 0xa54   : > { %v11240_v6 = vpop.xlane.xlu1 %11239  ;;  %v18110_v2 = vrot.slane %v11309_v41, %v11313_v7  ;;  %v18112_v20 = vrot.slane %v11309_v41, %v11321_v16 }
 0xa55   : > { %14041 = vrsqrt.f32 %v11254_v36  ;;  %v11248_v55 = vmul.f32 0.0078125, %v11240_v6  ;;  %v11255_v61 = vadd.f32 1e-05, %v11247_v49  ;;  %v18114_v36 = vrot.slane %v11309_v41, %v11317_v3 }
 0xa56   : > { %v18116_v49 = vrot.slane %v11309_v41, %v11325_v1 }
 0xa57   : > { %v11256_v47 = vadd.f32 1e-05, %v11248_v55 }
 0xa59   : > { %14043 = vrsqrt.f32 %v11256_v47 }
 0xa5a   : > { %14045 = vrsqrt.f32 %v11255_v61 }
 0xa5d   : > { %v14040_v9 = vpop.eup %14039 }
 0xa5e   : > { %v11269_v53 = vmul.f32 %v14040_v9, %v18070_v10  ;;  %v13856_v10 = vld [vmem:[#allocation14 + $0xc0] sm:$0xff]  }
 0xa5f   : > { %v14042_v0 = vpop.eup %14041  ;;  %13035 = vmatprep.subr.bf16.mxu0 %v13856_v10 }
 0xa60   : > { %v11270_v17 = vmul.f32 %v14042_v0, %v18073_v31  ;;  %v13857_v31 = vld [vmem:[#allocation14] sm:$0xff]   ;;  %13036 = vmatpush3.bf16.msra.mxu0 %v13858_v44 }
 0xa61   : > { %12996 = vmatpush3.bf16.msra.mxu1 %v13857_v31  ;;  %13037 = vmatprep.subr.bf16.mxu0 %v13860_v63 }
 0xa62   : > { %v11275_v59 = vpack.c.bf16 %v11270_v17, %v11269_v53  ;;  %12997 = vmatprep.subr.bf16.mxu1 %v13859_v27 }
 0xa63   : > { %v14044_v37 = vpop.eup %14043 }
 0xa64   : > { %11544 = vmatmul.mubr.bf16.gmra.mrb[168].mxu1 %v11275_v59  ;;  %11617 = vmatmul.mubr.bf16.gmra.mrb[152].mxu0 %v11275_v59  ;;  %v14046_v4 = vpop.eup %14045  ;;  %v11272_v11 = vmul.f32 %v14044_v37, %v18083_v39  ;;  %v13866_v39 = vld [vmem:[#allocation14 + $0x90] sm:$0xff]  }
 0xa65   : > { %11553 = vmatprep.mubr.bf16.mxu1 %v18655_v5  ;;  %11626 = vmatprep.mubr.bf16.mxu0 %v18655_v5  ;;  %v11271_v23 = vmul.f32 %v14046_v4, %v18078_v51  ;;  %v13863_v5 = vld [vmem:[#allocation14 + $0x50] sm:$0xff]  }
 0xa66   : > { %12998 = vmatpush3.bf16.msra.mxu1 %v13861_v18  ;;  %13038 = vmatpush3.bf16.msra.mxu0 %v13862_v45  ;;  %v13865_v51 = vld [vmem:[#allocation14 + $0x10] sm:$0xff]  }
 0xa67   : > { %v11276_v21 = vpack.c.bf16 %v11272_v11, %v11271_v23  ;;  %12999 = vmatprep.subr.bf16.mxu1 %v13863_v5  ;;  %13039 = vmatprep.subr.bf16.mxu0 %v13864_v12 }
 0xa6a   : > { %13000 = vmatpush3.bf16.msra.mxu1 %v13865_v51  ;;  %13040 = vmatpush3.bf16.msra.mxu0 %v13866_v39 }
 0xa6b   : > { %13001 = vmatprep.subr.bf16.mxu1 %v13867_v14  ;;  %13041 = vmatprep.subr.bf16.mxu0 %v13868_v50 }
 0xa6c   : > { %11554 = vmatmul.mubr.bf16.gmra.mrb[172].mxu1 %v11276_v21  ;;  %11627 = vmatmul.mubr.bf16.gmra.mrb[156].mxu0 %v11276_v21 }
 0xa6e   : > { %13002 = vmatpush3.bf16.msra.mxu1 %v13869_v29  ;;  %13042 = vmatpush3.bf16.msra.mxu0 %v13870_v22 }
 0xa6f   : > { %13003 = vmatprep.subr.bf16.mxu1 %v13871_v19  ;;  %13043 = vmatprep.subr.bf16.mxu0 %v13872_v34 }
 0xa72   : > { %13004 = vmatpush3.bf16.msra.mxu1 %v13873_v25  ;;  %13044 = vmatpush3.bf16.msra.mxu0 %v13874_v26 }
 0xa73   : > { %13005 = vmatprep.subr.bf16.mxu1 %v13875_v43  ;;  %13045 = vmatprep.subr.bf16.mxu0 %v13876_v57 }
 0xa76   : > { %13006 = vmatpush3.bf16.msra.mxu1 %v13877_v30  ;;  %13046 = vmatpush3.bf16.msra.mxu0 %v13878_v33 }
 0xa77   : > { %13007 = vmatprep.subr.bf16.mxu1 %v13879_v56  ;;  %13047 = vmatprep.subr.bf16.mxu0 %v13880_v48 }
 0xa7a   : > { %13008 = vmatpush3.bf16.msra.mxu1 %v13881_v46  ;;  %13048 = vmatpush3.bf16.msra.mxu0 %v13882_v28 }
 0xa7b   : > { %13009 = vmatprep.subr.bf16.mxu1 %v13883_v60  ;;  %13049 = vmatprep.subr.bf16.mxu0 %v13884_v40 }
 0xa7e   : > { %13010 = vmatpush3.bf16.msra.mxu1 %v13885_v58  ;;  %13050 = vmatpush3.bf16.msra.mxu0 %v13886_v32 }
 0xaf2   : > { %v11525_v6 = vpop.f32.mrb[160].mxu1  ;;  %v11598_v55 = vpop.f32.mrb[144].mxu0 }
 0xaf3   : > { %v18119_v61 = vadd.f32 %v11525_v6, %v18110_v2  ;;  %v18122_v47 = vadd.f32 %v11598_v55, %v18112_v20  ;;  %v11527_v9 = vpop.f32.mrb[161].mxu1  ;;  %v11600_v0 = vpop.f32.mrb[145].mxu0 }
 0xaf4   : > { %v18125_v53 = vadd.f32 %v11527_v9, %v18114_v36  ;;  %v18128_v17 = vadd.f32 %v11600_v0, %v18116_v49  ;;  %v11529_v59 = vpop.f32.mrb[162].mxu1  ;;  %v11602_v37 = vpop.f32.mrb[146].mxu0 }
 0xaf5   : > { %v12737_v4 = vmul.f32 -1.702, %v18119_v61  ;;  %v12739_v11 = vmul.f32 -1.702, %v18122_v47  ;;  %v18133_v23 = vadd.f32 %v11529_v59, %v18110_v2  ;;  %v18136_v21 = vadd.f32 %v11602_v37, %v18112_v20  ;;  %v11531_v35 = vpop.f32.mrb[163].mxu1  ;;  %v11604_v10 = vpop.f32.mrb[147].mxu0 }
 0xaf6   : > { %v12738_v31 = vmul.f32 -1.702, %v18125_v53  ;;  %v12740_v44 = vmul.f32 -1.702, %v18128_v17  ;;  %v18141_v27 = vadd.f32 %v11531_v35, %v18114_v36  ;;  %v18144_v63 = vadd.f32 %v11604_v10, %v18116_v49 }
 0xaf7   : > { %v11701_v18 = vmul.f32 1.442695, %v12737_v4  ;;  %v11705_v45 = vmul.f32 1.442695, %v12739_v11  ;;  %v12741_v5 = vmul.f32 -1.702, %v18133_v23 }
 0xaf8   : > { %v11703_v12 = vmul.f32 1.442695, %v12738_v31  ;;  %v11707_v51 = vmul.f32 1.442695, %v12740_v44  ;;  %v12743_v39 = vmul.f32 -1.702, %v18136_v21 }
 0xaf9   : > { %14047 = vpow2.f32 %v11701_v18  ;;  %v11709_v14 = vmul.f32 1.442695, %v12741_v5  ;;  %v12742_v50 = vmul.f32 -1.702, %v18141_v27  ;;  %v12744_v29 = vmul.f32 -1.702, %v18144_v63 }
 0xafa   : > { %14049 = vpow2.f32 %v11705_v45  ;;  %v11713_v22 = vmul.f32 1.442695, %v12743_v39  ;;  %v11535_v19 = vpop.f32.mrb[164].mxu1  ;;  %v11608_v34 = vpop.f32.mrb[148].mxu0 }
 0xafb   : > { %14051 = vpow2.f32 %v11703_v12  ;;  %v11711_v25 = vmul.f32 1.442695, %v12742_v50  ;;  %v18151_v26 = vadd.f32 %v11535_v19, %v18110_v2  ;;  %v11537_v43 = vpop.f32.mrb[165].mxu1  ;;  %v11610_v57 = vpop.f32.mrb[149].mxu0  ;;  %v11715_v30 = vmul.f32 1.442695, %v12744_v29 }
 0xafc   : > { %14053 = vpow2.f32 %v11707_v51  ;;  %v18154_v33 = vadd.f32 %v11608_v34, %v18112_v20  ;;  %v18157_v56 = vadd.f32 %v11537_v43, %v18114_v36  ;;  %v11539_v48 = vpop.f32.mrb[166].mxu1  ;;  %v11612_v46 = vpop.f32.mrb[150].mxu0  ;;  %v18167_v6 = vadd.f32 %v11610_v57, %v18116_v49 }
 0xafd   : > { %14055 = vpow2.f32 %v11709_v14  ;;  %v12745_v28 = vmul.f32 -1.702, %v18151_v26  ;;  %v18161_v60 = vadd.f32 %v11539_v48, %v18110_v2  ;;  %v11541_v40 = vpop.f32.mrb[167].mxu1  ;;  %v11614_v58 = vpop.f32.mrb[151].mxu0  ;;  %v18171_v44 = vadd.f32 %v11612_v46, %v18112_v20 }
 0xafe   : > { %14057 = vpow2.f32 %v11713_v22  ;;  %v12747_v32 = vmul.f32 -1.702, %v18154_v33  ;;  %v12746_v38 = vmul.f32 -1.702, %v18157_v56  ;;  %v12748_v35 = vmul.f32 -1.702, %v18167_v6 }
 0xaff   : > { %14059 = vpow2.f32 %v11711_v25  ;;  %v11717_v7 = vmul.f32 1.442695, %v12745_v28  ;;  %v12749_v16 = vmul.f32 -1.702, %v18161_v60  ;;  %v18174_v5 = vadd.f32 %v11541_v40, %v18114_v36 }
 0xb00   : > { %14061 = vpow2.f32 %v11715_v30  ;;  %v11721_v41 = vmul.f32 1.442695, %v12747_v32  ;;  %v11719_v3 = vmul.f32 1.442695, %v12746_v38  ;;  %v18177_v39 = vadd.f32 %v11614_v58, %v18116_v49 }
 0xb01   : > { %14063 = vpow2.f32 %v11717_v7  ;;  %v11725_v1 = vmul.f32 1.442695, %v12749_v16  ;;  %v11723_v29 = vmul.f32 1.442695, %v12748_v35  ;;  %v12751_v34 = vmul.f32 -1.702, %v18171_v44 }
 0xb02   : > { %14065 = vpow2.f32 %v11721_v41  ;;  %v12750_v43 = vmul.f32 -1.702, %v18174_v5  ;;  %v12752_v30 = vmul.f32 -1.702, %v18177_v39 }
 0xb03   : > { %v14048_v55 = vpop.eup %14047  ;;  %14067 = vpow2.f32 %v11719_v3  ;;  %v11729_v28 = vmul.f32 1.442695, %v12751_v34 }
 0xb04   : > { %v14050_v9 = vpop.eup %14049  ;;  %v11765_v0 = vadd.f32 1.0, %v14048_v55  ;;  %14069 = vpow2.f32 %v11725_v1  ;;  %v11727_v32 = vmul.f32 1.442695, %v12750_v43  ;;  %v11731_v7 = vmul.f32 1.442695, %v12752_v30 }
 0xb05   : > { %v14052_v59 = vpop.eup %14051  ;;  %v11767_v37 = vadd.f32 1.0, %v14050_v9 }
 0xb06   : > { %v14054_v4 = vpop.eup %14053  ;;  %14071 = vrcp.f32 %v11765_v0  ;;  %v11766_v11 = vadd.f32 1.0, %v14052_v59 }
 0xb07   : > { %v14056_v10 = vpop.eup %14055  ;;  %14073 = vrcp.f32 %v11767_v37  ;;  %v11768_v31 = vadd.f32 1.0, %v14054_v4 }
 0xb08   : > { %v14058_v18 = vpop.eup %14057  ;;  %14075 = vrcp.f32 %v11766_v11  ;;  %v11769_v45 = vadd.f32 1.0, %v14056_v10 }
 0xb09   : > { %v14060_v12 = vpop.eup %14059  ;;  %14077 = vrcp.f32 %v11768_v31  ;;  %v11771_v51 = vadd.f32 1.0, %v14058_v18 }
 0xb0a   : > { %v14062_v14 = vpop.eup %14061  ;;  %14079 = vrcp.f32 %v11769_v45  ;;  %v11770_v50 = vadd.f32 1.0, %v14060_v12 }
 0xb0b   : > { %v14064_v22 = vpop.eup %14063  ;;  %14081 = vrcp.f32 %v11771_v51  ;;  %v11772_v19 = vadd.f32 1.0, %v14062_v14 }
 0xb0c   : > { %14083 = vrcp.f32 %v11770_v50  ;;  %v11773_v25 = vadd.f32 1.0, %v14064_v22  ;;  %v14066_v57 = vpop.eup %14065 }
 0xb0d   : > { %14085 = vrcp.f32 %v11772_v19  ;;  %v14068_v48 = vpop.eup %14067  ;;  %v11775_v12 = vadd.f32 1.0, %v14066_v57 }
 0xb0e   : > { %14087 = vpow2.f32 %v11723_v29  ;;  %v14070_v46 = vpop.eup %14069  ;;  %v11774_v14 = vadd.f32 1.0, %v14068_v48 }
 0xb0f   : > { %14089 = vrcp.f32 %v11773_v25  ;;  %v11777_v58 = vadd.f32 1.0, %v14070_v46 }
 0xb10   : > { %v14072_v40 = vpop.eup %14071 }
 0xb11   : > { %v14074_v38 = vpop.eup %14073  ;;  %14091 = vrcp.f32 %v11777_v58  ;;  %v11861_v55 = vmul.f32 %v14072_v40, %v18119_v61 }
 0xb12   : > { %v14076_v16 = vpop.eup %14075  ;;  %14093 = vpow2.f32 %v11729_v28  ;;  %v11863_v59 = vmul.f32 %v14074_v38, %v18122_v47 }
 0xb13   : > { %v14078_v41 = vpop.eup %14077  ;;  %14095 = vpow2.f32 %v11727_v32  ;;  %v11862_v11 = vmul.f32 %v14076_v16, %v18125_v53 }
 0xb14   : > { %v14080_v3 = vpop.eup %14079  ;;  %14097 = vpow2.f32 %v11731_v7  ;;  %v11864_v18 = vmul.f32 %v14078_v41, %v18128_v17 }
 0xb15   : > { %v14082_v1 = vpop.eup %14081  ;;  %v11865_v9 = vmul.f32 %v14080_v3, %v18133_v23  ;;  %14099 = vrcp.f32 %v11775_v12 }
 0xb16   : > { %v14084_v0 = vpop.eup %14083  ;;  %v11867_v37 = vmul.f32 %v14082_v1, %v18136_v21  ;;  %14101 = vrcp.f32 %v11774_v14 }
 0xb17   : > { %v14086_v4 = vpop.eup %14085  ;;  %v11893_v35 = vpack.c.bf16 %v11865_v9, %v11861_v55  ;;  %v11866_v10 = vmul.f32 %v14084_v0, %v18141_v27 }
 0xb18   : > { %v14088_v31 = vpop.eup %14087  ;;  %v11895_v45 = vpack.c.bf16 %v11867_v37, %v11863_v59  ;;  %v11868_v61 = vmul.f32 %v14086_v4, %v18144_v63 }
 0xb19   : > { %v11894_v23 = vpack.c.bf16 %v11866_v10, %v11862_v11  ;;  %v14090_v51 = vpop.eup %14089  ;;  %v11776_v47 = vadd.f32 1.0, %v14088_v31 }
 0xb1a   : > { %v11896_v50 = vpack.c.bf16 %v11868_v61, %v11864_v18  ;;  %v11869_v29 = vmul.f32 %v14090_v51, %v18151_v26 }
 0xb1b   : > { %12204 = vmatprep.mubr.bf16.mxu1 %v11894_v23  ;;  %v14092_v21 = vpop.eup %14091  ;;  %14103 = vrcp.f32 %v11776_v47 }
 0xb1c   : > { %12269 = vmatprep.mubr.bf16.mxu0 %v11896_v50  ;;  %12205 = vmatmul.mubr.bf16.vlgmr.msra.gmra.mrb[176].mxu1 %v11893_v35  ;;  %v14094_v53 = vpop.eup %14093  ;;  %v11873_v27 = vmul.f32 %v14092_v21, %v18161_v60 }
 0xb1d   : > { %12270 = vmatmul.mubr.bf16.vlgmr.msra.gmra.mrb[160].mxu0 %v11895_v45  ;;  %v14096_v17 = vpop.eup %14095  ;;  %v11779_v63 = vadd.f32 1.0, %v14094_v53 }
 0xb1e   : > { %v14098_v22 = vpop.eup %14097  ;;  %v11778_v19 = vadd.f32 1.0, %v14096_v17  ;;  %v11897_v34 = vpack.c.bf16 %v11873_v27, %v11869_v29 }
 0xb1f   : > { %14105 = vrcp.f32 %v11779_v63  ;;  %v11780_v25 = vadd.f32 1.0, %v14098_v22  ;;  %v14100_v43 = vpop.eup %14099 }
 0xb20   : > { %14107 = vrcp.f32 %v11778_v19  ;;  %v14102_v57 = vpop.eup %14101  ;;  %v11871_v46 = vmul.f32 %v14100_v43, %v18154_v33 }
 0xb21   : > { %14109 = vrcp.f32 %v11780_v25  ;;  %v11870_v40 = vmul.f32 %v14102_v57, %v18157_v56 }
 0xb25   : > { %v14104_v30 = vpop.eup %14103 }
 0xb26   : > { %v11872_v32 = vmul.f32 %v14104_v30, %v18167_v6 }
 0xb29   : > { %v14106_v48 = vpop.eup %14105 }
 0xb2a   : > { %v14108_v26 = vpop.eup %14107  ;;  %v11875_v60 = vmul.f32 %v14106_v48, %v18171_v44 }
 0xb2b   : > { %v14110_v28 = vpop.eup %14109  ;;  %v11874_v58 = vmul.f32 %v14108_v26, %v18174_v5 }
 0xb2c   : > { %v11876_v38 = vmul.f32 %v14110_v28, %v18177_v39  ;;  %v11899_v7 = vpack.c.bf16 %v11875_v60, %v11871_v46 }
 0xb2d   : > { %v11898_v16 = vpack.c.bf16 %v11874_v58, %v11870_v40 }
 0xb2e   : > { %v11900_v41 = vpack.c.bf16 %v11876_v38, %v11872_v32 }
 0xb2f   : > { %12212 = vmatprep.mubr.bf16.mxu1 %v11898_v16 }
 0xb30   : > { %12277 = vmatprep.mubr.bf16.mxu0 %v11900_v41  ;;  %12213 = vmatmul.mubr.bf16.gmra.mrb[180].mxu1 %v11897_v34 }
 0xb31   : > { %12278 = vmatmul.mubr.bf16.gmra.mrb[164].mxu0 %v11899_v7 }
 0xb37   : > { %v11545_v3 = vpop.f32.mrb[168].mxu1  ;;  %v11618_v33 = vpop.f32.mrb[152].mxu0 }
 0xb38   : > { %v18199_v44 = vadd.f32 %v11545_v3, %v18110_v2  ;;  %v18202_v56 = vadd.f32 %v11618_v33, %v18112_v20  ;;  %v11547_v5 = vpop.f32.mrb[169].mxu1  ;;  %v11620_v1 = vpop.f32.mrb[153].mxu0 }
 0xb39   : > { %v18205_v6 = vadd.f32 %v11547_v5, %v18114_v36  ;;  %v18208_v39 = vadd.f32 %v11620_v1, %v18116_v49  ;;  %v11549_v55 = vpop.f32.mrb[170].mxu1  ;;  %v11622_v9 = vpop.f32.mrb[154].mxu0 }
 0xb3a   : > { %v12753_v0 = vmul.f32 -1.702, %v18199_v44  ;;  %v12755_v59 = vmul.f32 -1.702, %v18202_v56  ;;  %v18213_v37 = vadd.f32 %v11549_v55, %v18110_v2  ;;  %v18216_v4 = vadd.f32 %v11622_v9, %v18112_v20  ;;  %v11551_v11 = vpop.f32.mrb[171].mxu1  ;;  %v11624_v35 = vpop.f32.mrb[155].mxu0 }
 0xb3b   : > { %v12754_v10 = vmul.f32 -1.702, %v18205_v6  ;;  %v12756_v31 = vmul.f32 -1.702, %v18208_v39  ;;  %v18221_v18 = vadd.f32 %v11551_v11, %v18114_v36  ;;  %v18224_v45 = vadd.f32 %v11624_v35, %v18116_v49 }
 0xb3c   : > { %v11733_v61 = vmul.f32 1.442695, %v12753_v0  ;;  %v11737_v12 = vmul.f32 1.442695, %v12755_v59  ;;  %v12757_v23 = vmul.f32 -1.702, %v18213_v37 }
 0xb3d   : > { %v11735_v51 = vmul.f32 1.442695, %v12754_v10  ;;  %v11739_v14 = vmul.f32 1.442695, %v12756_v31  ;;  %v12759_v50 = vmul.f32 -1.702, %v18216_v4 }
 0xb3e   : > { %14111 = vpow2.f32 %v11733_v61  ;;  %v11741_v47 = vmul.f32 1.442695, %v12757_v23  ;;  %v12758_v21 = vmul.f32 -1.702, %v18221_v18  ;;  %v12760_v53 = vmul.f32 -1.702, %v18224_v45 }
 0xb3f   : > { %14113 = vpow2.f32 %v11737_v12  ;;  %v11745_v29 = vmul.f32 1.442695, %v12759_v50  ;;  %v11555_v27 = vpop.f32.mrb[172].mxu1  ;;  %v11628_v17 = vpop.f32.mrb[156].mxu0 }
 0xb40   : > { %14115 = vpow2.f32 %v11735_v51  ;;  %v11743_v63 = vmul.f32 1.442695, %v12758_v21  ;;  %v18231_v22 = vadd.f32 %v11555_v27, %v18110_v2  ;;  %v11557_v19 = vpop.f32.mrb[173].mxu1  ;;  %v11630_v34 = vpop.f32.mrb[157].mxu0  ;;  %v11747_v25 = vmul.f32 1.442695, %v12760_v53 }
 0xb41   : > { %14117 = vpow2.f32 %v11739_v14  ;;  %v18234_v43 = vadd.f32 %v11628_v17, %v18112_v20  ;;  %v18237_v57 = vadd.f32 %v11557_v19, %v18114_v36  ;;  %v11559_v30 = vpop.f32.mrb[174].mxu1  ;;  %v11632_v48 = vpop.f32.mrb[158].mxu0  ;;  %v18247_v3 = vadd.f32 %v11630_v34, %v18116_v49 }
 0xb42   : > { %14119 = vpow2.f32 %v11741_v47  ;;  %v12761_v26 = vmul.f32 -1.702, %v18231_v22  ;;  %v18241_v46 = vadd.f32 %v11559_v30, %v18110_v2  ;;  %v11561_v60 = vpop.f32.mrb[175].mxu1  ;;  %v11634_v28 = vpop.f32.mrb[159].mxu0  ;;  %v18251_v10 = vadd.f32 %v11632_v48, %v18112_v20 }
 0xb43   : > { %14121 = vpow2.f32 %v11745_v29  ;;  %v12763_v40 = vmul.f32 -1.702, %v18234_v43  ;;  %v12762_v58 = vmul.f32 -1.702, %v18237_v57  ;;  %v12764_v59 = vmul.f32 -1.702, %v18247_v3 }
 0xb44   : > { %14123 = vpow2.f32 %v11743_v63  ;;  %v11749_v32 = vmul.f32 1.442695, %v12761_v26  ;;  %v12765_v38 = vmul.f32 -1.702, %v18241_v46  ;;  %v18254_v12 = vadd.f32 %v11561_v60, %v18114_v36 }
 0xb45   : > { %14125 = vpow2.f32 %v11747_v25  ;;  %v11753_v7 = vmul.f32 1.442695, %v12763_v40  ;;  %v11751_v16 = vmul.f32 1.442695, %v12762_v58  ;;  %v18257_v14 = vadd.f32 %v11634_v28, %v18116_v49 }
 0xb46   : > { %14127 = vpow2.f32 %v11749_v32  ;;  %v11757_v41 = vmul.f32 1.442695, %v12765_v38  ;;  %v11755_v21 = vmul.f32 1.442695, %v12764_v59  ;;  %v12767_v29 = vmul.f32 -1.702, %v18251_v10 }
 0xb47   : > { %14129 = vpow2.f32 %v11753_v7  ;;  %v12766_v36 = vmul.f32 -1.702, %v18254_v12  ;;  %v12768_v63 = vmul.f32 -1.702, %v18257_v14 }
 0xb48   : > { %v14112_v2 = vpop.eup %14111  ;;  %14131 = vpow2.f32 %v11751_v16  ;;  %v11761_v34 = vmul.f32 1.442695, %v12767_v29 }
 0xb49   : > { %v14114_v33 = vpop.eup %14113  ;;  %v11781_v5 = vadd.f32 1.0, %v14112_v2  ;;  %14133 = vpow2.f32 %v11757_v41  ;;  %v11759_v48 = vmul.f32 1.442695, %v12766_v36  ;;  %v11763_v60 = vmul.f32 1.442695, %v12768_v63 }
 0xb4a   : > { %v14116_v1 = vpop.eup %14115  ;;  %v11783_v55 = vadd.f32 1.0, %v14114_v33 }
 0xb4b   : > { %v14118_v9 = vpop.eup %14117  ;;  %14135 = vrcp.f32 %v11781_v5  ;;  %v11782_v0 = vadd.f32 1.0, %v14116_v1 }
 0xb4c   : > { %v14120_v11 = vpop.eup %14119  ;;  %14137 = vrcp.f32 %v11783_v55  ;;  %v11784_v35 = vadd.f32 1.0, %v14118_v9 }
 0xb4d   : > { %v14122_v31 = vpop.eup %14121  ;;  %14139 = vrcp.f32 %v11782_v0  ;;  %v11785_v61 = vadd.f32 1.0, %v14120_v11 }
 0xb4e   : > { %v14124_v23 = vpop.eup %14123  ;;  %14141 = vrcp.f32 %v11784_v35  ;;  %v11787_v51 = vadd.f32 1.0, %v14122_v31 }
 0xb4f   : > { %v14126_v50 = vpop.eup %14125  ;;  %14143 = vrcp.f32 %v11785_v61  ;;  %v11786_v47 = vadd.f32 1.0, %v14124_v23 }
 0xb50   : > { %v14128_v53 = vpop.eup %14127  ;;  %14145 = vrcp.f32 %v11787_v51  ;;  %v11788_v20 = vadd.f32 1.0, %v14126_v50 }
 0xb51   : > { %14147 = vrcp.f32 %v11786_v47  ;;  %v11789_v27 = vadd.f32 1.0, %v14128_v53  ;;  %v14130_v17 = vpop.eup %14129 }
 0xb52   : > { %14149 = vrcp.f32 %v11788_v20  ;;  %v14132_v19 = vpop.eup %14131  ;;  %v11791_v11 = vadd.f32 1.0, %v14130_v17 }
 0xb53   : > { %14151 = vpow2.f32 %v11755_v21  ;;  %v14134_v49 = vpop.eup %14133  ;;  %v11790_v31 = vadd.f32 1.0, %v14132_v19 }
 0xb54   : > { %14153 = vrcp.f32 %v11789_v27  ;;  %v11793_v30 = vadd.f32 1.0, %v14134_v49 }
 0xb55   : > { %v14136_v25 = vpop.eup %14135 }
 0xb56   : > { %v14138_v26 = vpop.eup %14137  ;;  %14155 = vrcp.f32 %v11793_v30  ;;  %v11877_v38 = vmul.f32 %v14136_v25, %v18199_v44 }
 0xb57   : > { %v14140_v28 = vpop.eup %14139  ;;  %14157 = vpow2.f32 %v11761_v34  ;;  %v11879_v41 = vmul.f32 %v14138_v26, %v18202_v56 }
 0xb58   : > { %v14142_v40 = vpop.eup %14141  ;;  %14159 = vpow2.f32 %v11759_v48  ;;  %v11878_v5 = vmul.f32 %v14140_v28, %v18205_v6 }
 0xb59   : > { %v14144_v58 = vpop.eup %14143  ;;  %14161 = vpow2.f32 %v11763_v60  ;;  %v11880_v0 = vmul.f32 %v14142_v40, %v18208_v39 }
 0xb5a   : > { %v14146_v32 = vpop.eup %14145  ;;  %v11881_v7 = vmul.f32 %v14144_v58, %v18213_v37  ;;  %14163 = vrcp.f32 %v11791_v11 }
 0xb5b   : > { %v14148_v16 = vpop.eup %14147  ;;  %v11883_v2 = vmul.f32 %v14146_v32, %v18216_v4  ;;  %14165 = vrcp.f32 %v11790_v31 }
 0xb5c   : > { %v14150_v33 = vpop.eup %14149  ;;  %v11882_v1 = vmul.f32 %v14148_v16, %v18221_v18  ;;  %v11901_v55 = vpack.c.bf16 %v11881_v7, %v11877_v38 }
 0xb5d   : > { %v14152_v9 = vpop.eup %14151  ;;  %v11884_v59 = vmul.f32 %v14150_v33, %v18224_v45  ;;  %v11903_v44 = vpack.c.bf16 %v11883_v2, %v11879_v41 }
 0xb5e   : > { %v11902_v37 = vpack.c.bf16 %v11882_v1, %v11878_v5  ;;  %v14154_v35 = vpop.eup %14153  ;;  %v11792_v56 = vadd.f32 1.0, %v14152_v9 }
 0xb5f   : > { %v11904_v61 = vpack.c.bf16 %v11884_v59, %v11880_v0  ;;  %v11885_v18 = vmul.f32 %v14154_v35, %v18231_v22 }
 0xb60   : > { %12220 = vmatprep.mubr.bf16.mxu1 %v11902_v37  ;;  %v14156_v4 = vpop.eup %14155  ;;  %14167 = vrcp.f32 %v11792_v56 }
 0xb61   : > { %12285 = vmatprep.mubr.bf16.mxu0 %v11904_v61  ;;  %12221 = vmatmul.mubr.bf16.gmra.mrb[184].mxu1 %v11901_v55  ;;  %v14158_v6 = vpop.eup %14157  ;;  %v11889_v23 = vmul.f32 %v14156_v4, %v18241_v46 }
 0xb62   : > { %12286 = vmatmul.mubr.bf16.gmra.mrb[168].mxu0 %v11903_v44  ;;  %v14160_v39 = vpop.eup %14159  ;;  %v11795_v45 = vadd.f32 1.0, %v14158_v6 }
 0xb63   : > { %v14162_v51 = vpop.eup %14161  ;;  %v11794_v50 = vadd.f32 1.0, %v14160_v39  ;;  %v11905_v47 = vpack.c.bf16 %v11889_v23, %v11885_v18 }
 0xb64   : > { %14169 = vrcp.f32 %v11795_v45  ;;  %v11796_v21 = vadd.f32 1.0, %v14162_v51  ;;  %v14164_v53 = vpop.eup %14163 }
 0xb65   : > { %14171 = vrcp.f32 %v11794_v50  ;;  %v14166_v20 = vpop.eup %14165  ;;  %v11887_v36 = vmul.f32 %v14164_v53, %v18234_v43 }
 0xb66   : > { %14173 = vrcp.f32 %v11796_v21  ;;  %v11886_v63 = vmul.f32 %v14166_v20, %v18237_v57 }
 0xb6a   : > { %v14168_v29 = vpop.eup %14167 }
 0xb6b   : > { %v11888_v49 = vmul.f32 %v14168_v29, %v18247_v3 }
 0xb6e   : > { %v14170_v27 = vpop.eup %14169 }
 0xb6f   : > { %v14172_v22 = vpop.eup %14171  ;;  %v11891_v46 = vmul.f32 %v14170_v27, %v18251_v10  ;;  %v18281_v10 = vld [vmem:[%s18659_s4] ss:$0 sm:$0xff] }
 0xb70   : > { %v14174_v17 = vpop.eup %14173  ;;  %v11890_v19 = vmul.f32 %v14172_v22, %v18254_v12 }
 0xb71   : > { %v11892_v34 = vmul.f32 %v14174_v17, %v18257_v14  ;;  %v11907_v25 = vpack.c.bf16 %v11891_v46, %v11887_v36 }
 0xb72   : > { %v11906_v30 = vpack.c.bf16 %v11890_v19, %v11886_v63 }
 0xb73   : > { %v11908_v48 = vpack.c.bf16 %v11892_v34, %v11888_v49 }
 0xb74   : > { %12228 = vmatprep.mubr.bf16.mxu1 %v11906_v30 }
 0xb75   : > { %12293 = vmatprep.mubr.bf16.mxu0 %v11908_v48  ;;  %12229 = vmatmul.mubr.bf16.gmra.mrb[188].mxu1 %v11905_v47 }
 0xb76   : > { %12294 = vmatmul.mubr.bf16.gmra.mrb[172].mxu0 %v11907_v25 }
 0xbef   : > { %v13011_v26 = vpop.f32.mrb[176].mxu1 }
 0xbf0   : > { %v13051_v43 = vpop.f32.mrb[160].mxu0  ;;  %v13012_v57 = vpop.f32.mrb[177].mxu1 }
 0xbf1   : > { %v13013_v12 = vadd.f32 %v13012_v57, %v13011_v26  ;;  %v13052_v3 = vpop.f32.mrb[161].mxu0  ;;  %v13014_v60 = vpop.f32.mrb[178].mxu1 }
 0xbf2   : > { %v13053_v14 = vadd.f32 %v13052_v3, %v13051_v43  ;;  %v13054_v28 = vpop.f32.mrb[162].mxu0  ;;  %v13015_v40 = vpop.f32.mrb[179].mxu1 }
 0xbf3   : > { %v12207_v58 = vadd.f32 %v13013_v12, %v18281_v10  ;;  %v13016_v32 = vadd.f32 %v13015_v40, %v13014_v60  ;;  %v13055_v38 = vpop.f32.mrb[163].mxu0 }
 0xbf4   : > { %v13056_v7 = vadd.f32 %v13055_v38, %v13054_v28 }
 0xbf5   : > { %v12272_v16 = vadd.f32 %v13053_v14, %v12207_v58  ;;  %v12210_v41 = vadd.f32 %v13016_v32, %v18281_v10 }
 0xbf7   : > { %v12302_v2 = vadd.f32 %v12272_v16, %v18018_v42  ;;  %v12275_v33 = vadd.f32 %v13056_v7, %v12210_v41 }
 0xbf9   : > { %12310 = vst [vmem:[%s18288_s6] sm:$0xff] %v12302_v2  ;;  %v12303_v5 = vadd.f32 %v12275_v33, %v18021_v13 }
 0xbfb   : > { %12311 = vst [vmem:[%s18288_s6 + $0x8] sm:$0xff] %v12303_v5 }
 0xc03   : > { %v13017_v1 = vpop.f32.mrb[180].mxu1 }
 0xc04   : > { %v13057_v55 = vpop.f32.mrb[164].mxu0  ;;  %v13018_v9 = vpop.f32.mrb[181].mxu1 }
 0xc05   : > { %v13019_v0 = vadd.f32 %v13018_v9, %v13017_v1  ;;  %v13058_v59 = vpop.f32.mrb[165].mxu0  ;;  %v13020_v44 = vpop.f32.mrb[182].mxu1 }
 0xc06   : > { %v13059_v11 = vadd.f32 %v13058_v59, %v13057_v55  ;;  %v13060_v42 = vpop.f32.mrb[166].mxu0  ;;  %v13021_v37 = vpop.f32.mrb[183].mxu1 }
 0xc07   : > { %v12215_v35 = vadd.f32 %v13019_v0, %v18281_v10  ;;  %v13022_v31 = vadd.f32 %v13021_v37, %v13020_v44  ;;  %v13061_v61 = vpop.f32.mrb[167].mxu0 }
 0xc08   : > { %v13062_v56 = vadd.f32 %v13061_v61, %v13060_v42 }
 0xc09   : > { %v12280_v4 = vadd.f32 %v13059_v11, %v12215_v35  ;;  %v12218_v13 = vadd.f32 %v13022_v31, %v18281_v10 }
 0xc0b   : > { %v12304_v6 = vadd.f32 %v12280_v4, %v18025_v24  ;;  %v12283_v18 = vadd.f32 %v13062_v56, %v12218_v13 }
 0xc0d   : > { %12312 = vst [vmem:[%s18288_s6 + $0x10] sm:$0xff] %v12304_v6  ;;  %v12305_v23 = vadd.f32 %v12283_v18, %v18030_v62 }
 0xc0f   : > { %12313 = vst [vmem:[%s18288_s6 + $0x18] sm:$0xff] %v12305_v23 }
 0xc34   : > { %v13023_v39 = vpop.f32.mrb[184].mxu1 }
 0xc35   : > { %v13063_v45 = vpop.f32.mrb[168].mxu0  ;;  %v13024_v51 = vpop.f32.mrb[185].mxu1 }
 0xc36   : > { %v13025_v50 = vadd.f32 %v13024_v51, %v13023_v39  ;;  %v13064_v47 = vpop.f32.mrb[169].mxu0  ;;  %v13026_v21 = vpop.f32.mrb[186].mxu1 }
 0xc37   : > { %v13065_v53 = vadd.f32 %v13064_v47, %v13063_v45  ;;  %v13066_v20 = vpop.f32.mrb[170].mxu0  ;;  %v13027_v29 = vpop.f32.mrb[187].mxu1 }
 0xc38   : > { %v12223_v27 = vadd.f32 %v13025_v50, %v18281_v10  ;;  %v13028_v22 = vadd.f32 %v13027_v29, %v13026_v21  ;;  %v13067_v24 = vpop.f32.mrb[171].mxu0 }
 0xc39   : > { %v13068_v36 = vadd.f32 %v13067_v24, %v13066_v20 }
 0xc3a   : > { %v12288_v46 = vadd.f32 %v13065_v53, %v12223_v27  ;;  %v12226_v62 = vadd.f32 %v13028_v22, %v18281_v10 }
 0xc3c   : > { %v12306_v17 = vadd.f32 %v12288_v46, %v18034_v8  ;;  %v12291_v63 = vadd.f32 %v13068_v36, %v12226_v62 }
 0xc3e   : > { %12314 = vst [vmem:[%s18288_s6 + $0x20] sm:$0xff] %v12306_v17  ;;  %v12307_v19 = vadd.f32 %v12291_v63, %v18037_v15 }
 0xc40   : > { %12315 = vst [vmem:[%s18288_s6 + $0x28] sm:$0xff] %v12307_v19 }
 0xc48   : > { %v13029_v49 = vpop.f32.mrb[188].mxu1 }
 0xc49   : > { %v13069_v34 = vpop.f32.mrb[172].mxu0  ;;  %v13030_v25 = vpop.f32.mrb[189].mxu1 }
 0xc4a   : > { %v13031_v30 = vadd.f32 %v13030_v25, %v13029_v49  ;;  %v13070_v48 = vpop.f32.mrb[173].mxu0  ;;  %v13032_v26 = vpop.f32.mrb[190].mxu1 }
 0xc4b   : > { %v13071_v43 = vadd.f32 %v13070_v48, %v13069_v34  ;;  %v13072_v57 = vpop.f32.mrb[174].mxu0  ;;  %v13033_v12 = vpop.f32.mrb[191].mxu1 }
 0xc4c   : > { %v12231_v8 = vadd.f32 %v13031_v30, %v18281_v10  ;;  %v13034_v3 = vadd.f32 %v13033_v12, %v13032_v26  ;;  %v13073_v60 = vpop.f32.mrb[175].mxu0 }
 0xc4d   : > { %v13074_v15 = vadd.f32 %v13073_v60, %v13072_v57 }
 0xc4e   : > { %v12296_v14 = vadd.f32 %v13071_v43, %v12231_v8  ;;  %v12234_v28 = vadd.f32 %v13034_v3, %v18281_v10 }
 0xc50   : > { %v12308_v40 = vadd.f32 %v12296_v14, %v18041_v52  ;;  %v12299_v58 = vadd.f32 %v13074_v15, %v12234_v28 }
 0xc52   : > { %12316 = vst [vmem:[%s18288_s6 + $0x30] sm:$0xff] %v12308_v40  ;;  %v12309_v32 = vadd.f32 %v12299_v58, %v18045_v54 }
 0xc54   : > { %12317 = vst [vmem:[%s18288_s6 + $0x38] sm:$0xff] %v12309_v32 }
 0xc55   : > { %14424 = shalt.err (!%p14421_p3)
}
 0xc56   : > { %s14425_s0 = scalar_lea.hbm %s18313_s19, 1024  ;;  %s14429_s16 = scalar_lea.hbm %s18660_s20, 2048 }
 0xc57   : > { %p14426_p12 = scmp.ne.s32.totalorder %s18313_s19, %s14425_s0  ;;  %p14430_p0 = scmp.lt.u32.totalorder %s18313_s19, %s18660_s20 }
 0xc58   : > { %p14431_p6 = scmp.lt.u32.totalorder %s14429_s16, %s14425_s0  ;;  %p14433_p4 = scmp.lt.u32.totalorder %s14425_s0, %s18313_s19 }
 0xc59   : > { %p14427_p1 = pnand %p14426_p12, %p18661_p10 }
 0xc5a   : > { %p14432_p2 = por %p14431_p6, %p14430_p0 }
 0xc5b   : > { %p14428_p13 = pneg %p14427_p1 }
 0xc5c   : > { %p14434_p5 = por %p14433_p4, %p14432_p2 }
 0xc5e   : > { %p14435_p7 = pnand %p14434_p5, %p14428_p13 }
 0xc60   : > { %14438 = shalt.err (!%p14435_p7)
}
 0xc61   : > { %s14522_s4 = smov 128   ;;  %s14523_s6 = smov 8  }
 0xc62   : > { %13615 = dma.vmem_to_hbm [thread:$0]  (%p18661_p10), %s18315_s28, 1024, %s18313_s19, %s12319_s11, %s14522_s4, %s14522_s4, %s14523_s6  }
 0xc63 PF: > { %s12347_s30 = sand.u32 1, %s14485_s21   ;;  %p18662_p9 = scmp.ne.s32.totalorder %s18465_s14, 0 }
 0xc64   : > { %p18663_p8 = scmp.ge.s32.totalorder %s14497_s24, 2  ;;  %s12348_s26 = scalar_lea.sflag [#allocation4], %s12347_s30 }
 0xc66   : > { %p13644_p11 = pnand %p18663_p8, %p18662_p9 }
 0xc68   : > { %14480 = dma.done.wait (!%p13644_p11), %s12348_s26, 1024  }
 0xc69   : > { %14482 = vsyncadd (!%p13644_p11), %s12348_s26, 4294966272  ;;  %p31_p3 = scmp.ge.s32.totalorder %s14780_s25, 4   ;;  %s18664_s21 = smov %s14489_s22 }
 0xc6a   : > { %s18665_s22 = smov %s14493_s23  ;;  %s18666_s23 = smov %s14791_s9 }
 0xc6b   : > { %s18667_s24 = smov %s14780_s25  ;;  %33 = sbr.rel (!%p31_p3) target bundleno = 21 (0x15), region = 150 }
 0xc72   :  { %12353 = vsyncpa [#allocation3], 1 }
 0xc73   :  { %12355 = vsyncpa [#allocation3 + $0x1], 1 }
 0xc74   :  { %12356 = vsyncpa [#allocation6], 1 }
 0xc75   :  { %12358 = vsyncpa [#allocation6 + $0x1], 1 }
 0xc76   :  { %12359 = vsyncpa [#allocation9], 1 }
 0xc77   :  { %12360 = vsyncpa [#allocation12], 1 }
 0xc78   :  { %12361 = vsyncpa [#allocation15], 1 }
 0xc79   :  { %12362 = vsyncpa [#allocation4], 1 }
 0xc7a   :  { %12364 = vsyncpa [#allocation4 + $0x1], 1 }

</bundles_post_ra>
